<compile_context>
chip_gen: v5e
topology: v5e:2x2
jax: 0.10.0
libtpu: 0.0.40
codegen_flags: <defaults>
</compile_context>

<pallas_src>
import math
import functools

import jax
import jax.numpy as jnp
from jax import lax
from jax.experimental import pallas as pl
from jax.experimental.pallas import tpu as pltpu

EPS = 1e-6          # LayerNormalization epsilon from the module
MASK_NEG = -1e18    # matches torch masked_fill(mask, -1e18) magnitude


def _layer_norm(y, gain, bias):
    # torch ref: mean over last dim; std uses Bessel's correction (N-1);
    # gain*(x-mean)/(std+eps)+bias.  Exact division (no approx reciprocal).
    d = y.shape[-1]
    mean = jnp.mean(y, axis=-1, keepdims=True)
    var = jnp.sum((y - mean) ** 2, axis=-1, keepdims=True) * (1.0 / (d - 1))
    std = jnp.sqrt(var)
    return gain * (y - mean) / (std + EPS) + bias


def encoder_layer_kernel(src_ref, bias_ref,
                         wqkv_ref, bqkv_ref, wo_ref, bo_ref,
                         g1_ref, be1_ref,
                         w1_ref, bf1_ref, w2_ref, bf2_ref,
                         g2_ref, be2_ref,
                         out_ref,
                         ctx_ref,
                         *, heads_count, q_tile):
    x = src_ref[...]                          # (BT, S, D) f32
    BT, S, D = x.shape
    H = heads_count
    dh = D // H
    R = BT * S
    TQ = q_tile
    n_q = S // TQ

    xr = x.reshape(R, D)                      # pack batch rows -> MXU M dimension
    xb = xr.astype(jnp.bfloat16)

    # Fused Q|K|V projection (bf16 in, f32 accumulate).  1/sqrt(d_head) already
    # folded into the Q columns of wqkv/bqkv at prep time.
    qkv = jnp.dot(xb, wqkv_ref[...], preferred_element_type=jnp.float32) + bqkv_ref[...]
    qkv = qkv.astype(jnp.bfloat16)            # (R, 3D)

    bias_all = bias_ref[...]                  # (BT, 1, S) additive key-mask bias (f32)

    # Attention: blocked over (batch-elem, head, query-tile).  Static lane slices
    # (dh multiple of 128) -- no transposes / head reshapes; live scores = (TQ, S).
    for bt in range(BT):
        r0 = bt * S
        bias_b = bias_all[bt]                 # (1, S)
        for h in range(H):
            c0 = h * dh
            kh = qkv[r0:r0 + S, D + c0:D + c0 + dh]           # (S, dh) bf16
            vh = qkv[r0:r0 + S, 2 * D + c0:2 * D + c0 + dh]   # (S, dh) bf16
            for qi in range(n_q):
                q0 = r0 + qi * TQ
                qh = qkv[q0:q0 + TQ, c0:c0 + dh]              # (TQ, dh) bf16
                # q @ k^T via contraction on the last dim of both (no explicit .T)
                s = lax.dot_general(qh, kh, (((1,), (1,)), ((), ())),
                                    preferred_element_type=jnp.float32)  # (TQ, S)
                s = s + bias_b
                m = jnp.max(s, axis=-1, keepdims=True)
                p = jnp.exp(s - m)                            # unnormalized, in [0, 1]
                l = jnp.sum(p, axis=-1, keepdims=True)
                ctx = jnp.dot(p.astype(jnp.bfloat16), vh,
                              preferred_element_type=jnp.float32)        # (TQ, dh)
                # Deferred softmax normalization: scale the (TQ, dh) context
                # instead of the (TQ, S) probabilities (EUP reciprocal).
                ctx_ref[q0:q0 + TQ, c0:c0 + dh] = ctx * pl.reciprocal(l, approx=True)
    # TODO(synk): attention dropout omitted (eval-mode identity).

    attn = jnp.dot(ctx_ref[...].astype(jnp.bfloat16), wo_ref[...],
                   preferred_element_type=jnp.float32) + bo_ref[...]

    # Sublayer 1: residual + LayerNorm
    y1 = _layer_norm(attn + xr, g1_ref[...], be1_ref[...])

    # TODO(synk): dropout between sublayers / inside FFN omitted (eval-mode identity).
    # ---- Pointwise feed-forward ----
    h1 = jnp.dot(y1.astype(jnp.bfloat16), w1_ref[...],
                 preferred_element_type=jnp.float32) + bf1_ref[...]
    h1 = jnp.maximum(h1, 0.0)
    f = jnp.dot(h1.astype(jnp.bfloat16), w2_ref[...],
                preferred_element_type=jnp.float32) + bf2_ref[...]

    # Sublayer 2: residual + LayerNorm
    out_ref[...] = _layer_norm(f + y1, g2_ref[...], be2_ref[...]).reshape(BT, S, D)


def _vmem_capacity_bytes():
    try:
        return int(pltpu.get_tpu_info().vmem_capacity_bytes)
    except Exception:
        return 64 << 20   # conservative: v7x per-TensorCore VMEM


def _vmem_limit_bytes(BT, S, D, d_ff, TQ):
    R = BT * S
    weights = (4 * D * D + 2 * D * d_ff) * 2              # bf16, single-buffered
    smalls = (8 * D + d_ff) * 4 * 2                       # biases + LN params (f32)
    io_blk = (2 * R * D + BT * S) * 4 * 2                 # src/out/mask blocks, 2x buffered
    acts = (3 * R * D + 8 * R * D + 2 * R * d_ff + 3 * TQ * S) * 4
    need = weights + smalls + io_blk + acts + (8 << 20)
    cap = _vmem_capacity_bytes()
    return int(min(max(need, 32 << 20), (3 * cap) // 4))  # never exceed 75% of chip VMEM


def _cost_estimate(B, S, D, d_ff, H):
    flops = B * (8 * S * D * D          # fused qkv + out projection
                 + 4 * S * S * D        # scores + context
                 + 4 * S * D * d_ff)    # FFN
    transcendentals = B * (H * S * S + H * S)   # softmax exp + approx reciprocals
    bytes_accessed = (2 * B * S * D * 4 + B * S * 4
                      + (4 * D * D + 2 * D * d_ff) * 2 + (8 * D + d_ff) * 4)
    return pl.CostEstimate(flops=int(flops),
                           transcendentals=int(transcendentals),
                           bytes_accessed=int(bytes_accessed))


def _pick_batch_tile(B, S):
    """Pack batch elements per grid step so the MXU M dimension (BT*S rows) is
    reasonable, but keep >=2 grid steps when B allows (pipelining / megacore)."""
    best = 1
    for cand in range(1, B + 1):
        if B % cand != 0:
            continue
        rows_ok = (cand * S <= 256) or cand == 1
        grid_ok = (B // cand) >= 2 or B < 4
        if rows_ok and grid_ok:
            best = cand
    return best


def _pick_q_tile(S):
    if S <= 256:
        return S
    for t in (256, 128):
        if S % t == 0:
            return t
    return S


def _rep_spec(shape):
    """Replicated (grid-constant) operand: single-buffer it -- double-buffering a
    block whose index_map never changes only wastes VMEM."""
    n = len(shape)
    idx = lambda b, n=n: (0,) * n
    try:
        return pl.BlockSpec(shape, idx, pipeline_mode=pl.Buffered(1))
    except TypeError:   # older jax without BlockSpec.pipeline_mode
        return pl.BlockSpec(shape, idx)


def key_mask_to_bias(key_mask):
    """(B, S) mask (1.0 = masked key) -> (B, 1, S) additive f32 bias."""
    B, S = key_mask.shape
    return (key_mask.astype(jnp.float32) * jnp.float32(MASK_NEG)).reshape(B, 1, S)


def transformer_encoder_layer(sources, mask_bias, params, heads_count):
    B, S, D = sources.shape
    d_ff = params["w1"].shape[-1]
    assert D % heads_count == 0

    BT = _pick_batch_tile(B, S)
    TQ = _pick_q_tile(S)

    in_specs = [
        pl.BlockSpec((BT, S, D), lambda b: (b, 0, 0)),     # sources
        pl.BlockSpec((BT, 1, S), lambda b: (b, 0, 0)),     # additive key-mask bias
        _rep_spec((D, 3 * D)), _rep_spec((1, 3 * D)),      # fused Wqkv, bqkv
        _rep_spec((D, D)), _rep_spec((1, D)),              # Wo, bo
        _rep_spec((1, D)), _rep_spec((1, D)),              # LN1 gain, bias
        _rep_spec((D, d_ff)), _rep_spec((1, d_ff)),        # FFN W1, b1
        _rep_spec((d_ff, D)), _rep_spec((1, D)),           # FFN W2, b2
        _rep_spec((1, D)), _rep_spec((1, D)),              # LN2 gain, bias
    ]

    kernel = functools.partial(encoder_layer_kernel,
                               heads_count=heads_count, q_tile=TQ)

    return pl.pallas_call(
        kernel,
        out_shape=jax.ShapeDtypeStruct((B, S, D), jnp.float32),
        grid_spec=pltpu.PrefetchScalarGridSpec(
            num_scalar_prefetch=0,
            grid=(B // BT,),
            in_specs=in_specs,
            out_specs=pl.BlockSpec((BT, S, D), lambda b: (b, 0, 0)),
            scratch_shapes=[pltpu.VMEM((BT * S, D), jnp.float32)],   # attention context
        ),
        compiler_params=pltpu.CompilerParams(
            dimension_semantics=("parallel",),     # batch tiles independent
            vmem_limit_bytes=_vmem_limit_bytes(BT, S, D, d_ff, TQ),
        ),
        cost_estimate=_cost_estimate(B, S, D, d_ff, heads_count),
    )(sources, mask_bias,
      params["wqkv"], params["bqkv"], params["wo"], params["bo"],
      params["ln1_g"], params["ln1_b"],
      params["w1"], params["b1"], params["w2"], params["b2"],
      params["ln2_g"], params["ln2_b"])


@functools.partial(jax.jit, static_argnames=("heads_count",))
def transformer_encoder(sources, key_mask, layer_params, *, heads_count):
    """Stack of encoder layers (the TransformerEncoder forward).  Expects params
    already processed by prepare_layer_params (bf16 / fused / scale-folded)."""
    mask_bias = key_mask_to_bias(key_mask)
    x = sources
    for p in layer_params:
        x = transformer_encoder_layer(x, mask_bias, p, heads_count)
    return x


def prepare_layer_params(raw, heads_count):
    """One-time prep: fuse Wq|Wk|Wv into (D, 3D), fold 1/sqrt(d_head) into the Q
    columns, cast big weights to bf16.  Done once, outside the jitted forward."""
    D = raw["wq"].shape[0]
    dh = D // heads_count
    scale = 1.0 / math.sqrt(dh)
    bf16 = jnp.bfloat16
    wqkv = jnp.concatenate([raw["wq"] * scale, raw["wk"], raw["wv"]], axis=1)
    bqkv = jnp.concatenate([raw["bq"] * scale, raw["bk"], raw["bv"]], axis=1)
    return {
        "wqkv": wqkv.astype(bf16), "bqkv": bqkv,           # biases / LN stay f32
        "wo": raw["wo"].astype(bf16), "bo": raw["bo"],
        "ln1_g": raw["ln1_g"], "ln1_b": raw["ln1_b"],
        "w1": raw["w1"].astype(bf16), "b1": raw["b1"],
        "w2": raw["w2"].astype(bf16), "b2": raw["b2"],
        "ln2_g": raw["ln2_g"], "ln2_b": raw["ln2_b"],
    }


def init_params(key, d_model, d_ff):
    ks = jax.random.split(key, 8)
    scl = 0.05
    return {
        # weights stored (in, out) so the kernel does  y = x @ W + b
        "wq": scl * jax.random.normal(ks[0], (d_model, d_model), jnp.float32),
        "wk": scl * jax.random.normal(ks[1], (d_model, d_model), jnp.float32),
        "wv": scl * jax.random.normal(ks[2], (d_model, d_model), jnp.float32),
        "wo": scl * jax.random.normal(ks[3], (d_model, d_model), jnp.float32),
        "bq": scl * jax.random.normal(ks[4], (1, d_model), jnp.float32),
        "bk": jnp.zeros((1, d_model), jnp.float32),
        "bv": jnp.zeros((1, d_model), jnp.float32),
        "bo": jnp.zeros((1, d_model), jnp.float32),
        "ln1_g": jnp.ones((1, d_model), jnp.float32),
        "ln1_b": jnp.zeros((1, d_model), jnp.float32),
        "w1": scl * jax.random.normal(ks[5], (d_model, d_ff), jnp.float32),
        "b1": scl * jax.random.normal(ks[6], (1, d_ff), jnp.float32),
        "w2": scl * jax.random.normal(ks[7], (d_ff, d_model), jnp.float32),
        "b2": jnp.zeros((1, d_model), jnp.float32),
        "ln2_g": jnp.ones((1, d_model), jnp.float32),
        "ln2_b": jnp.zeros((1, d_model), jnp.float32),
    }


if __name__ == "__main__":
    # Lane-dense small demo: D and D_FF multiples of 128, d_head = D/H = 128.
    B, S, D, H, D_FF, LAYERS = 2, 16, 256, 2, 512, 2

    key = jax.random.PRNGKey(0)
    k_src, k_par = jax.random.split(key)

    sources = jax.random.normal(k_src, (B, S, D), jnp.float32)

    # key-padding mask: 1.0 = masked key; mask the last two keys of batch element 1.
    key_mask = jnp.zeros((B, S), jnp.float32).at[1, S - 2:].set(1.0)

    layer_keys = jax.random.split(k_par, LAYERS)
    raw_layers = [init_params(k, D, D_FF) for k in layer_keys]
    layer_params = [prepare_layer_params(p, H) for p in raw_layers]  # one-time bf16/fused prep

    out = transformer_encoder(sources, key_mask, layer_params, heads_count=H)
    out = jax.block_until_ready(out)

    assert out.shape == (B, S, D)
    assert bool(jnp.all(jnp.isfinite(out)))
    print("KERNEL_OK")
</pallas_src>

<mosaic_0001>
module attributes {stable_mosaic.version = 11 : i64} {
  func.func @encoder_layer_kernel(%arg0: i32, %arg1: memref<2x16x256xf32, #tpu.memory_space<vmem>>, %arg2: memref<2x1x16xf32, #tpu.memory_space<vmem>>, %arg3: memref<256x768xbf16, #tpu.memory_space<vmem>>, %arg4: memref<1x768xf32, #tpu.memory_space<vmem>>, %arg5: memref<256x256xbf16, #tpu.memory_space<vmem>>, %arg6: memref<1x256xf32, #tpu.memory_space<vmem>>, %arg7: memref<1x256xf32, #tpu.memory_space<vmem>>, %arg8: memref<1x256xf32, #tpu.memory_space<vmem>>, %arg9: memref<256x512xbf16, #tpu.memory_space<vmem>>, %arg10: memref<1x512xf32, #tpu.memory_space<vmem>>, %arg11: memref<512x256xbf16, #tpu.memory_space<vmem>>, %arg12: memref<1x256xf32, #tpu.memory_space<vmem>>, %arg13: memref<1x256xf32, #tpu.memory_space<vmem>>, %arg14: memref<1x256xf32, #tpu.memory_space<vmem>>, %arg15: memref<2x16x256xf32, #tpu.memory_space<vmem>>, %arg16: memref<32x256xf32, #tpu.memory_space<vmem>>) attributes {dimension_semantics = [#tpu.dimension_semantics<parallel>], iteration_bounds = array<i64: 1>, scalar_prefetch = 0 : i64, scratch_operands = 1 : i64, tpu.core_type = #tpu.core_type<tc>, window_params = [{transform_indices = @transform_0, window_bounds = array<i64: 2, 16, 256>}, {transform_indices = @transform_1, window_bounds = array<i64: 2, 1, 16>}, {pipeline_mode = #tpu.pipeline_mode<synchronous>, transform_indices = @transform_2, window_bounds = array<i64: 256, 768>}, {pipeline_mode = #tpu.pipeline_mode<synchronous>, transform_indices = @transform_3, window_bounds = array<i64: 1, 768>}, {pipeline_mode = #tpu.pipeline_mode<synchronous>, transform_indices = @transform_4, window_bounds = array<i64: 256, 256>}, {pipeline_mode = #tpu.pipeline_mode<synchronous>, transform_indices = @transform_5, window_bounds = array<i64: 1, 256>}, {pipeline_mode = #tpu.pipeline_mode<synchronous>, transform_indices = @transform_6, window_bounds = array<i64: 1, 256>}, {pipeline_mode = #tpu.pipeline_mode<synchronous>, transform_indices = @transform_7, window_bounds = array<i64: 1, 256>}, {pipeline_mode = #tpu.pipeline_mode<synchronous>, transform_indices = @transform_8, window_bounds = array<i64: 256, 512>}, {pipeline_mode = #tpu.pipeline_mode<synchronous>, transform_indices = @transform_9, window_bounds = array<i64: 1, 512>}, {pipeline_mode = #tpu.pipeline_mode<synchronous>, transform_indices = @transform_10, window_bounds = array<i64: 512, 256>}, {pipeline_mode = #tpu.pipeline_mode<synchronous>, transform_indices = @transform_11, window_bounds = array<i64: 1, 256>}, {pipeline_mode = #tpu.pipeline_mode<synchronous>, transform_indices = @transform_12, window_bounds = array<i64: 1, 256>}, {pipeline_mode = #tpu.pipeline_mode<synchronous>, transform_indices = @transform_13, window_bounds = array<i64: 1, 256>}, {transform_indices = @transform_14, window_bounds = array<i64: 2, 16, 256>}]} {
    %c0 = arith.constant 0 : index
    %c0_0 = arith.constant 0 : index
    %c0_1 = arith.constant 0 : index
    %0 = vector.load %arg1[%c0, %c0_0, %c0_1] : memref<2x16x256xf32, #tpu.memory_space<vmem>>, vector<2x16x256xf32>
    %1 = vector.shape_cast %0 : vector<2x16x256xf32> to vector<32x256xf32>
    %2 = arith.truncf %1 : vector<32x256xf32> to vector<32x256xbf16>
    %c0_2 = arith.constant 0 : index
    %c0_3 = arith.constant 0 : index
    %3 = vector.load %arg3[%c0_2, %c0_3] : memref<256x768xbf16, #tpu.memory_space<vmem>>, vector<256x768xbf16>
    %cst = arith.constant dense<0.000000e+00> : vector<32x768xf32>
    %4 = tpu.matmul %2, %3, %cst {dimension_numbers = #tpu.dot_dimension_numbers<[1], [0], [0], [1], [0, 0, 1, 1], [], []>} : vector<32x256xbf16>, vector<256x768xbf16>, vector<32x768xf32> -> vector<32x768xf32>
    %c0_4 = arith.constant 0 : index
    %c0_5 = arith.constant 0 : index
    %5 = vector.load %arg4[%c0_4, %c0_5] : memref<1x768xf32, #tpu.memory_space<vmem>>, vector<1x768xf32>
    %6 = vector.broadcast %5 : vector<1x768xf32> to vector<32x768xf32>
    %7 = arith.addf %4, %6 : vector<32x768xf32>
    %8 = arith.truncf %7 : vector<32x768xf32> to vector<32x768xbf16>
    %c0_6 = arith.constant 0 : index
    %c0_7 = arith.constant 0 : index
    %c0_8 = arith.constant 0 : index
    %9 = vector.load %arg2[%c0_6, %c0_7, %c0_8] : memref<2x1x16xf32, #tpu.memory_space<vmem>>, vector<2x1x16xf32>
    %10 = vector.extract_strided_slice %9 {offsets = [0, 0, 0], sizes = [1, 1, 16], strides = [1, 1, 1]} : vector<2x1x16xf32> to vector<1x1x16xf32>
    %11 = vector.shape_cast %10 : vector<1x1x16xf32> to vector<1x16xf32>
    %12 = vector.extract_strided_slice %8 {offsets = [0, 256], sizes = [16, 128], strides = [1, 1]} : vector<32x768xbf16> to vector<16x128xbf16>
    %13 = vector.extract_strided_slice %8 {offsets = [0, 512], sizes = [16, 128], strides = [1, 1]} : vector<32x768xbf16> to vector<16x128xbf16>
    %14 = vector.extract_strided_slice %8 {offsets = [0, 0], sizes = [16, 128], strides = [1, 1]} : vector<32x768xbf16> to vector<16x128xbf16>
    %cst_9 = arith.constant dense<0.000000e+00> : vector<16x16xf32>
    %15 = tpu.matmul %14, %12, %cst_9 {dimension_numbers = #tpu.dot_dimension_numbers<[1], [1], [0], [0], [0, 0, 1, 0], [], []>} : vector<16x128xbf16>, vector<16x128xbf16>, vector<16x16xf32> -> vector<16x16xf32>
    %16 = vector.broadcast %11 : vector<1x16xf32> to vector<16x16xf32>
    %17 = arith.addf %15, %16 : vector<16x16xf32>
    %cst_10 = arith.constant dense<0xFF800000> : vector<16xf32>
    %18 = vector.multi_reduction <maximumf>, %17, %cst_10 [1] : vector<16x16xf32> to vector<16xf32>
    %19 = vector.shape_cast %18 : vector<16xf32> to vector<16x1xf32>
    %20 = vector.broadcast %19 : vector<16x1xf32> to vector<16x16xf32>
    %21 = arith.subf %17, %20 : vector<16x16xf32>
    %22 = math.exp %21 : vector<16x16xf32>
    %cst_11 = arith.constant dense<0.000000e+00> : vector<16xf32>
    %23 = vector.multi_reduction <add>, %22, %cst_11 [1] : vector<16x16xf32> to vector<16xf32>
    %24 = vector.shape_cast %23 : vector<16xf32> to vector<16x1xf32>
    %25 = arith.truncf %22 : vector<16x16xf32> to vector<16x16xbf16>
    %cst_12 = arith.constant dense<0.000000e+00> : vector<16x128xf32>
    %26 = tpu.matmul %25, %13, %cst_12 {dimension_numbers = #tpu.dot_dimension_numbers<[1], [0], [0], [1], [0, 0, 1, 1], [], []>} : vector<16x16xbf16>, vector<16x128xbf16>, vector<16x128xf32> -> vector<16x128xf32>
    %27 = tpu.reciprocal %24 {approx = true} : vector<16x1xf32> -> vector<16x1xf32>
    %28 = vector.broadcast %27 : vector<16x1xf32> to vector<16x128xf32>
    %29 = arith.mulf %26, %28 : vector<16x128xf32>
    %c0_13 = arith.constant 0 : index
    %c0_14 = arith.constant 0 : index
    %30 = vector.load %arg16[%c0_13, %c0_14] : memref<32x256xf32, #tpu.memory_space<vmem>>, vector<16x128xf32>
    tpu.vector_store %arg16[%c0_13, %c0_14], %29 {strides = array<i32>} : memref<32x256xf32, #tpu.memory_space<vmem>>, vector<16x128xf32>,
    %31 = vector.extract_strided_slice %8 {offsets = [0, 384], sizes = [16, 128], strides = [1, 1]} : vector<32x768xbf16> to vector<16x128xbf16>
    %32 = vector.extract_strided_slice %8 {offsets = [0, 640], sizes = [16, 128], strides = [1, 1]} : vector<32x768xbf16> to vector<16x128xbf16>
    %33 = vector.extract_strided_slice %8 {offsets = [0, 128], sizes = [16, 128], strides = [1, 1]} : vector<32x768xbf16> to vector<16x128xbf16>
    %cst_15 = arith.constant dense<0.000000e+00> : vector<16x16xf32>
    %34 = tpu.matmul %33, %31, %cst_15 {dimension_numbers = #tpu.dot_dimension_numbers<[1], [1], [0], [0], [0, 0, 1, 0], [], []>} : vector<16x128xbf16>, vector<16x128xbf16>, vector<16x16xf32> -> vector<16x16xf32>
    %35 = vector.broadcast %11 : vector<1x16xf32> to vector<16x16xf32>
    %36 = arith.addf %34, %35 : vector<16x16xf32>
    %cst_16 = arith.constant dense<0xFF800000> : vector<16xf32>
    %37 = vector.multi_reduction <maximumf>, %36, %cst_16 [1] : vector<16x16xf32> to vector<16xf32>
    %38 = vector.shape_cast %37 : vector<16xf32> to vector<16x1xf32>
    %39 = vector.broadcast %38 : vector<16x1xf32> to vector<16x16xf32>
    %40 = arith.subf %36, %39 : vector<16x16xf32>
    %41 = math.exp %40 : vector<16x16xf32>
    %cst_17 = arith.constant dense<0.000000e+00> : vector<16xf32>
    %42 = vector.multi_reduction <add>, %41, %cst_17 [1] : vector<16x16xf32> to vector<16xf32>
    %43 = vector.shape_cast %42 : vector<16xf32> to vector<16x1xf32>
    %44 = arith.truncf %41 : vector<16x16xf32> to vector<16x16xbf16>
    %cst_18 = arith.constant dense<0.000000e+00> : vector<16x128xf32>
    %45 = tpu.matmul %44, %32, %cst_18 {dimension_numbers = #tpu.dot_dimension_numbers<[1], [0], [0], [1], [0, 0, 1, 1], [], []>} : vector<16x16xbf16>, vector<16x128xbf16>, vector<16x128xf32> -> vector<16x128xf32>
    %46 = tpu.reciprocal %43 {approx = true} : vector<16x1xf32> -> vector<16x1xf32>
    %47 = vector.broadcast %46 : vector<16x1xf32> to vector<16x128xf32>
    %48 = arith.mulf %45, %47 : vector<16x128xf32>
    %c0_19 = arith.constant 0 : index
    %c128 = arith.constant 128 : index
    %49 = vector.load %arg16[%c0_19, %c128] : memref<32x256xf32, #tpu.memory_space<vmem>>, vector<16x128xf32>
    tpu.vector_store %arg16[%c0_19, %c128], %48 {strides = array<i32>} : memref<32x256xf32, #tpu.memory_space<vmem>>, vector<16x128xf32>,
    %50 = vector.extract_strided_slice %9 {offsets = [1, 0, 0], sizes = [1, 1, 16], strides = [1, 1, 1]} : vector<2x1x16xf32> to vector<1x1x16xf32>
    %51 = vector.shape_cast %50 : vector<1x1x16xf32> to vector<1x16xf32>
    %52 = vector.extract_strided_slice %8 {offsets = [16, 256], sizes = [16, 128], strides = [1, 1]} : vector<32x768xbf16> to vector<16x128xbf16>
    %53 = vector.extract_strided_slice %8 {offsets = [16, 512], sizes = [16, 128], strides = [1, 1]} : vector<32x768xbf16> to vector<16x128xbf16>
    %54 = vector.extract_strided_slice %8 {offsets = [16, 0], sizes = [16, 128], strides = [1, 1]} : vector<32x768xbf16> to vector<16x128xbf16>
    %cst_20 = arith.constant dense<0.000000e+00> : vector<16x16xf32>
    %55 = tpu.matmul %54, %52, %cst_20 {dimension_numbers = #tpu.dot_dimension_numbers<[1], [1], [0], [0], [0, 0, 1, 0], [], []>} : vector<16x128xbf16>, vector<16x128xbf16>, vector<16x16xf32> -> vector<16x16xf32>
    %56 = vector.broadcast %51 : vector<1x16xf32> to vector<16x16xf32>
    %57 = arith.addf %55, %56 : vector<16x16xf32>
    %cst_21 = arith.constant dense<0xFF800000> : vector<16xf32>
    %58 = vector.multi_reduction <maximumf>, %57, %cst_21 [1] : vector<16x16xf32> to vector<16xf32>
    %59 = vector.shape_cast %58 : vector<16xf32> to vector<16x1xf32>
    %60 = vector.broadcast %59 : vector<16x1xf32> to vector<16x16xf32>
    %61 = arith.subf %57, %60 : vector<16x16xf32>
    %62 = math.exp %61 : vector<16x16xf32>
    %cst_22 = arith.constant dense<0.000000e+00> : vector<16xf32>
    %63 = vector.multi_reduction <add>, %62, %cst_22 [1] : vector<16x16xf32> to vector<16xf32>
    %64 = vector.shape_cast %63 : vector<16xf32> to vector<16x1xf32>
    %65 = arith.truncf %62 : vector<16x16xf32> to vector<16x16xbf16>
    %cst_23 = arith.constant dense<0.000000e+00> : vector<16x128xf32>
    %66 = tpu.matmul %65, %53, %cst_23 {dimension_numbers = #tpu.dot_dimension_numbers<[1], [0], [0], [1], [0, 0, 1, 1], [], []>} : vector<16x16xbf16>, vector<16x128xbf16>, vector<16x128xf32> -> vector<16x128xf32>
    %67 = tpu.reciprocal %64 {approx = true} : vector<16x1xf32> -> vector<16x1xf32>
    %68 = vector.broadcast %67 : vector<16x1xf32> to vector<16x128xf32>
    %69 = arith.mulf %66, %68 : vector<16x128xf32>
    %c16 = arith.constant 16 : index
    %c0_24 = arith.constant 0 : index
    %70 = vector.load %arg16[%c16, %c0_24] : memref<32x256xf32, #tpu.memory_space<vmem>>, vector<16x128xf32>
    tpu.vector_store %arg16[%c16, %c0_24], %69 {strides = array<i32>} : memref<32x256xf32, #tpu.memory_space<vmem>>, vector<16x128xf32>,
    %71 = vector.extract_strided_slice %8 {offsets = [16, 384], sizes = [16, 128], strides = [1, 1]} : vector<32x768xbf16> to vector<16x128xbf16>
    %72 = vector.extract_strided_slice %8 {offsets = [16, 640], sizes = [16, 128], strides = [1, 1]} : vector<32x768xbf16> to vector<16x128xbf16>
    %73 = vector.extract_strided_slice %8 {offsets = [16, 128], sizes = [16, 128], strides = [1, 1]} : vector<32x768xbf16> to vector<16x128xbf16>
    %cst_25 = arith.constant dense<0.000000e+00> : vector<16x16xf32>
    %74 = tpu.matmul %73, %71, %cst_25 {dimension_numbers = #tpu.dot_dimension_numbers<[1], [1], [0], [0], [0, 0, 1, 0], [], []>} : vector<16x128xbf16>, vector<16x128xbf16>, vector<16x16xf32> -> vector<16x16xf32>
    %75 = vector.broadcast %51 : vector<1x16xf32> to vector<16x16xf32>
    %76 = arith.addf %74, %75 : vector<16x16xf32>
    %cst_26 = arith.constant dense<0xFF800000> : vector<16xf32>
    %77 = vector.multi_reduction <maximumf>, %76, %cst_26 [1] : vector<16x16xf32> to vector<16xf32>
    %78 = vector.shape_cast %77 : vector<16xf32> to vector<16x1xf32>
    %79 = vector.broadcast %78 : vector<16x1xf32> to vector<16x16xf32>
    %80 = arith.subf %76, %79 : vector<16x16xf32>
    %81 = math.exp %80 : vector<16x16xf32>
    %cst_27 = arith.constant dense<0.000000e+00> : vector<16xf32>
    %82 = vector.multi_reduction <add>, %81, %cst_27 [1] : vector<16x16xf32> to vector<16xf32>
    %83 = vector.shape_cast %82 : vector<16xf32> to vector<16x1xf32>
    %84 = arith.truncf %81 : vector<16x16xf32> to vector<16x16xbf16>
    %cst_28 = arith.constant dense<0.000000e+00> : vector<16x128xf32>
    %85 = tpu.matmul %84, %72, %cst_28 {dimension_numbers = #tpu.dot_dimension_numbers<[1], [0], [0], [1], [0, 0, 1, 1], [], []>} : vector<16x16xbf16>, vector<16x128xbf16>, vector<16x128xf32> -> vector<16x128xf32>
    %86 = tpu.reciprocal %83 {approx = true} : vector<16x1xf32> -> vector<16x1xf32>
    %87 = vector.broadcast %86 : vector<16x1xf32> to vector<16x128xf32>
    %88 = arith.mulf %85, %87 : vector<16x128xf32>
    %c16_29 = arith.constant 16 : index
    %c128_30 = arith.constant 128 : index
    %89 = vector.load %arg16[%c16_29, %c128_30] : memref<32x256xf32, #tpu.memory_space<vmem>>, vector<16x128xf32>
    tpu.vector_store %arg16[%c16_29, %c128_30], %88 {strides = array<i32>} : memref<32x256xf32, #tpu.memory_space<vmem>>, vector<16x128xf32>,
    %c0_31 = arith.constant 0 : index
    %c0_32 = arith.constant 0 : index
    %90 = vector.load %arg16[%c0_31, %c0_32] : memref<32x256xf32, #tpu.memory_space<vmem>>, vector<32x256xf32>
    %91 = arith.truncf %90 : vector<32x256xf32> to vector<32x256xbf16>
    %c0_33 = arith.constant 0 : index
    %c0_34 = arith.constant 0 : index
    %92 = vector.load %arg5[%c0_33, %c0_34] : memref<256x256xbf16, #tpu.memory_space<vmem>>, vector<256x256xbf16>
    %cst_35 = arith.constant dense<0.000000e+00> : vector<32x256xf32>
    %93 = tpu.matmul %91, %92, %cst_35 {dimension_numbers = #tpu.dot_dimension_numbers<[1], [0], [0], [1], [0, 0, 1, 1], [], []>} : vector<32x256xbf16>, vector<256x256xbf16>, vector<32x256xf32> -> vector<32x256xf32>
    %c0_36 = arith.constant 0 : index
    %c0_37 = arith.constant 0 : index
    %94 = vector.load %arg6[%c0_36, %c0_37] : memref<1x256xf32, #tpu.memory_space<vmem>>, vector<1x256xf32>
    %95 = vector.broadcast %94 : vector<1x256xf32> to vector<32x256xf32>
    %96 = arith.addf %93, %95 : vector<32x256xf32>
    %97 = arith.addf %96, %1 : vector<32x256xf32>
    %c0_38 = arith.constant 0 : index
    %c0_39 = arith.constant 0 : index
    %98 = vector.load %arg7[%c0_38, %c0_39] : memref<1x256xf32, #tpu.memory_space<vmem>>, vector<1x256xf32>
    %c0_40 = arith.constant 0 : index
    %c0_41 = arith.constant 0 : index
    %99 = vector.load %arg8[%c0_40, %c0_41] : memref<1x256xf32, #tpu.memory_space<vmem>>, vector<1x256xf32>
    %cst_42 = arith.constant dense<0.000000e+00> : vector<32xf32>
    %100 = vector.multi_reduction <add>, %97, %cst_42 [1] : vector<32x256xf32> to vector<32xf32>
    %101 = vector.shape_cast %100 : vector<32xf32> to vector<32x1xf32>
    %cst_43 = arith.constant 2.560000e+02 : f32
    %102 = vector.broadcast %cst_43 : f32 to vector<32x1xf32>
    %103 = arith.divf %101, %102 : vector<32x1xf32>
    %104 = vector.broadcast %103 : vector<32x1xf32> to vector<32x256xf32>
    %105 = arith.subf %97, %104 : vector<32x256xf32>
    %106 = arith.mulf %105, %105 : vector<32x256xf32>
    %cst_44 = arith.constant dense<0.000000e+00> : vector<32xf32>
    %107 = vector.multi_reduction <add>, %106, %cst_44 [1] : vector<32x256xf32> to vector<32xf32>
    %108 = vector.shape_cast %107 : vector<32xf32> to vector<32x1xf32>
    %cst_45 = arith.constant 0.00392156886 : f32
    %109 = vector.broadcast %cst_45 : f32 to vector<32x1xf32>
    %110 = arith.mulf %108, %109 : vector<32x1xf32>
    %111 = math.sqrt %110 : vector<32x1xf32>
    %112 = vector.broadcast %103 : vector<32x1xf32> to vector<32x256xf32>
    %113 = arith.subf %97, %112 : vector<32x256xf32>
    %114 = vector.broadcast %98 : vector<1x256xf32> to vector<32x256xf32>
    %115 = arith.mulf %114, %113 : vector<32x256xf32>
    %cst_46 = arith.constant 9.99999997E-7 : f32
    %116 = vector.broadcast %cst_46 : f32 to vector<32x1xf32>
    %117 = arith.addf %111, %116 : vector<32x1xf32>
    %118 = vector.broadcast %117 : vector<32x1xf32> to vector<32x256xf32>
    %119 = arith.divf %115, %118 : vector<32x256xf32>
    %120 = vector.broadcast %99 : vector<1x256xf32> to vector<32x256xf32>
    %121 = arith.addf %119, %120 : vector<32x256xf32>
    %122 = arith.truncf %121 : vector<32x256xf32> to vector<32x256xbf16>
    %c0_47 = arith.constant 0 : index
    %c0_48 = arith.constant 0 : index
    %123 = vector.load %arg9[%c0_47, %c0_48] : memref<256x512xbf16, #tpu.memory_space<vmem>>, vector<256x512xbf16>
    %cst_49 = arith.constant dense<0.000000e+00> : vector<32x512xf32>
    %124 = tpu.matmul %122, %123, %cst_49 {dimension_numbers = #tpu.dot_dimension_numbers<[1], [0], [0], [1], [0, 0, 1, 1], [], []>} : vector<32x256xbf16>, vector<256x512xbf16>, vector<32x512xf32> -> vector<32x512xf32>
    %c0_50 = arith.constant 0 : index
    %c0_51 = arith.constant 0 : index
    %125 = vector.load %arg10[%c0_50, %c0_51] : memref<1x512xf32, #tpu.memory_space<vmem>>, vector<1x512xf32>
    %126 = vector.broadcast %125 : vector<1x512xf32> to vector<32x512xf32>
    %127 = arith.addf %124, %126 : vector<32x512xf32>
    %cst_52 = arith.constant 0.000000e+00 : f32
    %128 = vector.broadcast %cst_52 : f32 to vector<32x512xf32>
    %129 = arith.maximumf %127, %128 : vector<32x512xf32>
    %130 = arith.truncf %129 : vector<32x512xf32> to vector<32x512xbf16>
    %c0_53 = arith.constant 0 : index
    %c0_54 = arith.constant 0 : index
    %131 = vector.load %arg11[%c0_53, %c0_54] : memref<512x256xbf16, #tpu.memory_space<vmem>>, vector<512x256xbf16>
    %cst_55 = arith.constant dense<0.000000e+00> : vector<32x256xf32>
    %132 = tpu.matmul %130, %131, %cst_55 {dimension_numbers = #tpu.dot_dimension_numbers<[1], [0], [0], [1], [0, 0, 1, 1], [], []>} : vector<32x512xbf16>, vector<512x256xbf16>, vector<32x256xf32> -> vector<32x256xf32>
    %c0_56 = arith.constant 0 : index
    %c0_57 = arith.constant 0 : index
    %133 = vector.load %arg12[%c0_56, %c0_57] : memref<1x256xf32, #tpu.memory_space<vmem>>, vector<1x256xf32>
    %134 = vector.broadcast %133 : vector<1x256xf32> to vector<32x256xf32>
    %135 = arith.addf %132, %134 : vector<32x256xf32>
    %136 = arith.addf %135, %121 : vector<32x256xf32>
    %c0_58 = arith.constant 0 : index
    %c0_59 = arith.constant 0 : index
    %137 = vector.load %arg13[%c0_58, %c0_59] : memref<1x256xf32, #tpu.memory_space<vmem>>, vector<1x256xf32>
    %c0_60 = arith.constant 0 : index
    %c0_61 = arith.constant 0 : index
    %138 = vector.load %arg14[%c0_60, %c0_61] : memref<1x256xf32, #tpu.memory_space<vmem>>, vector<1x256xf32>
    %cst_62 = arith.constant dense<0.000000e+00> : vector<32xf32>
    %139 = vector.multi_reduction <add>, %136, %cst_62 [1] : vector<32x256xf32> to vector<32xf32>
    %140 = vector.shape_cast %139 : vector<32xf32> to vector<32x1xf32>
    %cst_63 = arith.constant 2.560000e+02 : f32
    %141 = vector.broadcast %cst_63 : f32 to vector<32x1xf32>
    %142 = arith.divf %140, %141 : vector<32x1xf32>
    %143 = vector.broadcast %142 : vector<32x1xf32> to vector<32x256xf32>
    %144 = arith.subf %136, %143 : vector<32x256xf32>
    %145 = arith.mulf %144, %144 : vector<32x256xf32>
    %cst_64 = arith.constant dense<0.000000e+00> : vector<32xf32>
    %146 = vector.multi_reduction <add>, %145, %cst_64 [1] : vector<32x256xf32> to vector<32xf32>
    %147 = vector.shape_cast %146 : vector<32xf32> to vector<32x1xf32>
    %cst_65 = arith.constant 0.00392156886 : f32
    %148 = vector.broadcast %cst_65 : f32 to vector<32x1xf32>
    %149 = arith.mulf %147, %148 : vector<32x1xf32>
    %150 = math.sqrt %149 : vector<32x1xf32>
    %151 = vector.broadcast %142 : vector<32x1xf32> to vector<32x256xf32>
    %152 = arith.subf %136, %151 : vector<32x256xf32>
    %153 = vector.broadcast %137 : vector<1x256xf32> to vector<32x256xf32>
    %154 = arith.mulf %153, %152 : vector<32x256xf32>
    %cst_66 = arith.constant 9.99999997E-7 : f32
    %155 = vector.broadcast %cst_66 : f32 to vector<32x1xf32>
    %156 = arith.addf %150, %155 : vector<32x1xf32>
    %157 = vector.broadcast %156 : vector<32x1xf32> to vector<32x256xf32>
    %158 = arith.divf %154, %157 : vector<32x256xf32>
    %159 = vector.broadcast %138 : vector<1x256xf32> to vector<32x256xf32>
    %160 = arith.addf %158, %159 : vector<32x256xf32>
    %161 = vector.shape_cast %160 : vector<32x256xf32> to vector<2x16x256xf32>
    %c0_67 = arith.constant 0 : index
    %c0_68 = arith.constant 0 : index
    %c0_69 = arith.constant 0 : index
    %162 = vector.load %arg15[%c0_67, %c0_68, %c0_69] : memref<2x16x256xf32, #tpu.memory_space<vmem>>, vector<2x16x256xf32>
    tpu.vector_store %arg15[%c0_67, %c0_68, %c0_69], %161 {strides = array<i32>} : memref<2x16x256xf32, #tpu.memory_space<vmem>>, vector<2x16x256xf32>,
    return
  }
  func.func @transform_0(%arg0: i32) -> (i32, i32, i32) {
    %c0_i32 = arith.constant 0 : i32
    %c0_i32_0 = arith.constant 0 : i32
    %c0_i32_1 = arith.constant 0 : i32
    return %arg0, %c0_i32, %c0_i32_0 : i32, i32, i32
  }
  func.func @transform_1(%arg0: i32) -> (i32, i32, i32) {
    %c0_i32 = arith.constant 0 : i32
    %c0_i32_0 = arith.constant 0 : i32
    %c0_i32_1 = arith.constant 0 : i32
    return %arg0, %c0_i32, %c0_i32_0 : i32, i32, i32
  }
  func.func @transform_2(%arg0: i32) -> (i32, i32) {
    %c0_i32 = arith.constant 0 : i32
    %c0_i32_0 = arith.constant 0 : i32
    %c0_i32_1 = arith.constant 0 : i32
    return %c0_i32, %c0_i32_0 : i32, i32
  }
  func.func @transform_3(%arg0: i32) -> (i32, i32) {
    %c0_i32 = arith.constant 0 : i32
    %c0_i32_0 = arith.constant 0 : i32
    %c0_i32_1 = arith.constant 0 : i32
    return %c0_i32, %c0_i32_0 : i32, i32
  }
  func.func @transform_4(%arg0: i32) -> (i32, i32) {
    %c0_i32 = arith.constant 0 : i32
    %c0_i32_0 = arith.constant 0 : i32
    %c0_i32_1 = arith.constant 0 : i32
    return %c0_i32, %c0_i32_0 : i32, i32
  }
  func.func @transform_5(%arg0: i32) -> (i32, i32) {
    %c0_i32 = arith.constant 0 : i32
    %c0_i32_0 = arith.constant 0 : i32
    %c0_i32_1 = arith.constant 0 : i32
    return %c0_i32, %c0_i32_0 : i32, i32
  }
  func.func @transform_6(%arg0: i32) -> (i32, i32) {
    %c0_i32 = arith.constant 0 : i32
    %c0_i32_0 = arith.constant 0 : i32
    %c0_i32_1 = arith.constant 0 : i32
    return %c0_i32, %c0_i32_0 : i32, i32
  }
  func.func @transform_7(%arg0: i32) -> (i32, i32) {
    %c0_i32 = arith.constant 0 : i32
    %c0_i32_0 = arith.constant 0 : i32
    %c0_i32_1 = arith.constant 0 : i32
    return %c0_i32, %c0_i32_0 : i32, i32
  }
  func.func @transform_8(%arg0: i32) -> (i32, i32) {
    %c0_i32 = arith.constant 0 : i32
    %c0_i32_0 = arith.constant 0 : i32
    %c0_i32_1 = arith.constant 0 : i32
    return %c0_i32, %c0_i32_0 : i32, i32
  }
  func.func @transform_9(%arg0: i32) -> (i32, i32) {
    %c0_i32 = arith.constant 0 : i32
    %c0_i32_0 = arith.constant 0 : i32
    %c0_i32_1 = arith.constant 0 : i32
    return %c0_i32, %c0_i32_0 : i32, i32
  }
  func.func @transform_10(%arg0: i32) -> (i32, i32) {
    %c0_i32 = arith.constant 0 : i32
    %c0_i32_0 = arith.constant 0 : i32
    %c0_i32_1 = arith.constant 0 : i32
    return %c0_i32, %c0_i32_0 : i32, i32
  }
  func.func @transform_11(%arg0: i32) -> (i32, i32) {
    %c0_i32 = arith.constant 0 : i32
    %c0_i32_0 = arith.constant 0 : i32
    %c0_i32_1 = arith.constant 0 : i32
    return %c0_i32, %c0_i32_0 : i32, i32
  }
  func.func @transform_12(%arg0: i32) -> (i32, i32) {
    %c0_i32 = arith.constant 0 : i32
    %c0_i32_0 = arith.constant 0 : i32
    %c0_i32_1 = arith.constant 0 : i32
    return %c0_i32, %c0_i32_0 : i32, i32
  }
  func.func @transform_13(%arg0: i32) -> (i32, i32) {
    %c0_i32 = arith.constant 0 : i32
    %c0_i32_0 = arith.constant 0 : i32
    %c0_i32_1 = arith.constant 0 : i32
    return %c0_i32, %c0_i32_0 : i32, i32
  }
  func.func @transform_14(%arg0: i32) -> (i32, i32, i32) {
    %c0_i32 = arith.constant 0 : i32
    %c0_i32_0 = arith.constant 0 : i32
    %c0_i32_1 = arith.constant 0 : i32
    return %arg0, %c0_i32, %c0_i32_0 : i32, i32, i32
  }
}

module attributes {stable_mosaic.version = 11 : i64} {
  func.func @encoder_layer_kernel(%arg0: i32, %arg1: memref<2x16x256xf32, #tpu.memory_space<vmem>>, %arg2: memref<2x1x16xf32, #tpu.memory_space<vmem>>, %arg3: memref<256x768xbf16, #tpu.memory_space<vmem>>, %arg4: memref<1x768xf32, #tpu.memory_space<vmem>>, %arg5: memref<256x256xbf16, #tpu.memory_space<vmem>>, %arg6: memref<1x256xf32, #tpu.memory_space<vmem>>, %arg7: memref<1x256xf32, #tpu.memory_space<vmem>>, %arg8: memref<1x256xf32, #tpu.memory_space<vmem>>, %arg9: memref<256x512xbf16, #tpu.memory_space<vmem>>, %arg10: memref<1x512xf32, #tpu.memory_space<vmem>>, %arg11: memref<512x256xbf16, #tpu.memory_space<vmem>>, %arg12: memref<1x256xf32, #tpu.memory_space<vmem>>, %arg13: memref<1x256xf32, #tpu.memory_space<vmem>>, %arg14: memref<1x256xf32, #tpu.memory_space<vmem>>, %arg15: memref<2x16x256xf32, #tpu.memory_space<vmem>>, %arg16: memref<32x256xf32, #tpu.memory_space<vmem>>) attributes {dimension_semantics = [#tpu.dimension_semantics<parallel>], iteration_bounds = array<i64: 1>, scalar_prefetch = 0 : i64, scratch_operands = 1 : i64, tpu.core_type = #tpu.core_type<tc>, window_params = [{transform_indices = @transform_0, window_bounds = array<i64: 2, 16, 256>}, {transform_indices = @transform_1, window_bounds = array<i64: 2, 1, 16>}, {pipeline_mode = #tpu.pipeline_mode<synchronous>, transform_indices = @transform_2, window_bounds = array<i64: 256, 768>}, {pipeline_mode = #tpu.pipeline_mode<synchronous>, transform_indices = @transform_3, window_bounds = array<i64: 1, 768>}, {pipeline_mode = #tpu.pipeline_mode<synchronous>, transform_indices = @transform_4, window_bounds = array<i64: 256, 256>}, {pipeline_mode = #tpu.pipeline_mode<synchronous>, transform_indices = @transform_5, window_bounds = array<i64: 1, 256>}, {pipeline_mode = #tpu.pipeline_mode<synchronous>, transform_indices = @transform_6, window_bounds = array<i64: 1, 256>}, {pipeline_mode = #tpu.pipeline_mode<synchronous>, transform_indices = @transform_7, window_bounds = array<i64: 1, 256>}, {pipeline_mode = #tpu.pipeline_mode<synchronous>, transform_indices = @transform_8, window_bounds = array<i64: 256, 512>}, {pipeline_mode = #tpu.pipeline_mode<synchronous>, transform_indices = @transform_9, window_bounds = array<i64: 1, 512>}, {pipeline_mode = #tpu.pipeline_mode<synchronous>, transform_indices = @transform_10, window_bounds = array<i64: 512, 256>}, {pipeline_mode = #tpu.pipeline_mode<synchronous>, transform_indices = @transform_11, window_bounds = array<i64: 1, 256>}, {pipeline_mode = #tpu.pipeline_mode<synchronous>, transform_indices = @transform_12, window_bounds = array<i64: 1, 256>}, {pipeline_mode = #tpu.pipeline_mode<synchronous>, transform_indices = @transform_13, window_bounds = array<i64: 1, 256>}, {transform_indices = @transform_14, window_bounds = array<i64: 2, 16, 256>}]} {
    %c0 = arith.constant 0 : index
    %c0_0 = arith.constant 0 : index
    %c0_1 = arith.constant 0 : index
    %0 = vector.load %arg1[%c0, %c0_0, %c0_1] : memref<2x16x256xf32, #tpu.memory_space<vmem>>, vector<2x16x256xf32>
    %1 = vector.shape_cast %0 : vector<2x16x256xf32> to vector<32x256xf32>
    %2 = arith.truncf %1 : vector<32x256xf32> to vector<32x256xbf16>
    %c0_2 = arith.constant 0 : index
    %c0_3 = arith.constant 0 : index
    %3 = vector.load %arg3[%c0_2, %c0_3] : memref<256x768xbf16, #tpu.memory_space<vmem>>, vector<256x768xbf16>
    %cst = arith.constant dense<0.000000e+00> : vector<32x768xf32>
    %4 = tpu.matmul %2, %3, %cst {dimension_numbers = #tpu.dot_dimension_numbers<[1], [0], [0], [1], [0, 0, 1, 1], [], []>} : vector<32x256xbf16>, vector<256x768xbf16>, vector<32x768xf32> -> vector<32x768xf32>
    %c0_4 = arith.constant 0 : index
    %c0_5 = arith.constant 0 : index
    %5 = vector.load %arg4[%c0_4, %c0_5] : memref<1x768xf32, #tpu.memory_space<vmem>>, vector<1x768xf32>
    %6 = vector.broadcast %5 : vector<1x768xf32> to vector<32x768xf32>
    %7 = arith.addf %4, %6 : vector<32x768xf32>
    %8 = arith.truncf %7 : vector<32x768xf32> to vector<32x768xbf16>
    %c0_6 = arith.constant 0 : index
    %c0_7 = arith.constant 0 : index
    %c0_8 = arith.constant 0 : index
    %9 = vector.load %arg2[%c0_6, %c0_7, %c0_8] : memref<2x1x16xf32, #tpu.memory_space<vmem>>, vector<2x1x16xf32>
    %10 = vector.extract_strided_slice %9 {offsets = [0, 0, 0], sizes = [1, 1, 16], strides = [1, 1, 1]} : vector<2x1x16xf32> to vector<1x1x16xf32>
    %11 = vector.shape_cast %10 : vector<1x1x16xf32> to vector<1x16xf32>
    %12 = vector.extract_strided_slice %8 {offsets = [0, 256], sizes = [16, 128], strides = [1, 1]} : vector<32x768xbf16> to vector<16x128xbf16>
    %13 = vector.extract_strided_slice %8 {offsets = [0, 512], sizes = [16, 128], strides = [1, 1]} : vector<32x768xbf16> to vector<16x128xbf16>
    %14 = vector.extract_strided_slice %8 {offsets = [0, 0], sizes = [16, 128], strides = [1, 1]} : vector<32x768xbf16> to vector<16x128xbf16>
    %cst_9 = arith.constant dense<0.000000e+00> : vector<16x16xf32>
    %15 = tpu.matmul %14, %12, %cst_9 {dimension_numbers = #tpu.dot_dimension_numbers<[1], [1], [0], [0], [0, 0, 1, 0], [], []>} : vector<16x128xbf16>, vector<16x128xbf16>, vector<16x16xf32> -> vector<16x16xf32>
    %16 = vector.broadcast %11 : vector<1x16xf32> to vector<16x16xf32>
    %17 = arith.addf %15, %16 : vector<16x16xf32>
    %cst_10 = arith.constant dense<0xFF800000> : vector<16xf32>
    %18 = vector.multi_reduction <maximumf>, %17, %cst_10 [1] : vector<16x16xf32> to vector<16xf32>
    %19 = vector.shape_cast %18 : vector<16xf32> to vector<16x1xf32>
    %20 = vector.broadcast %19 : vector<16x1xf32> to vector<16x16xf32>
    %21 = arith.subf %17, %20 : vector<16x16xf32>
    %22 = math.exp %21 : vector<16x16xf32>
    %cst_11 = arith.constant dense<0.000000e+00> : vector<16xf32>
    %23 = vector.multi_reduction <add>, %22, %cst_11 [1] : vector<16x16xf32> to vector<16xf32>
    %24 = vector.shape_cast %23 : vector<16xf32> to vector<16x1xf32>
    %25 = arith.truncf %22 : vector<16x16xf32> to vector<16x16xbf16>
    %cst_12 = arith.constant dense<0.000000e+00> : vector<16x128xf32>
    %26 = tpu.matmul %25, %13, %cst_12 {dimension_numbers = #tpu.dot_dimension_numbers<[1], [0], [0], [1], [0, 0, 1, 1], [], []>} : vector<16x16xbf16>, vector<16x128xbf16>, vector<16x128xf32> -> vector<16x128xf32>
    %27 = tpu.reciprocal %24 {approx = true} : vector<16x1xf32> -> vector<16x1xf32>
    %28 = vector.broadcast %27 : vector<16x1xf32> to vector<16x128xf32>
    %29 = arith.mulf %26, %28 : vector<16x128xf32>
    %c0_13 = arith.constant 0 : index
    %c0_14 = arith.constant 0 : index
    %30 = vector.load %arg16[%c0_13, %c0_14] : memref<32x256xf32, #tpu.memory_space<vmem>>, vector<16x128xf32>
    tpu.vector_store %arg16[%c0_13, %c0_14], %29 {strides = array<i32>} : memref<32x256xf32, #tpu.memory_space<vmem>>, vector<16x128xf32>,
    %31 = vector.extract_strided_slice %8 {offsets = [0, 384], sizes = [16, 128], strides = [1, 1]} : vector<32x768xbf16> to vector<16x128xbf16>
    %32 = vector.extract_strided_slice %8 {offsets = [0, 640], sizes = [16, 128], strides = [1, 1]} : vector<32x768xbf16> to vector<16x128xbf16>
    %33 = vector.extract_strided_slice %8 {offsets = [0, 128], sizes = [16, 128], strides = [1, 1]} : vector<32x768xbf16> to vector<16x128xbf16>
    %cst_15 = arith.constant dense<0.000000e+00> : vector<16x16xf32>
    %34 = tpu.matmul %33, %31, %cst_15 {dimension_numbers = #tpu.dot_dimension_numbers<[1], [1], [0], [0], [0, 0, 1, 0], [], []>} : vector<16x128xbf16>, vector<16x128xbf16>, vector<16x16xf32> -> vector<16x16xf32>
    %35 = vector.broadcast %11 : vector<1x16xf32> to vector<16x16xf32>
    %36 = arith.addf %34, %35 : vector<16x16xf32>
    %cst_16 = arith.constant dense<0xFF800000> : vector<16xf32>
    %37 = vector.multi_reduction <maximumf>, %36, %cst_16 [1] : vector<16x16xf32> to vector<16xf32>
    %38 = vector.shape_cast %37 : vector<16xf32> to vector<16x1xf32>
    %39 = vector.broadcast %38 : vector<16x1xf32> to vector<16x16xf32>
    %40 = arith.subf %36, %39 : vector<16x16xf32>
    %41 = math.exp %40 : vector<16x16xf32>
    %cst_17 = arith.constant dense<0.000000e+00> : vector<16xf32>
    %42 = vector.multi_reduction <add>, %41, %cst_17 [1] : vector<16x16xf32> to vector<16xf32>
    %43 = vector.shape_cast %42 : vector<16xf32> to vector<16x1xf32>
    %44 = arith.truncf %41 : vector<16x16xf32> to vector<16x16xbf16>
    %cst_18 = arith.constant dense<0.000000e+00> : vector<16x128xf32>
    %45 = tpu.matmul %44, %32, %cst_18 {dimension_numbers = #tpu.dot_dimension_numbers<[1], [0], [0], [1], [0, 0, 1, 1], [], []>} : vector<16x16xbf16>, vector<16x128xbf16>, vector<16x128xf32> -> vector<16x128xf32>
    %46 = tpu.reciprocal %43 {approx = true} : vector<16x1xf32> -> vector<16x1xf32>
    %47 = vector.broadcast %46 : vector<16x1xf32> to vector<16x128xf32>
    %48 = arith.mulf %45, %47 : vector<16x128xf32>
    %c0_19 = arith.constant 0 : index
    %c128 = arith.constant 128 : index
    %49 = vector.load %arg16[%c0_19, %c128] : memref<32x256xf32, #tpu.memory_space<vmem>>, vector<16x128xf32>
    tpu.vector_store %arg16[%c0_19, %c128], %48 {strides = array<i32>} : memref<32x256xf32, #tpu.memory_space<vmem>>, vector<16x128xf32>,
    %50 = vector.extract_strided_slice %9 {offsets = [1, 0, 0], sizes = [1, 1, 16], strides = [1, 1, 1]} : vector<2x1x16xf32> to vector<1x1x16xf32>
    %51 = vector.shape_cast %50 : vector<1x1x16xf32> to vector<1x16xf32>
    %52 = vector.extract_strided_slice %8 {offsets = [16, 256], sizes = [16, 128], strides = [1, 1]} : vector<32x768xbf16> to vector<16x128xbf16>
    %53 = vector.extract_strided_slice %8 {offsets = [16, 512], sizes = [16, 128], strides = [1, 1]} : vector<32x768xbf16> to vector<16x128xbf16>
    %54 = vector.extract_strided_slice %8 {offsets = [16, 0], sizes = [16, 128], strides = [1, 1]} : vector<32x768xbf16> to vector<16x128xbf16>
    %cst_20 = arith.constant dense<0.000000e+00> : vector<16x16xf32>
    %55 = tpu.matmul %54, %52, %cst_20 {dimension_numbers = #tpu.dot_dimension_numbers<[1], [1], [0], [0], [0, 0, 1, 0], [], []>} : vector<16x128xbf16>, vector<16x128xbf16>, vector<16x16xf32> -> vector<16x16xf32>
    %56 = vector.broadcast %51 : vector<1x16xf32> to vector<16x16xf32>
    %57 = arith.addf %55, %56 : vector<16x16xf32>
    %cst_21 = arith.constant dense<0xFF800000> : vector<16xf32>
    %58 = vector.multi_reduction <maximumf>, %57, %cst_21 [1] : vector<16x16xf32> to vector<16xf32>
    %59 = vector.shape_cast %58 : vector<16xf32> to vector<16x1xf32>
    %60 = vector.broadcast %59 : vector<16x1xf32> to vector<16x16xf32>
    %61 = arith.subf %57, %60 : vector<16x16xf32>
    %62 = math.exp %61 : vector<16x16xf32>
    %cst_22 = arith.constant dense<0.000000e+00> : vector<16xf32>
    %63 = vector.multi_reduction <add>, %62, %cst_22 [1] : vector<16x16xf32> to vector<16xf32>
    %64 = vector.shape_cast %63 : vector<16xf32> to vector<16x1xf32>
    %65 = arith.truncf %62 : vector<16x16xf32> to vector<16x16xbf16>
    %cst_23 = arith.constant dense<0.000000e+00> : vector<16x128xf32>
    %66 = tpu.matmul %65, %53, %cst_23 {dimension_numbers = #tpu.dot_dimension_numbers<[1], [0], [0], [1], [0, 0, 1, 1], [], []>} : vector<16x16xbf16>, vector<16x128xbf16>, vector<16x128xf32> -> vector<16x128xf32>
    %67 = tpu.reciprocal %64 {approx = true} : vector<16x1xf32> -> vector<16x1xf32>
    %68 = vector.broadcast %67 : vector<16x1xf32> to vector<16x128xf32>
    %69 = arith.mulf %66, %68 : vector<16x128xf32>
    %c16 = arith.constant 16 : index
    %c0_24 = arith.constant 0 : index
    %70 = vector.load %arg16[%c16, %c0_24] : memref<32x256xf32, #tpu.memory_space<vmem>>, vector<16x128xf32>
    tpu.vector_store %arg16[%c16, %c0_24], %69 {strides = array<i32>} : memref<32x256xf32, #tpu.memory_space<vmem>>, vector<16x128xf32>,
    %71 = vector.extract_strided_slice %8 {offsets = [16, 384], sizes = [16, 128], strides = [1, 1]} : vector<32x768xbf16> to vector<16x128xbf16>
    %72 = vector.extract_strided_slice %8 {offsets = [16, 640], sizes = [16, 128], strides = [1, 1]} : vector<32x768xbf16> to vector<16x128xbf16>
    %73 = vector.extract_strided_slice %8 {offsets = [16, 128], sizes = [16, 128], strides = [1, 1]} : vector<32x768xbf16> to vector<16x128xbf16>
    %cst_25 = arith.constant dense<0.000000e+00> : vector<16x16xf32>
    %74 = tpu.matmul %73, %71, %cst_25 {dimension_numbers = #tpu.dot_dimension_numbers<[1], [1], [0], [0], [0, 0, 1, 0], [], []>} : vector<16x128xbf16>, vector<16x128xbf16>, vector<16x16xf32> -> vector<16x16xf32>
    %75 = vector.broadcast %51 : vector<1x16xf32> to vector<16x16xf32>
    %76 = arith.addf %74, %75 : vector<16x16xf32>
    %cst_26 = arith.constant dense<0xFF800000> : vector<16xf32>
    %77 = vector.multi_reduction <maximumf>, %76, %cst_26 [1] : vector<16x16xf32> to vector<16xf32>
    %78 = vector.shape_cast %77 : vector<16xf32> to vector<16x1xf32>
    %79 = vector.broadcast %78 : vector<16x1xf32> to vector<16x16xf32>
    %80 = arith.subf %76, %79 : vector<16x16xf32>
    %81 = math.exp %80 : vector<16x16xf32>
    %cst_27 = arith.constant dense<0.000000e+00> : vector<16xf32>
    %82 = vector.multi_reduction <add>, %81, %cst_27 [1] : vector<16x16xf32> to vector<16xf32>
    %83 = vector.shape_cast %82 : vector<16xf32> to vector<16x1xf32>
    %84 = arith.truncf %81 : vector<16x16xf32> to vector<16x16xbf16>
    %cst_28 = arith.constant dense<0.000000e+00> : vector<16x128xf32>
    %85 = tpu.matmul %84, %72, %cst_28 {dimension_numbers = #tpu.dot_dimension_numbers<[1], [0], [0], [1], [0, 0, 1, 1], [], []>} : vector<16x16xbf16>, vector<16x128xbf16>, vector<16x128xf32> -> vector<16x128xf32>
    %86 = tpu.reciprocal %83 {approx = true} : vector<16x1xf32> -> vector<16x1xf32>
    %87 = vector.broadcast %86 : vector<16x1xf32> to vector<16x128xf32>
    %88 = arith.mulf %85, %87 : vector<16x128xf32>
    %c16_29 = arith.constant 16 : index
    %c128_30 = arith.constant 128 : index
    %89 = vector.load %arg16[%c16_29, %c128_30] : memref<32x256xf32, #tpu.memory_space<vmem>>, vector<16x128xf32>
    tpu.vector_store %arg16[%c16_29, %c128_30], %88 {strides = array<i32>} : memref<32x256xf32, #tpu.memory_space<vmem>>, vector<16x128xf32>,
    %c0_31 = arith.constant 0 : index
    %c0_32 = arith.constant 0 : index
    %90 = vector.load %arg16[%c0_31, %c0_32] : memref<32x256xf32, #tpu.memory_space<vmem>>, vector<32x256xf32>
    %91 = arith.truncf %90 : vector<32x256xf32> to vector<32x256xbf16>
    %c0_33 = arith.constant 0 : index
    %c0_34 = arith.constant 0 : index
    %92 = vector.load %arg5[%c0_33, %c0_34] : memref<256x256xbf16, #tpu.memory_space<vmem>>, vector<256x256xbf16>
    %cst_35 = arith.constant dense<0.000000e+00> : vector<32x256xf32>
    %93 = tpu.matmul %91, %92, %cst_35 {dimension_numbers = #tpu.dot_dimension_numbers<[1], [0], [0], [1], [0, 0, 1, 1], [], []>} : vector<32x256xbf16>, vector<256x256xbf16>, vector<32x256xf32> -> vector<32x256xf32>
    %c0_36 = arith.constant 0 : index
    %c0_37 = arith.constant 0 : index
    %94 = vector.load %arg6[%c0_36, %c0_37] : memref<1x256xf32, #tpu.memory_space<vmem>>, vector<1x256xf32>
    %95 = vector.broadcast %94 : vector<1x256xf32> to vector<32x256xf32>
    %96 = arith.addf %93, %95 : vector<32x256xf32>
    %97 = arith.addf %96, %1 : vector<32x256xf32>
    %c0_38 = arith.constant 0 : index
    %c0_39 = arith.constant 0 : index
    %98 = vector.load %arg7[%c0_38, %c0_39] : memref<1x256xf32, #tpu.memory_space<vmem>>, vector<1x256xf32>
    %c0_40 = arith.constant 0 : index
    %c0_41 = arith.constant 0 : index
    %99 = vector.load %arg8[%c0_40, %c0_41] : memref<1x256xf32, #tpu.memory_space<vmem>>, vector<1x256xf32>
    %cst_42 = arith.constant dense<0.000000e+00> : vector<32xf32>
    %100 = vector.multi_reduction <add>, %97, %cst_42 [1] : vector<32x256xf32> to vector<32xf32>
    %101 = vector.shape_cast %100 : vector<32xf32> to vector<32x1xf32>
    %cst_43 = arith.constant 2.560000e+02 : f32
    %102 = vector.broadcast %cst_43 : f32 to vector<32x1xf32>
    %103 = arith.divf %101, %102 : vector<32x1xf32>
    %104 = vector.broadcast %103 : vector<32x1xf32> to vector<32x256xf32>
    %105 = arith.subf %97, %104 : vector<32x256xf32>
    %106 = arith.mulf %105, %105 : vector<32x256xf32>
    %cst_44 = arith.constant dense<0.000000e+00> : vector<32xf32>
    %107 = vector.multi_reduction <add>, %106, %cst_44 [1] : vector<32x256xf32> to vector<32xf32>
    %108 = vector.shape_cast %107 : vector<32xf32> to vector<32x1xf32>
    %cst_45 = arith.constant 0.00392156886 : f32
    %109 = vector.broadcast %cst_45 : f32 to vector<32x1xf32>
    %110 = arith.mulf %108, %109 : vector<32x1xf32>
    %111 = math.sqrt %110 : vector<32x1xf32>
    %112 = vector.broadcast %103 : vector<32x1xf32> to vector<32x256xf32>
    %113 = arith.subf %97, %112 : vector<32x256xf32>
    %114 = vector.broadcast %98 : vector<1x256xf32> to vector<32x256xf32>
    %115 = arith.mulf %114, %113 : vector<32x256xf32>
    %cst_46 = arith.constant 9.99999997E-7 : f32
    %116 = vector.broadcast %cst_46 : f32 to vector<32x1xf32>
    %117 = arith.addf %111, %116 : vector<32x1xf32>
    %118 = vector.broadcast %117 : vector<32x1xf32> to vector<32x256xf32>
    %119 = arith.divf %115, %118 : vector<32x256xf32>
    %120 = vector.broadcast %99 : vector<1x256xf32> to vector<32x256xf32>
    %121 = arith.addf %119, %120 : vector<32x256xf32>
    %122 = arith.truncf %121 : vector<32x256xf32> to vector<32x256xbf16>
    %c0_47 = arith.constant 0 : index
    %c0_48 = arith.constant 0 : index
    %123 = vector.load %arg9[%c0_47, %c0_48] : memref<256x512xbf16, #tpu.memory_space<vmem>>, vector<256x512xbf16>
    %cst_49 = arith.constant dense<0.000000e+00> : vector<32x512xf32>
    %124 = tpu.matmul %122, %123, %cst_49 {dimension_numbers = #tpu.dot_dimension_numbers<[1], [0], [0], [1], [0, 0, 1, 1], [], []>} : vector<32x256xbf16>, vector<256x512xbf16>, vector<32x512xf32> -> vector<32x512xf32>
    %c0_50 = arith.constant 0 : index
    %c0_51 = arith.constant 0 : index
    %125 = vector.load %arg10[%c0_50, %c0_51] : memref<1x512xf32, #tpu.memory_space<vmem>>, vector<1x512xf32>
    %126 = vector.broadcast %125 : vector<1x512xf32> to vector<32x512xf32>
    %127 = arith.addf %124, %126 : vector<32x512xf32>
    %cst_52 = arith.constant 0.000000e+00 : f32
    %128 = vector.broadcast %cst_52 : f32 to vector<32x512xf32>
    %129 = arith.maximumf %127, %128 : vector<32x512xf32>
    %130 = arith.truncf %129 : vector<32x512xf32> to vector<32x512xbf16>
    %c0_53 = arith.constant 0 : index
    %c0_54 = arith.constant 0 : index
    %131 = vector.load %arg11[%c0_53, %c0_54] : memref<512x256xbf16, #tpu.memory_space<vmem>>, vector<512x256xbf16>
    %cst_55 = arith.constant dense<0.000000e+00> : vector<32x256xf32>
    %132 = tpu.matmul %130, %131, %cst_55 {dimension_numbers = #tpu.dot_dimension_numbers<[1], [0], [0], [1], [0, 0, 1, 1], [], []>} : vector<32x512xbf16>, vector<512x256xbf16>, vector<32x256xf32> -> vector<32x256xf32>
    %c0_56 = arith.constant 0 : index
    %c0_57 = arith.constant 0 : index
    %133 = vector.load %arg12[%c0_56, %c0_57] : memref<1x256xf32, #tpu.memory_space<vmem>>, vector<1x256xf32>
    %134 = vector.broadcast %133 : vector<1x256xf32> to vector<32x256xf32>
    %135 = arith.addf %132, %134 : vector<32x256xf32>
    %136 = arith.addf %135, %121 : vector<32x256xf32>
    %c0_58 = arith.constant 0 : index
    %c0_59 = arith.constant 0 : index
    %137 = vector.load %arg13[%c0_58, %c0_59] : memref<1x256xf32, #tpu.memory_space<vmem>>, vector<1x256xf32>
    %c0_60 = arith.constant 0 : index
    %c0_61 = arith.constant 0 : index
    %138 = vector.load %arg14[%c0_60, %c0_61] : memref<1x256xf32, #tpu.memory_space<vmem>>, vector<1x256xf32>
    %cst_62 = arith.constant dense<0.000000e+00> : vector<32xf32>
    %139 = vector.multi_reduction <add>, %136, %cst_62 [1] : vector<32x256xf32> to vector<32xf32>
    %140 = vector.shape_cast %139 : vector<32xf32> to vector<32x1xf32>
    %cst_63 = arith.constant 2.560000e+02 : f32
    %141 = vector.broadcast %cst_63 : f32 to vector<32x1xf32>
    %142 = arith.divf %140, %141 : vector<32x1xf32>
    %143 = vector.broadcast %142 : vector<32x1xf32> to vector<32x256xf32>
    %144 = arith.subf %136, %143 : vector<32x256xf32>
    %145 = arith.mulf %144, %144 : vector<32x256xf32>
    %cst_64 = arith.constant dense<0.000000e+00> : vector<32xf32>
    %146 = vector.multi_reduction <add>, %145, %cst_64 [1] : vector<32x256xf32> to vector<32xf32>
    %147 = vector.shape_cast %146 : vector<32xf32> to vector<32x1xf32>
    %cst_65 = arith.constant 0.00392156886 : f32
    %148 = vector.broadcast %cst_65 : f32 to vector<32x1xf32>
    %149 = arith.mulf %147, %148 : vector<32x1xf32>
    %150 = math.sqrt %149 : vector<32x1xf32>
    %151 = vector.broadcast %142 : vector<32x1xf32> to vector<32x256xf32>
    %152 = arith.subf %136, %151 : vector<32x256xf32>
    %153 = vector.broadcast %137 : vector<1x256xf32> to vector<32x256xf32>
    %154 = arith.mulf %153, %152 : vector<32x256xf32>
    %cst_66 = arith.constant 9.99999997E-7 : f32
    %155 = vector.broadcast %cst_66 : f32 to vector<32x1xf32>
    %156 = arith.addf %150, %155 : vector<32x1xf32>
    %157 = vector.broadcast %156 : vector<32x1xf32> to vector<32x256xf32>
    %158 = arith.divf %154, %157 : vector<32x256xf32>
    %159 = vector.broadcast %138 : vector<1x256xf32> to vector<32x256xf32>
    %160 = arith.addf %158, %159 : vector<32x256xf32>
    %161 = vector.shape_cast %160 : vector<32x256xf32> to vector<2x16x256xf32>
    %c0_67 = arith.constant 0 : index
    %c0_68 = arith.constant 0 : index
    %c0_69 = arith.constant 0 : index
    %162 = vector.load %arg15[%c0_67, %c0_68, %c0_69] : memref<2x16x256xf32, #tpu.memory_space<vmem>>, vector<2x16x256xf32>
    tpu.vector_store %arg15[%c0_67, %c0_68, %c0_69], %161 {strides = array<i32>} : memref<2x16x256xf32, #tpu.memory_space<vmem>>, vector<2x16x256xf32>,
    return
  }
  func.func @transform_0(%arg0: i32) -> (i32, i32, i32) {
    %c0_i32 = arith.constant 0 : i32
    %c0_i32_0 = arith.constant 0 : i32
    %c0_i32_1 = arith.constant 0 : i32
    return %arg0, %c0_i32, %c0_i32_0 : i32, i32, i32
  }
  func.func @transform_1(%arg0: i32) -> (i32, i32, i32) {
    %c0_i32 = arith.constant 0 : i32
    %c0_i32_0 = arith.constant 0 : i32
    %c0_i32_1 = arith.constant 0 : i32
    return %arg0, %c0_i32, %c0_i32_0 : i32, i32, i32
  }
  func.func @transform_2(%arg0: i32) -> (i32, i32) {
    %c0_i32 = arith.constant 0 : i32
    %c0_i32_0 = arith.constant 0 : i32
    %c0_i32_1 = arith.constant 0 : i32
    return %c0_i32, %c0_i32_0 : i32, i32
  }
  func.func @transform_3(%arg0: i32) -> (i32, i32) {
    %c0_i32 = arith.constant 0 : i32
    %c0_i32_0 = arith.constant 0 : i32
    %c0_i32_1 = arith.constant 0 : i32
    return %c0_i32, %c0_i32_0 : i32, i32
  }
  func.func @transform_4(%arg0: i32) -> (i32, i32) {
    %c0_i32 = arith.constant 0 : i32
    %c0_i32_0 = arith.constant 0 : i32
    %c0_i32_1 = arith.constant 0 : i32
    return %c0_i32, %c0_i32_0 : i32, i32
  }
  func.func @transform_5(%arg0: i32) -> (i32, i32) {
    %c0_i32 = arith.constant 0 : i32
    %c0_i32_0 = arith.constant 0 : i32
    %c0_i32_1 = arith.constant 0 : i32
    return %c0_i32, %c0_i32_0 : i32, i32
  }
  func.func @transform_6(%arg0: i32) -> (i32, i32) {
    %c0_i32 = arith.constant 0 : i32
    %c0_i32_0 = arith.constant 0 : i32
    %c0_i32_1 = arith.constant 0 : i32
    return %c0_i32, %c0_i32_0 : i32, i32
  }
  func.func @transform_7(%arg0: i32) -> (i32, i32) {
    %c0_i32 = arith.constant 0 : i32
    %c0_i32_0 = arith.constant 0 : i32
    %c0_i32_1 = arith.constant 0 : i32
    return %c0_i32, %c0_i32_0 : i32, i32
  }
  func.func @transform_8(%arg0: i32) -> (i32, i32) {
    %c0_i32 = arith.constant 0 : i32
    %c0_i32_0 = arith.constant 0 : i32
    %c0_i32_1 = arith.constant 0 : i32
    return %c0_i32, %c0_i32_0 : i32, i32
  }
  func.func @transform_9(%arg0: i32) -> (i32, i32) {
    %c0_i32 = arith.constant 0 : i32
    %c0_i32_0 = arith.constant 0 : i32
    %c0_i32_1 = arith.constant 0 : i32
    return %c0_i32, %c0_i32_0 : i32, i32
  }
  func.func @transform_10(%arg0: i32) -> (i32, i32) {
    %c0_i32 = arith.constant 0 : i32
    %c0_i32_0 = arith.constant 0 : i32
    %c0_i32_1 = arith.constant 0 : i32
    return %c0_i32, %c0_i32_0 : i32, i32
  }
  func.func @transform_11(%arg0: i32) -> (i32, i32) {
    %c0_i32 = arith.constant 0 : i32
    %c0_i32_0 = arith.constant 0 : i32
    %c0_i32_1 = arith.constant 0 : i32
    return %c0_i32, %c0_i32_0 : i32, i32
  }
  func.func @transform_12(%arg0: i32) -> (i32, i32) {
    %c0_i32 = arith.constant 0 : i32
    %c0_i32_0 = arith.constant 0 : i32
    %c0_i32_1 = arith.constant 0 : i32
    return %c0_i32, %c0_i32_0 : i32, i32
  }
  func.func @transform_13(%arg0: i32) -> (i32, i32) {
    %c0_i32 = arith.constant 0 : i32
    %c0_i32_0 = arith.constant 0 : i32
    %c0_i32_1 = arith.constant 0 : i32
    return %c0_i32, %c0_i32_0 : i32, i32
  }
  func.func @transform_14(%arg0: i32) -> (i32, i32, i32) {
    %c0_i32 = arith.constant 0 : i32
    %c0_i32_0 = arith.constant 0 : i32
    %c0_i32_1 = arith.constant 0 : i32
    return %arg0, %c0_i32, %c0_i32_0 : i32, i32, i32
  }
}

</mosaic_0001>

<bundles_post_ra>
// kernel: transformer_encoder.3
= control target key start
LH: loop header
LB: loop body
LE: loop exit
PB: predicated region body
PF: predicated region fallthrough
CT: control target
= control target key end

     0   :  { %s6571_s0 = inlined_call_operand.vmem [shape: f32[2,16,256], index: 0, kind: input, shape index: {}]   ;;  %s6572_s1 = inlined_call_operand.vmem [shape: f32[2,1,16], index: 1, kind: input, shape index: {}]   ;;  %s6573_s2 = inlined_call_operand.vmem [shape: bf16[256,768], index: 2, kind: input, shape index: {}]   ;;  %s6574_s3 = inlined_call_operand.vmem [shape: f32[1,768], index: 3, kind: input, shape index: {}]   ;;  %s6575_s4 = inlined_call_operand.vmem [shape: bf16[256,256], index: 4, kind: input, shape index: {}]   ;;  %s6576_s5 = inlined_call_operand.vmem [shape: f32[1,256], index: 5, kind: input, shape index: {}]   ;;  %s6577_s6 = inlined_call_operand.vmem [shape: f32[1,256], index: 6, kind: input, shape index: {}]   ;;  %s6578_s7 = inlined_call_operand.vmem [shape: f32[1,256], index: 7, kind: input, shape index: {}]   ;;  %s6579_s8 = inlined_call_operand.vmem [shape: bf16[256,512], index: 8, kind: input, shape index: {}]   ;;  %s6580_s9 = inlined_call_operand.vmem [shape: f32[1,512], index: 9, kind: input, shape index: {}]   ;;  %s6581_s10 = inlined_call_operand.vmem [shape: bf16[512,256], index: 10, kind: input, shape index: {}]   ;;  %s6582_s11 = inlined_call_operand.vmem [shape: f32[1,256], index: 11, kind: input, shape index: {}]   ;;  %s6583_s12 = inlined_call_operand.vmem [shape: f32[1,256], index: 12, kind: input, shape index: {}]   ;;  %s6584_s13 = inlined_call_operand.vmem [shape: f32[1,256], index: 13, kind: input, shape index: {}]   ;;  %s6585_s14 = inlined_call_operand.hbm [shape: f32[2,16,256], index: 14, kind: output, shape index: {}]  }
   0x1   :  { %v3189_v0 = vld [vmem:[%s6573_s2 + $0x150] sm:$0xf]  ;;  %v4092_v1 = vld [vmem:[%s6573_s2 + $0x164] sm:$0xf0]  ;;  %v4089_v5 = vld [vmem:[%s6573_s2 + $0x154] sm:$0xf] }
   0x2   :  { %v3381_v2 = vld [vmem:[%s6573_s2 + $0x2d0] sm:$0xf]  ;;  %v3190_v3 = vor.u32 %v4092_v1, %v3189_v0  ;;  %v4140_v4 = vld [vmem:[%s6573_s2 + $0x2e4] sm:$0xf0]  ;;  %v3191_v6 = vld [vmem:[%s6573_s2 + $0x168] sm:$0xf0] }
   0x3   :  { %v3382_v7 = vor.u32 %v4140_v4, %v3381_v2  ;;  %v3194_v8 = vor.u32 %v4089_v5, %v3191_v6  ;;  %v4137_v9 = vld [vmem:[%s6573_s2 + $0x2d4] sm:$0xf]  ;;  %v3383_v10 = vld [vmem:[%s6573_s2 + $0x2e8] sm:$0xf0]  ;;  %v3165_v11 = vld [vmem:[%s6573_s2 + $0x120] sm:$0xf] }
   0x4   :  { %651 = vmatpush.bf16.msra.mxu0 %v3190_v3  ;;  %v3386_v12 = vor.u32 %v4137_v9, %v3383_v10  ;;  %v4086_v13 = vld [vmem:[%s6573_s2 + $0x134] sm:$0xf0]  ;;  %v3357_v14 = vld [vmem:[%s6573_s2 + $0x2a0] sm:$0xf]  ;;  %v4083_v18 = vld [vmem:[%s6573_s2 + $0x124] sm:$0xf] }
   0x5   :  { %v4134_v15 = vld [vmem:[%s6573_s2 + $0x2b4] sm:$0xf0]  ;;  %670 = vmatpush.bf16.msra.mxu1 %v3382_v7  ;;  %689 = vmatpush.bf16.msra.mxu2 %v3194_v8  ;;  %v3166_v16 = vor.u32 %v4086_v13, %v3165_v11  ;;  %v3167_v19 = vld [vmem:[%s6573_s2 + $0x138] sm:$0xf0]  ;;  %v4131_v20 = vld [vmem:[%s6573_s2 + $0x2a4] sm:$0xf] }
   0x6   :  { %v3358_v17 = vor.u32 %v4134_v15, %v3357_v14  ;;  %708 = vmatpush.bf16.msra.mxu3 %v3386_v12  ;;  %v3170_v21 = vor.u32 %v4083_v18, %v3167_v19  ;;  %v3359_v22 = vld [vmem:[%s6573_s2 + $0x2b8] sm:$0xf0]  ;;  %v3141_v23 = vld [vmem:[%s6573_s2 + $0xf0] sm:$0xf]  ;;  %v4080_v24 = vld [vmem:[%s6573_s2 + $0x104] sm:$0xf0] }
   0x7   :  { %v3362_v25 = vor.u32 %v4131_v20, %v3359_v22  ;;  %v3333_v26 = vld [vmem:[%s6573_s2 + $0x270] sm:$0xf]  ;;  %v4128_v27 = vld [vmem:[%s6573_s2 + $0x284] sm:$0xf0]  ;;  %v4077_v28 = vld [vmem:[%s6573_s2 + $0xf4] sm:$0xf]  ;;  %v3142_v29 = vor.u32 %v4080_v24, %v3141_v23 }
   0x8   :  { %652 = vmatpush.bf16.msra.mxu0 %v3166_v16  ;;  %v3143_v30 = vld [vmem:[%s6573_s2 + $0x108] sm:$0xf0]  ;;  %v4125_v31 = vld [vmem:[%s6573_s2 + $0x274] sm:$0xf]  ;;  %v3334_v33 = vor.u32 %v4128_v27, %v3333_v26  ;;  %v3117_v35 = vld [vmem:[%s6573_s2 + $0xc0] sm:$0xf] }
   0x9   :  { %v3335_v32 = vld [vmem:[%s6573_s2 + $0x288] sm:$0xf0]  ;;  %671 = vmatpush.bf16.msra.mxu1 %v3358_v17  ;;  %690 = vmatpush.bf16.msra.mxu2 %v3170_v21  ;;  %v3146_v34 = vor.u32 %v4077_v28, %v3143_v30  ;;  %v4074_v36 = vld [vmem:[%s6573_s2 + $0xd4] sm:$0xf0]  ;;  %v3309_v37 = vld [vmem:[%s6573_s2 + $0x240] sm:$0xf] }
   0xa   :  { %709 = vmatpush.bf16.msra.mxu3 %v3362_v25  ;;  %v3338_v38 = vor.u32 %v4125_v31, %v3335_v32  ;;  %v4122_v39 = vld [vmem:[%s6573_s2 + $0x254] sm:$0xf0]  ;;  %v4071_v40 = vld [vmem:[%s6573_s2 + $0xc4] sm:$0xf]  ;;  %v3119_v41 = vld [vmem:[%s6573_s2 + $0xd8] sm:$0xf0]  ;;  %v3118_v44 = vor.u32 %v4074_v36, %v3117_v35 }
   0xb   :  { %v4119_v42 = vld [vmem:[%s6573_s2 + $0x244] sm:$0xf]  ;;  %v3311_v43 = vld [vmem:[%s6573_s2 + $0x258] sm:$0xf0]  ;;  %v3310_v45 = vor.u32 %v4122_v39, %v3309_v37  ;;  %v3122_v46 = vor.u32 %v4071_v40, %v3119_v41  ;;  %v3093_v47 = vld [vmem:[%s6573_s2 + $0x90] sm:$0xf] }
   0xc   :  { %653 = vmatpush.bf16.msra.mxu0 %v3142_v29  ;;  %v4068_v48 = vld [vmem:[%s6573_s2 + $0xa4] sm:$0xf0]  ;;  %v3285_v49 = vld [vmem:[%s6573_s2 + $0x210] sm:$0xf]  ;;  %v3314_v50 = vor.u32 %v4119_v42, %v3311_v43  ;;  %v4065_v52 = vld [vmem:[%s6573_s2 + $0x94] sm:$0xf] }
   0xd   :  { %672 = vmatpush.bf16.msra.mxu1 %v3334_v33  ;;  %691 = vmatpush.bf16.msra.mxu2 %v3146_v34  ;;  %v4116_v51 = vld [vmem:[%s6573_s2 + $0x224] sm:$0xf0]  ;;  %v3095_v53 = vld [vmem:[%s6573_s2 + $0xa8] sm:$0xf0]  ;;  %v4113_v54 = vld [vmem:[%s6573_s2 + $0x214] sm:$0xf]  ;;  %v3094_v56 = vor.u32 %v4068_v48, %v3093_v47 }
   0xe   :  { %710 = vmatpush.bf16.msra.mxu3 %v3338_v38  ;;  %v3287_v55 = vld [vmem:[%s6573_s2 + $0x228] sm:$0xf0]  ;;  %v3286_v57 = vor.u32 %v4116_v51, %v3285_v49  ;;  %v3098_v58 = vor.u32 %v4065_v52, %v3095_v53  ;;  %v3069_v59 = vld [vmem:[%s6573_s2 + $0x60] sm:$0xf]  ;;  %v4062_v60 = vld [vmem:[%s6573_s2 + $0x74] sm:$0xf0] }
   0xf   :  { %v3261_v61 = vld [vmem:[%s6573_s2 + $0x1e0] sm:$0xf]  ;;  %v3290_v62 = vor.u32 %v4113_v54, %v3287_v55  ;;  %v4110_v63 = vld [vmem:[%s6573_s2 + $0x1f4] sm:$0xf0]  ;;  %v4059_v0 = vld [vmem:[%s6573_s2 + $0x64] sm:$0xf]  ;;  %v3070_v4 = vor.u32 %v4062_v60, %v3069_v59 }
  0x10   :  { %654 = vmatpush.bf16.msra.mxu0 %v3118_v44  ;;  %v3071_v1 = vld [vmem:[%s6573_s2 + $0x78] sm:$0xf0]  ;;  %v4107_v2 = vld [vmem:[%s6573_s2 + $0x1e4] sm:$0xf]  ;;  %v3262_v5 = vor.u32 %v4110_v63, %v3261_v61  ;;  %v3045_v7 = vld [vmem:[%s6573_s2 + $0x30] sm:$0xf] }
  0x11   :  { %673 = vmatpush.bf16.msra.mxu1 %v3310_v45  ;;  %692 = vmatpush.bf16.msra.mxu2 %v3122_v46  ;;  %v3263_v3 = vld [vmem:[%s6573_s2 + $0x1f8] sm:$0xf0]  ;;  %v3074_v6 = vor.u32 %v4059_v0, %v3071_v1  ;;  %v4056_v8 = vld [vmem:[%s6573_s2 + $0x44] sm:$0xf0]  ;;  %v3237_v9 = vld [vmem:[%s6573_s2 + $0x1b0] sm:$0xf] }
  0x12   :  { %711 = vmatpush.bf16.msra.mxu3 %v3314_v50  ;;  %v3266_v10 = vor.u32 %v4107_v2, %v3263_v3  ;;  %v4104_v11 = vld [vmem:[%s6573_s2 + $0x1c4] sm:$0xf0]  ;;  %v4053_v12 = vld [vmem:[%s6573_s2 + $0x34] sm:$0xf]  ;;  %v3047_v13 = vld [vmem:[%s6573_s2 + $0x48] sm:$0xf0]  ;;  %v3046_v16 = vor.u32 %v4056_v8, %v3045_v7 }
  0x13   :  { %v4101_v14 = vld [vmem:[%s6573_s2 + $0x1b4] sm:$0xf]  ;;  %v3239_v15 = vld [vmem:[%s6573_s2 + $0x1c8] sm:$0xf0]  ;;  %v3021_v17 = vld [vmem:[%s6573_s2] sm:$0xf]  ;;  %v3238_v19 = vor.u32 %v4104_v11, %v3237_v9  ;;  %v3050_v20 = vor.u32 %v4053_v12, %v3047_v13 }
  0x14   :  { %655 = vmatpush.bf16.msra.mxu0 %v3094_v56  ;;  %v4050_v18 = vld [vmem:[%s6573_s2 + $0x14] sm:$0xf0]  ;;  %v3213_v21 = vld [vmem:[%s6573_s2 + $0x180] sm:$0xf]  ;;  %v4047_v23 = vld [vmem:[%s6573_s2 + $0x4] sm:$0xf]  ;;  %v3242_v24 = vor.u32 %v4101_v14, %v3239_v15 }
  0x15   :  { %674 = vmatpush.bf16.msra.mxu1 %v3286_v57  ;;  %693 = vmatpush.bf16.msra.mxu2 %v3098_v58  ;;  %v4098_v22 = vld [vmem:[%s6573_s2 + $0x194] sm:$0xf0]  ;;  %v3023_v25 = vld [vmem:[%s6573_s2 + $0x18] sm:$0xf0]  ;;  %v4095_v26 = vld [vmem:[%s6573_s2 + $0x184] sm:$0xf]  ;;  %v3022_v31 = vor.u32 %v4050_v18, %v3021_v17 }
  0x16   :  { %712 = vmatpush.bf16.msra.mxu3 %v3290_v62  ;;  %v3215_v27 = vld [vmem:[%s6573_s2 + $0x198] sm:$0xf0]  ;;  %v49_v28 = vld [vmem:[%s6571_s0] sm:$0xff]  ;;  %v3197_v29 = vld [vmem:[%s6573_s2 + $0x158] sm:$0xf]  ;;  %v3214_v35 = vor.u32 %v4098_v22, %v3213_v21  ;;  %v3026_v36 = vor.u32 %v4047_v23, %v3023_v25 }
  0x17   :  { %v4093_v30 = vld [vmem:[%s6573_s2 + $0x16c] sm:$0xf0]  ;;  %v3389_v33 = vld [vmem:[%s6573_s2 + $0x2d8] sm:$0xf]  ;;  %v50_v37 = vld [vmem:[%s6571_s0 + $0x8] sm:$0xff]  ;;  %v3218_v39 = vor.u32 %v4095_v26, %v3215_v27 }
  0x18   :  { %656 = vmatpush.bf16.msra.mxu0 %v3070_v4  ;;  %v51_v32 = vld [vmem:[%s6571_s0 + $0x10] sm:$0xff]  ;;  %v52_v38 = vld [vmem:[%s6571_s0 + $0x18] sm:$0xff]  ;;  %v3198_v40 = vor.u32 %v4093_v30, %v3197_v29  ;;  %v3173_v47 = vld [vmem:[%s6573_s2 + $0x128] sm:$0xf] }
  0x19   :  { %675 = vmatpush.bf16.msra.mxu1 %v3262_v5  ;;  %694 = vmatpush.bf16.msra.mxu2 %v3074_v6  ;;  %v4141_v34 = vld [vmem:[%s6573_s2 + $0x2ec] sm:$0xf0]  ;;  %v4090_v41 = vld [vmem:[%s6573_s2 + $0x15c] sm:$0xf]  ;;  %v3199_v42 = vld [vmem:[%s6573_s2 + $0x170] sm:$0xf0]  ;;  %v4713_v44 = vpack.c.bf16 %v51_v32, %v49_v28  ;;  %v4724_v49 = vpack.c.bf16 %v52_v38, %v50_v37 }
  0x1a   :  { %713 = vmatpush.bf16.msra.mxu3 %v3266_v10  ;;  %v4138_v43 = vld [vmem:[%s6573_s2 + $0x2dc] sm:$0xf]  ;;  %v3390_v45 = vor.u32 %v4141_v34, %v3389_v33  ;;  %v3391_v46 = vld [vmem:[%s6573_s2 + $0x2f0] sm:$0xf0]  ;;  %v4087_v48 = vld [vmem:[%s6573_s2 + $0x13c] sm:$0xf0]  ;;  %v3202_v52 = vor.u32 %v4090_v41, %v3199_v42 }
  0x1b   :  { %v3365_v50 = vld [vmem:[%s6573_s2 + $0x2a8] sm:$0xf]  ;;  %v4135_v51 = vld [vmem:[%s6573_s2 + $0x2bc] sm:$0xf0]  ;;  %v3394_v53 = vor.u32 %v4138_v43, %v3391_v46  ;;  %v3174_v54 = vor.u32 %v4087_v48, %v3173_v47  ;;  %v4084_v55 = vld [vmem:[%s6573_s2 + $0x12c] sm:$0xf] }
  0x1c   :  { %657 = vmatpush.bf16.msra.mxu0 %v3046_v16  ;;  %v3175_v56 = vld [vmem:[%s6573_s2 + $0x140] sm:$0xf0]  ;;  %v4132_v57 = vld [vmem:[%s6573_s2 + $0x2ac] sm:$0xf]  ;;  %v3366_v58 = vor.u32 %v4135_v51, %v3365_v50  ;;  %v3149_v60 = vld [vmem:[%s6573_s2 + $0xf8] sm:$0xf] }
  0x1d   :  { %676 = vmatpush.bf16.msra.mxu1 %v3238_v19  ;;  %695 = vmatpush.bf16.msra.mxu2 %v3050_v20  ;;  %v3367_v59 = vld [vmem:[%s6573_s2 + $0x2c0] sm:$0xf0]  ;;  %v4081_v61 = vld [vmem:[%s6573_s2 + $0x10c] sm:$0xf0]  ;;  %v3341_v62 = vld [vmem:[%s6573_s2 + $0x278] sm:$0xf]  ;;  %v3178_v0 = vor.u32 %v4084_v55, %v3175_v56 }
  0x1e   :  { %714 = vmatpush.bf16.msra.mxu3 %v3242_v24  ;;  %v4129_v63 = vld [vmem:[%s6573_s2 + $0x28c] sm:$0xf0]  ;;  %v3370_v1 = vor.u32 %v4132_v57, %v3367_v59  ;;  %v3150_v2 = vor.u32 %v4081_v61, %v3149_v60  ;;  %v4078_v3 = vld [vmem:[%s6573_s2 + $0xfc] sm:$0xf]  ;;  %v3151_v4 = vld [vmem:[%s6573_s2 + $0x110] sm:$0xf0] }
  0x1f   :  { %v4126_v5 = vld [vmem:[%s6573_s2 + $0x27c] sm:$0xf]  ;;  %v3342_v6 = vor.u32 %v4129_v63, %v3341_v62  ;;  %v3343_v7 = vld [vmem:[%s6573_s2 + $0x290] sm:$0xf0]  ;;  %v3125_v8 = vld [vmem:[%s6573_s2 + $0xc8] sm:$0xf]  ;;  %v3154_v12 = vor.u32 %v4078_v3, %v3151_v4 }
  0x20   :  { %658 = vmatpush.bf16.msra.mxu0 %v3022_v31  ;;  %v4075_v9 = vld [vmem:[%s6573_s2 + $0xdc] sm:$0xf0]  ;;  %v3317_v10 = vld [vmem:[%s6573_s2 + $0x248] sm:$0xf]  ;;  %v4072_v13 = vld [vmem:[%s6573_s2 + $0xcc] sm:$0xf]  ;;  %v3346_v16 = vor.u32 %v4126_v5, %v3343_v7 }
  0x21   :  { %677 = vmatpush.bf16.msra.mxu1 %v3214_v35  ;;  %696 = vmatpush.bf16.msra.mxu2 %v3026_v36  ;;  %v4123_v11 = vld [vmem:[%s6573_s2 + $0x25c] sm:$0xf0]  ;;  %v3127_v14 = vld [vmem:[%s6573_s2 + $0xe0] sm:$0xf0]  ;;  %v4120_v15 = vld [vmem:[%s6573_s2 + $0x24c] sm:$0xf]  ;;  %v3126_v17 = vor.u32 %v4075_v9, %v3125_v8 }
  0x22   :  { %715 = vmatpush.bf16.msra.mxu3 %v3218_v39  ;;  %v3319_v18 = vld [vmem:[%s6573_s2 + $0x260] sm:$0xf0]  ;;  %v55_v20 = vld [vmem:[%s6571_s0 + $0x30] sm:$0xff]  ;;  %v3318_v21 = vor.u32 %v4123_v11, %v3317_v10  ;;  %v54_v22 = vld [vmem:[%s6571_s0 + $0x28] sm:$0xff]  ;;  %v3130_v28 = vor.u32 %v4072_v13, %v3127_v14 }
  0x23   :  { %659 = vmatmul.bf16.vlgmr.msra.gmra.mxu0 %v4713_v44  ;;  %v53_v19 = vld [vmem:[%s6571_s0 + $0x20] sm:$0xff]  ;;  %v3101_v23 = vld [vmem:[%s6573_s2 + $0x98] sm:$0xf]  ;;  %v4069_v24 = vld [vmem:[%s6573_s2 + $0xac] sm:$0xf0]  ;;  %v3322_v32 = vor.u32 %v4120_v15, %v3319_v18 }
  0x24   :  { %727 = vmatpush.bf16.msrb.mxu0 %v3198_v40  ;;  %678 = vmatmul.bf16.vlgmr.msra.gmra.mxu1 %v4724_v49  ;;  %v56_v25 = vld [vmem:[%s6571_s0 + $0x38] sm:$0xff]  ;;  %v4117_v27 = vld [vmem:[%s6573_s2 + $0x22c] sm:$0xf0]  ;;  %v3103_v30 = vld [vmem:[%s6573_s2 + $0xb0] sm:$0xf0]  ;;  %v3102_v33 = vor.u32 %v4069_v24, %v3101_v23  ;;  %v4832_v35 = vpack.c.bf16 %v55_v20, %v53_v19 }
  0x25   :  { %746 = vmatpush.bf16.msrb.mxu1 %v3390_v45  ;;  %697 = vmatmul.bf16.vlgmr.msra.gmra.mxu2 %v4713_v44  ;;  %v3293_v26 = vld [vmem:[%s6573_s2 + $0x218] sm:$0xf]  ;;  %v4066_v29 = vld [vmem:[%s6573_s2 + $0x9c] sm:$0xf]  ;;  %v3295_v34 = vld [vmem:[%s6573_s2 + $0x230] sm:$0xf0] }
  0x26   :  { %716 = vmatmul.bf16.vlgmr.msra.gmra.mxu3 %v4724_v49  ;;  %765 = vmatpush.bf16.msrb.mxu2 %v3202_v52  ;;  %v4114_v31 = vld [vmem:[%s6573_s2 + $0x21c] sm:$0xf]  ;;  %v3294_v36 = vor.u32 %v4117_v27, %v3293_v26  ;;  %v3077_v37 = vld [vmem:[%s6573_s2 + $0x68] sm:$0xf]  ;;  %v4063_v38 = vld [vmem:[%s6573_s2 + $0x7c] sm:$0xf0] }
  0x27   :  { %784 = vmatpush.bf16.msrb.mxu3 %v3394_v53 }
  0x28   :  { %728 = vmatpush.bf16.msrb.mxu0 %v3174_v54 }
  0x29   :  { %747 = vmatpush.bf16.msrb.mxu1 %v3366_v58 }
  0x2a   :  { %766 = vmatpush.bf16.msrb.mxu2 %v3178_v0 }
  0x2b   :  { %785 = vmatpush.bf16.msrb.mxu3 %v3370_v1 }
  0x2c   :  { %729 = vmatpush.bf16.msrb.mxu0 %v3150_v2 }
  0x2d   :  { %748 = vmatpush.bf16.msrb.mxu1 %v3342_v6 }
  0x2e   :  { %767 = vmatpush.bf16.msrb.mxu2 %v3154_v12 }
  0x2f   :  { %786 = vmatpush.bf16.msrb.mxu3 %v3346_v16 }
  0x30   :  { %730 = vmatpush.bf16.msrb.mxu0 %v3126_v17 }
  0x31   :  { %749 = vmatpush.bf16.msrb.mxu1 %v3318_v21 }
  0x32   :  { %19 = vsyncpa [#allocation4], 0  ;;  %v4840_v39 = vpack.c.bf16 %v56_v25, %v54_v22  ;;  %v3269_v40 = vld [vmem:[%s6573_s2 + $0x1e8] sm:$0xf]  ;;  %v4111_v41 = vld [vmem:[%s6573_s2 + $0x1fc] sm:$0xf0]  ;;  %768 = vmatpush.bf16.msrb.mxu2 %v3130_v28  ;;  %v3106_v42 = vor.u32 %v4066_v29, %v3103_v30  ;;  %v3298_v43 = vor.u32 %v4114_v31, %v3295_v34  ;;  %v3078_v45 = vor.u32 %v4063_v38, %v3077_v37 }
  0x33   :  { %787 = vmatpush.bf16.msrb.mxu3 %v3322_v32  ;;  %v4060_v46 = vld [vmem:[%s6573_s2 + $0x6c] sm:$0xf]  ;;  %v3079_v47 = vld [vmem:[%s6573_s2 + $0x80] sm:$0xf0]  ;;  %664 = vmatmul.bf16.gmra.mxu0 %v4832_v35  ;;  %v3270_v50 = vor.u32 %v4111_v41, %v3269_v40  ;;  %v3053_v52 = vld [vmem:[%s6573_s2 + $0x38] sm:$0xf] }
  0x34   :  { %731 = vmatpush.bf16.msrb.mxu0 %v3102_v33  ;;  %v4108_v48 = vld [vmem:[%s6573_s2 + $0x1ec] sm:$0xf]  ;;  %v3271_v51 = vld [vmem:[%s6573_s2 + $0x200] sm:$0xf0]  ;;  %v4057_v53 = vld [vmem:[%s6573_s2 + $0x4c] sm:$0xf0]  ;;  %683 = vmatmul.bf16.gmra.mxu1 %v4840_v39  ;;  %v3082_v56 = vor.u32 %v4060_v46, %v3079_v47 }
  0x35   :  { %750 = vmatpush.bf16.msrb.mxu1 %v3294_v36  ;;  %702 = vmatmul.bf16.gmra.mxu2 %v4832_v35  ;;  %v3245_v54 = vld [vmem:[%s6573_s2 + $0x1b8] sm:$0xf]  ;;  %v4105_v55 = vld [vmem:[%s6573_s2 + $0x1cc] sm:$0xf0]  ;;  %v3274_v57 = vor.u32 %v4108_v48, %v3271_v51  ;;  %v3054_v58 = vor.u32 %v4057_v53, %v3053_v52  ;;  %v4054_v59 = vld [vmem:[%s6573_s2 + $0x3c] sm:$0xf] }
  0x36   :  { %721 = vmatmul.bf16.gmra.mxu3 %v4840_v39  ;;  %769 = vmatpush.bf16.msrb.mxu2 %v3106_v42  ;;  %v3055_v60 = vld [vmem:[%s6573_s2 + $0x50] sm:$0xf0]  ;;  %v4102_v61 = vld [vmem:[%s6573_s2 + $0x1bc] sm:$0xf]  ;;  %v3246_v62 = vor.u32 %v4105_v55, %v3245_v54  ;;  %v3029_v0 = vld [vmem:[%s6573_s2 + $0x8] sm:$0xf] }
  0x37   :  { %788 = vmatpush.bf16.msrb.mxu3 %v3298_v43  ;;  %v3247_v63 = vld [vmem:[%s6573_s2 + $0x1d0] sm:$0xf0]  ;;  %v4051_v1 = vld [vmem:[%s6573_s2 + $0x1c] sm:$0xf0]  ;;  %v3221_v2 = vld [vmem:[%s6573_s2 + $0x188] sm:$0xf]  ;;  %v3058_v4 = vor.u32 %v4054_v59, %v3055_v60 }
  0x38   :  { %732 = vmatpush.bf16.msrb.mxu0 %v3078_v45  ;;  %v4099_v3 = vld [vmem:[%s6573_s2 + $0x19c] sm:$0xf0]  ;;  %v3250_v5 = vor.u32 %v4102_v61, %v3247_v63  ;;  %v3030_v6 = vor.u32 %v4051_v1, %v3029_v0  ;;  %v4048_v7 = vld [vmem:[%s6573_s2 + $0xc] sm:$0xf]  ;;  %v3031_v8 = vld [vmem:[%s6573_s2 + $0x20] sm:$0xf0] }
  0x39   :  { %751 = vmatpush.bf16.msrb.mxu1 %v3270_v50  ;;  %v3222_v9 = vor.u32 %v4099_v3, %v3221_v2  ;;  %v4096_v10 = vld [vmem:[%s6573_s2 + $0x18c] sm:$0xf]  ;;  %v3223_v11 = vld [vmem:[%s6573_s2 + $0x1a0] sm:$0xf0]  ;;  %v3034_v12 = vor.u32 %v4048_v7, %v3031_v8  ;;  %v3207_v15 = vld [vmem:[%s6573_s2 + $0x178] sm:$0xf0] }
  0x3a   :  { %770 = vmatpush.bf16.msrb.mxu2 %v3082_v56  ;;  %v3226_v13 = vor.u32 %v4096_v10, %v3223_v11  ;;  %v4091_v14 = vld [vmem:[%s6573_s2 + $0x164] sm:$0xf]  ;;  %v3399_v18 = vld [vmem:[%s6573_s2 + $0x2f8] sm:$0xf0]  ;;  %v4085_v20 = vld [vmem:[%s6573_s2 + $0x134] sm:$0xf] }
  0x3b   :  { %789 = vmatpush.bf16.msrb.mxu3 %v3274_v57  ;;  %v3210_v16 = vor.u32 %v4091_v14, %v3207_v15  ;;  %v4139_v17 = vld [vmem:[%s6573_s2 + $0x2e4] sm:$0xf]  ;;  %v3183_v21 = vld [vmem:[%s6573_s2 + $0x148] sm:$0xf0]  ;;  %v3205_v23 = vld [vmem:[%s6573_s2 + $0x160] sm:$0xf] }
  0x3c   :  { %733 = vmatpush.bf16.msrb.mxu0 %v3054_v58  ;;  %v3402_v19 = vor.u32 %v4139_v17, %v3399_v18  ;;  %v3186_v22 = vor.u32 %v4085_v20, %v3183_v21  ;;  %v4094_v24 = vld [vmem:[%s6573_s2 + $0x174] sm:$0xf0]  ;;  %v4133_v25 = vld [vmem:[%s6573_s2 + $0x2b4] sm:$0xf]  ;;  %v3375_v27 = vld [vmem:[%s6573_s2 + $0x2c8] sm:$0xf0] }
  0x3d   :  { %752 = vmatpush.bf16.msrb.mxu1 %v3246_v62  ;;  %v3206_v26 = vor.u32 %v4094_v24, %v3205_v23  ;;  %v4079_v28 = vld [vmem:[%s6573_s2 + $0x104] sm:$0xf]  ;;  %v3159_v29 = vld [vmem:[%s6573_s2 + $0x118] sm:$0xf0]  ;;  %v3378_v30 = vor.u32 %v4133_v25, %v3375_v27  ;;  %v3397_v31 = vld [vmem:[%s6573_s2 + $0x2e0] sm:$0xf] }
  0x3e   :  { %771 = vmatpush.bf16.msrb.mxu2 %v3058_v4  ;;  %v3162_v32 = vor.u32 %v4079_v28, %v3159_v29  ;;  %v4142_v33 = vld [vmem:[%s6573_s2 + $0x2f4] sm:$0xf0]  ;;  %v3181_v34 = vld [vmem:[%s6573_s2 + $0x130] sm:$0xf]  ;;  %v4088_v36 = vld [vmem:[%s6573_s2 + $0x144] sm:$0xf0] }
  0x3f   :  { %790 = vmatpush.bf16.msrb.mxu3 %v3250_v5  ;;  %v3398_v37 = vor.u32 %v4142_v33, %v3397_v31  ;;  %v4127_v38 = vld [vmem:[%s6573_s2 + $0x284] sm:$0xf]  ;;  %v3182_v40 = vor.u32 %v4088_v36, %v3181_v34  ;;  %v3351_v41 = vld [vmem:[%s6573_s2 + $0x298] sm:$0xf0]  ;;  %v4073_v42 = vld [vmem:[%s6573_s2 + $0xd4] sm:$0xf] }
  0x40   :  { %734 = vmatpush.bf16.msrb.mxu0 %v3030_v6  ;;  %v3135_v43 = vld [vmem:[%s6573_s2 + $0xe8] sm:$0xf0]  ;;  %v3354_v45 = vor.u32 %v4127_v38, %v3351_v41  ;;  %v3373_v46 = vld [vmem:[%s6573_s2 + $0x2b0] sm:$0xf]  ;;  %v4136_v48 = vld [vmem:[%s6573_s2 + $0x2c4] sm:$0xf0] }
  0x41   :  { %753 = vmatpush.bf16.msrb.mxu1 %v3222_v9  ;;  %v3138_v47 = vor.u32 %v4073_v42, %v3135_v43  ;;  %v3157_v50 = vld [vmem:[%s6573_s2 + $0x100] sm:$0xf]  ;;  %v4082_v51 = vld [vmem:[%s6573_s2 + $0x114] sm:$0xf0]  ;;  %v3374_v52 = vor.u32 %v4136_v48, %v3373_v46  ;;  %v4121_v53 = vld [vmem:[%s6573_s2 + $0x254] sm:$0xf] }
  0x42   :  { %772 = vmatpush.bf16.msrb.mxu2 %v3034_v12  ;;  %v3158_v54 = vor.u32 %v4082_v51, %v3157_v50  ;;  %v3327_v55 = vld [vmem:[%s6573_s2 + $0x268] sm:$0xf0]  ;;  %v4067_v56 = vld [vmem:[%s6573_s2 + $0xa4] sm:$0xf]  ;;  %v3111_v57 = vld [vmem:[%s6573_s2 + $0xb8] sm:$0xf0] }
  0x43   :  { %791 = vmatpush.bf16.msrb.mxu3 %v3226_v13  ;;  %735 = vmatmul.bf16.vlgmr.msrb.gmra.mxu0 %v4713_v44  ;;  %v3330_v58 = vor.u32 %v4121_v53, %v3327_v55  ;;  %v3349_v59 = vld [vmem:[%s6573_s2 + $0x280] sm:$0xf]  ;;  %v3114_v60 = vor.u32 %v4067_v56, %v3111_v57  ;;  %v4130_v61 = vld [vmem:[%s6573_s2 + $0x294] sm:$0xf0]  ;;  %v3133_v62 = vld [vmem:[%s6573_s2 + $0xd0] sm:$0xf] }
  0x44   :  { %754 = vmatmul.bf16.vlgmr.msrb.gmra.mxu1 %v4724_v49  ;;  %803 = vmatpush.bf16.msra.mxu0 %v3206_v26  ;;  %v4076_v63 = vld [vmem:[%s6573_s2 + $0xe4] sm:$0xf0]  ;;  %v3350_v0 = vor.u32 %v4130_v61, %v3349_v59  ;;  %v4115_v1 = vld [vmem:[%s6573_s2 + $0x224] sm:$0xf]  ;;  %v3303_v3 = vld [vmem:[%s6573_s2 + $0x238] sm:$0xf0] }
  0x45   :  { %773 = vmatmul.bf16.vlgmr.msrb.gmra.mxu2 %v4713_v44  ;;  %822 = vmatpush.bf16.msra.mxu1 %v3398_v37  ;;  %v3134_v2 = vor.u32 %v4076_v63, %v3133_v62  ;;  %v4061_v4 = vld [vmem:[%s6573_s2 + $0x74] sm:$0xf]  ;;  %v3087_v5 = vld [vmem:[%s6573_s2 + $0x88] sm:$0xf0]  ;;  %v3306_v6 = vor.u32 %v4115_v1, %v3303_v3  ;;  %v3325_v7 = vld [vmem:[%s6573_s2 + $0x250] sm:$0xf] }
  0x46   :  { %792 = vmatmul.bf16.vlgmr.msrb.gmra.mxu3 %v4724_v49  ;;  %841 = vmatpush.bf16.msra.mxu2 %v3210_v16  ;;  %v3090_v8 = vor.u32 %v4061_v4, %v3087_v5  ;;  %v4124_v9 = vld [vmem:[%s6573_s2 + $0x264] sm:$0xf0]  ;;  %v3109_v10 = vld [vmem:[%s6573_s2 + $0xa0] sm:$0xf]  ;;  %v4070_v11 = vld [vmem:[%s6573_s2 + $0xb4] sm:$0xf0] }
  0x47   :  { %860 = vmatpush.bf16.msra.mxu3 %v3402_v19  ;;  %v3326_v12 = vor.u32 %v4124_v9, %v3325_v7  ;;  %v4109_v13 = vld [vmem:[%s6573_s2 + $0x1f4] sm:$0xf]  ;;  %v3110_v14 = vor.u32 %v4070_v11, %v3109_v10  ;;  %v3279_v15 = vld [vmem:[%s6573_s2 + $0x208] sm:$0xf0]  ;;  %v4055_v16 = vld [vmem:[%s6573_s2 + $0x44] sm:$0xf] }
  0x48   :  { %804 = vmatpush.bf16.msra.mxu0 %v3182_v40  ;;  %v3063_v17 = vld [vmem:[%s6573_s2 + $0x58] sm:$0xf0]  ;;  %v3282_v18 = vor.u32 %v4109_v13, %v3279_v15  ;;  %v3301_v19 = vld [vmem:[%s6573_s2 + $0x220] sm:$0xf]  ;;  %v4118_v21 = vld [vmem:[%s6573_s2 + $0x234] sm:$0xf0] }
  0x49   :  { %823 = vmatpush.bf16.msra.mxu1 %v3374_v52  ;;  %v3066_v20 = vor.u32 %v4055_v16, %v3063_v17  ;;  %v4064_v23 = vld [vmem:[%s6573_s2 + $0x84] sm:$0xf0]  ;;  %v3302_v24 = vor.u32 %v4118_v21, %v3301_v19  ;;  %v4103_v25 = vld [vmem:[%s6573_s2 + $0x1c4] sm:$0xf]  ;;  %v3255_v27 = vld [vmem:[%s6573_s2 + $0x1d8] sm:$0xf0] }
  0x4a   :  { %842 = vmatpush.bf16.msra.mxu2 %v3186_v22  ;;  %v3085_v22 = vld [vmem:[%s6573_s2 + $0x70] sm:$0xf]  ;;  %v4049_v28 = vld [vmem:[%s6573_s2 + $0x14] sm:$0xf]  ;;  %v3039_v29 = vld [vmem:[%s6573_s2 + $0x28] sm:$0xf0] }
  0x4b   :  { %861 = vmatpush.bf16.msra.mxu3 %v3378_v30  ;;  %v3086_v26 = vor.u32 %v4064_v23, %v3085_v22  ;;  %v3258_v30 = vor.u32 %v4103_v25, %v3255_v27  ;;  %v3277_v31 = vld [vmem:[%s6573_s2 + $0x1f0] sm:$0xf]  ;;  %v4112_v33 = vld [vmem:[%s6573_s2 + $0x204] sm:$0xf0]  ;;  %v3061_v34 = vld [vmem:[%s6573_s2 + $0x40] sm:$0xf] }
  0x4c   :  { %805 = vmatpush.bf16.msra.mxu0 %v3158_v54  ;;  %v4058_v36 = vld [vmem:[%s6573_s2 + $0x54] sm:$0xf0]  ;;  %v3278_v37 = vor.u32 %v4112_v33, %v3277_v31  ;;  %v4097_v38 = vld [vmem:[%s6573_s2 + $0x194] sm:$0xf]  ;;  %v3231_v41 = vld [vmem:[%s6573_s2 + $0x1a8] sm:$0xf0] }
  0x4d   :  { %824 = vmatpush.bf16.msra.mxu1 %v3350_v0  ;;  %v3062_v40 = vor.u32 %v4058_v36, %v3061_v34  ;;  %v3234_v42 = vor.u32 %v4097_v38, %v3231_v41  ;;  %v3253_v43 = vld [vmem:[%s6573_s2 + $0x1c0] sm:$0xf]  ;;  %v4052_v48 = vld [vmem:[%s6573_s2 + $0x24] sm:$0xf0]  ;;  %v3229_v51 = vld [vmem:[%s6573_s2 + $0x190] sm:$0xf] }
  0x4e   :  { %843 = vmatpush.bf16.msra.mxu2 %v3162_v32  ;;  %v3042_v32 = vor.u32 %v4049_v28, %v3039_v29  ;;  %v4100_v52 = vld [vmem:[%s6573_s2 + $0x1a4] sm:$0xf0]  ;;  %vm922_vm0 = vcmask 130048   ;;  %s3007_s17 = sshll.u32 %s6585_s14, 4  ;;  %s4411_s18 = smov 256   ;;  %s3008_s17 = int_to_ptr.hbm [resolvable:$true] %s3007_s17 }
  0x4f   :  { %862 = vmatpush.bf16.msra.mxu3 %v3354_v45  ;;  %v4106_v45 = vld [vmem:[%s6573_s2 + $0x1d4] sm:$0xf0]  ;;  %v3230_v53 = vor.u32 %v4100_v52, %v3229_v51  ;;  %s4412_s19 = smov 16  }
  0x50   :  { %806 = vmatpush.bf16.msra.mxu0 %v3134_v2  ;;  %v3254_v46 = vor.u32 %v4106_v45, %v3253_v43 }
  0x51   :  { %825 = vmatpush.bf16.msra.mxu1 %v3326_v12 }
  0x52   :  { %844 = vmatpush.bf16.msra.mxu2 %v3138_v47  ;;  %v3037_v47 = vld [vmem:[%s6573_s2 + $0x10] sm:$0xf] }
  0x53   :  { %740 = vmatmul.bf16.gmra.mxu0 %v4832_v35  ;;  %863 = vmatpush.bf16.msra.mxu3 %v3330_v58  ;;  %v3038_v50 = vor.u32 %v4052_v48, %v3037_v47 }
  0x54   :  { %759 = vmatmul.bf16.gmra.mxu1 %v4840_v39  ;;  %807 = vmatpush.bf16.msra.mxu0 %v3110_v14 }
  0x55   :  { %778 = vmatmul.bf16.gmra.mxu2 %v4832_v35  ;;  %826 = vmatpush.bf16.msra.mxu1 %v3302_v24 }
  0x56   :  { %797 = vmatmul.bf16.gmra.mxu3 %v4840_v39  ;;  %845 = vmatpush.bf16.msra.mxu2 %v3114_v60 }
  0x57   :  { %864 = vmatpush.bf16.msra.mxu3 %v3306_v6 }
  0x58   :  { %808 = vmatpush.bf16.msra.mxu0 %v3086_v26 }
  0x59   :  { %827 = vmatpush.bf16.msra.mxu1 %v3278_v37 }
  0x5a   :  { %846 = vmatpush.bf16.msra.mxu2 %v3090_v8 }
  0x5b   :  { %865 = vmatpush.bf16.msra.mxu3 %v3282_v18 }
  0x5c   :  { %809 = vmatpush.bf16.msra.mxu0 %v3062_v40 }
  0x5d   :  { %828 = vmatpush.bf16.msra.mxu1 %v3254_v46 }
  0x5e   :  { %847 = vmatpush.bf16.msra.mxu2 %v3066_v20 }
  0x5f   :  { %866 = vmatpush.bf16.msra.mxu3 %v3258_v30 }
  0x60   :  { %810 = vmatpush.bf16.msra.mxu0 %v3038_v50 }
  0x61   :  { %829 = vmatpush.bf16.msra.mxu1 %v3230_v53 }
  0x62   :  { %848 = vmatpush.bf16.msra.mxu2 %v3042_v32 }
  0x63   :  { %867 = vmatpush.bf16.msra.mxu3 %v3234_v42  ;;  %811 = vmatmul.bf16.vlgmr.msra.gmra.mxu0 %v4713_v44 }
  0x64   :  { %830 = vmatmul.bf16.vlgmr.msra.gmra.mxu1 %v4724_v49 }
  0x65   :  { %849 = vmatmul.bf16.vlgmr.msra.gmra.mxu2 %v4713_v44 }
  0x66   :  { %868 = vmatmul.bf16.vlgmr.msra.gmra.mxu3 %v4724_v49 }
  0x73   :  { %816 = vmatmul.bf16.gmra.mxu0 %v4832_v35 }
  0x74   :  { %835 = vmatmul.bf16.gmra.mxu1 %v4840_v39 }
  0x75   :  { %854 = vmatmul.bf16.gmra.mxu2 %v4832_v35  ;;  %v5137_v35 = vld [vmem:[%s6574_s3] sm:$0x3f] }
  0x76   :  { %873 = vmatmul.bf16.gmra.mxu3 %v4840_v39  ;;  %v161_v39 = vperm.slane %v5137_v35, 2  ;;  %v162_v6 = vperm.slane %v5137_v35, 3  ;;  %v159_v12 = vperm.slane %v5137_v35, 0  ;;  %v160_v13 = vperm.slane %v5137_v35, 1 }
  0xa0   :  { %v660_v54 = vpop.f32.mrf.mxu0 }
  0xa1   :  { %v679_v55 = vpop.f32.mrf.mxu1  ;;  %v661_v22 = vadd.f32 %v660_v54, %v159_v12 }
  0xa3   :  { %v680_v31 = vadd.f32 %v679_v55, %v661_v22 }
  0xa8   :  { %v698_v56 = vpop.f32.mrf.mxu2  ;;  %v662_v58 = vpop.f32.mrf.mxu0 }
  0xa9   :  { %v717_v57 = vpop.f32.mrf.mxu3  ;;  %v681_v59 = vpop.f32.mrf.mxu1  ;;  %v699_v23 = vadd.f32 %v698_v56, %v160_v13  ;;  %v663_v24 = vadd.f32 %v662_v58, %v159_v12 }
  0xab   :  { %v718_v32 = vadd.f32 %v717_v57, %v699_v23  ;;  %v682_v33 = vadd.f32 %v681_v59, %v663_v24 }
  0xad   :  { %v879_v47 = vpack.c.bf16 %v718_v32, %v680_v31 }
  0xaf   :  { %v898_v54 = vunpack.c.l.b16 %v879_v47  ;;  %v971_v55 = vunpack.c.h.b16 %v879_v47 }
  0xb0   :  { %v700_v60 = vpop.f32.mrf.mxu2  ;;  %v5118_v62 = vpop.f32.mrf.mxu0 }
  0xb1   :  { %v719_v61 = vpop.f32.mrf.mxu3  ;;  %v5121_v63 = vpop.f32.mrf.mxu1  ;;  %v701_v18 = vadd.f32 %v700_v60, %v160_v13 }
  0xb3   :  { %v720_v29 = vadd.f32 %v719_v61, %v701_v18 }
  0xb5   :  { %v882_v40 = vpack.c.bf16 %v720_v29, %v682_v33 }
  0xb7   :  { %v899_v51 = vunpack.c.l.b16 %v882_v40  ;;  %v972_v52 = vunpack.c.h.b16 %v882_v40 }
  0xb8   :  { %v5124_v44 = vpop.f32.mrf.mxu2  ;;  %v5128_v0 = vpop.f32.mrf.mxu0 }
  0xb9   :  { %v5126_v49 = vpop.f32.mrf.mxu3  ;;  %v5130_v1 = vpop.f32.mrf.mxu1  ;;  %v900_v61 = vpack.c.b16 %v899_v51, %v898_v54 }
  0xc0   :  { %v705_v2 = vpop.f32.mrf.mxu2  ;;  %v736_v4 = vpop.f32.mrf.mxu0 }
  0xc1   :  { %v5132_v3 = vpop.f32.mrf.mxu3  ;;  %v755_v5 = vpop.f32.mrf.mxu1  ;;  %v737_v10 = vadd.f32 %v736_v4, %v161_v39  ;;  %v706_v59 = vadd.f32 %v705_v2, %v160_v13  ;;  %v973_v4 = vpack.c.b16 %v972_v52, %v971_v55 }
  0xc3   :  { %v756_v15 = vadd.f32 %v755_v5, %v737_v10 }
  0xc8   :  { %v774_v7 = vpop.f32.mrf.mxu2  ;;  %v738_v9 = vpop.f32.mrf.mxu0 }
  0xc9   :  { %v793_v8 = vpop.f32.mrf.mxu3  ;;  %v775_v11 = vadd.f32 %v774_v7, %v162_v6  ;;  %v757_v14 = vpop.f32.mrf.mxu1  ;;  %v739_v17 = vadd.f32 %v738_v9, %v161_v39  ;;  %v666_v7 = vadd.f32 %v5118_v62, %v159_v12  ;;  %v668_v9 = vadd.f32 %v5128_v0, %v159_v12 }
  0xcb   :  { %v794_v16 = vadd.f32 %v793_v8, %v775_v11  ;;  %v758_v27 = vadd.f32 %v757_v14, %v739_v17  ;;  %v704_v8 = vadd.f32 %v5124_v44, %v160_v13  ;;  %v685_v17 = vadd.f32 %v5121_v63, %v666_v7 }
  0xcc   :  { %v687_v62 = vadd.f32 %v5130_v1, %v668_v9  ;;  %v164_v1 = vperm.slane %v5137_v35, 5 }
  0xcd   :  { %v880_v26 = vpack.c.bf16 %v794_v16, %v756_v15 }
  0xcf   :  { %v904_v34 = vunpack.c.l.b16 %v880_v26  ;;  %v975_v36 = vunpack.c.h.b16 %v880_v26 }
  0xd0   :  { %v776_v19 = vpop.f32.mrf.mxu2  ;;  %v741_v25 = vpop.f32.mrf.mxu0 }
  0xd1   :  { %v777_v20 = vadd.f32 %v776_v19, %v162_v6  ;;  %v795_v21 = vpop.f32.mrf.mxu3  ;;  %v760_v42 = vpop.f32.mrf.mxu1  ;;  %v742_v48 = vadd.f32 %v741_v25, %v161_v39 }
  0xd3   :  { %v796_v28 = vadd.f32 %v795_v21, %v777_v20  ;;  %v761_v56 = vadd.f32 %v760_v42, %v742_v48 }
  0xd5   :  { %v883_v30 = vpack.c.bf16 %v796_v28, %v758_v27 }
  0xd7   :  { %v905_v37 = vunpack.c.l.b16 %v883_v30  ;;  %v976_v38 = vunpack.c.h.b16 %v883_v30 }
  0xd8   :  { %v779_v41 = vpop.f32.mrf.mxu2  ;;  %v743_v53 = vpop.f32.mrf.mxu0 }
  0xd9   :  { %v798_v43 = vpop.f32.mrf.mxu3  ;;  %v906_v45 = vpack.c.b16 %v905_v37, %v904_v34  ;;  %v977_v46 = vpack.c.b16 %v976_v38, %v975_v36  ;;  %v780_v50 = vadd.f32 %v779_v41, %v162_v6  ;;  %v744_v58 = vadd.f32 %v743_v53, %v161_v39  ;;  %v762_v10 = vpop.f32.mrf.mxu1 }
  0xda   :  { %v725_v39 = vadd.f32 %v5132_v3, %v706_v59 }
  0xdb   :  { %915 = vmatpush.bf16.xpose.msrb.mxu0 %v906_v45  ;;  %986 = vmatpush.bf16.xpose.msrb.mxu2 %v977_v46  ;;  %v799_v57 = vadd.f32 %v798_v43, %v780_v50  ;;  %v763_v15 = vadd.f32 %v762_v10, %v744_v58 }
  0xdc   :  { %v888_v12 = vpack.c.bf16 %v725_v39, %v687_v62 }
  0xdd   :  { %v886_v14 = vpack.c.bf16 %v799_v57, %v761_v56 }
  0xde   :  { %v1045_v22 = vunpack.c.l.b16 %v888_v12  ;;  %v1117_v23 = vunpack.c.h.b16 %v888_v12 }
  0xdf   :  { %v1050_v18 = vunpack.c.l.b16 %v886_v14  ;;  %v1120_v44 = vunpack.c.h.b16 %v886_v14 }
  0xe0   :  { %v781_v60 = vpop.f32.mrf.mxu2  ;;  %v812_v26 = vpop.f32.mrf.mxu0 }
  0xe1   :  { %v782_v5 = vadd.f32 %v781_v60, %v162_v6  ;;  %v800_v11 = vpop.f32.mrf.mxu3  ;;  %v723_v6 = vadd.f32 %v5126_v49, %v704_v8  ;;  %v163_v49 = vperm.slane %v5137_v35, 4  ;;  %v831_v30 = vpop.f32.mrf.mxu1 }
  0xe2   :  { %916 = vmatmul.bf16.vlgmr.msrb.gmra.mxu0 %v900_v61  ;;  %987 = vmatmul.bf16.vlgmr.msrb.gmra.mxu2 %v973_v4 }
  0xe3   :  { %v801_v16 = vadd.f32 %v800_v11, %v782_v5  ;;  %v885_v21 = vpack.c.bf16 %v723_v6, %v685_v17  ;;  %v813_v28 = vadd.f32 %v812_v26, %v163_v49 }
  0xe5   :  { %v889_v2 = vpack.c.bf16 %v801_v16, %v763_v15  ;;  %v1044_v3 = vunpack.c.l.b16 %v885_v21  ;;  %v1116_v24 = vunpack.c.h.b16 %v885_v21  ;;  %v832_v32 = vadd.f32 %v831_v30, %v813_v28 }
  0xe7   :  { %v1051_v13 = vunpack.c.l.b16 %v889_v2  ;;  %v1121_v0 = vunpack.c.h.b16 %v889_v2  ;;  %v1046_v25 = vpack.c.b16 %v1045_v22, %v1044_v3  ;;  %v1118_v63 = vpack.c.b16 %v1117_v23, %v1116_v24 }
  0xe8   :  { %v850_v27 = vpop.f32.mrf.mxu2  ;;  %v814_v34 = vpop.f32.mrf.mxu0 }
  0xe9   :  { %v1052_v19 = vpack.c.b16 %v1051_v13, %v1050_v18  ;;  %v1122_v20 = vpack.c.b16 %v1121_v0, %v1120_v44  ;;  %v851_v29 = vadd.f32 %v850_v27, %v164_v1  ;;  %v869_v31 = vpop.f32.mrf.mxu3  ;;  %v815_v37 = vadd.f32 %v814_v34, %v163_v49  ;;  %v833_v41 = vpop.f32.mrf.mxu1  ;;  %v4307_v18 = vld [vmem:[%s6572_s1] ss:$0 sm:$0xff] }
  0xeb   :  { %1061 = vmatpush.bf16.xpose.msra.mxu0 %v1052_v19  ;;  %1131 = vmatpush.bf16.xpose.msra.mxu2 %v1122_v20  ;;  %v870_v33 = vadd.f32 %v869_v31, %v851_v29  ;;  %v834_v43 = vadd.f32 %v833_v41, %v815_v37 }
  0xed   :  { %v881_v40 = vpack.c.bf16 %v870_v33, %v832_v32 }
  0xef   :  { %v944_v46 = vunpack.c.l.b16 %v881_v40  ;;  %v1012_v47 = vunpack.c.h.b16 %v881_v40 }
  0xf0   :  { %v852_v36 = vpop.f32.mrf.mxu2  ;;  %v817_v48 = vpop.f32.mrf.mxu0 }
  0xf1   :  { %v853_v38 = vadd.f32 %v852_v36, %v164_v1  ;;  %v871_v42 = vpop.f32.mrf.mxu3  ;;  %v836_v55 = vpop.f32.mrf.mxu1  ;;  %v818_v57 = vadd.f32 %v817_v48, %v163_v49 }
  0xf2   :  { %1062 = vmatmul.bf16.vlgmr.msra.gmra.mxu0 %v1046_v25  ;;  %1132 = vmatmul.bf16.vlgmr.msra.gmra.mxu2 %v1118_v63  ;;  %v4308_v63 = vld [vmem:[%s6572_s1 + $0x1] ss:$0 sm:$0xff] }
  0xf3   :  { %v872_v45 = vadd.f32 %v871_v42, %v853_v38  ;;  %v837_v5 = vadd.f32 %v836_v55, %v818_v57 }
  0xf5   :  { %v884_v35 = vpack.c.bf16 %v872_v45, %v834_v43 }
  0xf7   :  { %v945_v51 = vunpack.c.l.b16 %v884_v35  ;;  %v1013_v52 = vunpack.c.h.b16 %v884_v35 }
  0xf8   :  { %v855_v50 = vpop.f32.mrf.mxu2  ;;  %v819_v59 = vpop.f32.mrf.mxu0 }
  0xf9   :  { %v946_v53 = vpack.c.b16 %v945_v51, %v944_v46  ;;  %v1014_v54 = vpack.c.b16 %v1013_v52, %v1012_v47  ;;  %v874_v56 = vpop.f32.mrf.mxu3  ;;  %v856_v58 = vadd.f32 %v855_v50, %v164_v1  ;;  %v820_v61 = vadd.f32 %v819_v59, %v163_v49  ;;  %v838_v8 = vpop.f32.mrf.mxu1 }
  0xfb   :  { %958 = vmatpush.bf16.msrb.mxu1 %v946_v53  ;;  %1026 = vmatpush.bf16.msrb.mxu3 %v1014_v54  ;;  %v875_v7 = vadd.f32 %v874_v56, %v856_v58  ;;  %v839_v10 = vadd.f32 %v838_v8, %v820_v61 }
  0xfd   :  { %v887_v14 = vpack.c.bf16 %v875_v7, %v837_v5 }
  0xff   :  { %v1089_v16 = vunpack.c.l.b16 %v887_v14  ;;  %v1157_v39 = vunpack.c.h.b16 %v887_v14 }
 0x100   :  { %v857_v60 = vpop.f32.mrf.mxu2 }
 0x101   :  { %v858_v4 = vadd.f32 %v857_v60, %v164_v1  ;;  %v876_v9 = vpop.f32.mrf.mxu3 }
 0x103   :  { %v877_v11 = vadd.f32 %v876_v9, %v858_v4 }
 0x105   :  { %v890_v15 = vpack.c.bf16 %v877_v11, %v839_v10 }
 0x107   :  { %v1090_v2 = vunpack.c.l.b16 %v890_v15  ;;  %v1158_v17 = vunpack.c.h.b16 %v890_v15 }
 0x109   :  { %v1091_v6 = vpack.c.b16 %v1090_v2, %v1089_v16  ;;  %v1159_v62 = vpack.c.b16 %v1158_v17, %v1157_v39 }
 0x10b   :  { %1103 = vmatpush.bf16.msra.mxu1 %v1091_v6  ;;  %1171 = vmatpush.bf16.msra.mxu3 %v1159_v62 }
 0x15f   :  { %v917_v44 = vpop.f32.mrf.mxu0 }
 0x160   :  { %v918_v13 = vadd.f32 %v4307_v18, %v917_v44 }
 0x162   :  { %v923_v0 = vsel %vm922_vm0, %v918_v13, -inf }
 0x163   :  { %924 = vmax.xlane.f32.xlu1 %v923_v0 }
 0x165   :  { %v988_v12 = vpop.f32.mrf.mxu2 }
 0x166   :  { %v989_v19 = vadd.f32 %v4307_v18, %v988_v12 }
 0x167   :  { %v919_v20 = vpop.f32.mrf.mxu0 }
 0x168   :  { %v920_v21 = vadd.f32 %v4307_v18, %v919_v20  ;;  %v993_v22 = vsel %vm922_vm0, %v989_v19, -inf  ;;  %v3465_v20 = vld [vmem:[%s6575_s4 + $0x70] sm:$0xf] }
 0x169   :  { %994 = vmax.xlane.f32.xlu0 %v993_v22  ;;  %v4157_v22 = vld [vmem:[%s6575_s4 + $0x74] sm:$0xf] }
 0x16a   :  { %v926_v23 = vsel %vm922_vm0, %v920_v21, -inf }
 0x16b   :  { %927 = vmax.xlane.f32.xlu1 %v926_v23 }
 0x16d   :  { %v990_v3 = vpop.f32.mrf.mxu2 }
 0x16e   :  { %v991_v24 = vadd.f32 %v4307_v18, %v990_v3  ;;  %v3467_v3 = vld [vmem:[%s6575_s4 + $0x78] sm:$0xf0] }
 0x16f   :  { %v1063_v25 = vpop.f32.mrf.mxu0 }
 0x170   :  { %v996_v49 = vsel %vm922_vm0, %v991_v24, -inf  ;;  %v1064_v1 = vadd.f32 %v4308_v63, %v1063_v25  ;;  %v3457_v25 = vld [vmem:[%s6575_s4 + $0x60] sm:$0xf] }
 0x171   :  { %997 = vmax.xlane.f32.xlu0 %v996_v49  ;;  %v4155_v49 = vld [vmem:[%s6575_s4 + $0x64] sm:$0xf] }
 0x172   :  { %v1068_v31 = vsel %vm922_vm0, %v1064_v1, -inf }
 0x175   :  { %v1133_v26 = vpop.f32.mrf.mxu2 }
 0x176   :  { %v1134_v27 = vadd.f32 %v4308_v63, %v1133_v26  ;;  %v3459_v26 = vld [vmem:[%s6575_s4 + $0x68] sm:$0xf0] }
 0x177   :  { %v1065_v28 = vpop.f32.mrf.mxu0 }
 0x178   :  { %v1066_v29 = vadd.f32 %v4308_v63, %v1065_v28  ;;  %v1138_v30 = vsel %vm922_vm0, %v1134_v27, -inf  ;;  %v3449_v28 = vld [vmem:[%s6575_s4 + $0x50] sm:$0xf] }
 0x179   :  { %1139 = vmax.xlane.f32.xlu2 %v1138_v30  ;;  %1069 = vmax.xlane.f32.xlu0 %v1068_v31  ;;  %v4153_v30 = vld [vmem:[%s6575_s4 + $0x54] sm:$0xf] }
 0x17a   :  { %v1071_v32 = vsel %vm922_vm0, %v1066_v29, -inf }
 0x17b   :  { %1072 = vmax.xlane.f32.xlu1 %v1071_v32  ;;  %v3451_v32 = vld [vmem:[%s6575_s4 + $0x58] sm:$0xf0] }
 0x17d   :  { %v1135_v33 = vpop.f32.mrf.mxu2 }
 0x17e   :  { %v1136_v34 = vadd.f32 %v4308_v63, %v1135_v33  ;;  %v4156_v63 = vld [vmem:[%s6575_s4 + $0x64] sm:$0xf0]  ;;  %v3454_v33 = vor.u32 %v4153_v30, %v3451_v32  ;;  %v3489_v30 = vld [vmem:[%s6575_s4 + $0xa0] sm:$0xf]  ;;  %v4163_v32 = vld [vmem:[%s6575_s4 + $0xa4] sm:$0xf] }
 0x180   :  { %v1141_v36 = vsel %vm922_vm0, %v1136_v34, -inf }
 0x181   :  { %1142 = vmax.xlane.f32.xlu2 %v1141_v36  ;;  %v4152_v36 = vld [vmem:[%s6575_s4 + $0x44] sm:$0xf0] }
 0x1d6   :  { %v925_v37 = vpop.xlane.xlu1 %924 }
 0x1d7   :  { %v929_v38 = vsub.f32 %v918_v13, %v925_v37  ;;  %v3529_v37 = vld [vmem:[%s6575_s4 + $0xf0] sm:$0xf] }
 0x1d9   :  { %v931_v40 = vmul.f32 1.442695, %v929_v38 }
 0x1db   :  { %4309 = vpow2.f32 %v931_v40  ;;  %v4174_v40 = vld [vmem:[%s6575_s4 + $0xf4] sm:$0xf0] }
 0x1dc   :  { %v995_v41 = vpop.xlane.xlu0 %994 }
 0x1dd   :  { %v999_v42 = vsub.f32 %v989_v19, %v995_v41  ;;  %v4151_v41 = vld [vmem:[%s6575_s4 + $0x44] sm:$0xf] }
 0x1de   :  { %v928_v43 = vpop.xlane.xlu1 %927 }
 0x1df   :  { %v1001_v45 = vmul.f32 1.442695, %v999_v42  ;;  %v930_v46 = vsub.f32 %v920_v21, %v928_v43  ;;  %v4158_v21 = vld [vmem:[%s6575_s4 + $0x74] sm:$0xf0]  ;;  %v3443_v42 = vld [vmem:[%s6575_s4 + $0x48] sm:$0xf0]  ;;  %v3530_v43 = vor.u32 %v4174_v40, %v3529_v37 }
 0x1e0   :  { %v3466_v23 = vor.u32 %v4158_v21, %v3465_v20  ;;  %v3507_v20 = vld [vmem:[%s6575_s4 + $0xc8] sm:$0xf0]  ;;  %v3481_v37 = vld [vmem:[%s6575_s4 + $0x90] sm:$0xf]  ;;  %v4161_v40 = vld [vmem:[%s6575_s4 + $0x94] sm:$0xf] }
 0x1e1   :  { %v4310_v47 = vpop.eup %4309  ;;  %4311 = vpow2.f32 %v1001_v45  ;;  %v933_v35 = vmul.f32 1.442695, %v930_v46  ;;  %v3446_v45 = vor.u32 %v4151_v41, %v3443_v42  ;;  %v4173_v46 = vld [vmem:[%s6575_s4 + $0xf4] sm:$0xf]  ;;  %v3483_v42 = vld [vmem:[%s6575_s4 + $0x98] sm:$0xf0] }
 0x1e2   :  { %v935_v48 = vsel %vm922_vm0, %v4310_v47, 0.0  ;;  %1394 = vmatpush.bf16.msrb.mxu0 %v3466_v23  ;;  %v4144_v23 = vld [vmem:[%s6575_s4 + $0x4] sm:$0xf0] }
 0x1e3   :  { %4313 = vpow2.f32 %v933_v35  ;;  %936 = vadd.xlane.f32.xlu2 %v935_v48  ;;  %v3433_v48 = vld [vmem:[%s6575_s4 + $0x30] sm:$0xf] }
 0x1e4   :  { %v998_v50 = vpop.xlane.xlu0 %997 }
 0x1e5   :  { %v1000_v51 = vsub.f32 %v991_v24, %v998_v50  ;;  %v3470_v24 = vor.u32 %v4157_v22, %v3467_v3  ;;  %v4150_v50 = vld [vmem:[%s6575_s4 + $0x34] sm:$0xf0]  ;;  %v3409_v22 = vld [vmem:[%s6575_s4] sm:$0xf]  ;;  %v3497_v3 = vld [vmem:[%s6575_s4 + $0xb0] sm:$0xf] }
 0x1e7   :  { %v4312_v52 = vpop.eup %4311  ;;  %v1003_v53 = vmul.f32 1.442695, %v1000_v51  ;;  %1432 = vmatpush.bf16.msrb.mxu2 %v3470_v24  ;;  %v3521_v51 = vld [vmem:[%s6575_s4 + $0xe0] sm:$0xf]  ;;  %v3410_v24 = vor.u32 %v4144_v23, %v3409_v22 }
 0x1e8   :  { %v1005_v54 = vsel %vm922_vm0, %v4312_v52, 0.0 }
 0x1e9   :  { %v4314_v55 = vpop.eup %4313  ;;  %4315 = vpow2.f32 %v1003_v53  ;;  %1006 = vadd.xlane.f32.xlu1 %v1005_v54  ;;  %v4172_v53 = vld [vmem:[%s6575_s4 + $0xe4] sm:$0xf0]  ;;  %v4149_v54 = vld [vmem:[%s6575_s4 + $0x34] sm:$0xf] }
 0x1ea   :  { %v941_v56 = vpack.c.bf16 %v4314_v55, %v4310_v47  ;;  %v938_v57 = vsel %vm922_vm0, %v4314_v55, 0.0  ;;  %v3531_v47 = vld [vmem:[%s6575_s4 + $0xf8] sm:$0xf0] }
 0x1eb   :  { %939 = vadd.xlane.f32.xlu0 %v938_v57  ;;  %v3534_v35 = vor.u32 %v4173_v46, %v3531_v47  ;;  %v3435_v55 = vld [vmem:[%s6575_s4 + $0x38] sm:$0xf0]  ;;  %v4160_v46 = vld [vmem:[%s6575_s4 + $0x84] sm:$0xf0]  ;;  %v4159_v47 = vld [vmem:[%s6575_s4 + $0x84] sm:$0xf] }
 0x1ec   :  { %v1140_v58 = vpop.xlane.xlu2 %1139  ;;  %v1070_v59 = vpop.xlane.xlu0 %1069  ;;  %3403 = vmatmul.msk.bf16.vlgmr.msrb.gmra.mxu1 %vm922_vm0, %v941_v56  ;;  %v3522_v56 = vor.u32 %v4172_v53, %v3521_v51  ;;  %v3438_v57 = vor.u32 %v4149_v54, %v3435_v55 }
 0x1ed   :  { %v1144_v60 = vsub.f32 %v1134_v27, %v1140_v58  ;;  %v1074_v61 = vsub.f32 %v1064_v1, %v1070_v59  ;;  %v3458_v1 = vor.u32 %v4156_v63, %v3457_v25  ;;  %v3462_v27 = vor.u32 %v4155_v49, %v3459_v26  ;;  %1413 = vmatpush.bf16.msrb.mxu1 %v3530_v43  ;;  %v4171_v58 = vld [vmem:[%s6575_s4 + $0xe4] sm:$0xf]  ;;  %v3523_v59 = vld [vmem:[%s6575_s4 + $0xe8] sm:$0xf0]  ;;  %v4166_v25 = vld [vmem:[%s6575_s4 + $0xb4] sm:$0xf0] }
 0x1ee   :  { %v1073_v4 = vpop.xlane.xlu1 %1072  ;;  %v4143_v63 = vld [vmem:[%s6575_s4 + $0x4] sm:$0xf]  ;;  %v3411_v49 = vld [vmem:[%s6575_s4 + $0x8] sm:$0xf0]  ;;  %v3486_v43 = vor.u32 %v4161_v40, %v3483_v42 }
 0x1ef   :  { %v4316_v5 = vpop.eup %4315  ;;  %v1146_v7 = vmul.f32 1.442695, %v1144_v60  ;;  %v1076_v8 = vmul.f32 1.442695, %v1074_v61  ;;  %v1075_v9 = vsub.f32 %v1066_v29, %v1073_v4  ;;  %1395 = vmatpush.bf16.msrb.mxu0 %v3458_v1  ;;  %1433 = vmatpush.bf16.msrb.mxu2 %v3462_v27  ;;  %v4154_v29 = vld [vmem:[%s6575_s4 + $0x54] sm:$0xf0]  ;;  %v3526_v60 = vor.u32 %v4171_v58, %v3523_v59 }
 0x1f0   :  { %v1011_v10 = vpack.c.bf16 %v4316_v5, %v4312_v52  ;;  %v1008_v11 = vsel %vm922_vm0, %v4316_v5, 0.0  ;;  %v3450_v31 = vor.u32 %v4154_v29, %v3449_v28  ;;  %v3434_v52 = vor.u32 %v4150_v50, %v3433_v48  ;;  %v3425_v61 = vld [vmem:[%s6575_s4 + $0x20] sm:$0xf]  ;;  %v4148_v4 = vld [vmem:[%s6575_s4 + $0x24] sm:$0xf0] }
 0x1f1   :  { %4317 = vpow2.f32 %v1146_v7  ;;  %v1078_v14 = vmul.f32 1.442695, %v1075_v9  ;;  %1009 = vadd.xlane.f32.xlu2 %v1008_v11  ;;  %1414 = vmatpush.bf16.msrb.mxu1 %v3522_v56  ;;  %v3513_v5 = vld [vmem:[%s6575_s4 + $0xd0] sm:$0xf]  ;;  %v3426_v7 = vor.u32 %v4148_v4, %v3425_v61  ;;  %v4147_v9 = vld [vmem:[%s6575_s4 + $0x24] sm:$0xf]  ;;  %v3498_v1 = vor.u32 %v4166_v25, %v3497_v3 }
 0x1f2   :  { %4319 = vpow2.f32 %v1076_v8  ;;  %3404 = vmatmul.msk.bf16.vlgmr.msrb.gmra.mxu3 %vm922_vm0, %v1011_v10  ;;  %v4170_v8 = vld [vmem:[%s6575_s4 + $0xd4] sm:$0xf0]  ;;  %v3427_v10 = vld [vmem:[%s6575_s4 + $0x28] sm:$0xf0]  ;;  %v3414_v26 = vor.u32 %v4143_v63, %v3411_v49  ;;  %v4165_v27 = vld [vmem:[%s6575_s4 + $0xb4] sm:$0xf] }
 0x1f3   :  { %4321 = vpow2.f32 %v1078_v14  ;;  %1396 = vmatpush.bf16.msrb.mxu0 %v3450_v31  ;;  %1434 = vmatpush.bf16.msrb.mxu2 %v3454_v33  ;;  %v3514_v11 = vor.u32 %v4170_v8, %v3513_v5  ;;  %v3430_v14 = vor.u32 %v4147_v9, %v3427_v10  ;;  %v3499_v28 = vld [vmem:[%s6575_s4 + $0xb8] sm:$0xf0]  ;;  %v4164_v31 = vld [vmem:[%s6575_s4 + $0xa4] sm:$0xf0]  ;;  %v3475_v48 = vld [vmem:[%s6575_s4 + $0x88] sm:$0xf0] }
 0x1f4   :  { %v1143_v15 = vpop.xlane.xlu2 %1142  ;;  %1451 = vmatpush.bf16.msrb.mxu3 %v3534_v35  ;;  %v3502_v29 = vor.u32 %v4165_v27, %v3499_v28  ;;  %v3490_v33 = vor.u32 %v4164_v31, %v3489_v30  ;;  %v3478_v50 = vor.u32 %v4159_v47, %v3475_v48 }
 0x1f5   :  { %v1145_v16 = vsub.f32 %v1136_v34, %v1143_v15  ;;  %v3441_v34 = vld [vmem:[%s6575_s4 + $0x40] sm:$0xf]  ;;  %v4169_v15 = vld [vmem:[%s6575_s4 + $0xd4] sm:$0xf]  ;;  %1415 = vmatpush.bf16.msrb.mxu1 %v3514_v11 }
 0x1f6   :  { %v3442_v38 = vor.u32 %v4152_v36, %v3441_v34  ;;  %v3491_v34 = vld [vmem:[%s6575_s4 + $0xa8] sm:$0xf0] }
 0x1f7   :  { %v4318_v39 = vpop.eup %4317  ;;  %v1148_v2 = vmul.f32 1.442695, %v1145_v16  ;;  %1435 = vmatpush.bf16.msrb.mxu2 %v3446_v45  ;;  %v3515_v16 = vld [vmem:[%s6575_s4 + $0xd8] sm:$0xf0]  ;;  %v3494_v36 = vor.u32 %v4163_v32, %v3491_v34  ;;  %v3473_v45 = vld [vmem:[%s6575_s4 + $0x80] sm:$0xf] }
 0x1f8   :  { %v4320_v17 = vpop.eup %4319  ;;  %v1150_v6 = vsel %vm922_vm0, %v4318_v39, 0.0  ;;  %1397 = vmatpush.bf16.msrb.mxu0 %v3442_v38  ;;  %1452 = vmatpush.bf16.msrb.mxu3 %v3526_v60  ;;  %v4162_v38 = vld [vmem:[%s6575_s4 + $0x94] sm:$0xf0]  ;;  %v3474_v35 = vor.u32 %v4160_v46, %v3473_v45  ;;  %v4375_v34 = vld [vmem:[%s6571_s0] sm:$0xff] }
 0x1f9   :  { %v4322_v62 = vpop.eup %4321  ;;  %4323 = vpow2.f32 %v1148_v2  ;;  %1151 = vadd.xlane.f32.xlu2 %v1150_v6  ;;  %v1080_v18 = vsel %vm922_vm0, %v4320_v17, 0.0  ;;  %v3417_v2 = vld [vmem:[%s6575_s4 + $0x10] sm:$0xf]  ;;  %v3505_v6 = vld [vmem:[%s6575_s4 + $0xc0] sm:$0xf]  ;;  %v3482_v41 = vor.u32 %v4162_v38, %v3481_v37  ;;  %v4376_v37 = vld [vmem:[%s6571_s0 + $0x8] sm:$0xff] }
 0x1fa   :  { %v1086_v44 = vpack.c.bf16 %v4322_v62, %v4320_v17  ;;  %1081 = vadd.xlane.f32.xlu0 %v1080_v18  ;;  %v1083_v13 = vsel %vm922_vm0, %v4322_v62, 0.0  ;;  %v4146_v17 = vld [vmem:[%s6575_s4 + $0x14] sm:$0xf0]  ;;  %v4168_v18 = vld [vmem:[%s6575_s4 + $0xc4] sm:$0xf0] }
 0x1fb   :  { %1084 = vadd.xlane.f32.xlu1 %v1083_v13  ;;  %1436 = vmatpush.bf16.msrb.mxu2 %v3438_v57  ;;  %v3418_v62 = vor.u32 %v4146_v17, %v3417_v2  ;;  %v3419_v13 = vld [vmem:[%s6575_s4 + $0x18] sm:$0xf0] }
 0x1fc   :  { %3405 = vmatmul.msk.bf16.vlgmr.msra.gmra.mxu1 %vm922_vm0, %v1086_v44  ;;  %1398 = vmatpush.bf16.msrb.mxu0 %v3434_v52  ;;  %v4145_v44 = vld [vmem:[%s6575_s4 + $0x14] sm:$0xf] }
 0x1ff   :  { %v4324_v0 = vpop.eup %4323  ;;  %1437 = vmatpush.bf16.msrb.mxu2 %v3430_v14 }
 0x200   :  { %v1156_v12 = vpack.c.bf16 %v4324_v0, %v4318_v39  ;;  %v1153_v19 = vsel %vm922_vm0, %v4324_v0, 0.0  ;;  %1399 = vmatpush.bf16.msrb.mxu0 %v3426_v7  ;;  %v3518_v39 = vor.u32 %v4169_v15, %v3515_v16  ;;  %v3506_v0 = vor.u32 %v4168_v18, %v3505_v6 }
 0x202   :  { %1154 = vadd.xlane.f32.xlu0 %v1153_v19  ;;  %3406 = vmatmul.msk.bf16.vlgmr.msra.gmra.mxu3 %vm922_vm0, %v1156_v12  ;;  %v3422_v12 = vor.u32 %v4145_v44, %v3419_v13  ;;  %v4167_v19 = vld [vmem:[%s6575_s4 + $0xc4] sm:$0xf] }
 0x203   :  { %1453 = vmatpush.bf16.msrb.mxu3 %v3518_v39  ;;  %v3510_v21 = vor.u32 %v4167_v19, %v3507_v20  ;;  %1416 = vmatpush.bf16.msrb.mxu1 %v3506_v0 }
 0x204   :  { %1400 = vmatpush.bf16.msrb.mxu0 %v3418_v62  ;;  %1438 = vmatpush.bf16.msrb.mxu2 %v3422_v12 }
 0x207   :  { %1454 = vmatpush.bf16.msrb.mxu3 %v3510_v21  ;;  %1417 = vmatpush.bf16.msrb.mxu1 %v3498_v1 }
 0x208   :  { %1401 = vmatpush.bf16.msrb.mxu0 %v3410_v24  ;;  %1439 = vmatpush.bf16.msrb.mxu2 %v3414_v26  ;;  %v1228_v24 = vld [vmem:[%s6576_s5] sm:$0x3] }
 0x209   :  { %v1230_v63 = vperm.slane %v1228_v24, 0  ;;  %v1231_v1 = vperm.slane %v1228_v24, 1 }
 0x20b   :  { %1455 = vmatpush.bf16.msrb.mxu3 %v3502_v29  ;;  %1418 = vmatpush.bf16.msrb.mxu1 %v3490_v33 }
 0x20f   :  { %1456 = vmatpush.bf16.msrb.mxu3 %v3494_v36  ;;  %1419 = vmatpush.bf16.msrb.mxu1 %v3482_v41 }
 0x213   :  { %1457 = vmatpush.bf16.msrb.mxu3 %v3486_v43  ;;  %1420 = vmatpush.bf16.msrb.mxu1 %v3474_v35 }
 0x217   :  { %1458 = vmatpush.bf16.msrb.mxu3 %v3478_v50  ;;  %v4377_v50 = vld [vmem:[%s6571_s0 + $0x10] sm:$0xff] }
 0x256   :  { %v937_v51 = vpop.xlane.xlu2 %936 }
 0x257   :  { %4325 = vrcp.f32 %v937_v51 }
 0x25c   :  { %v1007_v55 = vpop.xlane.xlu1 %1006 }
 0x25d   :  { %v4326_v54 = vpop.eup %4325 }
 0x25e   :  { %v940_v52 = vpop.xlane.xlu0 %939 }
 0x25f   :  { %4327 = vrcp.f32 %v940_v52  ;;  %v4378_v52 = vld [vmem:[%s6571_s0 + $0x18] sm:$0xff] }
 0x260   :  { %4329 = vrcp.f32 %v1007_v55 }
 0x264   :  { %v1010_v60 = vpop.xlane.xlu2 %1009 }
 0x265   :  { %v4328_v56 = vpop.eup %4327  ;;  %4331 = vrcp.f32 %v1010_v60 }
 0x266   :  { %v4330_v9 = vpop.eup %4329 }
 0x269   :  { %v960_v53 = vpop.f32.mrf.mxu1 }
 0x26a   :  { %v967_v58 = vmul.f32 %v4326_v54, %v960_v53 }
 0x26b   :  { %v4332_v10 = vpop.eup %4331 }
 0x26c   :  { %v1152_v18 = vpop.xlane.xlu2 %1151 }
 0x26d   :  { %v1082_v5 = vpop.xlane.xlu0 %1081 }
 0x26e   :  { %v1085_v7 = vpop.xlane.xlu1 %1084  ;;  %4333 = vrcp.f32 %v1082_v5  ;;  %v4380_v5 = vld [vmem:[%s6571_s0 + $0x28] sm:$0xff] }
 0x26f   :  { %4335 = vrcp.f32 %v1085_v7 }
 0x270   :  { %4337 = vrcp.f32 %v1152_v18 }
 0x271   :  { %v962_v57 = vpop.f32.mrf.mxu1 }
 0x272   :  { %v968_v59 = vmul.f32 %v4328_v56, %v962_v57 }
 0x274   :  { %v1192_v61 = vpack.c.bf16 %v968_v59, %v967_v58  ;;  %v4334_v16 = vpop.eup %4333 }
 0x275   :  { %v1028_v4 = vpop.f32.mrf.mxu3  ;;  %v4336_v2 = vpop.eup %4335 }
 0x276   :  { %1402 = vmatmul.bf16.vlgmr.msrb.gmra.mxu0 %v1192_v61  ;;  %1440 = vmatmul.bf16.vlgmr.msrb.gmra.mxu2 %v1192_v61  ;;  %v1035_v14 = vmul.f32 %v4330_v9, %v1028_v4  ;;  %v1155_v44 = vpop.xlane.xlu0 %1154  ;;  %v4338_v12 = vpop.eup %4337  ;;  %v4379_v61 = vld [vmem:[%s6571_s0 + $0x20] sm:$0xff] }
 0x277   :  { %4339 = vrcp.f32 %v1155_v44  ;;  %v4409_v44 = vmov 256.0  }
 0x278   :  { %4341 = vrcp.f32 %v4409_v44 }
 0x279   :  { %v1105_v8 = vpop.f32.mrf.mxu1 }
 0x27a   :  { %v1112_v6 = vmul.f32 %v4334_v16, %v1105_v8 }
 0x27d   :  { %v1030_v11 = vpop.f32.mrf.mxu3  ;;  %v4340_v19 = vpop.eup %4339 }
 0x27e   :  { %v1036_v15 = vmul.f32 %v4332_v10, %v1030_v11 }
 0x280   :  { %v1193_v39 = vpack.c.bf16 %v1036_v15, %v1035_v14 }
 0x281   :  { %v1107_v17 = vpop.f32.mrf.mxu1 }
 0x282   :  { %v1113_v62 = vmul.f32 %v4336_v2, %v1107_v17  ;;  %1421 = vmatmul.bf16.vlgmr.msrb.gmra.mxu1 %v1193_v39  ;;  %1459 = vmatmul.bf16.vlgmr.msrb.gmra.mxu3 %v1193_v39  ;;  %v4381_v2 = vld [vmem:[%s6571_s0 + $0x30] sm:$0xff] }
 0x284   :  { %v1194_v13 = vpack.c.bf16 %v1113_v62, %v1112_v6  ;;  %v4382_v6 = vld [vmem:[%s6571_s0 + $0x38] sm:$0xff] }
 0x285   :  { %v1173_v0 = vpop.f32.mrf.mxu3 }
 0x286   :  { %1407 = vmatmul.bf16.gmra.mxu0 %v1194_v13  ;;  %1445 = vmatmul.bf16.gmra.mxu2 %v1194_v13  ;;  %v1180_v21 = vmul.f32 %v4338_v12, %v1173_v0  ;;  %v4342_v13 = vpop.eup %4341 }
 0x287   :  { %v1493_v0 = vmul.f32 256.0, %v4342_v13  ;;  %vm1497_vm1 = vweird.f32 %v4342_v13 }
 0x289   :  { %v1494_v12 = vsub.f32 1.0, %v1493_v0  ;;  %v4195_v0 = vld [vmem:[%s6579_s8 + $0xa4] sm:$0xf] }
 0x28d   :  { %v1175_v20 = vpop.f32.mrf.mxu3 }
 0x28e   :  { %v1181_v22 = vmul.f32 %v4340_v19, %v1175_v20  ;;  %v1495_v19 = vmul.f32 %v4342_v13, %v1494_v12 }
 0x290   :  { %v1195_v23 = vpack.c.bf16 %v1181_v22, %v1180_v21  ;;  %v1496_v20 = vadd.f32 %v4342_v13, %v1495_v19  ;;  %v3619_v19 = vld [vmem:[%s6579_s8 + $0xb0] sm:$0xf0] }
 0x292   :  { %1426 = vmatmul.bf16.gmra.mxu1 %v1195_v23  ;;  %1464 = vmatmul.bf16.gmra.mxu3 %v1195_v23  ;;  %v5397_v21 = vsel %vm1497_vm1, %v4342_v13, %v1496_v20  ;;  %v4229_v13 = vld [vmem:[%s6579_s8 + $0x1ac] sm:$0xf0]  ;;  %v4227_v20 = vld [vmem:[%s6579_s8 + $0x1a4] sm:$0xf] }
 0x2f3   :  { %v1403_v3 = vpop.f32.mrf.mxu0 }
 0x2f4   :  { %v1404_v26 = vadd.f32 %v1403_v3, %v1230_v63 }
 0x2f9   :  { %v1441_v25 = vpop.f32.mrf.mxu2 }
 0x2fa   :  { %v1442_v28 = vadd.f32 %v1441_v25, %v1231_v1 }
 0x2fb   :  { %v1405_v27 = vpop.f32.mrf.mxu0 }
 0x2fc   :  { %v1406_v40 = vadd.f32 %v1405_v27, %v1230_v63 }
 0x2ff   :  { %v1422_v49 = vpop.f32.mrf.mxu1 }
 0x300   :  { %v1423_v29 = vadd.f32 %v1422_v49, %v1404_v26 }
 0x301   :  { %v1443_v30 = vpop.f32.mrf.mxu2 }
 0x302   :  { %v1470_v36 = vadd.f32 %v4375_v34, %v1423_v29  ;;  %v1444_v42 = vadd.f32 %v1443_v30, %v1231_v1 }
 0x303   :  { %v1408_v45 = vpop.f32.mrf.mxu0 }
 0x304   :  { %v1409_v54 = vadd.f32 %v1408_v45, %v1230_v63 }
 0x305   :  { %v1460_v31 = vpop.f32.mrf.mxu3 }
 0x306   :  { %v1461_v32 = vadd.f32 %v1460_v31, %v1442_v28 }
 0x307   :  { %v1424_v33 = vpop.f32.mrf.mxu1 }
 0x308   :  { %v1471_v38 = vadd.f32 %v4376_v37, %v1461_v32  ;;  %v1425_v43 = vadd.f32 %v1424_v33, %v1406_v40 }
 0x309   :  { %v1446_v35 = vpop.f32.mrf.mxu2 }
 0x30a   :  { %v1480_v41 = vadd.f32 %v1471_v38, %v1470_v36  ;;  %v1472_v51 = vadd.f32 %v4377_v50, %v1425_v43  ;;  %v1447_v56 = vadd.f32 %v1446_v35, %v1231_v1  ;;  %v4205_v50 = vld [vmem:[%s6579_s8 + $0xec] sm:$0xf0] }
 0x30b   :  { %v1410_v60 = vpop.f32.mrf.mxu0 }
 0x30c   :  { %1481 = vadd.xlane.f32.xlu1 %v1480_v41  ;;  %v1411_v10 = vadd.f32 %v1410_v60, %v1230_v63 }
 0x30d   :  { %v1462_v46 = vpop.f32.mrf.mxu3 }
 0x30e   :  { %v1463_v47 = vadd.f32 %v1462_v46, %v1444_v42 }
 0x30f   :  { %v1427_v48 = vpop.f32.mrf.mxu1 }
 0x310   :  { %v1473_v53 = vadd.f32 %v4378_v52, %v1463_v47  ;;  %v1428_v57 = vadd.f32 %v1427_v48, %v1409_v54  ;;  %v3649_v48 = vld [vmem:[%s6579_s8 + $0xe0] sm:$0xf]  ;;  %v4203_v54 = vld [vmem:[%s6579_s8 + $0xe4] sm:$0xf] }
 0x311   :  { %v1448_v8 = vpop.f32.mrf.mxu2  ;;  %v3650_v52 = vor.u32 %v4205_v50, %v3649_v48 }
 0x312   :  { %v1483_v55 = vadd.f32 %v1473_v53, %v1472_v51  ;;  %v1474_v4 = vadd.f32 %v4379_v61, %v1428_v57  ;;  %v1449_v14 = vadd.f32 %v1448_v8, %v1231_v1  ;;  %v3633_v61 = vld [vmem:[%s6579_s8 + $0xc0] sm:$0xf]  ;;  %v4233_v8 = vld [vmem:[%s6579_s8 + $0x1cc] sm:$0xf0] }
 0x313   :  { %2075 = vmatpush.bf16.msra.mxu0 %v3650_v52  ;;  %v4187_v52 = vld [vmem:[%s6579_s8 + $0x64] sm:$0xf] }
 0x314   :  { %1484 = vadd.xlane.f32.xlu2 %v1483_v55  ;;  %v3651_v55 = vld [vmem:[%s6579_s8 + $0xf0] sm:$0xf0] }
 0x315   :  { %v1465_v58 = vpop.f32.mrf.mxu3  ;;  %v3654_v57 = vor.u32 %v4203_v54, %v3651_v55  ;;  %v3587_v55 = vld [vmem:[%s6579_s8 + $0x70] sm:$0xf0] }
 0x316   :  { %v1466_v59 = vadd.f32 %v1465_v58, %v1447_v56  ;;  %v4235_v58 = vld [vmem:[%s6579_s8 + $0x1e4] sm:$0xf] }
 0x317   :  { %v1429_v9 = vpop.f32.mrf.mxu1  ;;  %2113 = vmatpush.bf16.msra.mxu2 %v3654_v57  ;;  %v3715_v57 = vld [vmem:[%s6579_s8 + $0x170] sm:$0xf0] }
 0x318   :  { %v1475_v7 = vadd.f32 %v4380_v5, %v1466_v59  ;;  %v1430_v15 = vadd.f32 %v1429_v9, %v1411_v10  ;;  %v3779_v59 = vld [vmem:[%s6579_s8 + $0x1f0] sm:$0xf0]  ;;  %v3761_v5 = vld [vmem:[%s6579_s8 + $0x1c0] sm:$0xf]  ;;  %v4199_v9 = vld [vmem:[%s6579_s8 + $0xc4] sm:$0xf] }
 0x319   :  { %v3782_v60 = vor.u32 %v4235_v58, %v3779_v59  ;;  %v3635_v10 = vld [vmem:[%s6579_s8 + $0xd0] sm:$0xf0]  ;;  %v3590_v59 = vor.u32 %v4187_v52, %v3587_v55 }
 0x31a   :  { %v1486_v11 = vadd.f32 %v1475_v7, %v1474_v4  ;;  %v1476_v17 = vadd.f32 %v4381_v2, %v1430_v15  ;;  %v4231_v15 = vld [vmem:[%s6579_s8 + $0x1c4] sm:$0xf]  ;;  %v3667_v55 = vld [vmem:[%s6579_s8 + $0x110] sm:$0xf0] }
 0x31b   :  { %2132 = vmatpush.bf16.msra.mxu3 %v3782_v60 }
 0x31c   :  { %1487 = vadd.xlane.f32.xlu0 %v1486_v11  ;;  %v3762_v11 = vor.u32 %v4233_v8, %v3761_v5  ;;  %v3697_v5 = vld [vmem:[%s6579_s8 + $0x140] sm:$0xf]  ;;  %v4217_v8 = vld [vmem:[%s6579_s8 + $0x14c] sm:$0xf0] }
 0x31d   :  { %v1467_v16 = vpop.f32.mrf.mxu3 }
 0x31e   :  { %v1468_v39 = vadd.f32 %v1467_v16, %v1449_v14  ;;  %v3638_v14 = vor.u32 %v4199_v9, %v3635_v10  ;;  %v3763_v16 = vld [vmem:[%s6579_s8 + $0x1d0] sm:$0xf0]  ;;  %v4183_v9 = vld [vmem:[%s6579_s8 + $0x44] sm:$0xf] }
 0x31f   :  { %v3571_v10 = vld [vmem:[%s6579_s8 + $0x50] sm:$0xf0] }
 0x320   :  { %v1477_v62 = vadd.f32 %v4382_v6, %v1468_v39  ;;  %v3766_v39 = vor.u32 %v4231_v15, %v3763_v16  ;;  %2114 = vmatpush.bf16.msra.mxu2 %v3638_v14  ;;  %v4197_v6 = vld [vmem:[%s6579_s8 + $0xac] sm:$0xf0]  ;;  %v3698_v14 = vor.u32 %v4217_v8, %v3697_v5  ;;  %v3574_v15 = vor.u32 %v4183_v9, %v3571_v10  ;;  %v4215_v16 = vld [vmem:[%s6579_s8 + $0x144] sm:$0xf]  ;;  %v1479_v5 = vld [vmem:[%s6578_s7] sm:$0x3] }
 0x321   :  { %v4206_v9 = vld [vmem:[%s6579_s8 + $0xf4] sm:$0xf0] }
 0x322   :  { %v1489_v18 = vadd.f32 %v1477_v62, %v1476_v17  ;;  %2133 = vmatpush.bf16.msra.mxu3 %v3766_v39  ;;  %v3699_v39 = vld [vmem:[%s6579_s8 + $0x150] sm:$0xf0] }
 0x324   :  { %1490 = vadd.xlane.f32.xlu1 %v1489_v18 }
 0x37f   :  { %v1482_v22 = vpop.xlane.xlu1 %1481 }
 0x380   :  { %v1499_v23 = vmul.f32 %v5397_v21, %v1482_v22  ;;  %v3747_v22 = vld [vmem:[%s6579_s8 + $0x1b0] sm:$0xf0] }
 0x382   :  { %v5400_v3 = vsub.f32 %v1470_v36, %v1499_v23  ;;  %v5402_v24 = vsub.f32 %v1471_v38, %v1499_v23  ;;  %v3622_v23 = vor.u32 %v4195_v0, %v3619_v19  ;;  %v3681_v19 = vld [vmem:[%s6579_s8 + $0x120] sm:$0xf] }
 0x384   :  { %v1511_v25 = vmul.f32 %v5400_v3, %v5400_v3  ;;  %v1512_v63 = vmul.f32 %v5402_v24, %v5402_v24  ;;  %2115 = vmatpush.bf16.msra.mxu2 %v3622_v23 }
 0x386   :  { %v1519_v49 = vadd.f32 %v1512_v63, %v1511_v25  ;;  %v3750_v25 = vor.u32 %v4227_v20, %v3747_v22  ;;  %v3601_v63 = vld [vmem:[%s6579_s8 + $0x80] sm:$0xf]  ;;  %v4213_v20 = vld [vmem:[%s6579_s8 + $0x12c] sm:$0xf0] }
 0x387   :  { %v1485_v1 = vpop.xlane.xlu2 %1484  ;;  %v1478_v22 = vld [vmem:[%s6577_s6] sm:$0x3] }
 0x388   :  { %v1500_v26 = vmul.f32 %v5397_v21, %v1485_v1  ;;  %1520 = vadd.xlane.f32.xlu2 %v1519_v49  ;;  %v4193_v49 = vld [vmem:[%s6579_s8 + $0x8c] sm:$0xf0]  ;;  %v3729_v1 = vld [vmem:[%s6579_s8 + $0x180] sm:$0xf]  ;;  %2134 = vmatpush.bf16.msra.mxu3 %v3750_v25 }
 0x38a   :  { %v5409_v27 = vsub.f32 %v1472_v51, %v1500_v26  ;;  %v5411_v28 = vsub.f32 %v1473_v53, %v1500_v26  ;;  %v3777_v51 = vld [vmem:[%s6579_s8 + $0x1e0] sm:$0xf]  ;;  %v4237_v53 = vld [vmem:[%s6579_s8 + $0x1ec] sm:$0xf0]  ;;  %v3602_v26 = vor.u32 %v4193_v49, %v3601_v63  ;;  %v3682_v63 = vor.u32 %v4213_v20, %v3681_v19  ;;  %v4179_v49 = vld [vmem:[%s6579_s8 + $0x24] sm:$0xf] }
 0x38b   :  { %v3778_v56 = vor.u32 %v4237_v53, %v3777_v51  ;;  %v4221_v51 = vld [vmem:[%s6579_s8 + $0x16c] sm:$0xf0] }
 0x38c   :  { %v1513_v29 = vmul.f32 %v5409_v27, %v5409_v27  ;;  %v1514_v30 = vmul.f32 %v5411_v28, %v5411_v28 }
 0x38d   :  { %2094 = vmatpush.bf16.msra.mxu1 %v3778_v56  ;;  %v4219_v56 = vld [vmem:[%s6579_s8 + $0x164] sm:$0xf] }
 0x38e   :  { %v1522_v31 = vadd.f32 %v1514_v30, %v1513_v29  ;;  %v4225_v29 = vld [vmem:[%s6579_s8 + $0x18c] sm:$0xf0]  ;;  %v4191_v30 = vld [vmem:[%s6579_s8 + $0x84] sm:$0xf]  ;;  %v3718_v60 = vor.u32 %v4219_v56, %v3715_v57  ;;  %v5648_v56 = vperm.slane %v1478_v22, 0 }
 0x38f   :  { %v1488_v32 = vpop.xlane.xlu0 %1487 }
 0x390   :  { %v1501_v33 = vmul.f32 %v5397_v21, %v1488_v32  ;;  %1523 = vadd.xlane.f32.xlu0 %v1522_v31  ;;  %v3603_v31 = vld [vmem:[%s6579_s8 + $0x90] sm:$0xf0]  ;;  %v3730_v32 = vor.u32 %v4225_v29, %v3729_v1 }
 0x391   :  { %2095 = vmatpush.bf16.msra.mxu1 %v3762_v11  ;;  %v3555_v1 = vld [vmem:[%s6579_s8 + $0x30] sm:$0xf0] }
 0x392   :  { %v5418_v34 = vsub.f32 %v1474_v4, %v1501_v33  ;;  %v5420_v36 = vsub.f32 %v1475_v7, %v1501_v33  ;;  %v4201_v4 = vld [vmem:[%s6579_s8 + $0xcc] sm:$0xf0]  ;;  %v3606_v33 = vor.u32 %v4191_v30, %v3603_v31  ;;  %v3683_v30 = vld [vmem:[%s6579_s8 + $0x130] sm:$0xf0] }
 0x393   :  { %v3634_v7 = vor.u32 %v4201_v4, %v3633_v61  ;;  %v3569_v61 = vld [vmem:[%s6579_s8 + $0x40] sm:$0xf]  ;;  %v4185_v4 = vld [vmem:[%s6579_s8 + $0x4c] sm:$0xf0] }
 0x394   :  { %v1515_v37 = vmul.f32 %v5418_v34, %v5418_v34  ;;  %v1516_v38 = vmul.f32 %v5420_v36, %v5420_v36  ;;  %2116 = vmatpush.bf16.msra.mxu2 %v3606_v33  ;;  %v3558_v33 = vor.u32 %v4179_v49, %v3555_v1  ;;  %v3769_v1 = vld [vmem:[%s6579_s8 + $0x1c8] sm:$0xf] }
 0x395   :  { %2076 = vmatpush.bf16.msra.mxu0 %v3634_v7  ;;  %v3570_v7 = vor.u32 %v4185_v4, %v3569_v61 }
 0x396   :  { %v1525_v40 = vadd.f32 %v1516_v38, %v1515_v37  ;;  %v4223_v37 = vld [vmem:[%s6579_s8 + $0x184] sm:$0xf]  ;;  %v3731_v38 = vld [vmem:[%s6579_s8 + $0x190] sm:$0xf0] }
 0x397   :  { %v1491_v41 = vpop.xlane.xlu1 %1490 }
 0x398   :  { %v1502_v42 = vmul.f32 %v5397_v21, %v1491_v41  ;;  %1526 = vadd.xlane.f32.xlu1 %v1525_v40  ;;  %v3734_v40 = vor.u32 %v4223_v37, %v3731_v38  ;;  %2117 = vmatpush.bf16.msra.mxu2 %v3590_v59  ;;  %v3537_v38 = vld [vmem:[%s6579_s8] sm:$0xf]  ;;  %v5652_v59 = vperm.slane %v1478_v22, 1  ;;  %v3787_v22 = vld [vmem:[%s6579_s8 + $0x1f8] sm:$0xf0] }
 0x39a   :  { %v5427_v43 = vsub.f32 %v1476_v17, %v1502_v42  ;;  %v5429_v45 = vsub.f32 %v1477_v62, %v1502_v42  ;;  %v3617_v17 = vld [vmem:[%s6579_s8 + $0xa0] sm:$0xf]  ;;  %2135 = vmatpush.bf16.msra.mxu3 %v3734_v40  ;;  %v4177_v40 = vld [vmem:[%s6579_s8 + $0xc] sm:$0xf0] }
 0x39b   :  { %v3745_v62 = vld [vmem:[%s6579_s8 + $0x1a0] sm:$0xf]  ;;  %v3618_v44 = vor.u32 %v4197_v6, %v3617_v17 }
 0x39c   :  { %v1517_v46 = vmul.f32 %v5427_v43, %v5427_v43  ;;  %v1518_v47 = vmul.f32 %v5429_v45, %v5429_v45  ;;  %v3746_v12 = vor.u32 %v4229_v13, %v3745_v62  ;;  %v3585_v42 = vld [vmem:[%s6579_s8 + $0x60] sm:$0xf]  ;;  %2118 = vmatpush.bf16.msra.mxu2 %v3574_v15  ;;  %v4238_v15 = vld [vmem:[%s6579_s8 + $0x1f4] sm:$0xf0] }
 0x39d   :  { %2077 = vmatpush.bf16.msra.mxu0 %v3618_v44  ;;  %v3553_v62 = vld [vmem:[%s6579_s8 + $0x20] sm:$0xf]  ;;  %v4181_v44 = vld [vmem:[%s6579_s8 + $0x2c] sm:$0xf0] }
 0x39e   :  { %v1528_v35 = vadd.f32 %v1518_v47, %v1517_v46  ;;  %2096 = vmatpush.bf16.msra.mxu1 %v3746_v12  ;;  %v4189_v46 = vld [vmem:[%s6579_s8 + $0x6c] sm:$0xf0]  ;;  %v3713_v47 = vld [vmem:[%s6579_s8 + $0x160] sm:$0xf]  ;;  %2136 = vmatpush.bf16.msra.mxu3 %v3718_v60  ;;  %v3554_v12 = vor.u32 %v4181_v44, %v3553_v62  ;;  %v5686_v62 = vperm.slane %v1479_v5, 0  ;;  %v5688_v44 = vperm.slane %v1479_v5, 1 }
 0x39f   :  { %v3586_v50 = vor.u32 %v4189_v46, %v3585_v42  ;;  %v3714_v54 = vor.u32 %v4221_v51, %v3713_v47  ;;  %v3538_v42 = vor.u32 %v4177_v40, %v3537_v38  ;;  %v4209_v46 = vld [vmem:[%s6579_s8 + $0x10c] sm:$0xf0]  ;;  %v4175_v47 = vld [vmem:[%s6579_s8 + $0x4] sm:$0xf] }
 0x3a0   :  { %1529 = vadd.xlane.f32.xlu2 %v1528_v35  ;;  %2119 = vmatpush.bf16.msra.mxu2 %v3558_v33  ;;  %v3643_v33 = vld [vmem:[%s6579_s8 + $0xd8] sm:$0xf0] }
 0x3a1   :  { %2078 = vmatpush.bf16.msra.mxu0 %v3602_v26  ;;  %v4211_v26 = vld [vmem:[%s6579_s8 + $0x124] sm:$0xf] }
 0x3a2   :  { %2097 = vmatpush.bf16.msra.mxu1 %v3730_v32  ;;  %v3686_v37 = vor.u32 %v4211_v26, %v3683_v30 }
 0x3a5   :  { %2079 = vmatpush.bf16.msra.mxu0 %v3586_v50 }
 0x3a6   :  { %2098 = vmatpush.bf16.msra.mxu1 %v3714_v54  ;;  %v4207_v54 = vld [vmem:[%s6579_s8 + $0x104] sm:$0xf] }
 0x3a9   :  { %2080 = vmatpush.bf16.msra.mxu0 %v3570_v7 }
 0x3aa   :  { %2099 = vmatpush.bf16.msra.mxu1 %v3698_v14  ;;  %v3785_v14 = vld [vmem:[%s6579_s8 + $0x1e8] sm:$0xf] }
 0x3ab   :  { %v3786_v19 = vor.u32 %v4238_v15, %v3785_v14  ;;  %v3627_v14 = vld [vmem:[%s6579_s8 + $0xb8] sm:$0xf0]  ;;  %v4228_v15 = vld [vmem:[%s6579_s8 + $0x1ac] sm:$0xf] }
 0x3ad   :  { %2081 = vmatpush.bf16.msra.mxu0 %v3554_v12 }
 0x3ae   :  { %2100 = vmatpush.bf16.msra.mxu1 %v3682_v63 }
 0x3b1   :  { %2082 = vmatpush.bf16.msra.mxu0 %v3538_v42  ;;  %v4232_v42 = vld [vmem:[%s6579_s8 + $0x1cc] sm:$0xf] }
 0x3fb   :  { %v1521_v2 = vpop.xlane.xlu2 %1520 }
 0x3fc   :  { %v5492_v18 = vmul.f32 0.003921569, %v1521_v2  ;;  %v3702_v2 = vor.u32 %v4215_v16, %v3699_v39  ;;  %v4204_v16 = vld [vmem:[%s6579_s8 + $0xec] sm:$0xf] }
 0x3fe   :  { %4343 = vrsqrt.f32 %v5492_v18  ;;  %2137 = vmatpush.bf16.msra.mxu3 %v3702_v2  ;;  %vm1542_vm2 = vcmp.eq.f32.partialorder %v5492_v18, inf  ;;  %vm1544_vm3 = vcmp.eq.f32.partialorder %v5492_v18, 0.0  ;;  %v1545_v29 = vand.u32 2147483648, %v5492_v18  ;;  %v3659_v2 = vld [vmem:[%s6579_s8 + $0xf8] sm:$0xf0] }
 0x3ff   :  { %v3662_v20 = vor.u32 %v4204_v16, %v3659_v2  ;;  %v3755_v16 = vld [vmem:[%s6579_s8 + $0x1b8] sm:$0xf0] }
 0x402   :  { %2138 = vmatpush.bf16.msra.mxu3 %v3686_v37 }
 0x403   :  { %v1524_v41 = vpop.xlane.xlu0 %1523 }
 0x404   :  { %v4344_v35 = vpop.eup %4343  ;;  %v5543_v48 = vmul.f32 0.003921569, %v1524_v41  ;;  %v3665_v41 = vld [vmem:[%s6579_s8 + $0x100] sm:$0xf] }
 0x405   :  { %v1536_v53 = vmul.f32 %v4344_v35, %v5492_v18  ;;  %v3666_v52 = vor.u32 %v4209_v46, %v3665_v41 }
 0x406   :  { %4345 = vrsqrt.f32 %v5543_v48  ;;  %vm1554_vm4 = vcmp.eq.f32.partialorder %v5543_v48, inf  ;;  %vm1556_vm5 = vcmp.eq.f32.partialorder %v5543_v48, 0.0  ;;  %v1557_v39 = vand.u32 2147483648, %v5543_v48 }
 0x407   :  { %v1537_v58 = vmul.f32 %v4344_v35, %v1536_v53  ;;  %2101 = vmatpush.bf16.msra.mxu1 %v3666_v52 }
 0x409   :  { %v1538_v11 = vmul.f32 0.5, %v1537_v58  ;;  %v3670_v58 = vor.u32 %v4207_v54, %v3667_v55  ;;  %v3753_v55 = vld [vmem:[%s6579_s8 + $0x1a8] sm:$0xf] }
 0x40b   :  { %v1539_v17 = vsub.f32 1.5, %v1538_v11  ;;  %v1527_v6 = vpop.xlane.xlu1 %1526  ;;  %2139 = vmatpush.bf16.msra.mxu3 %v3670_v58  ;;  %2170 = vmatpush.bf16.msrb.mxu1 %v3786_v19 }
 0x40c   :  { %v4346_v13 = vpop.eup %4345  ;;  %v5592_v0 = vmul.f32 0.003921569, %v1527_v6 }
 0x40d   :  { %v1540_v23 = vmul.f32 %v4344_v35, %v1539_v17  ;;  %v1548_v25 = vmul.f32 %v4346_v13, %v5543_v48  ;;  %v3539_v35 = vld [vmem:[%s6579_s8 + $0x10] sm:$0xf0] }
 0x40e   :  { %4347 = vrsqrt.f32 %v5592_v0  ;;  %v3542_v53 = vor.u32 %v4175_v47, %v3539_v35  ;;  %vm1566_vm6 = vcmp.eq.f32.partialorder %v5592_v0, inf  ;;  %vm1568_vm7 = vcmp.eq.f32.partialorder %v5592_v0, 0.0  ;;  %v3771_v35 = vld [vmem:[%s6579_s8 + $0x1d8] sm:$0xf0] }
 0x40f   :  { %v1541_v31 = vmul.f32 %v1540_v23, %v5492_v18  ;;  %v1549_v32 = vmul.f32 %v4346_v13, %v1548_v25  ;;  %v3641_v23 = vld [vmem:[%s6579_s8 + $0xc8] sm:$0xf]  ;;  %v4202_v25 = vld [vmem:[%s6579_s8 + $0xd4] sm:$0xf0]  ;;  %v3774_v5 = vor.u32 %v4232_v42, %v3771_v35  ;;  %v1588_v42 = vmul.f32 %v5648_v56, %v5400_v3 }
 0x410   :  { %2120 = vmatpush.bf16.msra.mxu2 %v3542_v53  ;;  %v3642_v30 = vor.u32 %v4202_v25, %v3641_v23  ;;  %v1569_v53 = vand.u32 2147483648, %v5592_v0  ;;  %v3737_v23 = vld [vmem:[%s6579_s8 + $0x188] sm:$0xf]  ;;  %v4226_v25 = vld [vmem:[%s6579_s8 + $0x194] sm:$0xf0] }
 0x411   :  { %v1543_v50 = vsel %vm1542_vm2, %v5492_v18, %v1541_v31  ;;  %v1550_v51 = vmul.f32 0.5, %v1549_v32  ;;  %v3657_v18 = vld [vmem:[%s6579_s8 + $0xe8] sm:$0xf]  ;;  %v4234_v31 = vld [vmem:[%s6579_s8 + $0x1d4] sm:$0xf0] }
 0x412   :  { %v1546_v57 = vsel %vm1544_vm3, %v1545_v29, %v1543_v50  ;;  %v3658_v12 = vor.u32 %v4206_v9, %v3657_v18  ;;  %v4200_v32 = vld [vmem:[%s6579_s8 + $0xcc] sm:$0xf]  ;;  %v3770_v40 = vor.u32 %v4234_v31, %v3769_v1  ;;  %v3625_v50 = vld [vmem:[%s6579_s8 + $0xa8] sm:$0xf]  ;;  %v3738_v1 = vor.u32 %v4226_v25, %v3737_v23 }
 0x413   :  { %v5654_v60 = vadd.f32 1e-06, %v1546_v57  ;;  %v1551_v61 = vsub.f32 1.5, %v1550_v51  ;;  %v1530_v4 = vpop.xlane.xlu2 %1529  ;;  %v3646_v41 = vor.u32 %v4200_v32, %v3643_v33  ;;  %v4198_v51 = vld [vmem:[%s6579_s8 + $0xb4] sm:$0xf0] }
 0x414   :  { %v4348_v7 = vpop.eup %4347  ;;  %v5659_v8 = vmul.f32 0.003921569, %v1530_v4  ;;  %2151 = vmatpush.bf16.msrb.mxu0 %v3658_v12  ;;  %2189 = vmatpush.bf16.msrb.mxu2 %v3662_v20  ;;  %v4230_v57 = vld [vmem:[%s6579_s8 + $0x1b4] sm:$0xf0]  ;;  %v3758_v20 = vor.u32 %v4228_v15, %v3755_v16  ;;  %v3721_v3 = vld [vmem:[%s6579_s8 + $0x168] sm:$0xf] }
 0x415   :  { %4349 = vrcp.f32 %v5654_v60  ;;  %v1552_v10 = vmul.f32 %v4346_v13, %v1551_v61  ;;  %v1560_v11 = vmul.f32 %v4348_v7, %v5592_v0  ;;  %v4236_v13 = vld [vmem:[%s6579_s8 + $0x1ec] sm:$0xf]  ;;  %v1609_v61 = vand.u32 2147483647, %v5654_v60  ;;  %2171 = vmatpush.bf16.msrb.mxu1 %v3770_v40 }
 0x416   :  { %4351 = vrsqrt.f32 %v5659_v8  ;;  %v3790_v29 = vor.u32 %v4236_v13, %v3787_v22  ;;  %v1611_v4 = vand.u32 2147483648, %v5654_v60  ;;  %vm1578_vm8 = vcmp.eq.f32.partialorder %v5659_v8, inf  ;;  %v4194_v13 = vld [vmem:[%s6579_s8 + $0x94] sm:$0xf0] }
 0x417   :  { %v1553_v17 = vmul.f32 %v1552_v10, %v5543_v48  ;;  %v1561_v6 = vmul.f32 %v4348_v7, %v1560_v11  ;;  %v3626_v10 = vor.u32 %v4198_v51, %v3625_v50  ;;  %v3754_v11 = vor.u32 %v4230_v57, %v3753_v55  ;;  %v3593_v51 = vld [vmem:[%s6579_s8 + $0x68] sm:$0xf]  ;;  %v4222_v55 = vld [vmem:[%s6579_s8 + $0x174] sm:$0xf0] }
 0x418   :  { %2208 = vmatpush.bf16.msrb.mxu3 %v3790_v29  ;;  %2152 = vmatpush.bf16.msrb.mxu0 %v3642_v30  ;;  %vm1580_vm10 = vcmp.eq.f32.partialorder %v5659_v8, 0.0  ;;  %vm1605_vm11 = vweird.f32 %v5654_v60  ;;  %v3611_v29 = vld [vmem:[%s6579_s8 + $0x98] sm:$0xf0]  ;;  %v1581_v33 = vand.u32 2147483648, %v5659_v8  ;;  %v1590_v57 = vmul.f32 %v5648_v56, %v5409_v27 }
 0x419   :  { %v1555_v63 = vsel %vm1554_vm4, %v5543_v48, %v1553_v17  ;;  %v1562_v49 = vmul.f32 0.5, %v1561_v6  ;;  %2190 = vmatpush.bf16.msrb.mxu2 %v3646_v41  ;;  %v3609_v6 = vld [vmem:[%s6579_s8 + $0x88] sm:$0xf]  ;;  %2172 = vmatpush.bf16.msrb.mxu1 %v3754_v11  ;;  %v3739_v41 = vld [vmem:[%s6579_s8 + $0x198] sm:$0xf0]  ;;  %vm1610_vm13 = vcmp.eq.f32.partialorder %v1609_v61, 8.507059e+37 }
 0x41a   :  { %v1558_v26 = vsel %vm1556_vm5, %v1557_v39, %v1555_v63  ;;  %v3610_v22 = vor.u32 %v4194_v13, %v3609_v6  ;;  %v4186_v61 = vld [vmem:[%s6579_s8 + $0x54] sm:$0xf0] }
 0x41b   :  { %v5721_v37 = vpop.eup %4349  ;;  %v5723_v48 = vadd.f32 1e-06, %v1558_v26  ;;  %v1563_v38 = vsub.f32 1.5, %v1562_v49  ;;  %v4192_v26 = vld [vmem:[%s6579_s8 + $0x8c] sm:$0xf] }
 0x41c   :  { %v5728_v46 = vpop.eup %4351  ;;  %v1601_v47 = vmul.f32 %v5721_v37, %v5654_v60  ;;  %vm1606_vm9 = vweird.f32 %v5721_v37  ;;  %2209 = vmatpush.bf16.msrb.mxu3 %v3774_v5  ;;  %2153 = vmatpush.bf16.msrb.mxu0 %v3626_v10  ;;  %v3614_v40 = vor.u32 %v4192_v26, %v3611_v29  ;;  %v1612_v5 = vor.u32 1.1754944e-38, %v1611_v4  ;;  %v4220_v4 = vld [vmem:[%s6579_s8 + $0x16c] sm:$0xf]  ;;  %v3577_v60 = vld [vmem:[%s6579_s8 + $0x48] sm:$0xf] }
 0x41d   :  { %4353 = vrcp.f32 %v5723_v48  ;;  %v1564_v52 = vmul.f32 %v4348_v7, %v1563_v38  ;;  %v1572_v54 = vmul.f32 %v5728_v46, %v5659_v8  ;;  %v4196_v7 = vld [vmem:[%s6579_s8 + $0xac] sm:$0xf]  ;;  %v1625_v2 = vand.u32 2147483647, %v5723_v48  ;;  %vm5807_vm12 = vmor %vm1605_vm11, %vm1606_vm9  ;;  %2173 = vmatpush.bf16.msrb.mxu1 %v3738_v1  ;;  %v4218_v6 = vld [vmem:[%s6579_s8 + $0x154] sm:$0xf0] }
 0x41e   :  { %v1602_v58 = vsub.f32 1.0, %v1601_v47  ;;  %v3630_v17 = vor.u32 %v4196_v7, %v3627_v14  ;;  %v1589_v47 = vmul.f32 %v5652_v59, %v5402_v24  ;;  %vm1621_vm0 = vweird.f32 %v5723_v48  ;;  %v3707_v26 = vld [vmem:[%s6579_s8 + $0x158] sm:$0xf0]  ;;  %v3561_v29 = vld [vmem:[%s6579_s8 + $0x28] sm:$0xf] }
 0x41f   :  { %v1565_v18 = vmul.f32 %v1564_v52, %v5592_v0  ;;  %v1573_v9 = vmul.f32 %v5728_v46, %v1572_v54  ;;  %v4190_v52 = vld [vmem:[%s6579_s8 + $0x74] sm:$0xf0]  ;;  %v1627_v54 = vand.u32 2147483648, %v5723_v48  ;;  %vm5859_vm15 = vcmp.eq.f32.partialorder %v1625_v2, 8.507059e+37  ;;  %v3705_v2 = vld [vmem:[%s6579_s8 + $0x148] sm:$0xf] }
 0x420   :  { %v1603_v39 = vmul.f32 %v5721_v37, %v1602_v58  ;;  %2191 = vmatpush.bf16.msrb.mxu2 %v3630_v17  ;;  %2210 = vmatpush.bf16.msrb.mxu3 %v3758_v20  ;;  %v1591_v58 = vmul.f32 %v5652_v59, %v5411_v28  ;;  %v3594_v27 = vor.u32 %v4190_v52, %v3593_v51  ;;  %v4184_v20 = vld [vmem:[%s6579_s8 + $0x4c] sm:$0xf] }
 0x421   :  { %v1567_v12 = vsel %vm1566_vm6, %v5592_v0, %v1565_v18  ;;  %v1574_v19 = vmul.f32 0.5, %v1573_v9  ;;  %v4224_v0 = vld [vmem:[%s6579_s8 + $0x18c] sm:$0xf]  ;;  %2154 = vmatpush.bf16.msrb.mxu0 %v3610_v22  ;;  %v3722_v28 = vor.u32 %v4222_v55, %v3721_v3  ;;  %v3723_v9 = vld [vmem:[%s6579_s8 + $0x178] sm:$0xf0]  ;;  %v1628_v16 = vor.u32 1.1754944e-38, %v1627_v54 }
 0x422   :  { %v1570_v63 = vsel %vm1568_vm7, %v1569_v53, %v1567_v12  ;;  %v1604_v49 = vadd.f32 %v5721_v37, %v1603_v39  ;;  %v3742_v50 = vor.u32 %v4224_v0, %v3739_v41  ;;  %v3726_v17 = vor.u32 %v4220_v4, %v3723_v9  ;;  %v3579_v22 = vld [vmem:[%s6579_s8 + $0x58] sm:$0xf0]  ;;  %v3689_v41 = vld [vmem:[%s6579_s8 + $0x128] sm:$0xf]  ;;  %v4212_v3 = vld [vmem:[%s6579_s8 + $0x12c] sm:$0xf] }
 0x423   :  { %v5800_v30 = vpop.eup %4353  ;;  %v5802_v31 = vadd.f32 1e-06, %v1570_v63  ;;  %v1575_v32 = vsub.f32 1.5, %v1574_v19  ;;  %2174 = vmatpush.bf16.msrb.mxu1 %v3722_v28  ;;  %v3578_v19 = vor.u32 %v4186_v61, %v3577_v60  ;;  %v3582_v1 = vor.u32 %v4184_v20, %v3579_v22  ;;  %v4210_v28 = vld [vmem:[%s6579_s8 + $0x114] sm:$0xf0] }
 0x424   :  { %v1617_v35 = vmul.f32 %v5800_v30, %v5723_v48  ;;  %v1608_v53 = vsel %vm5807_vm12, %v5721_v37, %v1604_v49  ;;  %v4188_v37 = vld [vmem:[%s6579_s8 + $0x6c] sm:$0xf]  ;;  %2192 = vmatpush.bf16.msrb.mxu2 %v3614_v40  ;;  %vm1622_vm14 = vweird.f32 %v5800_v30  ;;  %2211 = vmatpush.bf16.msrb.mxu3 %v3742_v50  ;;  %v3706_v49 = vor.u32 %v4218_v6, %v3705_v2  ;;  %v4182_v40 = vld [vmem:[%s6579_s8 + $0x34] sm:$0xf0]  ;;  %v3675_v6 = vld [vmem:[%s6579_s8 + $0x118] sm:$0xf0] }
 0x425   :  { %4355 = vrcp.f32 %v5802_v31  ;;  %v1576_v24 = vmul.f32 %v5728_v46, %v1575_v32  ;;  %v3595_v46 = vld [vmem:[%s6579_s8 + $0x78] sm:$0xf0]  ;;  %v1613_v10 = vsel %vm1610_vm13, %v1612_v5, %v1608_v53  ;;  %2155 = vmatpush.bf16.msrb.mxu0 %v3594_v27  ;;  %vm5897_vm1 = vmor %vm1621_vm0, %vm1622_vm14  ;;  %v3562_v54 = vor.u32 %v4182_v40, %v3561_v29  ;;  %v3673_v27 = vld [vmem:[%s6579_s8 + $0x108] sm:$0xf] }
 0x426   :  { %v1618_v7 = vsub.f32 1.0, %v1617_v35  ;;  %v3598_v39 = vor.u32 %v4188_v37, %v3595_v46  ;;  %v1614_v48 = vmul.f32 %v1613_v10, %v1588_v42  ;;  %v1615_v32 = vmul.f32 %v1613_v10, %v1589_v47  ;;  %v4214_v42 = vld [vmem:[%s6579_s8 + $0x134] sm:$0xf0]  ;;  %v4180_v47 = vld [vmem:[%s6579_s8 + $0x2c] sm:$0xf] }
 0x427   :  { %v1577_v18 = vmul.f32 %v1576_v24, %v5659_v8  ;;  %v3563_v35 = vld [vmem:[%s6579_s8 + $0x38] sm:$0xf0]  ;;  %2175 = vmatpush.bf16.msrb.mxu1 %v3706_v49  ;;  %v3690_v55 = vor.u32 %v4214_v42, %v3689_v41  ;;  %v4176_v10 = vld [vmem:[%s6579_s8 + $0xc] sm:$0xf]  ;;  %vm1637_vm3 = vweird.f32 %v5802_v31  ;;  %v1594_v29 = vmul.f32 %v5648_v56, %v5427_v43 }
 0x428   :  { %v1619_v11 = vmul.f32 %v5800_v30, %v1618_v7  ;;  %2193 = vmatpush.bf16.msrb.mxu2 %v3598_v39  ;;  %2212 = vmatpush.bf16.msrb.mxu3 %v3726_v17  ;;  %v3691_v24 = vld [vmem:[%s6579_s8 + $0x138] sm:$0xf0]  ;;  %v5937_v53 = vadd.f32 %v5686_v62, %v1614_v48  ;;  %v3566_v5 = vor.u32 %v4180_v47, %v3563_v35  ;;  %v4208_v2 = vld [vmem:[%s6579_s8 + $0x10c] sm:$0xf]  ;;  %v4252_v35 = vld [vmem:[%s6581_s10 + $0x64] sm:$0xf0] }
 0x429   :  { %v1579_v15 = vsel %vm1578_vm8, %v5659_v8, %v1577_v18  ;;  %v4216_v8 = vld [vmem:[%s6579_s8 + $0x14c] sm:$0xf]  ;;  %2156 = vmatpush.bf16.msrb.mxu0 %v3578_v19  ;;  %v5949_v37 = vadd.f32 %v5688_v44, %v1615_v32  ;;  %v3694_v4 = vor.u32 %v4212_v3, %v3691_v24  ;;  %v3674_v39 = vor.u32 %v4210_v28, %v3673_v27  ;;  %v3905_v3 = vld [vmem:[%s6581_s10 + $0xe0] sm:$0xf]  ;;  %v4248_v27 = vld [vmem:[%s6581_s10 + $0x44] sm:$0xf0] }
 0x42a   :  { %v1582_v13 = vsel %vm1580_vm10, %v1581_v33, %v1579_v15  ;;  %v1620_v12 = vadd.f32 %v5800_v30, %v1619_v11  ;;  %v3710_v38 = vor.u32 %v4216_v8, %v3707_v26  ;;  %v3547_v11 = vld [vmem:[%s6579_s8 + $0x18] sm:$0xf0]  ;;  %v3678_v22 = vor.u32 %v4208_v2, %v3675_v6  ;;  %v3881_v6 = vld [vmem:[%s6581_s10 + $0xb0] sm:$0xf] }
 0x42b   :  { %v5891_v23 = vpop.eup %4355  ;;  %v5893_v25 = vadd.f32 1e-06, %v1582_v13  ;;  %2176 = vmatpush.bf16.msrb.mxu1 %v3690_v55  ;;  %v3550_v17 = vor.u32 %v4176_v10, %v3547_v11  ;;  %v1641_v13 = vand.u32 2147483647, %v5802_v31  ;;  %v3833_v55 = vld [vmem:[%s6581_s10 + $0x50] sm:$0xf] }
 0x42c   :  { %v1624_v0 = vsel %vm5897_vm1, %v5800_v30, %v1620_v12  ;;  %v1633_v33 = vmul.f32 %v5891_v23, %v5802_v31  ;;  %2194 = vmatpush.bf16.msrb.mxu2 %v3582_v1  ;;  %2213 = vmatpush.bf16.msrb.mxu3 %v3710_v38  ;;  %vm1638_vm2 = vweird.f32 %v5891_v23  ;;  %v1592_v1 = vmul.f32 %v5648_v56, %v5418_v34  ;;  %v3817_v11 = vld [vmem:[%s6581_s10 + $0x30] sm:$0xf] }
 0x42d   :  { %4357 = vrcp.f32 %v5893_v25  ;;  %v1629_v30 = vsel %vm5859_vm15, %v1628_v16, %v1624_v0  ;;  %2157 = vmatpush.bf16.msrb.mxu0 %v3562_v54  ;;  %v1643_v16 = vand.u32 2147483648, %v5802_v31  ;;  %vm1639_vm4 = vmor %vm1637_vm3, %vm1638_vm2  ;;  %v1659_v48 = vand.u32 2147483648, %v5893_v25  ;;  %v4268_v54 = vld [vmem:[%s6581_s10 + $0xe4] sm:$0xf0] }
 0x42e   :  { %v1630_v50 = vmul.f32 %v1629_v30, %v1590_v57  ;;  %v1631_v51 = vmul.f32 %v1629_v30, %v1591_v58  ;;  %v1634_v52 = vsub.f32 1.0, %v1633_v33  ;;  %v3545_v57 = vld [vmem:[%s6579_s8 + $0x8] sm:$0xf]  ;;  %v4178_v58 = vld [vmem:[%s6579_s8 + $0x14] sm:$0xf0]  ;;  %vm1642_vm5 = vcmp.eq.f32.partialorder %v1641_v13, 8.507059e+37 }
 0x42f   :  { %v3546_v9 = vor.u32 %v4178_v58, %v3545_v57  ;;  %v1644_v8 = vor.u32 1.1754944e-38, %v1643_v16  ;;  %2177 = vmatpush.bf16.msrb.mxu1 %v3674_v39  ;;  %v1657_v63 = vand.u32 2147483647, %v5893_v25  ;;  %vm1653_vm7 = vweird.f32 %v5893_v25  ;;  %v4254_v30 = vld [vmem:[%s6581_s10 + $0x74] sm:$0xf0] }
 0x430   :  { %v5946_v7 = vadd.f32 %v5686_v62, %v1630_v50  ;;  %v5952_v46 = vadd.f32 %v5688_v44, %v1631_v51  ;;  %v1635_v18 = vmul.f32 %v5891_v23, %v1634_v52  ;;  %2195 = vmatpush.bf16.msrb.mxu2 %v3566_v5  ;;  %2214 = vmatpush.bf16.msrb.mxu3 %v3694_v4  ;;  %v1660_v32 = vor.u32 1.1754944e-38, %v1659_v48  ;;  %v3913_v50 = vld [vmem:[%s6581_s10 + $0xf0] sm:$0xf]  ;;  %v4270_v51 = vld [vmem:[%s6581_s10 + $0xf4] sm:$0xf0] }
 0x431   :  { %2158 = vmatpush.bf16.msrb.mxu0 %v3546_v9  ;;  %v1595_v0 = vmul.f32 %v5652_v59, %v5429_v45  ;;  %vm1658_vm9 = vcmp.eq.f32.partialorder %v1657_v63, 8.507059e+37  ;;  %v3914_v52 = vor.u32 %v4270_v51, %v3913_v50  ;;  %v4250_v5 = vld [vmem:[%s6581_s10 + $0x54] sm:$0xf0]  ;;  %v3906_v57 = vor.u32 %v4268_v54, %v3905_v3  ;;  %v3897_v4 = vld [vmem:[%s6581_s10 + $0xd0] sm:$0xf] }
 0x432   :  { %v5969_v14 = vpack.c.bf16 %v5946_v7, %v5937_v53  ;;  %v5973_v60 = vpack.c.bf16 %v5952_v46, %v5949_v37  ;;  %v1636_v61 = vadd.f32 %v5891_v23, %v1635_v18  ;;  %v3834_v58 = vor.u32 %v4250_v5, %v3833_v55  ;;  %v3825_v18 = vld [vmem:[%s6581_s10 + $0x40] sm:$0xf]  ;;  %v4266_v9 = vld [vmem:[%s6581_s10 + $0xd4] sm:$0xf0]  ;;  %v4260_v48 = vld [vmem:[%s6581_s10 + $0xa4] sm:$0xf0] }
 0x433   :  { %v4358_v15 = vpop.eup %4357  ;;  %v3826_v28 = vor.u32 %v4248_v27, %v3825_v18  ;;  %v3898_v10 = vor.u32 %v4266_v9, %v3897_v4  ;;  %v3809_v39 = vld [vmem:[%s6581_s10 + $0x20] sm:$0xf]  ;;  %v4262_v13 = vld [vmem:[%s6581_s10 + $0xb4] sm:$0xf0]  ;;  %v4041_v50 = vld [vmem:[%s6581_s10 + $0x1f0] sm:$0xf] }
 0x434   :  { %2083 = vmatmul.bf16.vlgmr.msra.gmra.mxu0 %v5969_v14  ;;  %2102 = vmatmul.bf16.vlgmr.msra.gmra.mxu1 %v5973_v60  ;;  %v1649_v12 = vmul.f32 %v4358_v15, %v5893_v25  ;;  %v1640_v19 = vsel %vm1639_vm4, %v5891_v23, %v1636_v61  ;;  %vm1654_vm6 = vweird.f32 %v4358_v15  ;;  %v1593_v23 = vmul.f32 %v5652_v59, %v5420_v36  ;;  %v3889_v61 = vld [vmem:[%s6581_s10 + $0xc0] sm:$0xf]  ;;  %v4302_v51 = vld [vmem:[%s6581_s10 + $0x1f4] sm:$0xf0]  ;;  %v3961_v55 = vld [vmem:[%s6581_s10 + $0x150] sm:$0xf] }
 0x435   :  { %2121 = vmatmul.bf16.vlgmr.msra.gmra.mxu2 %v5969_v14  ;;  %2140 = vmatmul.bf16.vlgmr.msra.gmra.mxu3 %v5973_v60  ;;  %v1645_v49 = vsel %vm1642_vm5, %v1644_v8, %v1640_v19  ;;  %vm1655_vm8 = vmor %vm1653_vm7, %vm1654_vm6  ;;  %v3801_v19 = vld [vmem:[%s6581_s10 + $0x10] sm:$0xf]  ;;  %v3873_v8 = vld [vmem:[%s6581_s10 + $0xa0] sm:$0xf]  ;;  %v4042_v3 = vor.u32 %v4302_v51, %v4041_v50 }
 0x436   :  { %v1650_v20 = vsub.f32 1.0, %v1649_v12  ;;  %2196 = vmatpush.bf16.msrb.mxu2 %v3550_v17  ;;  %2215 = vmatpush.bf16.msrb.mxu3 %v3678_v22  ;;  %v1646_v33 = vmul.f32 %v1645_v49, %v1592_v1  ;;  %v1647_v40 = vmul.f32 %v1645_v49, %v1593_v23  ;;  %v4244_v17 = vld [vmem:[%s6581_s10 + $0x24] sm:$0xf0]  ;;  %v3882_v12 = vor.u32 %v4262_v13, %v3881_v6  ;;  %v3793_v63 = vld [vmem:[%s6581_s10] sm:$0xf] }
 0x437   :  { %2660 = vmatpush.bf16.msra.mxu1 %v3914_v52  ;;  %v3810_v2 = vor.u32 %v4244_v17, %v3809_v39  ;;  %v4240_v49 = vld [vmem:[%s6581_s10 + $0x4] sm:$0xf0]  ;;  %v3865_v23 = vld [vmem:[%s6581_s10 + $0x90] sm:$0xf]  ;;  %v4269_v52 = vld [vmem:[%s6581_s10 + $0xf4] sm:$0xf] }
 0x438   :  { %v1651_v31 = vmul.f32 %v4358_v15, %v1650_v20  ;;  %v6006_v36 = vadd.f32 %v5686_v62, %v1646_v33  ;;  %v6012_v43 = vadd.f32 %v5688_v44, %v1647_v40  ;;  %v4242_v20 = vld [vmem:[%s6581_s10 + $0x14] sm:$0xf0]  ;;  %v3794_v1 = vor.u32 %v4240_v49, %v3793_v63  ;;  %v4253_v33 = vld [vmem:[%s6581_s10 + $0x74] sm:$0xf]  ;;  %v3851_v40 = vld [vmem:[%s6581_s10 + $0x78] sm:$0xf0] }
 0x439   :  { %v3802_v22 = vor.u32 %v4242_v20, %v3801_v19  ;;  %v4282_v5 = vld [vmem:[%s6581_s10 + $0x154] sm:$0xf0]  ;;  %v3835_v18 = vld [vmem:[%s6581_s10 + $0x58] sm:$0xf0]  ;;  %v4300_v4 = vld [vmem:[%s6581_s10 + $0x1e4] sm:$0xf0] }
 0x43a   :  { %v1652_v26 = vadd.f32 %v4358_v15, %v1651_v31  ;;  %v3874_v31 = vor.u32 %v4260_v48, %v3873_v8  ;;  %2698 = vmatpush.bf16.msra.mxu3 %v4042_v3  ;;  %v4267_v9 = vld [vmem:[%s6581_s10 + $0xe4] sm:$0xf]  ;;  %v3827_v17 = vld [vmem:[%s6581_s10 + $0x48] sm:$0xf0]  ;;  %v4025_v6 = vld [vmem:[%s6581_s10 + $0x1d0] sm:$0xf] }
 0x43b   :  { %2661 = vmatpush.bf16.msra.mxu1 %v3906_v57  ;;  %v4249_v57 = vld [vmem:[%s6581_s10 + $0x54] sm:$0xf]  ;;  %v4298_v13 = vld [vmem:[%s6581_s10 + $0x1d4] sm:$0xf0]  ;;  %v3899_v8 = vld [vmem:[%s6581_s10 + $0xd8] sm:$0xf0] }
 0x43c   :  { %v1656_v38 = vsel %vm1655_vm8, %v4358_v15, %v1652_v26  ;;  %v4264_v15 = vld [vmem:[%s6581_s10 + $0xc4] sm:$0xf0]  ;;  %v4258_v26 = vld [vmem:[%s6581_s10 + $0x94] sm:$0xf0]  ;;  %v3838_v27 = vor.u32 %v4249_v57, %v3835_v18  ;;  %v3945_v63 = vld [vmem:[%s6581_s10 + $0x130] sm:$0xf] }
 0x43d   :  { %v1661_v34 = vsel %vm1658_vm9, %v1660_v32, %v1656_v38  ;;  %v3890_v16 = vor.u32 %v4264_v15, %v3889_v61  ;;  %v4286_v32 = vld [vmem:[%s6581_s10 + $0x174] sm:$0xf0]  ;;  %v4280_v61 = vld [vmem:[%s6581_s10 + $0x144] sm:$0xf0]  ;;  %v4247_v15 = vld [vmem:[%s6581_s10 + $0x44] sm:$0xf] }
 0x43e   :  { %v1662_v41 = vmul.f32 %v1661_v34, %v1594_v29  ;;  %v1663_v42 = vmul.f32 %v1661_v34, %v1595_v0  ;;  %v3866_v29 = vor.u32 %v4258_v26, %v3865_v23  ;;  %v3977_v0 = vld [vmem:[%s6581_s10 + $0x170] sm:$0xf]  ;;  %v3854_v34 = vor.u32 %v4253_v33, %v3851_v40  ;;  %v4278_v49 = vld [vmem:[%s6581_s10 + $0x134] sm:$0xf0]  ;;  %v4245_v23 = vld [vmem:[%s6581_s10 + $0x34] sm:$0xf] }
 0x43f   :  { %2662 = vmatpush.bf16.msra.mxu1 %v3898_v10  ;;  %v3978_v38 = vor.u32 %v4286_v32, %v3977_v0  ;;  %v3819_v26 = vld [vmem:[%s6581_s10 + $0x38] sm:$0xf0]  ;;  %v4017_v0 = vld [vmem:[%s6581_s10 + $0x1c0] sm:$0xf]  ;;  %v4296_v32 = vld [vmem:[%s6581_s10 + $0x1c4] sm:$0xf0] }
 0x440   :  { %v6009_v25 = vadd.f32 %v5686_v62, %v1662_v41  ;;  %v6015_v45 = vadd.f32 %v5688_v44, %v1663_v42  ;;  %v3849_v62 = vld [vmem:[%s6581_s10 + $0x70] sm:$0xf]  ;;  %v3841_v44 = vld [vmem:[%s6581_s10 + $0x60] sm:$0xf]  ;;  %v4256_v42 = vld [vmem:[%s6581_s10 + $0x84] sm:$0xf0] }
 0x441   :  { %v3850_v47 = vor.u32 %v4254_v30, %v3849_v62  ;;  %v3842_v24 = vor.u32 %v4252_v35, %v3841_v44  ;;  %v3857_v41 = vld [vmem:[%s6581_s10 + $0x80] sm:$0xf]  ;;  %2679 = vmatpush.bf16.msra.mxu2 %v3978_v38  ;;  %v4284_v62 = vld [vmem:[%s6581_s10 + $0x164] sm:$0xf0]  ;;  %v4251_v30 = vld [vmem:[%s6581_s10 + $0x64] sm:$0xf]  ;;  %v4018_v38 = vor.u32 %v4296_v32, %v4017_v0 }
 0x442   :  { %v1679_v56 = vpack.c.bf16 %v6009_v25, %v6006_v36  ;;  %v1680_v59 = vpack.c.bf16 %v6015_v45, %v6012_v43  ;;  %v4263_v33 = vld [vmem:[%s6581_s10 + $0xc4] sm:$0xf]  ;;  %v3891_v40 = vld [vmem:[%s6581_s10 + $0xc8] sm:$0xf0]  ;;  %v4009_v50 = vld [vmem:[%s6581_s10 + $0x1b0] sm:$0xf] }
 0x443   :  { %2641 = vmatpush.bf16.msra.mxu0 %v3850_v47  ;;  %2663 = vmatpush.bf16.msra.mxu1 %v3890_v16  ;;  %v3843_v47 = vld [vmem:[%s6581_s10 + $0x68] sm:$0xf0]  ;;  %v6193_v16 = vld [vmem:[%s6580_s9] sm:$0xf]  ;;  %v4294_v51 = vld [vmem:[%s6581_s10 + $0x1b4] sm:$0xf0] }
 0x444   :  { %2088 = vmatmul.bf16.gmra.mxu0 %v1679_v56  ;;  %2107 = vmatmul.bf16.gmra.mxu1 %v1680_v59  ;;  %v3846_v35 = vor.u32 %v4251_v30, %v3843_v47  ;;  %v6211_v48 = vperm.slane %v6193_v16, 0  ;;  %v3811_v30 = vld [vmem:[%s6581_s10 + $0x28] sm:$0xf0]  ;;  %v6260_v3 = vperm.slane %v6193_v16, 1  ;;  %v4257_v0 = vld [vmem:[%s6581_s10 + $0x94] sm:$0xf] }
 0x445   :  { %2126 = vmatmul.bf16.gmra.mxu2 %v1679_v56  ;;  %2145 = vmatmul.bf16.gmra.mxu3 %v1680_v59 }
 0x447   :  { %2642 = vmatpush.bf16.msra.mxu0 %v3842_v24  ;;  %2664 = vmatpush.bf16.msra.mxu1 %v3882_v12  ;;  %v3915_v24 = vld [vmem:[%s6581_s10 + $0xf8] sm:$0xf0]  ;;  %v4265_v12 = vld [vmem:[%s6581_s10 + $0xd4] sm:$0xf] }
 0x448   :  { %v3918_v54 = vor.u32 %v4269_v52, %v3915_v24  ;;  %v4261_v52 = vld [vmem:[%s6581_s10 + $0xb4] sm:$0xf] }
 0x44b   :  { %2643 = vmatpush.bf16.msra.mxu0 %v3834_v58  ;;  %2665 = vmatpush.bf16.msra.mxu1 %v3874_v31  ;;  %v3962_v58 = vor.u32 %v4282_v5, %v3961_v55  ;;  %v3902_v31 = vor.u32 %v4265_v12, %v3899_v8  ;;  %v4010_v55 = vor.u32 %v4294_v51, %v4009_v50  ;;  %v3883_v5 = vld [vmem:[%s6581_s10 + $0xb8] sm:$0xf0]  ;;  %v4239_v8 = vld [vmem:[%s6581_s10 + $0x4] sm:$0xf] }
 0x44c   :  { %v3886_v18 = vor.u32 %v4261_v52, %v3883_v5  ;;  %v4283_v5 = vld [vmem:[%s6581_s10 + $0x164] sm:$0xf] }
 0x44f   :  { %2644 = vmatpush.bf16.msra.mxu0 %v3826_v28  ;;  %2666 = vmatpush.bf16.msra.mxu1 %v3866_v29  ;;  %v4033_v28 = vld [vmem:[%s6581_s10 + $0x1e0] sm:$0xf]  ;;  %v3822_v29 = vor.u32 %v4245_v23, %v3819_v26  ;;  %v3993_v26 = vld [vmem:[%s6581_s10 + $0x190] sm:$0xf] }
 0x450   :  { %v4034_v10 = vor.u32 %v4300_v4, %v4033_v28  ;;  %v4274_v28 = vld [vmem:[%s6581_s10 + $0x114] sm:$0xf0]  ;;  %v4241_v4 = vld [vmem:[%s6581_s10 + $0x14] sm:$0xf] }
 0x452   :  { %2699 = vmatpush.bf16.msra.mxu3 %v4034_v10  ;;  %v3803_v10 = vld [vmem:[%s6581_s10 + $0x18] sm:$0xf0] }
 0x454   :  { %2159 = vmatmul.bf16.vlgmr.msrb.gmra.mxu0 %v5969_v14  ;;  %2178 = vmatmul.bf16.vlgmr.msrb.gmra.mxu1 %v5973_v60 }
 0x455   :  { %2197 = vmatmul.bf16.vlgmr.msrb.gmra.mxu2 %v5969_v14  ;;  %2216 = vmatmul.bf16.vlgmr.msrb.gmra.mxu3 %v5973_v60  ;;  %v4246_v14 = vld [vmem:[%s6581_s10 + $0x34] sm:$0xf0] }
 0x456   :  { %v3818_v60 = vor.u32 %v4246_v14, %v3817_v11  ;;  %v3907_v11 = vld [vmem:[%s6581_s10 + $0xe8] sm:$0xf0] }
 0x457   :  { %v3910_v14 = vor.u32 %v4267_v9, %v3907_v11 }
 0x458   :  { %2645 = vmatpush.bf16.msra.mxu0 %v3818_v60  ;;  %v3953_v60 = vld [vmem:[%s6581_s10 + $0x140] sm:$0xf] }
 0x459   :  { %v3954_v39 = vor.u32 %v4280_v61, %v3953_v60  ;;  %v4001_v60 = vld [vmem:[%s6581_s10 + $0x1a0] sm:$0xf]  ;;  %v4292_v61 = vld [vmem:[%s6581_s10 + $0x1a4] sm:$0xf0] }
 0x45c   :  { %2646 = vmatpush.bf16.msra.mxu0 %v3810_v2  ;;  %v3830_v2 = vor.u32 %v4247_v15, %v3827_v17  ;;  %v4259_v15 = vld [vmem:[%s6581_s10 + $0xa4] sm:$0xf]  ;;  %v4002_v17 = vor.u32 %v4292_v61, %v4001_v60 }
 0x460   :  { %2647 = vmatpush.bf16.msra.mxu0 %v3802_v22  ;;  %v4026_v22 = vor.u32 %v4298_v13, %v4025_v6 }
 0x462   :  { %2700 = vmatpush.bf16.msra.mxu3 %v4026_v22 }
 0x464   :  { %2164 = vmatmul.bf16.gmra.mxu0 %v1679_v56  ;;  %2183 = vmatmul.bf16.gmra.mxu1 %v1680_v59 }
 0x465   :  { %2202 = vmatmul.bf16.gmra.mxu2 %v1679_v56  ;;  %2221 = vmatmul.bf16.gmra.mxu3 %v1680_v59  ;;  %v3858_v56 = vor.u32 %v4256_v42, %v3857_v41  ;;  %v3969_v59 = vld [vmem:[%s6581_s10 + $0x160] sm:$0xf]  ;;  %v3894_v41 = vor.u32 %v4263_v33, %v3891_v40 }
 0x466   :  { %2648 = vmatpush.bf16.msra.mxu0 %v3794_v1  ;;  %v3970_v44 = vor.u32 %v4284_v62, %v3969_v59  ;;  %v3946_v1 = vor.u32 %v4278_v49, %v3945_v63  ;;  %v3937_v42 = vld [vmem:[%s6581_s10 + $0x120] sm:$0xf]  ;;  %2701 = vmatpush.bf16.msra.mxu3 %v4018_v38  ;;  %v4243_v62 = vld [vmem:[%s6581_s10 + $0x24] sm:$0xf] }
 0x467   :  { %2667 = vmatpush.bf16.msra.mxu1 %v3858_v56  ;;  %v4276_v56 = vld [vmem:[%s6581_s10 + $0x124] sm:$0xf0] }
 0x468   :  { %2680 = vmatpush.bf16.msra.mxu2 %v3970_v44  ;;  %v3938_v59 = vor.u32 %v4276_v56, %v3937_v42  ;;  %v4285_v56 = vld [vmem:[%s6581_s10 + $0x174] sm:$0xf] }
 0x46a   :  { %2717 = vmatpush.bf16.msrb.mxu0 %v3854_v34  ;;  %2702 = vmatpush.bf16.msra.mxu3 %v4010_v55 }
 0x46b   :  { %2736 = vmatpush.bf16.msrb.mxu1 %v3918_v54 }
 0x46c   :  { %2681 = vmatpush.bf16.msra.mxu2 %v3962_v58 }
 0x46e   :  { %2718 = vmatpush.bf16.msrb.mxu0 %v3846_v35  ;;  %v3814_v35 = vor.u32 %v4243_v62, %v3811_v30  ;;  %2703 = vmatpush.bf16.msra.mxu3 %v4002_v17 }
 0x46f   :  { %2737 = vmatpush.bf16.msrb.mxu1 %v3910_v14  ;;  %v3806_v14 = vor.u32 %v4241_v4, %v3803_v10  ;;  %v4301_v4 = vld [vmem:[%s6581_s10 + $0x1f4] sm:$0xf] }
 0x470   :  { %2682 = vmatpush.bf16.msra.mxu2 %v3954_v39 }
 0x472   :  { %2719 = vmatpush.bf16.msrb.mxu0 %v3838_v27  ;;  %v3929_v27 = vld [vmem:[%s6581_s10 + $0x110] sm:$0xf] }
 0x473   :  { %2738 = vmatpush.bf16.msrb.mxu1 %v3902_v31  ;;  %v3930_v9 = vor.u32 %v4274_v28, %v3929_v27  ;;  %v3795_v31 = vld [vmem:[%s6581_s10 + $0x8] sm:$0xf0] }
 0x474   :  { %2683 = vmatpush.bf16.msra.mxu2 %v3946_v1  ;;  %v3798_v23 = vor.u32 %v4239_v8, %v3795_v31  ;;  %v3955_v8 = vld [vmem:[%s6581_s10 + $0x148] sm:$0xf0] }
 0x476   :  { %2720 = vmatpush.bf16.msrb.mxu0 %v3830_v2  ;;  %v3875_v2 = vld [vmem:[%s6581_s10 + $0xa8] sm:$0xf0] }
 0x477   :  { %2739 = vmatpush.bf16.msrb.mxu1 %v3894_v41  ;;  %v3878_v12 = vor.u32 %v4259_v15, %v3875_v2  ;;  %v3867_v41 = vld [vmem:[%s6581_s10 + $0x98] sm:$0xf0]  ;;  %v4281_v15 = vld [vmem:[%s6581_s10 + $0x154] sm:$0xf] }
 0x478   :  { %2684 = vmatpush.bf16.msra.mxu2 %v3938_v59  ;;  %v3870_v42 = vor.u32 %v4257_v0, %v3867_v41  ;;  %v3979_v59 = vld [vmem:[%s6581_s10 + $0x178] sm:$0xf0]  ;;  %v4277_v41 = vld [vmem:[%s6581_s10 + $0x134] sm:$0xf] }
 0x479   :  { %v3982_v30 = vor.u32 %v4285_v56, %v3979_v59  ;;  %v4295_v59 = vld [vmem:[%s6581_s10 + $0x1c4] sm:$0xf] }
 0x47a   :  { %2721 = vmatpush.bf16.msrb.mxu0 %v3822_v29  ;;  %v4290_v29 = vld [vmem:[%s6581_s10 + $0x194] sm:$0xf0] }
 0x47b   :  { %2740 = vmatpush.bf16.msrb.mxu1 %v3886_v18 }
 0x47c   :  { %2685 = vmatpush.bf16.msra.mxu2 %v3930_v9  ;;  %v4043_v9 = vld [vmem:[%s6581_s10 + $0x1f8] sm:$0xf0] }
 0x47e   :  { %2722 = vmatpush.bf16.msrb.mxu0 %v3814_v35  ;;  %v4255_v35 = vld [vmem:[%s6581_s10 + $0x84] sm:$0xf] }
 0x47f   :  { %2741 = vmatpush.bf16.msrb.mxu1 %v3878_v12 }
 0x482   :  { %2723 = vmatpush.bf16.msrb.mxu0 %v3806_v14  ;;  %v4046_v14 = vor.u32 %v4301_v4, %v4043_v9  ;;  %v3931_v9 = vld [vmem:[%s6581_s10 + $0x118] sm:$0xf0] }
 0x483   :  { %2742 = vmatpush.bf16.msrb.mxu1 %v3870_v42  ;;  %v3947_v42 = vld [vmem:[%s6581_s10 + $0x138] sm:$0xf0] }
 0x486   :  { %2724 = vmatpush.bf16.msrb.mxu0 %v3798_v23 }
 0x4b1   :  { %v2084_v19 = vpop.f32.mrf.mxu0  ;;  %v2103_v20 = vpop.f32.mrf.mxu1 }
 0x4b2   :  { %v2085_v34 = vadd.f32 %v2084_v19, %v6211_v48  ;;  %v3921_v19 = vld [vmem:[%s6581_s10 + $0x100] sm:$0xf] }
 0x4b4   :  { %v2104_v57 = vadd.f32 %v2103_v20, %v2085_v34  ;;  %v4272_v20 = vld [vmem:[%s6581_s10 + $0x104] sm:$0xf0]  ;;  %v3994_v34 = vor.u32 %v4290_v29, %v3993_v26  ;;  %v4297_v26 = vld [vmem:[%s6581_s10 + $0x1d4] sm:$0xf]  ;;  %v4027_v29 = vld [vmem:[%s6581_s10 + $0x1d8] sm:$0xf0] }
 0x4b5   :  { %v3922_v22 = vor.u32 %v4272_v20, %v3921_v19 }
 0x4b6   :  { %v2227_v6 = vmax.f32 %v2104_v57, 0.0  ;;  %2704 = vmatpush.bf16.msra.mxu3 %v3994_v34  ;;  %v3971_v57 = vld [vmem:[%s6581_s10 + $0x168] sm:$0xf0]  ;;  %v6383_v34 = vperm.slane %v6193_v16, 2 }
 0x4b7   :  { %2686 = vmatpush.bf16.msra.mxu2 %v3922_v22  ;;  %v3974_v18 = vor.u32 %v4283_v5, %v3971_v57  ;;  %v4279_v22 = vld [vmem:[%s6581_s10 + $0x144] sm:$0xf]  ;;  %v4293_v57 = vld [vmem:[%s6581_s10 + $0x1b4] sm:$0xf] }
 0x4b8   :  { %v2122_v44 = vpop.f32.mrf.mxu2  ;;  %v2141_v47 = vpop.f32.mrf.mxu3  ;;  %v3958_v31 = vor.u32 %v4279_v22, %v3955_v8 }
 0x4b9   :  { %v2086_v24 = vpop.f32.mrf.mxu0  ;;  %v2105_v54 = vpop.f32.mrf.mxu1  ;;  %v2123_v39 = vadd.f32 %v2122_v44, %v6260_v3  ;;  %v3985_v44 = vld [vmem:[%s6581_s10 + $0x180] sm:$0xf] }
 0x4ba   :  { %v2087_v58 = vadd.f32 %v2086_v24, %v6211_v48  ;;  %v3859_v24 = vld [vmem:[%s6581_s10 + $0x88] sm:$0xf0] }
 0x4bb   :  { %v2142_v32 = vadd.f32 %v2141_v47, %v2123_v39  ;;  %v4288_v47 = vld [vmem:[%s6581_s10 + $0x184] sm:$0xf0]  ;;  %2755 = vmatpush.bf16.msrb.mxu2 %v3982_v30  ;;  %v3862_v55 = vor.u32 %v4255_v35, %v3859_v24  ;;  %v3963_v39 = vld [vmem:[%s6581_s10 + $0x158] sm:$0xf0] }
 0x4bc   :  { %v2106_v11 = vadd.f32 %v2105_v54, %v2087_v58  ;;  %v3986_v52 = vor.u32 %v4288_v47, %v3985_v44  ;;  %v3966_v17 = vor.u32 %v4281_v15, %v3963_v39  ;;  %v4271_v15 = vld [vmem:[%s6581_s10 + $0x104] sm:$0xf]  ;;  %v3923_v39 = vld [vmem:[%s6581_s10 + $0x108] sm:$0xf0] }
 0x4bd   :  { %v2228_v50 = vmax.f32 %v2142_v32, 0.0  ;;  %2743 = vmatpush.bf16.msrb.mxu1 %v3862_v55 }
 0x4be   :  { %v2231_v13 = vmax.f32 %v2106_v11, 0.0  ;;  %2705 = vmatpush.bf16.msra.mxu3 %v3986_v52 }
 0x4bf   :  { %2756 = vmatpush.bf16.msrb.mxu2 %v3974_v18  ;;  %v4011_v18 = vld [vmem:[%s6581_s10 + $0x1b8] sm:$0xf0] }
 0x4c0   :  { %v6303_v63 = vpack.c.bf16 %v2231_v13, %v2227_v6  ;;  %v2124_v49 = vpop.f32.mrf.mxu2  ;;  %v2143_v1 = vpop.f32.mrf.mxu3  ;;  %v4299_v6 = vld [vmem:[%s6581_s10 + $0x1e4] sm:$0xf]  ;;  %v4035_v13 = vld [vmem:[%s6581_s10 + $0x1e8] sm:$0xf0]  ;;  %v4014_v4 = vor.u32 %v4293_v57, %v4011_v18 }
 0x4c1   :  { %v2125_v33 = vadd.f32 %v2124_v49, %v6260_v3  ;;  %v2089_v38 = vpop.f32.mrf.mxu0  ;;  %v2108_v40 = vpop.f32.mrf.mxu1  ;;  %v4038_v12 = vor.u32 %v4299_v6, %v4035_v13  ;;  %v4289_v6 = vld [vmem:[%s6581_s10 + $0x194] sm:$0xf]  ;;  %v3995_v13 = vld [vmem:[%s6581_s10 + $0x198] sm:$0xf0] }
 0x4c2   :  { %2649 = vmatmul.bf16.vlgmr.msra.gmra.mxu0 %v6303_v63  ;;  %v2090_v54 = vadd.f32 %v2089_v38, %v6211_v48  ;;  %2774 = vmatpush.bf16.msrb.mxu3 %v4046_v14  ;;  %v3998_v22 = vor.u32 %v4289_v6, %v3995_v13 }
 0x4c3   :  { %v2144_v62 = vadd.f32 %v2143_v1, %v2125_v33  ;;  %2757 = vmatpush.bf16.msrb.mxu2 %v3966_v17 }
 0x4c4   :  { %v2109_v60 = vadd.f32 %v2108_v40, %v2090_v54  ;;  %v4030_v40 = vor.u32 %v4297_v26, %v4027_v29  ;;  %v6408_v54 = vperm.slane %v6193_v16, 3  ;;  %v4273_v16 = vld [vmem:[%s6581_s10 + $0x114] sm:$0xf] }
 0x4c5   :  { %v2232_v51 = vmax.f32 %v2144_v62, 0.0  ;;  %v4019_v62 = vld [vmem:[%s6581_s10 + $0x1c8] sm:$0xf0] }
 0x4c6   :  { %v2235_v19 = vmax.f32 %v2109_v60, 0.0  ;;  %2775 = vmatpush.bf16.msrb.mxu3 %v4038_v12  ;;  %v4022_v47 = vor.u32 %v4295_v59, %v4019_v62  ;;  %v3934_v60 = vor.u32 %v4273_v16, %v3931_v9  ;;  %v3926_v12 = vor.u32 %v4271_v15, %v3923_v39 }
 0x4c7   :  { %v6344_v58 = vpack.c.bf16 %v2232_v51, %v2228_v50  ;;  %2758 = vmatpush.bf16.msrb.mxu2 %v3958_v31  ;;  %v4275_v50 = vld [vmem:[%s6581_s10 + $0x124] sm:$0xf]  ;;  %v3939_v51 = vld [vmem:[%s6581_s10 + $0x128] sm:$0xf0] }
 0x4c8   :  { %v2127_v27 = vpop.f32.mrf.mxu2  ;;  %v2146_v28 = vpop.f32.mrf.mxu3  ;;  %v3942_v24 = vor.u32 %v4275_v50, %v3939_v51 }
 0x4c9   :  { %2668 = vmatmul.bf16.vlgmr.msra.gmra.mxu1 %v6344_v58  ;;  %v2091_v10 = vpop.f32.mrf.mxu0  ;;  %v2110_v11 = vpop.f32.mrf.mxu1 }
 0x4ca   :  { %v2092_v61 = vadd.f32 %v2091_v10, %v6211_v48  ;;  %v2128_v48 = vadd.f32 %v2127_v27, %v6260_v3  ;;  %2776 = vmatpush.bf16.msrb.mxu3 %v4030_v40  ;;  %v4291_v10 = vld [vmem:[%s6581_s10 + $0x1a4] sm:$0xf] }
 0x4cc   :  { %v2111_v2 = vadd.f32 %v2110_v11, %v2092_v61  ;;  %v2147_v0 = vadd.f32 %v2146_v28, %v2128_v48  ;;  %v4003_v61 = vld [vmem:[%s6581_s10 + $0x1a8] sm:$0xf0] }
 0x4cd   :  { %v4006_v17 = vor.u32 %v4291_v10, %v4003_v61 }
 0x4ce   :  { %v2239_v20 = vmax.f32 %v2111_v2, 0.0  ;;  %v2236_v30 = vmax.f32 %v2147_v0, 0.0  ;;  %2777 = vmatpush.bf16.msrb.mxu3 %v4022_v47 }
 0x4d0   :  { %v6373_v49 = vpack.c.bf16 %v2239_v20, %v2235_v19  ;;  %v2129_v1 = vpop.f32.mrf.mxu2  ;;  %v2148_v23 = vpop.f32.mrf.mxu3 }
 0x4d1   :  { %v2130_v32 = vadd.f32 %v2129_v1, %v6260_v3  ;;  %v2160_v33 = vpop.f32.mrf.mxu0  ;;  %v2179_v38 = vpop.f32.mrf.mxu1  ;;  %v3950_v3 = vor.u32 %v4277_v41, %v3947_v42 }
 0x4d2   :  { %2654 = vmatmul.bf16.gmra.mxu0 %v6373_v49  ;;  %v2161_v35 = vadd.f32 %v2160_v33, %v6383_v34  ;;  %2778 = vmatpush.bf16.msrb.mxu3 %v4014_v4  ;;  %v3987_v33 = vld [vmem:[%s6581_s10 + $0x188] sm:$0xf0] }
 0x4d3   :  { %v2149_v56 = vadd.f32 %v2148_v23, %v2130_v32  ;;  %2759 = vmatpush.bf16.msrb.mxu2 %v3950_v3  ;;  %v4287_v32 = vld [vmem:[%s6581_s10 + $0x184] sm:$0xf] }
 0x4d4   :  { %v2180_v11 = vadd.f32 %v2179_v38, %v2161_v35  ;;  %v3990_v40 = vor.u32 %v4287_v32, %v3987_v33 }
 0x4d5   :  { %v2240_v44 = vmax.f32 %v2149_v56, 0.0 }
 0x4d6   :  { %v2229_v19 = vmax.f32 %v2180_v11, 0.0  ;;  %2779 = vmatpush.bf16.msrb.mxu3 %v4006_v17 }
 0x4d7   :  { %v6405_v52 = vpack.c.bf16 %v2240_v44, %v2236_v30  ;;  %2760 = vmatpush.bf16.msrb.mxu2 %v3942_v24 }
 0x4d8   :  { %v2198_v55 = vpop.f32.mrf.mxu2  ;;  %v2217_v5 = vpop.f32.mrf.mxu3 }
 0x4d9   :  { %2673 = vmatmul.bf16.gmra.mxu1 %v6405_v52  ;;  %v2162_v27 = vpop.f32.mrf.mxu0  ;;  %v2181_v28 = vpop.f32.mrf.mxu1  ;;  %v2199_v48 = vadd.f32 %v2198_v55, %v6408_v54 }
 0x4da   :  { %v2163_v14 = vadd.f32 %v2162_v27, %v6383_v34  ;;  %2780 = vmatpush.bf16.msrb.mxu3 %v3998_v22 }
 0x4db   :  { %2761 = vmatpush.bf16.msrb.mxu2 %v3934_v60  ;;  %v2218_v23 = vadd.f32 %v2217_v5, %v2199_v48 }
 0x4dc   :  { %v2182_v2 = vadd.f32 %v2181_v28, %v2163_v14 }
 0x4dd   :  { %v2230_v41 = vmax.f32 %v2218_v23, 0.0 }
 0x4de   :  { %v2233_v20 = vmax.f32 %v2182_v2, 0.0  ;;  %2781 = vmatpush.bf16.msrb.mxu3 %v3990_v40 }
 0x4df   :  { %2762 = vmatpush.bf16.msrb.mxu2 %v3926_v12 }
 0x4e0   :  { %v2245_v8 = vpack.c.bf16 %v2233_v20, %v2229_v19  ;;  %v2200_v31 = vpop.f32.mrf.mxu2  ;;  %v2219_v1 = vpop.f32.mrf.mxu3 }
 0x4e1   :  { %v2201_v26 = vadd.f32 %v2200_v31, %v6408_v54  ;;  %v2165_v29 = vpop.f32.mrf.mxu0  ;;  %v2184_v0 = vpop.f32.mrf.mxu1 }
 0x4e2   :  { %2687 = vmatmul.bf16.vlgmr.msra.gmra.mxu2 %v2245_v8  ;;  %2725 = vmatmul.bf16.vlgmr.msrb.gmra.mxu0 %v6303_v63  ;;  %v2166_v56 = vadd.f32 %v2165_v29, %v6383_v34 }
 0x4e3   :  { %v2220_v38 = vadd.f32 %v2219_v1, %v2201_v26 }
 0x4e4   :  { %v2185_v30 = vadd.f32 %v2184_v0, %v2166_v56 }
 0x4e5   :  { %v2234_v42 = vmax.f32 %v2220_v38, 0.0 }
 0x4e6   :  { %v2237_v51 = vmax.f32 %v2185_v30, 0.0 }
 0x4e7   :  { %v2246_v3 = vpack.c.bf16 %v2234_v42, %v2230_v41 }
 0x4e8   :  { %v2203_v59 = vpop.f32.mrf.mxu2  ;;  %v2222_v62 = vpop.f32.mrf.mxu3 }
 0x4e9   :  { %2706 = vmatmul.bf16.vlgmr.msra.gmra.mxu3 %v2246_v3  ;;  %2744 = vmatmul.bf16.vlgmr.msrb.gmra.mxu1 %v6344_v58  ;;  %v2167_v63 = vpop.f32.mrf.mxu0  ;;  %v2186_v47 = vpop.f32.mrf.mxu1  ;;  %v2204_v50 = vadd.f32 %v2203_v59, %v6408_v54 }
 0x4ea   :  { %v2168_v44 = vadd.f32 %v2167_v63, %v6383_v34 }
 0x4eb   :  { %v2223_v57 = vadd.f32 %v2222_v62, %v2204_v50 }
 0x4ec   :  { %v2187_v35 = vadd.f32 %v2186_v47, %v2168_v44 }
 0x4ed   :  { %v2238_v28 = vmax.f32 %v2223_v57, 0.0 }
 0x4ee   :  { %v2241_v24 = vmax.f32 %v2187_v35, 0.0 }
 0x4f0   :  { %v2249_v55 = vpack.c.bf16 %v2241_v24, %v2237_v51  ;;  %v2205_v5 = vpop.f32.mrf.mxu2  ;;  %v2224_v27 = vpop.f32.mrf.mxu3 }
 0x4f1   :  { %v2206_v18 = vadd.f32 %v2205_v5, %v6408_v54 }
 0x4f2   :  { %2692 = vmatmul.bf16.gmra.mxu2 %v2249_v55  ;;  %2730 = vmatmul.bf16.gmra.mxu0 %v6373_v49 }
 0x4f3   :  { %v2225_v58 = vadd.f32 %v2224_v27, %v2206_v18 }
 0x4f5   :  { %v2242_v4 = vmax.f32 %v2225_v58, 0.0 }
 0x4f7   :  { %v2250_v16 = vpack.c.bf16 %v2242_v4, %v2238_v28 }
 0x4f9   :  { %2711 = vmatmul.bf16.gmra.mxu3 %v2250_v16  ;;  %2749 = vmatmul.bf16.gmra.mxu1 %v6405_v52  ;;  %v2315_v52 = vld [vmem:[%s6582_s11] sm:$0x3] }
 0x4fa   :  { %v2317_v19 = vperm.slane %v2315_v52, 0  ;;  %v2318_v20 = vperm.slane %v2315_v52, 1 }
 0x502   :  { %2763 = vmatmul.bf16.vlgmr.msrb.gmra.mxu2 %v2245_v8 }
 0x509   :  { %2782 = vmatmul.bf16.vlgmr.msrb.gmra.mxu3 %v2246_v3 }
 0x512   :  { %2768 = vmatmul.bf16.gmra.mxu2 %v2249_v55 }
 0x519   :  { %2787 = vmatmul.bf16.gmra.mxu3 %v2250_v16 }
 0x53f   :  { %v2650_v34 = vpop.f32.mrf.mxu0 }
 0x540   :  { %v2651_v8 = vadd.f32 %v2650_v34, %v2317_v19 }
 0x546   :  { %v2669_v9 = vpop.f32.mrf.mxu1 }
 0x547   :  { %v2652_v10 = vpop.f32.mrf.mxu0  ;;  %v2670_v1 = vadd.f32 %v2669_v9, %v2651_v8 }
 0x548   :  { %v2653_v41 = vadd.f32 %v2652_v10, %v2317_v19 }
 0x54e   :  { %v2671_v11 = vpop.f32.mrf.mxu1 }
 0x54f   :  { %v2655_v14 = vpop.f32.mrf.mxu0  ;;  %v2672_v3 = vadd.f32 %v2671_v11, %v2653_v41 }
 0x550   :  { %v2656_v5 = vadd.f32 %v2655_v14, %v2317_v19 }
 0x556   :  { %v2674_v60 = vpop.f32.mrf.mxu1 }
 0x557   :  { %v2657_v15 = vpop.f32.mrf.mxu0  ;;  %v2675_v27 = vadd.f32 %v2674_v60, %v2656_v5 }
 0x55e   :  { %v2676_v2 = vpop.f32.mrf.mxu1 }
 0x55f   :  { %v2726_v48 = vpop.f32.mrf.mxu0 }
 0x560   :  { %v2727_v23 = vadd.f32 %v2726_v48, %v2318_v20 }
 0x565   :  { %v2688_v54 = vpop.f32.mrf.mxu2 }
 0x566   :  { %v2745_v12 = vpop.f32.mrf.mxu1  ;;  %v2689_v29 = vadd.f32 %v2688_v54, %v2670_v1  ;;  %v2658_v54 = vadd.f32 %v2657_v15, %v2317_v19 }
 0x567   :  { %v2728_v26 = vpop.f32.mrf.mxu0  ;;  %v2746_v0 = vadd.f32 %v2745_v12, %v2727_v23 }
 0x568   :  { %v2729_v59 = vadd.f32 %v2728_v26, %v2318_v20  ;;  %v2677_v14 = vadd.f32 %v2676_v2, %v2658_v54 }
 0x56c   :  { %v2707_v61 = vpop.f32.mrf.mxu3 }
 0x56d   :  { %v2690_v49 = vpop.f32.mrf.mxu2  ;;  %v2708_v33 = vadd.f32 %v2707_v61, %v2689_v29 }
 0x56e   :  { %v2747_v32 = vpop.f32.mrf.mxu1  ;;  %v2691_v30 = vadd.f32 %v2690_v49, %v2672_v3 }
 0x56f   :  { %v2793_v62 = vadd.f32 %v2708_v33, %v5937_v53  ;;  %v2748_v44 = vadd.f32 %v2747_v32, %v2729_v59  ;;  %v2731_v35 = vpop.f32.mrf.mxu0 }
 0x570   :  { %v2732_v58 = vadd.f32 %v2731_v35, %v2318_v20 }
 0x574   :  { %v2709_v39 = vpop.f32.mrf.mxu3 }
 0x575   :  { %v2693_v17 = vpop.f32.mrf.mxu2  ;;  %v2710_v50 = vadd.f32 %v2709_v39, %v2691_v30 }
 0x576   :  { %v2750_v24 = vpop.f32.mrf.mxu1  ;;  %v2694_v4 = vadd.f32 %v2693_v17, %v2675_v27 }
 0x577   :  { %v2795_v28 = vadd.f32 %v2710_v50, %v5946_v7  ;;  %v2733_v10 = vpop.f32.mrf.mxu0 }
 0x578   :  { %v2734_v39 = vadd.f32 %v2733_v10, %v2318_v20 }
 0x57c   :  { %v2712_v6 = vpop.f32.mrf.mxu3 }
 0x57d   :  { %v2695_v13 = vpop.f32.mrf.mxu2  ;;  %v2713_v34 = vadd.f32 %v2712_v6, %v2694_v4 }
 0x57e   :  { %v2752_v49 = vpop.f32.mrf.mxu1  ;;  %v2696_v48 = vadd.f32 %v2695_v13, %v2677_v14 }
 0x57f   :  { %v2797_v60 = vadd.f32 %v2713_v34, %v6006_v36 }
 0x584   :  { %v2714_v22 = vpop.f32.mrf.mxu3 }
 0x585   :  { %v2764_v31 = vpop.f32.mrf.mxu2  ;;  %v2715_v12 = vadd.f32 %v2714_v22, %v2696_v48 }
 0x586   :  { %v2765_v38 = vadd.f32 %v2764_v31, %v2746_v0 }
 0x587   :  { %v2799_v1 = vadd.f32 %v2715_v12, %v6009_v25  ;;  %v2801_v12 = vld [vmem:[%s6583_s12] sm:$0x3] }
 0x58c   :  { %v2783_v40 = vpop.f32.mrf.mxu3 }
 0x58d   :  { %v2784_v42 = vadd.f32 %v2783_v40, %v2765_v38  ;;  %v2766_v56 = vpop.f32.mrf.mxu2 }
 0x58e   :  { %v2767_v51 = vadd.f32 %v2766_v56, %v2748_v44 }
 0x58f   :  { %v2794_v63 = vadd.f32 %v2784_v42, %v5949_v37  ;;  %v2751_v37 = vadd.f32 %v2750_v24, %v2732_v58 }
 0x591   :  { %v2803_v47 = vadd.f32 %v2794_v63, %v2793_v62 }
 0x593   :  { %2804 = vadd.xlane.f32.xlu0 %v2803_v47 }
 0x594   :  { %v2785_v55 = vpop.f32.mrf.mxu3 }
 0x595   :  { %v2786_v57 = vadd.f32 %v2785_v55, %v2767_v51  ;;  %v2769_v18 = vpop.f32.mrf.mxu2 }
 0x596   :  { %v2770_v9 = vadd.f32 %v2769_v18, %v2751_v37 }
 0x597   :  { %v2796_v53 = vadd.f32 %v2786_v57, %v5952_v46  ;;  %v2753_v46 = vadd.f32 %v2752_v49, %v2734_v39 }
 0x599   :  { %v2806_v16 = vadd.f32 %v2796_v53, %v2795_v28 }
 0x59b   :  { %2807 = vadd.xlane.f32.xlu1 %v2806_v16 }
 0x59c   :  { %v2788_v11 = vpop.f32.mrf.mxu3 }
 0x59d   :  { %v2789_v61 = vadd.f32 %v2788_v11, %v2770_v9  ;;  %v2771_v7 = vpop.f32.mrf.mxu2 }
 0x59e   :  { %v2772_v8 = vadd.f32 %v2771_v7, %v2753_v46 }
 0x59f   :  { %v2798_v52 = vadd.f32 %v2789_v61, %v6012_v43 }
 0x5a1   :  { %v2809_v17 = vadd.f32 %v2798_v52, %v2797_v60 }
 0x5a3   :  { %2810 = vadd.xlane.f32.xlu2 %v2809_v17 }
 0x5a4   :  { %v2790_v6 = vpop.f32.mrf.mxu3 }
 0x5a5   :  { %v2791_v31 = vadd.f32 %v2790_v6, %v2772_v8 }
 0x5a7   :  { %v2800_v15 = vadd.f32 %v2791_v31, %v6015_v45 }
 0x5a9   :  { %v2812_v19 = vadd.f32 %v2800_v15, %v2799_v1 }
 0x5ab   :  { %2813 = vadd.xlane.f32.xlu0 %v2812_v19 }
 0x606   :  { %v2805_v2 = vpop.xlane.xlu0 %2804 }
 0x607   :  { %v2815_v36 = vmul.f32 %v2805_v2, %v5397_v21  ;;  %v6515_v2 = vperm.slane %v2801_v12, 0 }
 0x609   :  { %v6470_v20 = vsub.f32 %v2793_v62, %v2815_v36  ;;  %v6472_v43 = vsub.f32 %v2794_v63, %v2815_v36 }
 0x60b   :  { %v2827_v13 = vmul.f32 %v6470_v20, %v6470_v20  ;;  %v2828_v22 = vmul.f32 %v6472_v43, %v6472_v43 }
 0x60d   :  { %v2835_v23 = vadd.f32 %v2828_v22, %v2827_v13 }
 0x60e   :  { %v2808_v26 = vpop.xlane.xlu1 %2807 }
 0x60f   :  { %v2816_v25 = vmul.f32 %v2808_v26, %v5397_v21  ;;  %2836 = vadd.xlane.f32.xlu1 %v2835_v23  ;;  %v6519_v23 = vperm.slane %v2801_v12, 1 }
 0x611   :  { %v6479_v45 = vsub.f32 %v2795_v28, %v2816_v25  ;;  %v6481_v29 = vsub.f32 %v2796_v53, %v2816_v25 }
 0x613   :  { %v2829_v0 = vmul.f32 %v6479_v45, %v6479_v45  ;;  %v2830_v32 = vmul.f32 %v6481_v29, %v6481_v29 }
 0x615   :  { %v2838_v33 = vadd.f32 %v2830_v32, %v2829_v0  ;;  %v2802_v0 = vld [vmem:[%s6584_s13] sm:$0x3]  ;;  %s4410_s13 = smov [#allocation3]  }
 0x616   :  { %v2811_v38 = vpop.xlane.xlu2 %2810  ;;  %s3005_s16 = sshll.u32 %s4410_s13, 4  ;;  %s3006_s16 = int_to_ptr.vmem [resolvable:$true] %s3005_s16 }
 0x617   :  { %v2817_v40 = vmul.f32 %v2811_v38, %v5397_v21  ;;  %2839 = vadd.xlane.f32.xlu2 %v2838_v33 }
 0x619   :  { %v6488_v41 = vsub.f32 %v2797_v60, %v2817_v40  ;;  %v6490_v42 = vsub.f32 %v2798_v52, %v2817_v40  ;;  %v2904_v40 = vmul.f32 %v6515_v2, %v6470_v20 }
 0x61b   :  { %v2831_v56 = vmul.f32 %v6488_v41, %v6488_v41  ;;  %v2832_v3 = vmul.f32 %v6490_v42, %v6490_v42 }
 0x61d   :  { %v2841_v59 = vadd.f32 %v2832_v3, %v2831_v56 }
 0x61e   :  { %v2814_v62 = vpop.xlane.xlu0 %2813 }
 0x61f   :  { %v2818_v63 = vmul.f32 %v2814_v62, %v5397_v21  ;;  %2842 = vadd.xlane.f32.xlu0 %v2841_v59  ;;  %v2905_v59 = vmul.f32 %v6519_v23, %v6472_v43 }
 0x621   :  { %v6497_v30 = vsub.f32 %v2799_v1, %v2818_v63  ;;  %v6499_v44 = vsub.f32 %v2800_v15, %v2818_v63 }
 0x623   :  { %v2833_v47 = vmul.f32 %v6497_v30, %v6497_v30  ;;  %v2834_v35 = vmul.f32 %v6499_v44, %v6499_v44 }
 0x625   :  { %v2844_v50 = vadd.f32 %v2834_v35, %v2833_v47  ;;  %v6531_v47 = vperm.slane %v2802_v0, 0 }
 0x627   :  { %2845 = vadd.xlane.f32.xlu1 %v2844_v50 }
 0x682   :  { %v2837_v51 = vpop.xlane.xlu1 %2836 }
 0x683   :  { %v2847_v24 = vmul.f32 0.003921569, %v2837_v51 }
 0x685   :  { %4359 = vrsqrt.f32 %v2847_v24  ;;  %vm2858_vm10 = vcmp.eq.f32.partialorder %v2847_v24, inf  ;;  %v2861_v10 = vand.u32 2147483648, %v2847_v24  ;;  %vm2860_vm11 = vcmp.eq.f32.partialorder %v2847_v24, 0.0 }
 0x68a   :  { %v2840_v55 = vpop.xlane.xlu2 %2839 }
 0x68b   :  { %v4360_v5 = vpop.eup %4359  ;;  %v2848_v57 = vmul.f32 0.003921569, %v2840_v55 }
 0x68c   :  { %v2852_v21 = vmul.f32 %v4360_v5, %v2847_v24 }
 0x68d   :  { %4361 = vrsqrt.f32 %v2848_v57  ;;  %vm2870_vm12 = vcmp.eq.f32.partialorder %v2848_v57, inf  ;;  %v2873_v8 = vand.u32 2147483648, %v2848_v57  ;;  %vm2872_vm13 = vcmp.eq.f32.partialorder %v2848_v57, 0.0 }
 0x68e   :  { %v2853_v18 = vmul.f32 %v4360_v5, %v2852_v21 }
 0x690   :  { %v2854_v27 = vmul.f32 0.5, %v2853_v18 }
 0x692   :  { %v2855_v58 = vsub.f32 1.5, %v2854_v27  ;;  %v2843_v28 = vpop.xlane.xlu0 %2842 }
 0x693   :  { %v4362_v53 = vpop.eup %4361  ;;  %v6505_v4 = vmul.f32 0.003921569, %v2843_v28 }
 0x694   :  { %v2856_v37 = vmul.f32 %v4360_v5, %v2855_v58  ;;  %v2864_v16 = vmul.f32 %v4362_v53, %v2848_v57 }
 0x695   :  { %4363 = vrsqrt.f32 %v6505_v4  ;;  %vm2882_vm0 = vcmp.eq.f32.partialorder %v6505_v4, inf  ;;  %v2885_v50 = vand.u32 2147483648, %v6505_v4  ;;  %vm2884_vm2 = vcmp.eq.f32.partialorder %v6505_v4, 0.0 }
 0x696   :  { %v2857_v34 = vmul.f32 %v2856_v37, %v2847_v24  ;;  %v2865_v9 = vmul.f32 %v4362_v53, %v2864_v16 }
 0x698   :  { %v2859_v11 = vsel %vm2858_vm10, %v2847_v24, %v2857_v34  ;;  %v2866_v54 = vmul.f32 0.5, %v2865_v9 }
 0x699   :  { %v2862_v61 = vsel %vm2860_vm11, %v2861_v10, %v2859_v11 }
 0x69a   :  { %v2912_v49 = vadd.f32 1e-06, %v2862_v61  ;;  %v2867_v14 = vsub.f32 1.5, %v2866_v54  ;;  %v2846_v39 = vpop.xlane.xlu1 %2845 }
 0x69b   :  { %v4364_v60 = vpop.eup %4363  ;;  %v6508_v52 = vmul.f32 0.003921569, %v2846_v39 }
 0x69c   :  { %4365 = vrcp.f32 %v2912_v49  ;;  %v2868_v7 = vmul.f32 %v4362_v53, %v2867_v14  ;;  %v2876_v48 = vmul.f32 %v4364_v60, %v6505_v4  ;;  %v2927_v32 = vand.u32 2147483648, %v2912_v49 }
 0x69d   :  { %4367 = vrsqrt.f32 %v6508_v52  ;;  %v2925_v3 = vand.u32 2147483647, %v2912_v49  ;;  %vm2921_vm15 = vweird.f32 %v2912_v49  ;;  %vm2894_vm4 = vcmp.eq.f32.partialorder %v6508_v52, inf }
 0x69e   :  { %v2869_v46 = vmul.f32 %v2868_v7, %v2848_v57  ;;  %v2877_v17 = vmul.f32 %v4364_v60, %v2876_v48  ;;  %v2928_v51 = vor.u32 1.1754944e-38, %v2927_v32  ;;  %v2897_v54 = vand.u32 2147483648, %v6508_v52 }
 0x69f   :  { %vm2926_vm3 = vcmp.eq.f32.partialorder %v2925_v3, 8.507059e+37  ;;  %vm2896_vm6 = vcmp.eq.f32.partialorder %v6508_v52, 0.0  ;;  %v2906_v48 = vmul.f32 %v6515_v2, %v6479_v45 }
 0x6a0   :  { %v2871_v6 = vsel %vm2870_vm12, %v2848_v57, %v2869_v46  ;;  %v2878_v31 = vmul.f32 0.5, %v2877_v17  ;;  %v6537_v57 = vperm.slane %v2802_v0, 1  ;;  %v2907_v46 = vmul.f32 %v6519_v23, %v6481_v29 }
 0x6a1   :  { %v2874_v15 = vsel %vm2872_vm13, %v2873_v8, %v2871_v6  ;;  %v2909_v0 = vmul.f32 %v6519_v23, %v6490_v42  ;;  %v2910_v42 = vmul.f32 %v6515_v2, %v6497_v30 }
 0x6a2   :  { %v4366_v1 = vpop.eup %4365  ;;  %v6517_v13 = vadd.f32 1e-06, %v2874_v15  ;;  %v2879_v22 = vsub.f32 1.5, %v2878_v31 }
 0x6a3   :  { %v4368_v19 = vpop.eup %4367  ;;  %v2917_v36 = vmul.f32 %v4366_v1, %v2912_v49  ;;  %vm2922_vm14 = vweird.f32 %v4366_v1 }
 0x6a4   :  { %v2888_v26 = vmul.f32 %v4368_v19, %v6508_v52  ;;  %4369 = vrcp.f32 %v6517_v13  ;;  %v2880_v33 = vmul.f32 %v4364_v60, %v2879_v22  ;;  %vm2923_vm1 = vmor %vm2921_vm15, %vm2922_vm14  ;;  %v2941_v11 = vand.u32 2147483647, %v6517_v13 }
 0x6a5   :  { %v2918_v25 = vsub.f32 1.0, %v2917_v36  ;;  %vm2937_vm7 = vweird.f32 %v6517_v13 }
 0x6a6   :  { %v2889_v38 = vmul.f32 %v4368_v19, %v2888_v26  ;;  %v2881_v62 = vmul.f32 %v2880_v33, %v6505_v4  ;;  %vm2942_vm9 = vcmp.eq.f32.partialorder %v2941_v11, 8.507059e+37 }
 0x6a7   :  { %v2919_v56 = vmul.f32 %v4366_v1, %v2918_v25  ;;  %v2908_v25 = vmul.f32 %v6515_v2, %v6488_v41 }
 0x6a8   :  { %v2890_v63 = vmul.f32 0.5, %v2889_v38  ;;  %v2883_v20 = vsel %vm2882_vm0, %v6505_v4, %v2881_v62  ;;  %v2943_v4 = vand.u32 2147483648, %v6517_v13 }
 0x6a9   :  { %v2920_v35 = vadd.f32 %v4366_v1, %v2919_v56  ;;  %v2886_v5 = vsel %vm2884_vm2, %v2885_v50, %v2883_v20 }
 0x6aa   :  { %v2891_v24 = vsub.f32 1.5, %v2890_v63  ;;  %v4370_v55 = vpop.eup %4369  ;;  %v2914_v27 = vadd.f32 1e-06, %v2886_v5  ;;  %v2944_v39 = vor.u32 1.1754944e-38, %v2943_v4 }
 0x6ab   :  { %v2924_v43 = vsel %vm2923_vm1, %v4366_v1, %v2920_v35  ;;  %v2933_v18 = vmul.f32 %v4370_v55, %v6517_v13  ;;  %vm2938_vm5 = vweird.f32 %v4370_v55 }
 0x6ac   :  { %v2929_v21 = vsel %vm2926_vm3, %v2928_v51, %v2924_v43  ;;  %v2892_v53 = vmul.f32 %v4368_v19, %v2891_v24  ;;  %4371 = vrcp.f32 %v2914_v27  ;;  %vm2939_vm8 = vmor %vm2937_vm7, %vm2938_vm5  ;;  %v2959_v1 = vand.u32 2147483648, %v2914_v27 }
 0x6ad   :  { %v2930_v58 = vmul.f32 %v2929_v21, %v2904_v40  ;;  %v2931_v28 = vmul.f32 %v2929_v21, %v2905_v59  ;;  %v2934_v37 = vsub.f32 1.0, %v2933_v18  ;;  %v2957_v13 = vand.u32 2147483647, %v2914_v27 }
 0x6ae   :  { %v2893_v16 = vmul.f32 %v2892_v53, %v6508_v52  ;;  %vm2953_vm11 = vweird.f32 %v2914_v27  ;;  %v2960_v29 = vor.u32 1.1754944e-38, %v2959_v1  ;;  %v2911_v51 = vmul.f32 %v6519_v23, %v6499_v44 }
 0x6af   :  { %v2985_v34 = vadd.f32 %v6531_v47, %v2930_v58  ;;  %v2986_v9 = vadd.f32 %v6537_v57, %v2931_v28  ;;  %v2935_v10 = vmul.f32 %v4370_v55, %v2934_v37  ;;  %vm2958_vm13 = vcmp.eq.f32.partialorder %v2957_v13, 8.507059e+37 }
 0x6b0   :  { %v2895_v61 = vsel %vm2894_vm4, %v6508_v52, %v2893_v16 }
 0x6b1   :  { %2993 = vst [vmem:[#allocation3] sm:$0xff] %v2985_v34  ;;  %v2936_v49 = vadd.f32 %v4370_v55, %v2935_v10  ;;  %v2898_v14 = vsel %vm2896_vm6, %v2897_v54, %v2895_v61 }
 0x6b2   :  { %2994 = vst [vmem:[#allocation3 + $0x8] sm:$0xff] %v2986_v9  ;;  %v2915_v60 = vadd.f32 1e-06, %v2898_v14  ;;  %v4372_v7 = vpop.eup %4371 }
 0x6b3   :  { %v2940_v17 = vsel %vm2939_vm8, %v4370_v55, %v2936_v49  ;;  %v2949_v52 = vmul.f32 %v4372_v7, %v2914_v27  ;;  %vm2954_vm10 = vweird.f32 %v4372_v7 }
 0x6b4   :  { %v2945_v12 = vsel %vm2942_vm9, %v2944_v39, %v2940_v17  ;;  %4373 = vrcp.f32 %v2915_v60  ;;  %vm2955_vm12 = vmor %vm2953_vm11, %vm2954_vm10  ;;  %v2975_v3 = vand.u32 2147483648, %v2915_v60  ;;  %v2973_v62 = vand.u32 2147483647, %v2915_v60 }
 0x6b5   :  { %v2946_v8 = vmul.f32 %v2945_v12, %v2906_v48  ;;  %v2947_v6 = vmul.f32 %v2945_v12, %v2907_v46  ;;  %v2950_v31 = vsub.f32 1.0, %v2949_v52  ;;  %vm2969_vm15 = vweird.f32 %v2915_v60 }
 0x6b6   :  { %v2976_v41 = vor.u32 1.1754944e-38, %v2975_v3  ;;  %vm2974_vm1 = vcmp.eq.f32.partialorder %v2973_v62, 8.507059e+37 }
 0x6b7   :  { %v2987_v15 = vadd.f32 %v6531_v47, %v2946_v8  ;;  %v2988_v19 = vadd.f32 %v6537_v57, %v2947_v6  ;;  %v2951_v36 = vmul.f32 %v4372_v7, %v2950_v31 }
 0x6b9   :  { %2995 = vst [vmem:[#allocation3 + $0x10] sm:$0xff] %v2987_v15  ;;  %v2952_v22 = vadd.f32 %v4372_v7, %v2951_v36 }
 0x6ba   :  { %v4374_v45 = vpop.eup %4373  ;;  %2996 = vst [vmem:[#allocation3 + $0x18] sm:$0xff] %v2988_v19 }
 0x6bb   :  { %v2965_v26 = vmul.f32 %v4374_v45, %v2915_v60  ;;  %v2956_v32 = vsel %vm2955_vm12, %v4372_v7, %v2952_v22  ;;  %vm2970_vm14 = vweird.f32 %v4374_v45 }
 0x6bc   :  { %v2961_v33 = vsel %vm2958_vm13, %v2960_v29, %v2956_v32  ;;  %vm2971_vm0 = vmor %vm2969_vm15, %vm2970_vm14 }
 0x6bd   :  { %v2966_v38 = vsub.f32 1.0, %v2965_v26  ;;  %v2962_v40 = vmul.f32 %v2961_v33, %v2908_v25  ;;  %v2963_v56 = vmul.f32 %v2961_v33, %v2909_v0 }
 0x6bf   :  { %v2967_v59 = vmul.f32 %v4374_v45, %v2966_v38  ;;  %v2989_v63 = vadd.f32 %v6531_v47, %v2962_v40  ;;  %v2990_v35 = vadd.f32 %v6537_v57, %v2963_v56 }
 0x6c1   :  { %v2968_v50 = vadd.f32 %v4374_v45, %v2967_v59  ;;  %2997 = vst [vmem:[#allocation3 + $0x20] sm:$0xff] %v2989_v63 }
 0x6c2   :  { %2998 = vst [vmem:[#allocation3 + $0x28] sm:$0xff] %v2990_v35 }
 0x6c3   :  { %v2972_v20 = vsel %vm2971_vm0, %v4374_v45, %v2968_v50 }
 0x6c4   :  { %v2977_v24 = vsel %vm2974_vm1, %v2976_v41, %v2972_v20 }
 0x6c5   :  { %v2978_v55 = vmul.f32 %v2977_v24, %v2910_v42  ;;  %v2979_v43 = vmul.f32 %v2977_v24, %v2911_v51 }
 0x6c7   :  { %v2991_v5 = vadd.f32 %v6531_v47, %v2978_v55  ;;  %v2992_v21 = vadd.f32 %v6537_v57, %v2979_v43 }
 0x6c9   :  { %2999 = vst [vmem:[#allocation3 + $0x30] sm:$0xff] %v2991_v5 }
 0x6ca   :  { %3000 = vst [vmem:[#allocation3 + $0x38] sm:$0xff] %v2992_v21 }
 0x6cb   :  { %3013 = dma.vmem_to_hbm [thread:$0]  %s3006_s16, 1024, %s3008_s17, [#allocation4], %s4411_s18, %s4411_s18, %s4412_s19  }
 0x6cc   :  { %4407 = dma.done.wait [#allocation4], 1024  }
 0x6cd   :  { %4408 = vsyncadd [#allocation4], 4294966272 }
 0x6ce   :  { %3018 = vsyncpa [#allocation4], 1 }

// kernel: transformer_encoder.2
= control target key start
LH: loop header
LB: loop body
LE: loop exit
PB: predicated region body
PF: predicated region fallthrough
CT: control target
= control target key end

     0   :  { %19 = vsyncpa [#allocation4], 0  ;;  %s5369_s0 = inlined_call_operand.hbm [shape: f32[2,16,256], index: 0, kind: input, shape index: {}]   ;;  %s5370_s1 = inlined_call_operand.vmem [shape: f32[2,1,16], index: 1, kind: input, shape index: {}]   ;;  %s5371_s2 = inlined_call_operand.hbm [shape: bf16[256,768], index: 2, kind: input, shape index: {}]   ;;  %s5372_s3 = inlined_call_operand.vmem [shape: f32[1,768], index: 3, kind: input, shape index: {}]   ;;  %s5373_s4 = inlined_call_operand.hbm [shape: bf16[256,256], index: 4, kind: input, shape index: {}]   ;;  %s5374_s5 = inlined_call_operand.vmem [shape: f32[1,256], index: 5, kind: input, shape index: {}]   ;;  %s5375_s6 = inlined_call_operand.vmem [shape: f32[1,256], index: 6, kind: input, shape index: {}]   ;;  %s5376_s7 = inlined_call_operand.hbm [shape: f32[1,256], index: 7, kind: input, shape index: {}]   ;;  %s5377_s8 = inlined_call_operand.hbm [shape: bf16[256,512], index: 8, kind: input, shape index: {}]   ;;  %s5378_s9 = inlined_call_operand.hbm [shape: f32[1,512], index: 9, kind: input, shape index: {}]   ;;  %s5379_s10 = inlined_call_operand.hbm [shape: bf16[512,256], index: 10, kind: input, shape index: {}]   ;;  %s5380_s11 = inlined_call_operand.hbm [shape: f32[1,256], index: 11, kind: input, shape index: {}]   ;;  %s5381_s12 = inlined_call_operand.vmem [shape: f32[1,256], index: 12, kind: input, shape index: {}]   ;;  %s5382_s13 = inlined_call_operand.hbm [shape: f32[1,256], index: 13, kind: input, shape index: {}]   ;;  %s5383_s14 = inlined_call_operand.vmem [shape: f32[2,16,256], index: 14, kind: output, shape index: {}]  }
   0x1   :  { %20 = vsyncpa [#allocation6], 0 }
   0x2   :  { %21 = vsyncpa [#allocation9], 0 }
   0x3   :  { %22 = vsyncpa [#allocation12], 0  ;;  %s43_s15 = sshll.u32 %s5371_s2, 4  ;;  %s44_s15 = int_to_ptr.hbm [resolvable:$true] %s43_s15 }
   0x4   :  { %23 = vsyncpa [#allocation15], 0  ;;  %s4743_s16 = smov [#allocation5]   ;;  %s76_s20 = sshll.u32 %s5376_s7, 4  ;;  %s77_s20 = int_to_ptr.hbm [resolvable:$true] %s76_s20 }
   0x5   :  { %s45_s17 = sshll.u32 %s4743_s16, 4  ;;  %s4744_s21 = smov 384   ;;  %s46_s17 = int_to_ptr.vmem [resolvable:$true] %s45_s17 }
   0x6   :  { %s4745_s22 = smov 24   ;;  %s4746_s23 = smov [#allocation8]  }
   0x7   :  { %51 = dma.hbm_to_vmem [thread:$0]  %s44_s15, 12288, %s46_s17, [#allocation6], %s4744_s21, %s4744_s21, %s4745_s22  }
   0x8   :  { %s78_s24 = sshll.u32 %s4746_s23, 4  ;;  %s100_s27 = sshll.u32 %s5378_s9, 4  ;;  %s79_s24 = int_to_ptr.vmem [resolvable:$true] %s78_s24  ;;  %s101_s27 = int_to_ptr.hbm [resolvable:$true] %s100_s27 }
   0x9   :  { %81 = dma.hbm_to_vmem [thread:$0]  %s77_s20, 32, %s79_s24, [#allocation9]  }
   0xa   :  { %s124_s29 = sshll.u32 %s5380_s11, 4  ;;  %s4747_s30 = smov [#allocation11]   ;;  %s125_s29 = int_to_ptr.hbm [resolvable:$true] %s124_s29 }
   0xb   :  { %s102_s16 = sshll.u32 %s4747_s30, 4  ;;  %s4748_s7 = smov [#allocation14]   ;;  %s103_s16 = int_to_ptr.vmem [resolvable:$true] %s102_s16 }
   0xc   :  { %105 = dma.hbm_to_vmem [thread:$0]  %s101_s27, 64, %s103_s16, [#allocation12]  }
   0xd   :  { %s126_s15 = sshll.u32 %s4748_s7, 4  ;;  %s28_s19 = sshll.u32 %s5369_s0, 4  ;;  %s127_s15 = int_to_ptr.vmem [resolvable:$true] %s126_s15  ;;  %s29_s19 = int_to_ptr.hbm [resolvable:$true] %s28_s19 }
   0xe   :  { %129 = dma.hbm_to_vmem [thread:$0]  %s125_s29, 32, %s127_s15, [#allocation15]  }
   0xf   :  { %s4749_s9 = smov [#allocation3]   ;;  %s58_s11 = sshll.u32 %s5373_s4, 4  ;;  %s59_s11 = int_to_ptr.hbm [resolvable:$true] %s58_s11 }
  0x10   :  { %s30_s20 = sshll.u32 %s4749_s9, 4  ;;  %s4750_s23 = smov 256   ;;  %s31_s20 = int_to_ptr.vmem [resolvable:$true] %s30_s20 }
  0x11   :  { %s4751_s24 = smov 16   ;;  %s4752_s25 = smov [#allocation7]  }
  0x12   :  { %36 = dma.hbm_to_vmem [thread:$0]  %s29_s19, 1024, %s31_s20, [#allocation4], %s4750_s23, %s4750_s23, %s4751_s24  }
  0x13   :  { %s60_s26 = sshll.u32 %s4752_s25, 4  ;;  %s4753_s27 = smov 128   ;;  %s61_s26 = int_to_ptr.vmem [resolvable:$true] %s60_s26 }
  0x14   :  { %s4754_s2 = smov 8   ;;  %s86_s29 = sshll.u32 %s5377_s8, 4  ;;  %s87_s29 = int_to_ptr.hbm [resolvable:$true] %s86_s29 }
  0x15   :  { %66 = dma.hbm_to_vmem [thread:$0]  %s59_s11, 4096, %s61_s26, [#allocation6], %s4753_s27, %s4753_s27, %s4754_s2  }
  0x16   :  { %s4755_s30 = smov [#allocation10]   ;;  %s110_s15 = sshll.u32 %s5379_s10, 4  ;;  %s111_s15 = int_to_ptr.hbm [resolvable:$true] %s110_s15 }
  0x17   :  { %s88_s16 = sshll.u32 %s4755_s30, 4  ;;  %s4756_s17 = smov [#allocation13]   ;;  %s89_s16 = int_to_ptr.vmem [resolvable:$true] %s88_s16 }
  0x18   :  { %94 = dma.hbm_to_vmem [thread:$0]  %s87_s29, 8192, %s89_s16, [#allocation9], %s4750_s23, %s4750_s23, %s4751_s24  }
  0x19   :  { %s112_s18 = sshll.u32 %s4756_s17, 4  ;;  %s137_s20 = sshll.u32 %s5382_s13, 4  ;;  %s113_s18 = int_to_ptr.vmem [resolvable:$true] %s112_s18  ;;  %s138_s20 = int_to_ptr.hbm [resolvable:$true] %s137_s20 }
  0x1a   :  { %118 = dma.hbm_to_vmem [thread:$0]  %s111_s15, 8192, %s113_s18, [#allocation12], %s4753_s27, %s4753_s27, %s4754_s2  }
  0x1b   :  { %s4757_s8 = smov [#allocation16]  }
  0x1c   :  { %s139_s21 = sshll.u32 %s4757_s8, 4  ;;  %s140_s21 = int_to_ptr.vmem [resolvable:$true] %s139_s21 }
  0x1d   :  { %142 = dma.hbm_to_vmem [thread:$0]  %s138_s20, 32, %s140_s21, [#allocation15]  }
  0x1e   :  { %4733 = dma.done.wait [#allocation4], 1024  }
  0x1f   :  { %4734 = vsyncadd [#allocation4], 4294966272 }
  0x20   :  { %4735 = dma.done.wait [#allocation6], 16384  }
  0x21   :  { %4736 = vsyncadd [#allocation6], 4294950912 }
  0x22   :  { %4737 = dma.done.wait [#allocation9], 8224  }
  0x23   :  { %4738 = vsyncadd [#allocation9], 4294959072 }
  0x24   :  { %4739 = dma.done.wait [#allocation12], 8256  }
  0x25   :  { %4740 = vsyncadd [#allocation12], 4294959040 }
  0x26   :  { %4741 = dma.done.wait [#allocation15], 64  }
  0x27   :  { %4742 = vsyncadd [#allocation15], 4294967232  ;;  %v3311_v0 = vld [vmem:[#allocation5 + $0x150] sm:$0xf]  ;;  %v4214_v1 = vld [vmem:[#allocation5 + $0x164] sm:$0xf0] }
  0x28   :  { %v3503_v2 = vld [vmem:[#allocation5 + $0x2d0] sm:$0xf]  ;;  %v3312_v3 = vor.u32 %v4214_v1, %v3311_v0  ;;  %v4262_v4 = vld [vmem:[#allocation5 + $0x2e4] sm:$0xf0]  ;;  %v4211_v5 = vld [vmem:[#allocation5 + $0x154] sm:$0xf] }
  0x29   :  { %v3313_v6 = vld [vmem:[#allocation5 + $0x168] sm:$0xf0]  ;;  %v3504_v7 = vor.u32 %v4262_v4, %v3503_v2  ;;  %v4259_v9 = vld [vmem:[#allocation5 + $0x2d4] sm:$0xf]  ;;  %v3287_v11 = vld [vmem:[#allocation5 + $0x120] sm:$0xf] }
  0x2a   :  { %v3316_v8 = vor.u32 %v4211_v5, %v3313_v6  ;;  %v3505_v10 = vld [vmem:[#allocation5 + $0x2e8] sm:$0xf0]  ;;  %782 = vmatpush.bf16.msra.mxu0 %v3312_v3  ;;  %v4208_v13 = vld [vmem:[#allocation5 + $0x134] sm:$0xf0]  ;;  %v3479_v14 = vld [vmem:[#allocation5 + $0x2a0] sm:$0xf] }
  0x2b   :  { %v3508_v12 = vor.u32 %v4259_v9, %v3505_v10  ;;  %v4256_v15 = vld [vmem:[#allocation5 + $0x2b4] sm:$0xf0]  ;;  %801 = vmatpush.bf16.msra.mxu1 %v3504_v7  ;;  %v3288_v16 = vor.u32 %v4208_v13, %v3287_v11  ;;  %v4205_v18 = vld [vmem:[#allocation5 + $0x124] sm:$0xf]  ;;  %v3289_v19 = vld [vmem:[#allocation5 + $0x138] sm:$0xf0] }
  0x2c   :  { %820 = vmatpush.bf16.msra.mxu2 %v3316_v8  ;;  %v3480_v17 = vor.u32 %v4256_v15, %v3479_v14  ;;  %v4253_v20 = vld [vmem:[#allocation5 + $0x2a4] sm:$0xf]  ;;  %v3292_v21 = vor.u32 %v4205_v18, %v3289_v19  ;;  %v3481_v22 = vld [vmem:[#allocation5 + $0x2b8] sm:$0xf0]  ;;  %v3263_v23 = vld [vmem:[#allocation5 + $0xf0] sm:$0xf] }
  0x2d   :  { %839 = vmatpush.bf16.msra.mxu3 %v3508_v12  ;;  %v4202_v24 = vld [vmem:[#allocation5 + $0x104] sm:$0xf0]  ;;  %v3484_v25 = vor.u32 %v4253_v20, %v3481_v22  ;;  %v3455_v26 = vld [vmem:[#allocation5 + $0x270] sm:$0xf]  ;;  %v4199_v28 = vld [vmem:[#allocation5 + $0xf4] sm:$0xf] }
  0x2e   :  { %v4250_v27 = vld [vmem:[#allocation5 + $0x284] sm:$0xf0]  ;;  %783 = vmatpush.bf16.msra.mxu0 %v3288_v16  ;;  %v3264_v29 = vor.u32 %v4202_v24, %v3263_v23  ;;  %v3265_v30 = vld [vmem:[#allocation5 + $0x108] sm:$0xf0]  ;;  %v4247_v31 = vld [vmem:[#allocation5 + $0x274] sm:$0xf] }
  0x2f   :  { %v3457_v32 = vld [vmem:[#allocation5 + $0x288] sm:$0xf0]  ;;  %802 = vmatpush.bf16.msra.mxu1 %v3480_v17  ;;  %v3456_v33 = vor.u32 %v4250_v27, %v3455_v26  ;;  %v3268_v34 = vor.u32 %v4199_v28, %v3265_v30  ;;  %v3239_v35 = vld [vmem:[#allocation5 + $0xc0] sm:$0xf]  ;;  %v4196_v36 = vld [vmem:[#allocation5 + $0xd4] sm:$0xf0] }
  0x30   :  { %821 = vmatpush.bf16.msra.mxu2 %v3292_v21  ;;  %v3431_v37 = vld [vmem:[#allocation5 + $0x240] sm:$0xf]  ;;  %v3460_v38 = vor.u32 %v4247_v31, %v3457_v32  ;;  %v4244_v39 = vld [vmem:[#allocation5 + $0x254] sm:$0xf0]  ;;  %v4193_v40 = vld [vmem:[#allocation5 + $0xc4] sm:$0xf]  ;;  %v3240_v44 = vor.u32 %v4196_v36, %v3239_v35 }
  0x31   :  { %840 = vmatpush.bf16.msra.mxu3 %v3484_v25  ;;  %v3241_v41 = vld [vmem:[#allocation5 + $0xd8] sm:$0xf0]  ;;  %v4241_v42 = vld [vmem:[#allocation5 + $0x244] sm:$0xf]  ;;  %v3432_v45 = vor.u32 %v4244_v39, %v3431_v37  ;;  %v3215_v47 = vld [vmem:[#allocation5 + $0x90] sm:$0xf] }
  0x32   :  { %v3433_v43 = vld [vmem:[#allocation5 + $0x258] sm:$0xf0]  ;;  %784 = vmatpush.bf16.msra.mxu0 %v3264_v29  ;;  %v3244_v46 = vor.u32 %v4193_v40, %v3241_v41  ;;  %v4190_v48 = vld [vmem:[#allocation5 + $0xa4] sm:$0xf0]  ;;  %v3407_v49 = vld [vmem:[#allocation5 + $0x210] sm:$0xf] }
  0x33   :  { %803 = vmatpush.bf16.msra.mxu1 %v3456_v33  ;;  %v3436_v50 = vor.u32 %v4241_v42, %v3433_v43  ;;  %v4238_v51 = vld [vmem:[#allocation5 + $0x224] sm:$0xf0]  ;;  %v4187_v52 = vld [vmem:[#allocation5 + $0x94] sm:$0xf]  ;;  %v3217_v53 = vld [vmem:[#allocation5 + $0xa8] sm:$0xf0]  ;;  %v3216_v56 = vor.u32 %v4190_v48, %v3215_v47 }
  0x34   :  { %822 = vmatpush.bf16.msra.mxu2 %v3268_v34  ;;  %v4235_v54 = vld [vmem:[#allocation5 + $0x214] sm:$0xf]  ;;  %v3409_v55 = vld [vmem:[#allocation5 + $0x228] sm:$0xf0]  ;;  %v3408_v57 = vor.u32 %v4238_v51, %v3407_v49  ;;  %v3220_v58 = vor.u32 %v4187_v52, %v3217_v53  ;;  %v3191_v59 = vld [vmem:[#allocation5 + $0x60] sm:$0xf] }
  0x35   :  { %841 = vmatpush.bf16.msra.mxu3 %v3460_v38  ;;  %v4184_v60 = vld [vmem:[#allocation5 + $0x74] sm:$0xf0]  ;;  %v3383_v61 = vld [vmem:[#allocation5 + $0x1e0] sm:$0xf]  ;;  %v3412_v62 = vor.u32 %v4235_v54, %v3409_v55  ;;  %v4181_v0 = vld [vmem:[#allocation5 + $0x64] sm:$0xf] }
  0x36   :  { %785 = vmatpush.bf16.msra.mxu0 %v3240_v44  ;;  %v4232_v63 = vld [vmem:[#allocation5 + $0x1f4] sm:$0xf0]  ;;  %v3193_v1 = vld [vmem:[#allocation5 + $0x78] sm:$0xf0]  ;;  %v4229_v2 = vld [vmem:[#allocation5 + $0x1e4] sm:$0xf]  ;;  %v3192_v4 = vor.u32 %v4184_v60, %v3191_v59 }
  0x37   :  { %804 = vmatpush.bf16.msra.mxu1 %v3432_v45  ;;  %v3385_v3 = vld [vmem:[#allocation5 + $0x1f8] sm:$0xf0]  ;;  %v3384_v5 = vor.u32 %v4232_v63, %v3383_v61  ;;  %v3196_v6 = vor.u32 %v4181_v0, %v3193_v1  ;;  %v3167_v7 = vld [vmem:[#allocation5 + $0x30] sm:$0xf]  ;;  %v4178_v8 = vld [vmem:[#allocation5 + $0x44] sm:$0xf0] }
  0x38   :  { %823 = vmatpush.bf16.msra.mxu2 %v3244_v46  ;;  %v3359_v9 = vld [vmem:[#allocation5 + $0x1b0] sm:$0xf]  ;;  %v3388_v10 = vor.u32 %v4229_v2, %v3385_v3  ;;  %v4226_v11 = vld [vmem:[#allocation5 + $0x1c4] sm:$0xf0]  ;;  %v4175_v12 = vld [vmem:[#allocation5 + $0x34] sm:$0xf]  ;;  %v3168_v16 = vor.u32 %v4178_v8, %v3167_v7 }
  0x39   :  { %842 = vmatpush.bf16.msra.mxu3 %v3436_v50  ;;  %v3169_v13 = vld [vmem:[#allocation5 + $0x48] sm:$0xf0]  ;;  %v4223_v14 = vld [vmem:[#allocation5 + $0x1b4] sm:$0xf]  ;;  %v3143_v17 = vld [vmem:[#allocation5] sm:$0xf]  ;;  %v3360_v19 = vor.u32 %v4226_v11, %v3359_v9 }
  0x3a   :  { %786 = vmatpush.bf16.msra.mxu0 %v3216_v56  ;;  %v3361_v15 = vld [vmem:[#allocation5 + $0x1c8] sm:$0xf0]  ;;  %v4172_v18 = vld [vmem:[#allocation5 + $0x14] sm:$0xf0]  ;;  %v3172_v20 = vor.u32 %v4175_v12, %v3169_v13  ;;  %v3335_v21 = vld [vmem:[#allocation5 + $0x180] sm:$0xf] }
  0x3b   :  { %805 = vmatpush.bf16.msra.mxu1 %v3408_v57  ;;  %v4220_v22 = vld [vmem:[#allocation5 + $0x194] sm:$0xf0]  ;;  %v4169_v23 = vld [vmem:[#allocation5 + $0x4] sm:$0xf]  ;;  %v3364_v24 = vor.u32 %v4223_v14, %v3361_v15  ;;  %v3145_v25 = vld [vmem:[#allocation5 + $0x18] sm:$0xf0]  ;;  %v3144_v31 = vor.u32 %v4172_v18, %v3143_v17 }
  0x3c   :  { %824 = vmatpush.bf16.msra.mxu2 %v3220_v58  ;;  %v4217_v26 = vld [vmem:[#allocation5 + $0x184] sm:$0xf]  ;;  %v3337_v27 = vld [vmem:[#allocation5 + $0x198] sm:$0xf0]  ;;  %v3319_v29 = vld [vmem:[#allocation5 + $0x158] sm:$0xf]  ;;  %v3336_v35 = vor.u32 %v4220_v22, %v3335_v21  ;;  %v3148_v36 = vor.u32 %v4169_v23, %v3145_v25 }
  0x3d   :  { %843 = vmatpush.bf16.msra.mxu3 %v3412_v62  ;;  %v180_v28 = vld [vmem:[#allocation3] sm:$0xff]  ;;  %v4215_v30 = vld [vmem:[#allocation5 + $0x16c] sm:$0xf0]  ;;  %v3511_v33 = vld [vmem:[#allocation5 + $0x2d8] sm:$0xf]  ;;  %v3340_v39 = vor.u32 %v4217_v26, %v3337_v27  ;;  %vm1053_vm0 = vcmask 130048  }
  0x3e   :  { %787 = vmatpush.bf16.msra.mxu0 %v3192_v4  ;;  %v182_v32 = vld [vmem:[#allocation3 + $0x10] sm:$0xff]  ;;  %v181_v37 = vld [vmem:[#allocation3 + $0x8] sm:$0xff]  ;;  %v183_v38 = vld [vmem:[#allocation3 + $0x18] sm:$0xff]  ;;  %v3320_v40 = vor.u32 %v4215_v30, %v3319_v29 }
  0x3f   :  { %806 = vmatpush.bf16.msra.mxu1 %v3384_v5  ;;  %v4263_v34 = vld [vmem:[#allocation5 + $0x2ec] sm:$0xf0]  ;;  %v4212_v41 = vld [vmem:[#allocation5 + $0x15c] sm:$0xf]  ;;  %v3321_v42 = vld [vmem:[#allocation5 + $0x170] sm:$0xf0]  ;;  %v4861_v44 = vpack.c.bf16 %v182_v32, %v180_v28  ;;  %v4863_v49 = vpack.c.bf16 %v183_v38, %v181_v37 }
  0x40   :  { %825 = vmatpush.bf16.msra.mxu2 %v3196_v6  ;;  %v4260_v43 = vld [vmem:[#allocation5 + $0x2dc] sm:$0xf]  ;;  %v3512_v45 = vor.u32 %v4263_v34, %v3511_v33  ;;  %v3513_v46 = vld [vmem:[#allocation5 + $0x2f0] sm:$0xf0]  ;;  %v3295_v47 = vld [vmem:[#allocation5 + $0x128] sm:$0xf]  ;;  %v3324_v52 = vor.u32 %v4212_v41, %v3321_v42 }
  0x41   :  { %844 = vmatpush.bf16.msra.mxu3 %v3388_v10  ;;  %v4209_v48 = vld [vmem:[#allocation5 + $0x13c] sm:$0xf0]  ;;  %v3487_v50 = vld [vmem:[#allocation5 + $0x2a8] sm:$0xf]  ;;  %v3516_v53 = vor.u32 %v4260_v43, %v3513_v46  ;;  %v4206_v55 = vld [vmem:[#allocation5 + $0x12c] sm:$0xf] }
  0x42   :  { %788 = vmatpush.bf16.msra.mxu0 %v3168_v16  ;;  %v4257_v51 = vld [vmem:[#allocation5 + $0x2bc] sm:$0xf0]  ;;  %v3296_v54 = vor.u32 %v4209_v48, %v3295_v47  ;;  %v3297_v56 = vld [vmem:[#allocation5 + $0x140] sm:$0xf0]  ;;  %v4254_v57 = vld [vmem:[#allocation5 + $0x2ac] sm:$0xf] }
  0x43   :  { %807 = vmatpush.bf16.msra.mxu1 %v3360_v19  ;;  %v3488_v58 = vor.u32 %v4257_v51, %v3487_v50  ;;  %v3489_v59 = vld [vmem:[#allocation5 + $0x2c0] sm:$0xf0]  ;;  %v3271_v60 = vld [vmem:[#allocation5 + $0xf8] sm:$0xf]  ;;  %v4203_v61 = vld [vmem:[#allocation5 + $0x10c] sm:$0xf0]  ;;  %v3300_v0 = vor.u32 %v4206_v55, %v3297_v56 }
  0x44   :  { %826 = vmatpush.bf16.msra.mxu2 %v3172_v20  ;;  %v3463_v62 = vld [vmem:[#allocation5 + $0x278] sm:$0xf]  ;;  %v4251_v63 = vld [vmem:[#allocation5 + $0x28c] sm:$0xf0]  ;;  %v3492_v1 = vor.u32 %v4254_v57, %v3489_v59  ;;  %v3272_v2 = vor.u32 %v4203_v61, %v3271_v60  ;;  %v4200_v3 = vld [vmem:[#allocation5 + $0xfc] sm:$0xf] }
  0x45   :  { %845 = vmatpush.bf16.msra.mxu3 %v3364_v24  ;;  %v3273_v4 = vld [vmem:[#allocation5 + $0x110] sm:$0xf0]  ;;  %v4248_v5 = vld [vmem:[#allocation5 + $0x27c] sm:$0xf]  ;;  %v3464_v6 = vor.u32 %v4251_v63, %v3463_v62  ;;  %v3247_v8 = vld [vmem:[#allocation5 + $0xc8] sm:$0xf] }
  0x46   :  { %789 = vmatpush.bf16.msra.mxu0 %v3144_v31  ;;  %v3465_v7 = vld [vmem:[#allocation5 + $0x290] sm:$0xf0]  ;;  %v4197_v9 = vld [vmem:[#allocation5 + $0xdc] sm:$0xf0]  ;;  %v3439_v10 = vld [vmem:[#allocation5 + $0x248] sm:$0xf]  ;;  %v3276_v12 = vor.u32 %v4200_v3, %v3273_v4 }
  0x47   :  { %808 = vmatpush.bf16.msra.mxu1 %v3336_v35  ;;  %v4245_v11 = vld [vmem:[#allocation5 + $0x25c] sm:$0xf0]  ;;  %v4194_v13 = vld [vmem:[#allocation5 + $0xcc] sm:$0xf]  ;;  %v3249_v14 = vld [vmem:[#allocation5 + $0xe0] sm:$0xf0]  ;;  %v3468_v15 = vor.u32 %v4248_v5, %v3465_v7  ;;  %v3248_v16 = vor.u32 %v4197_v9, %v3247_v8 }
  0x48   :  { %827 = vmatpush.bf16.msra.mxu2 %v3148_v36  ;;  %v4242_v17 = vld [vmem:[#allocation5 + $0x24c] sm:$0xf]  ;;  %v3441_v18 = vld [vmem:[#allocation5 + $0x260] sm:$0xf0]  ;;  %v3440_v20 = vor.u32 %v4245_v11, %v3439_v10  ;;  %v186_v21 = vld [vmem:[#allocation3 + $0x30] sm:$0xff]  ;;  %v3252_v27 = vor.u32 %v4194_v13, %v3249_v14 }
  0x49   :  { %846 = vmatpush.bf16.msra.mxu3 %v3340_v39  ;;  %790 = vmatmul.bf16.vlgmr.msra.gmra.mxu0 %v4861_v44  ;;  %v184_v19 = vld [vmem:[#allocation3 + $0x20] sm:$0xff]  ;;  %v3223_v22 = vld [vmem:[#allocation5 + $0x98] sm:$0xf]  ;;  %v4191_v23 = vld [vmem:[#allocation5 + $0xac] sm:$0xf0]  ;;  %v3444_v31 = vor.u32 %v4242_v17, %v3441_v18 }
  0x4a   :  { %858 = vmatpush.bf16.msrb.mxu0 %v3320_v40  ;;  %809 = vmatmul.bf16.vlgmr.msra.gmra.mxu1 %v4863_v49  ;;  %v185_v24 = vld [vmem:[#allocation3 + $0x28] sm:$0xff]  ;;  %v3415_v25 = vld [vmem:[#allocation5 + $0x218] sm:$0xf]  ;;  %v4239_v26 = vld [vmem:[#allocation5 + $0x22c] sm:$0xf0]  ;;  %v3224_v32 = vor.u32 %v4191_v23, %v3223_v22  ;;  %v4869_v34 = vpack.c.bf16 %v186_v21, %v184_v19 }
  0x4b   :  { %877 = vmatpush.bf16.msrb.mxu1 %v3512_v45  ;;  %828 = vmatmul.bf16.vlgmr.msra.gmra.mxu2 %v4861_v44  ;;  %v187_v28 = vld [vmem:[#allocation3 + $0x38] sm:$0xff]  ;;  %v3225_v30 = vld [vmem:[#allocation5 + $0xb0] sm:$0xf0]  ;;  %v3416_v35 = vor.u32 %v4239_v26, %v3415_v25  ;;  %v3199_v37 = vld [vmem:[#allocation5 + $0x68] sm:$0xf] }
  0x4c   :  { %847 = vmatmul.bf16.vlgmr.msra.gmra.mxu3 %v4863_v49  ;;  %896 = vmatpush.bf16.msrb.mxu2 %v3324_v52  ;;  %v4188_v29 = vld [vmem:[#allocation5 + $0x9c] sm:$0xf]  ;;  %v3417_v36 = vld [vmem:[#allocation5 + $0x230] sm:$0xf0]  ;;  %v4185_v38 = vld [vmem:[#allocation5 + $0x7c] sm:$0xf0]  ;;  %v4871_v39 = vpack.c.bf16 %v187_v28, %v185_v24 }
  0x4d   :  { %915 = vmatpush.bf16.msrb.mxu3 %v3516_v53  ;;  %v4236_v33 = vld [vmem:[#allocation5 + $0x21c] sm:$0xf]  ;;  %v3391_v40 = vld [vmem:[#allocation5 + $0x1e8] sm:$0xf]  ;;  %v4233_v41 = vld [vmem:[#allocation5 + $0x1fc] sm:$0xf0]  ;;  %v3228_v42 = vor.u32 %v4188_v29, %v3225_v30  ;;  %v3200_v45 = vor.u32 %v4185_v38, %v3199_v37 }
  0x4e   :  { %859 = vmatpush.bf16.msrb.mxu0 %v3296_v54  ;;  %v3420_v43 = vor.u32 %v4236_v33, %v3417_v36  ;;  %v4182_v46 = vld [vmem:[#allocation5 + $0x6c] sm:$0xf]  ;;  %v3201_v47 = vld [vmem:[#allocation5 + $0x80] sm:$0xf0]  ;;  %v3392_v50 = vor.u32 %v4233_v41, %v3391_v40  ;;  %v3175_v52 = vld [vmem:[#allocation5 + $0x38] sm:$0xf] }
  0x4f   :  { %878 = vmatpush.bf16.msrb.mxu1 %v3488_v58  ;;  %v4230_v48 = vld [vmem:[#allocation5 + $0x1ec] sm:$0xf]  ;;  %v3393_v51 = vld [vmem:[#allocation5 + $0x200] sm:$0xf0]  ;;  %v4179_v53 = vld [vmem:[#allocation5 + $0x4c] sm:$0xf0]  ;;  %v3204_v56 = vor.u32 %v4182_v46, %v3201_v47 }
  0x50   :  { %897 = vmatpush.bf16.msrb.mxu2 %v3300_v0  ;;  %v3367_v54 = vld [vmem:[#allocation5 + $0x1b8] sm:$0xf]  ;;  %v4227_v55 = vld [vmem:[#allocation5 + $0x1cc] sm:$0xf0]  ;;  %v3396_v57 = vor.u32 %v4230_v48, %v3393_v51  ;;  %v3176_v58 = vor.u32 %v4179_v53, %v3175_v52  ;;  %v4176_v59 = vld [vmem:[#allocation5 + $0x3c] sm:$0xf] }
  0x51   :  { %916 = vmatpush.bf16.msrb.mxu3 %v3492_v1  ;;  %v3177_v60 = vld [vmem:[#allocation5 + $0x50] sm:$0xf0]  ;;  %v4224_v61 = vld [vmem:[#allocation5 + $0x1bc] sm:$0xf]  ;;  %v3368_v62 = vor.u32 %v4227_v55, %v3367_v54  ;;  %v3151_v0 = vld [vmem:[#allocation5 + $0x8] sm:$0xf] }
  0x52   :  { %860 = vmatpush.bf16.msrb.mxu0 %v3272_v2  ;;  %v3369_v63 = vld [vmem:[#allocation5 + $0x1d0] sm:$0xf0]  ;;  %v4173_v1 = vld [vmem:[#allocation5 + $0x1c] sm:$0xf0]  ;;  %v3343_v2 = vld [vmem:[#allocation5 + $0x188] sm:$0xf]  ;;  %v3180_v4 = vor.u32 %v4176_v59, %v3177_v60 }
  0x53   :  { %879 = vmatpush.bf16.msrb.mxu1 %v3464_v6  ;;  %v4221_v3 = vld [vmem:[#allocation5 + $0x19c] sm:$0xf0]  ;;  %v3372_v5 = vor.u32 %v4224_v61, %v3369_v63  ;;  %v3152_v6 = vor.u32 %v4173_v1, %v3151_v0  ;;  %v4170_v7 = vld [vmem:[#allocation5 + $0xc] sm:$0xf]  ;;  %v3153_v8 = vld [vmem:[#allocation5 + $0x20] sm:$0xf0] }
  0x54   :  { %898 = vmatpush.bf16.msrb.mxu2 %v3276_v12  ;;  %v3344_v9 = vor.u32 %v4221_v3, %v3343_v2  ;;  %v4218_v10 = vld [vmem:[#allocation5 + $0x18c] sm:$0xf]  ;;  %v3345_v11 = vld [vmem:[#allocation5 + $0x1a0] sm:$0xf0]  ;;  %v3156_v12 = vor.u32 %v4170_v7, %v3153_v8  ;;  %v3521_v18 = vld [vmem:[#allocation5 + $0x2f8] sm:$0xf0] }
  0x55   :  { %917 = vmatpush.bf16.msrb.mxu3 %v3468_v15  ;;  %v3348_v13 = vor.u32 %v4218_v10, %v3345_v11  ;;  %v4213_v14 = vld [vmem:[#allocation5 + $0x164] sm:$0xf]  ;;  %v3329_v15 = vld [vmem:[#allocation5 + $0x178] sm:$0xf0]  ;;  %v3305_v21 = vld [vmem:[#allocation5 + $0x148] sm:$0xf0] }
  0x56   :  { %861 = vmatpush.bf16.msrb.mxu0 %v3248_v16  ;;  %v3332_v16 = vor.u32 %v4213_v14, %v3329_v15  ;;  %v4261_v17 = vld [vmem:[#allocation5 + $0x2e4] sm:$0xf]  ;;  %v3327_v23 = vld [vmem:[#allocation5 + $0x160] sm:$0xf]  ;;  %v4216_v24 = vld [vmem:[#allocation5 + $0x174] sm:$0xf0] }
  0x57   :  { %880 = vmatpush.bf16.msrb.mxu1 %v3440_v20  ;;  %v3524_v19 = vor.u32 %v4261_v17, %v3521_v18  ;;  %v4207_v20 = vld [vmem:[#allocation5 + $0x134] sm:$0xf]  ;;  %v3328_v26 = vor.u32 %v4216_v24, %v3327_v23  ;;  %v4201_v28 = vld [vmem:[#allocation5 + $0x104] sm:$0xf]  ;;  %v3281_v29 = vld [vmem:[#allocation5 + $0x118] sm:$0xf0] }
  0x58   :  { %899 = vmatpush.bf16.msrb.mxu2 %v3252_v27  ;;  %v3308_v22 = vor.u32 %v4207_v20, %v3305_v21  ;;  %v4255_v25 = vld [vmem:[#allocation5 + $0x2b4] sm:$0xf]  ;;  %v3497_v27 = vld [vmem:[#allocation5 + $0x2c8] sm:$0xf0]  ;;  %v4264_v33 = vld [vmem:[#allocation5 + $0x2f4] sm:$0xf0] }
  0x59   :  { %918 = vmatpush.bf16.msrb.mxu3 %v3444_v31  ;;  %795 = vmatmul.bf16.gmra.mxu0 %v4869_v34  ;;  %v3500_v30 = vor.u32 %v4255_v25, %v3497_v27  ;;  %v3519_v31 = vld [vmem:[#allocation5 + $0x2e0] sm:$0xf]  ;;  %v4210_v36 = vld [vmem:[#allocation5 + $0x144] sm:$0xf0]  ;;  %v4249_v38 = vld [vmem:[#allocation5 + $0x284] sm:$0xf] }
  0x5a   :  { %862 = vmatpush.bf16.msrb.mxu0 %v3224_v32  ;;  %814 = vmatmul.bf16.gmra.mxu1 %v4871_v39  ;;  %v3284_v32 = vor.u32 %v4201_v28, %v3281_v29  ;;  %v3520_v37 = vor.u32 %v4264_v33, %v3519_v31  ;;  %v3473_v41 = vld [vmem:[#allocation5 + $0x298] sm:$0xf0]  ;;  %v3495_v46 = vld [vmem:[#allocation5 + $0x2b0] sm:$0xf]  ;;  %v4258_v48 = vld [vmem:[#allocation5 + $0x2c4] sm:$0xf0] }
  0x5b   :  { %881 = vmatpush.bf16.msrb.mxu1 %v3416_v35  ;;  %833 = vmatmul.bf16.gmra.mxu2 %v4869_v34  ;;  %v3303_v35 = vld [vmem:[#allocation5 + $0x130] sm:$0xf]  ;;  %v4204_v51 = vld [vmem:[#allocation5 + $0x114] sm:$0xf0]  ;;  %v3496_v52 = vor.u32 %v4258_v48, %v3495_v46  ;;  %v4243_v53 = vld [vmem:[#allocation5 + $0x254] sm:$0xf] }
  0x5c   :  { %852 = vmatmul.bf16.gmra.mxu3 %v4871_v39  ;;  %900 = vmatpush.bf16.msrb.mxu2 %v3228_v42  ;;  %v3304_v40 = vor.u32 %v4210_v36, %v3303_v35  ;;  %v4195_v42 = vld [vmem:[#allocation5 + $0xd4] sm:$0xf]  ;;  %v3449_v55 = vld [vmem:[#allocation5 + $0x268] sm:$0xf0]  ;;  %v3471_v59 = vld [vmem:[#allocation5 + $0x280] sm:$0xf] }
  0x5d   :  { %919 = vmatpush.bf16.msrb.mxu3 %v3420_v43  ;;  %v3257_v43 = vld [vmem:[#allocation5 + $0xe8] sm:$0xf0]  ;;  %v4252_v61 = vld [vmem:[#allocation5 + $0x294] sm:$0xf0]  ;;  %v4198_v63 = vld [vmem:[#allocation5 + $0xe4] sm:$0xf0] }
  0x5e   :  { %863 = vmatpush.bf16.msrb.mxu0 %v3200_v45  ;;  %v3476_v45 = vor.u32 %v4249_v38, %v3473_v41  ;;  %v3260_v47 = vor.u32 %v4195_v42, %v3257_v43  ;;  %v3472_v0 = vor.u32 %v4252_v61, %v3471_v59  ;;  %v4237_v1 = vld [vmem:[#allocation5 + $0x224] sm:$0xf]  ;;  %v3425_v3 = vld [vmem:[#allocation5 + $0x238] sm:$0xf0]  ;;  %v3447_v7 = vld [vmem:[#allocation5 + $0x250] sm:$0xf] }
  0x5f   :  { %882 = vmatpush.bf16.msrb.mxu1 %v3392_v50  ;;  %v3279_v50 = vld [vmem:[#allocation5 + $0x100] sm:$0xf]  ;;  %v4192_v11 = vld [vmem:[#allocation5 + $0xb4] sm:$0xf0]  ;;  %v3401_v15 = vld [vmem:[#allocation5 + $0x208] sm:$0xf0] }
  0x60   :  { %901 = vmatpush.bf16.msrb.mxu2 %v3204_v56  ;;  %v3280_v54 = vor.u32 %v4204_v51, %v3279_v50  ;;  %v4189_v56 = vld [vmem:[#allocation5 + $0xa4] sm:$0xf]  ;;  %v3231_v10 = vld [vmem:[#allocation5 + $0xa0] sm:$0xf]  ;;  %v3185_v17 = vld [vmem:[#allocation5 + $0x58] sm:$0xf0] }
  0x61   :  { %920 = vmatpush.bf16.msrb.mxu3 %v3396_v57  ;;  %v3233_v57 = vld [vmem:[#allocation5 + $0xb8] sm:$0xf0]  ;;  %v3232_v14 = vor.u32 %v4192_v11, %v3231_v10  ;;  %v4240_v21 = vld [vmem:[#allocation5 + $0x234] sm:$0xf0]  ;;  %v4186_v23 = vld [vmem:[#allocation5 + $0x84] sm:$0xf0] }
  0x62   :  { %864 = vmatpush.bf16.msrb.mxu0 %v3176_v58  ;;  %v3452_v58 = vor.u32 %v4243_v53, %v3449_v55  ;;  %v3236_v60 = vor.u32 %v4189_v56, %v3233_v57  ;;  %v4225_v25 = vld [vmem:[#allocation5 + $0x1c4] sm:$0xf]  ;;  %v3377_v27 = vld [vmem:[#allocation5 + $0x1d8] sm:$0xf0]  ;;  %v4171_v28 = vld [vmem:[#allocation5 + $0x14] sm:$0xf] }
  0x63   :  { %883 = vmatpush.bf16.msrb.mxu1 %v3368_v62  ;;  %v3255_v62 = vld [vmem:[#allocation5 + $0xd0] sm:$0xf]  ;;  %v3161_v29 = vld [vmem:[#allocation5 + $0x28] sm:$0xf0]  ;;  %v4234_v33 = vld [vmem:[#allocation5 + $0x204] sm:$0xf0] }
  0x64   :  { %902 = vmatpush.bf16.msrb.mxu2 %v3180_v4  ;;  %v3256_v2 = vor.u32 %v4198_v63, %v3255_v62  ;;  %v4183_v4 = vld [vmem:[#allocation5 + $0x74] sm:$0xf]  ;;  %v3399_v31 = vld [vmem:[#allocation5 + $0x1f0] sm:$0xf]  ;;  %v3183_v35 = vld [vmem:[#allocation5 + $0x40] sm:$0xf] }
  0x65   :  { %921 = vmatpush.bf16.msrb.mxu3 %v3372_v5  ;;  %v3209_v5 = vld [vmem:[#allocation5 + $0x88] sm:$0xf0]  ;;  %v4180_v36 = vld [vmem:[#allocation5 + $0x54] sm:$0xf0]  ;;  %v4219_v38 = vld [vmem:[#allocation5 + $0x194] sm:$0xf] }
  0x66   :  { %865 = vmatpush.bf16.msrb.mxu0 %v3152_v6  ;;  %v3428_v6 = vor.u32 %v4237_v1, %v3425_v3  ;;  %v3212_v8 = vor.u32 %v4183_v4, %v3209_v5  ;;  %v3353_v41 = vld [vmem:[#allocation5 + $0x1a8] sm:$0xf0]  ;;  %v3375_v43 = vld [vmem:[#allocation5 + $0x1c0] sm:$0xf]  ;;  %v4174_v48 = vld [vmem:[#allocation5 + $0x24] sm:$0xf0] }
  0x67   :  { %884 = vmatpush.bf16.msrb.mxu1 %v3344_v9  ;;  %v4246_v9 = vld [vmem:[#allocation5 + $0x264] sm:$0xf0]  ;;  %v3356_v42 = vor.u32 %v4219_v38, %v3353_v41  ;;  %v3351_v51 = vld [vmem:[#allocation5 + $0x190] sm:$0xf] }
  0x68   :  { %903 = vmatpush.bf16.msrb.mxu2 %v3156_v12  ;;  %v3448_v12 = vor.u32 %v4246_v9, %v3447_v7 }
  0x69   :  { %922 = vmatpush.bf16.msrb.mxu3 %v3348_v13  ;;  %866 = vmatmul.bf16.vlgmr.msrb.gmra.mxu0 %v4861_v44  ;;  %v4231_v13 = vld [vmem:[#allocation5 + $0x1f4] sm:$0xf] }
  0x6a   :  { %885 = vmatmul.bf16.vlgmr.msrb.gmra.mxu1 %v4863_v49  ;;  %934 = vmatpush.bf16.msra.mxu0 %v3328_v26  ;;  %v3404_v18 = vor.u32 %v4231_v13, %v3401_v15 }
  0x6b   :  { %904 = vmatmul.bf16.vlgmr.msrb.gmra.mxu2 %v4861_v44  ;;  %953 = vmatpush.bf16.msra.mxu1 %v3520_v37  ;;  %v3400_v37 = vor.u32 %v4234_v33, %v3399_v31 }
  0x6c   :  { %923 = vmatmul.bf16.vlgmr.msrb.gmra.mxu3 %v4863_v49  ;;  %972 = vmatpush.bf16.msra.mxu2 %v3332_v16  ;;  %v4177_v16 = vld [vmem:[#allocation5 + $0x44] sm:$0xf] }
  0x6d   :  { %991 = vmatpush.bf16.msra.mxu3 %v3524_v19  ;;  %v3423_v19 = vld [vmem:[#allocation5 + $0x220] sm:$0xf]  ;;  %v3188_v20 = vor.u32 %v4177_v16, %v3185_v17 }
  0x6e   :  { %935 = vmatpush.bf16.msra.mxu0 %v3304_v40  ;;  %v3424_v24 = vor.u32 %v4240_v21, %v3423_v19  ;;  %v3184_v40 = vor.u32 %v4180_v36, %v3183_v35 }
  0x6f   :  { %954 = vmatpush.bf16.msra.mxu1 %v3496_v52  ;;  %v4222_v52 = vld [vmem:[#allocation5 + $0x1a4] sm:$0xf0] }
  0x70   :  { %973 = vmatpush.bf16.msra.mxu2 %v3308_v22  ;;  %v3207_v22 = vld [vmem:[#allocation5 + $0x70] sm:$0xf]  ;;  %v3352_v53 = vor.u32 %v4222_v52, %v3351_v51 }
  0x71   :  { %992 = vmatpush.bf16.msra.mxu3 %v3500_v30  ;;  %v3208_v26 = vor.u32 %v4186_v23, %v3207_v22  ;;  %v3380_v30 = vor.u32 %v4225_v25, %v3377_v27 }
  0x72   :  { %936 = vmatpush.bf16.msra.mxu0 %v3280_v54 }
  0x73   :  { %955 = vmatpush.bf16.msra.mxu1 %v3472_v0 }
  0x74   :  { %974 = vmatpush.bf16.msra.mxu2 %v3284_v32  ;;  %v3164_v32 = vor.u32 %v4171_v28, %v3161_v29 }
  0x75   :  { %993 = vmatpush.bf16.msra.mxu3 %v3476_v45  ;;  %v4228_v45 = vld [vmem:[#allocation5 + $0x1d4] sm:$0xf0] }
  0x76   :  { %937 = vmatpush.bf16.msra.mxu0 %v3256_v2  ;;  %v3376_v46 = vor.u32 %v4228_v45, %v3375_v43 }
  0x77   :  { %956 = vmatpush.bf16.msra.mxu1 %v3448_v12 }
  0x78   :  { %975 = vmatpush.bf16.msra.mxu2 %v3260_v47  ;;  %v3159_v47 = vld [vmem:[#allocation5 + $0x10] sm:$0xf] }
  0x79   :  { %871 = vmatmul.bf16.gmra.mxu0 %v4869_v34  ;;  %994 = vmatpush.bf16.msra.mxu3 %v3452_v58  ;;  %v3160_v50 = vor.u32 %v4174_v48, %v3159_v47 }
  0x7a   :  { %890 = vmatmul.bf16.gmra.mxu1 %v4871_v39  ;;  %938 = vmatpush.bf16.msra.mxu0 %v3232_v14 }
  0x7b   :  { %909 = vmatmul.bf16.gmra.mxu2 %v4869_v34  ;;  %957 = vmatpush.bf16.msra.mxu1 %v3424_v24 }
  0x7c   :  { %928 = vmatmul.bf16.gmra.mxu3 %v4871_v39  ;;  %976 = vmatpush.bf16.msra.mxu2 %v3236_v60 }
  0x7d   :  { %995 = vmatpush.bf16.msra.mxu3 %v3428_v6 }
  0x7e   :  { %939 = vmatpush.bf16.msra.mxu0 %v3208_v26 }
  0x7f   :  { %958 = vmatpush.bf16.msra.mxu1 %v3400_v37 }
  0x80   :  { %977 = vmatpush.bf16.msra.mxu2 %v3212_v8 }
  0x81   :  { %996 = vmatpush.bf16.msra.mxu3 %v3404_v18 }
  0x82   :  { %940 = vmatpush.bf16.msra.mxu0 %v3184_v40 }
  0x83   :  { %959 = vmatpush.bf16.msra.mxu1 %v3376_v46 }
  0x84   :  { %978 = vmatpush.bf16.msra.mxu2 %v3188_v20 }
  0x85   :  { %997 = vmatpush.bf16.msra.mxu3 %v3380_v30 }
  0x86   :  { %941 = vmatpush.bf16.msra.mxu0 %v3160_v50 }
  0x87   :  { %960 = vmatpush.bf16.msra.mxu1 %v3352_v53 }
  0x88   :  { %979 = vmatpush.bf16.msra.mxu2 %v3164_v32 }
  0x89   :  { %998 = vmatpush.bf16.msra.mxu3 %v3356_v42  ;;  %942 = vmatmul.bf16.vlgmr.msra.gmra.mxu0 %v4861_v44 }
  0x8a   :  { %961 = vmatmul.bf16.vlgmr.msra.gmra.mxu1 %v4863_v49 }
  0x8b   :  { %980 = vmatmul.bf16.vlgmr.msra.gmra.mxu2 %v4861_v44 }
  0x8c   :  { %999 = vmatmul.bf16.vlgmr.msra.gmra.mxu3 %v4863_v49 }
  0x99   :  { %947 = vmatmul.bf16.gmra.mxu0 %v4869_v34 }
  0x9a   :  { %966 = vmatmul.bf16.gmra.mxu1 %v4871_v39 }
  0x9b   :  { %985 = vmatmul.bf16.gmra.mxu2 %v4869_v34  ;;  %v4910_v34 = vld [vmem:[%s5372_s3] sm:$0x3f] }
  0x9c   :  { %1004 = vmatmul.bf16.gmra.mxu3 %v4871_v39  ;;  %v292_v39 = vperm.slane %v4910_v34, 2  ;;  %v293_v6 = vperm.slane %v4910_v34, 3  ;;  %v290_v12 = vperm.slane %v4910_v34, 0  ;;  %v291_v13 = vperm.slane %v4910_v34, 1 }
  0xc6   :  { %v791_v54 = vpop.f32.mrf.mxu0 }
  0xc7   :  { %v810_v55 = vpop.f32.mrf.mxu1  ;;  %v792_v22 = vadd.f32 %v791_v54, %v290_v12 }
  0xc9   :  { %v811_v31 = vadd.f32 %v810_v55, %v792_v22 }
  0xce   :  { %v829_v56 = vpop.f32.mrf.mxu2  ;;  %v793_v58 = vpop.f32.mrf.mxu0 }
  0xcf   :  { %v848_v57 = vpop.f32.mrf.mxu3  ;;  %v812_v59 = vpop.f32.mrf.mxu1  ;;  %v830_v23 = vadd.f32 %v829_v56, %v291_v13  ;;  %v794_v24 = vadd.f32 %v793_v58, %v290_v12 }
  0xd1   :  { %v849_v32 = vadd.f32 %v848_v57, %v830_v23  ;;  %v813_v33 = vadd.f32 %v812_v59, %v794_v24 }
  0xd3   :  { %v1010_v47 = vpack.c.bf16 %v849_v32, %v811_v31 }
  0xd5   :  { %v1029_v54 = vunpack.c.l.b16 %v1010_v47  ;;  %v1102_v55 = vunpack.c.h.b16 %v1010_v47 }
  0xd6   :  { %v831_v60 = vpop.f32.mrf.mxu2  ;;  %v4891_v62 = vpop.f32.mrf.mxu0 }
  0xd7   :  { %v850_v61 = vpop.f32.mrf.mxu3  ;;  %v4894_v63 = vpop.f32.mrf.mxu1  ;;  %v832_v18 = vadd.f32 %v831_v60, %v291_v13 }
  0xd9   :  { %v851_v29 = vadd.f32 %v850_v61, %v832_v18 }
  0xdb   :  { %v1013_v40 = vpack.c.bf16 %v851_v29, %v813_v33 }
  0xdd   :  { %v1030_v51 = vunpack.c.l.b16 %v1013_v40  ;;  %v1103_v52 = vunpack.c.h.b16 %v1013_v40 }
  0xde   :  { %v4897_v44 = vpop.f32.mrf.mxu2  ;;  %v4901_v0 = vpop.f32.mrf.mxu0 }
  0xdf   :  { %v4899_v49 = vpop.f32.mrf.mxu3  ;;  %v4903_v1 = vpop.f32.mrf.mxu1  ;;  %v1031_v61 = vpack.c.b16 %v1030_v51, %v1029_v54 }
  0xe6   :  { %v836_v2 = vpop.f32.mrf.mxu2  ;;  %v867_v4 = vpop.f32.mrf.mxu0 }
  0xe7   :  { %v4905_v3 = vpop.f32.mrf.mxu3  ;;  %v886_v5 = vpop.f32.mrf.mxu1  ;;  %v868_v10 = vadd.f32 %v867_v4, %v292_v39  ;;  %v837_v59 = vadd.f32 %v836_v2, %v291_v13  ;;  %v1104_v4 = vpack.c.b16 %v1103_v52, %v1102_v55 }
  0xe9   :  { %v887_v15 = vadd.f32 %v886_v5, %v868_v10 }
  0xee   :  { %v905_v7 = vpop.f32.mrf.mxu2  ;;  %v869_v9 = vpop.f32.mrf.mxu0 }
  0xef   :  { %v924_v8 = vpop.f32.mrf.mxu3  ;;  %v906_v11 = vadd.f32 %v905_v7, %v293_v6  ;;  %v888_v14 = vpop.f32.mrf.mxu1  ;;  %v870_v17 = vadd.f32 %v869_v9, %v292_v39  ;;  %v797_v7 = vadd.f32 %v4891_v62, %v290_v12  ;;  %v799_v9 = vadd.f32 %v4901_v0, %v290_v12 }
  0xf1   :  { %v925_v16 = vadd.f32 %v924_v8, %v906_v11  ;;  %v889_v27 = vadd.f32 %v888_v14, %v870_v17  ;;  %v835_v8 = vadd.f32 %v4897_v44, %v291_v13  ;;  %v816_v17 = vadd.f32 %v4894_v63, %v797_v7 }
  0xf2   :  { %v818_v62 = vadd.f32 %v4903_v1, %v799_v9  ;;  %v295_v1 = vperm.slane %v4910_v34, 5 }
  0xf3   :  { %v1011_v26 = vpack.c.bf16 %v925_v16, %v887_v15 }
  0xf5   :  { %v1035_v35 = vunpack.c.l.b16 %v1011_v26  ;;  %v1106_v36 = vunpack.c.h.b16 %v1011_v26 }
  0xf6   :  { %v907_v19 = vpop.f32.mrf.mxu2  ;;  %v872_v25 = vpop.f32.mrf.mxu0 }
  0xf7   :  { %v908_v20 = vadd.f32 %v907_v19, %v293_v6  ;;  %v926_v21 = vpop.f32.mrf.mxu3  ;;  %v891_v42 = vpop.f32.mrf.mxu1  ;;  %v873_v48 = vadd.f32 %v872_v25, %v292_v39 }
  0xf9   :  { %v927_v28 = vadd.f32 %v926_v21, %v908_v20  ;;  %v892_v56 = vadd.f32 %v891_v42, %v873_v48 }
  0xfb   :  { %v1014_v30 = vpack.c.bf16 %v927_v28, %v889_v27 }
  0xfd   :  { %v1036_v37 = vunpack.c.l.b16 %v1014_v30  ;;  %v1107_v38 = vunpack.c.h.b16 %v1014_v30 }
  0xfe   :  { %v910_v41 = vpop.f32.mrf.mxu2  ;;  %v874_v53 = vpop.f32.mrf.mxu0 }
  0xff   :  { %v929_v43 = vpop.f32.mrf.mxu3  ;;  %v1037_v45 = vpack.c.b16 %v1036_v37, %v1035_v35  ;;  %v1108_v46 = vpack.c.b16 %v1107_v38, %v1106_v36  ;;  %v911_v50 = vadd.f32 %v910_v41, %v293_v6  ;;  %v875_v58 = vadd.f32 %v874_v53, %v292_v39  ;;  %v893_v10 = vpop.f32.mrf.mxu1 }
 0x100   :  { %v856_v39 = vadd.f32 %v4905_v3, %v837_v59 }
 0x101   :  { %1046 = vmatpush.bf16.xpose.msrb.mxu0 %v1037_v45  ;;  %1117 = vmatpush.bf16.xpose.msrb.mxu2 %v1108_v46  ;;  %v930_v57 = vadd.f32 %v929_v43, %v911_v50  ;;  %v894_v15 = vadd.f32 %v893_v10, %v875_v58 }
 0x102   :  { %v1019_v12 = vpack.c.bf16 %v856_v39, %v818_v62 }
 0x103   :  { %v1017_v14 = vpack.c.bf16 %v930_v57, %v892_v56 }
 0x104   :  { %v1176_v22 = vunpack.c.l.b16 %v1019_v12  ;;  %v1248_v23 = vunpack.c.h.b16 %v1019_v12 }
 0x105   :  { %v1181_v18 = vunpack.c.l.b16 %v1017_v14  ;;  %v1251_v44 = vunpack.c.h.b16 %v1017_v14 }
 0x106   :  { %v912_v60 = vpop.f32.mrf.mxu2  ;;  %v943_v26 = vpop.f32.mrf.mxu0 }
 0x107   :  { %v913_v5 = vadd.f32 %v912_v60, %v293_v6  ;;  %v931_v11 = vpop.f32.mrf.mxu3  ;;  %v854_v6 = vadd.f32 %v4899_v49, %v835_v8  ;;  %v294_v49 = vperm.slane %v4910_v34, 4  ;;  %v962_v30 = vpop.f32.mrf.mxu1 }
 0x108   :  { %1047 = vmatmul.bf16.vlgmr.msrb.gmra.mxu0 %v1031_v61  ;;  %1118 = vmatmul.bf16.vlgmr.msrb.gmra.mxu2 %v1104_v4 }
 0x109   :  { %v932_v16 = vadd.f32 %v931_v11, %v913_v5  ;;  %v1016_v21 = vpack.c.bf16 %v854_v6, %v816_v17  ;;  %v944_v28 = vadd.f32 %v943_v26, %v294_v49 }
 0x10b   :  { %v1020_v2 = vpack.c.bf16 %v932_v16, %v894_v15  ;;  %v1175_v3 = vunpack.c.l.b16 %v1016_v21  ;;  %v1247_v24 = vunpack.c.h.b16 %v1016_v21  ;;  %v963_v32 = vadd.f32 %v962_v30, %v944_v28 }
 0x10d   :  { %v1182_v13 = vunpack.c.l.b16 %v1020_v2  ;;  %v1252_v0 = vunpack.c.h.b16 %v1020_v2  ;;  %v1177_v25 = vpack.c.b16 %v1176_v22, %v1175_v3  ;;  %v1249_v63 = vpack.c.b16 %v1248_v23, %v1247_v24 }
 0x10e   :  { %v981_v27 = vpop.f32.mrf.mxu2  ;;  %v945_v35 = vpop.f32.mrf.mxu0 }
 0x10f   :  { %v1183_v19 = vpack.c.b16 %v1182_v13, %v1181_v18  ;;  %v1253_v20 = vpack.c.b16 %v1252_v0, %v1251_v44  ;;  %v982_v29 = vadd.f32 %v981_v27, %v295_v1  ;;  %v1000_v31 = vpop.f32.mrf.mxu3  ;;  %v946_v37 = vadd.f32 %v945_v35, %v294_v49  ;;  %v964_v41 = vpop.f32.mrf.mxu1  ;;  %v4441_v18 = vld [vmem:[%s5370_s1] ss:$0 sm:$0xff] }
 0x111   :  { %1192 = vmatpush.bf16.xpose.msra.mxu0 %v1183_v19  ;;  %1262 = vmatpush.bf16.xpose.msra.mxu2 %v1253_v20  ;;  %v1001_v33 = vadd.f32 %v1000_v31, %v982_v29  ;;  %v965_v43 = vadd.f32 %v964_v41, %v946_v37 }
 0x113   :  { %v1012_v40 = vpack.c.bf16 %v1001_v33, %v963_v32 }
 0x115   :  { %v1075_v46 = vunpack.c.l.b16 %v1012_v40  ;;  %v1143_v47 = vunpack.c.h.b16 %v1012_v40 }
 0x116   :  { %v983_v36 = vpop.f32.mrf.mxu2  ;;  %v948_v48 = vpop.f32.mrf.mxu0 }
 0x117   :  { %v984_v38 = vadd.f32 %v983_v36, %v295_v1  ;;  %v1002_v42 = vpop.f32.mrf.mxu3  ;;  %v967_v55 = vpop.f32.mrf.mxu1  ;;  %v949_v57 = vadd.f32 %v948_v48, %v294_v49 }
 0x118   :  { %1193 = vmatmul.bf16.vlgmr.msra.gmra.mxu0 %v1177_v25  ;;  %1263 = vmatmul.bf16.vlgmr.msra.gmra.mxu2 %v1249_v63  ;;  %v4442_v63 = vld [vmem:[%s5370_s1 + $0x1] ss:$0 sm:$0xff] }
 0x119   :  { %v1003_v45 = vadd.f32 %v1002_v42, %v984_v38  ;;  %v968_v5 = vadd.f32 %v967_v55, %v949_v57 }
 0x11b   :  { %v1015_v34 = vpack.c.bf16 %v1003_v45, %v965_v43 }
 0x11d   :  { %v1076_v51 = vunpack.c.l.b16 %v1015_v34  ;;  %v1144_v52 = vunpack.c.h.b16 %v1015_v34 }
 0x11e   :  { %v986_v50 = vpop.f32.mrf.mxu2  ;;  %v950_v59 = vpop.f32.mrf.mxu0 }
 0x11f   :  { %v1077_v53 = vpack.c.b16 %v1076_v51, %v1075_v46  ;;  %v1145_v54 = vpack.c.b16 %v1144_v52, %v1143_v47  ;;  %v1005_v56 = vpop.f32.mrf.mxu3  ;;  %v987_v58 = vadd.f32 %v986_v50, %v295_v1  ;;  %v951_v61 = vadd.f32 %v950_v59, %v294_v49  ;;  %v969_v8 = vpop.f32.mrf.mxu1 }
 0x121   :  { %1089 = vmatpush.bf16.msrb.mxu1 %v1077_v53  ;;  %1157 = vmatpush.bf16.msrb.mxu3 %v1145_v54  ;;  %v1006_v7 = vadd.f32 %v1005_v56, %v987_v58  ;;  %v970_v10 = vadd.f32 %v969_v8, %v951_v61 }
 0x123   :  { %v1018_v14 = vpack.c.bf16 %v1006_v7, %v968_v5 }
 0x125   :  { %v1220_v16 = vunpack.c.l.b16 %v1018_v14  ;;  %v1288_v39 = vunpack.c.h.b16 %v1018_v14 }
 0x126   :  { %v988_v60 = vpop.f32.mrf.mxu2 }
 0x127   :  { %v989_v4 = vadd.f32 %v988_v60, %v295_v1  ;;  %v1007_v9 = vpop.f32.mrf.mxu3 }
 0x129   :  { %v1008_v11 = vadd.f32 %v1007_v9, %v989_v4 }
 0x12b   :  { %v1021_v15 = vpack.c.bf16 %v1008_v11, %v970_v10 }
 0x12d   :  { %v1221_v2 = vunpack.c.l.b16 %v1021_v15  ;;  %v1289_v17 = vunpack.c.h.b16 %v1021_v15 }
 0x12f   :  { %v1222_v6 = vpack.c.b16 %v1221_v2, %v1220_v16  ;;  %v1290_v62 = vpack.c.b16 %v1289_v17, %v1288_v39 }
 0x131   :  { %1234 = vmatpush.bf16.msra.mxu1 %v1222_v6  ;;  %1302 = vmatpush.bf16.msra.mxu3 %v1290_v62 }
 0x185   :  { %v1048_v44 = vpop.f32.mrf.mxu0 }
 0x186   :  { %v1049_v13 = vadd.f32 %v4441_v18, %v1048_v44 }
 0x188   :  { %v1054_v0 = vsel %vm1053_vm0, %v1049_v13, -inf }
 0x189   :  { %1055 = vmax.xlane.f32.xlu1 %v1054_v0 }
 0x18b   :  { %v1119_v12 = vpop.f32.mrf.mxu2 }
 0x18c   :  { %v1120_v19 = vadd.f32 %v4441_v18, %v1119_v12 }
 0x18d   :  { %v1050_v20 = vpop.f32.mrf.mxu0 }
 0x18e   :  { %v1051_v21 = vadd.f32 %v4441_v18, %v1050_v20  ;;  %v1124_v22 = vsel %vm1053_vm0, %v1120_v19, -inf  ;;  %v3587_v20 = vld [vmem:[#allocation7 + $0x70] sm:$0xf] }
 0x18f   :  { %1125 = vmax.xlane.f32.xlu0 %v1124_v22  ;;  %v4279_v22 = vld [vmem:[#allocation7 + $0x74] sm:$0xf] }
 0x190   :  { %v1057_v23 = vsel %vm1053_vm0, %v1051_v21, -inf }
 0x191   :  { %1058 = vmax.xlane.f32.xlu1 %v1057_v23 }
 0x193   :  { %v1121_v3 = vpop.f32.mrf.mxu2 }
 0x194   :  { %v1122_v24 = vadd.f32 %v4441_v18, %v1121_v3  ;;  %v3589_v3 = vld [vmem:[#allocation7 + $0x78] sm:$0xf0] }
 0x195   :  { %v1194_v25 = vpop.f32.mrf.mxu0 }
 0x196   :  { %v1127_v49 = vsel %vm1053_vm0, %v1122_v24, -inf  ;;  %v1195_v1 = vadd.f32 %v4442_v63, %v1194_v25  ;;  %v3579_v25 = vld [vmem:[#allocation7 + $0x60] sm:$0xf] }
 0x197   :  { %1128 = vmax.xlane.f32.xlu0 %v1127_v49  ;;  %v4277_v49 = vld [vmem:[#allocation7 + $0x64] sm:$0xf] }
 0x198   :  { %v1199_v31 = vsel %vm1053_vm0, %v1195_v1, -inf }
 0x19b   :  { %v1264_v26 = vpop.f32.mrf.mxu2 }
 0x19c   :  { %v1265_v27 = vadd.f32 %v4442_v63, %v1264_v26  ;;  %v3581_v26 = vld [vmem:[#allocation7 + $0x68] sm:$0xf0] }
 0x19d   :  { %v1196_v28 = vpop.f32.mrf.mxu0 }
 0x19e   :  { %v1197_v29 = vadd.f32 %v4442_v63, %v1196_v28  ;;  %v1269_v30 = vsel %vm1053_vm0, %v1265_v27, -inf  ;;  %v3571_v28 = vld [vmem:[#allocation7 + $0x50] sm:$0xf] }
 0x19f   :  { %1270 = vmax.xlane.f32.xlu2 %v1269_v30  ;;  %1200 = vmax.xlane.f32.xlu0 %v1199_v31  ;;  %v4275_v30 = vld [vmem:[#allocation7 + $0x54] sm:$0xf] }
 0x1a0   :  { %v1202_v32 = vsel %vm1053_vm0, %v1197_v29, -inf }
 0x1a1   :  { %1203 = vmax.xlane.f32.xlu1 %v1202_v32  ;;  %v3573_v32 = vld [vmem:[#allocation7 + $0x58] sm:$0xf0] }
 0x1a3   :  { %v1266_v33 = vpop.f32.mrf.mxu2 }
 0x1a4   :  { %v1267_v35 = vadd.f32 %v4442_v63, %v1266_v33  ;;  %v4278_v63 = vld [vmem:[#allocation7 + $0x64] sm:$0xf0]  ;;  %v3576_v33 = vor.u32 %v4275_v30, %v3573_v32  ;;  %v3611_v30 = vld [vmem:[#allocation7 + $0xa0] sm:$0xf]  ;;  %v4285_v32 = vld [vmem:[#allocation7 + $0xa4] sm:$0xf] }
 0x1a6   :  { %v1272_v36 = vsel %vm1053_vm0, %v1267_v35, -inf }
 0x1a7   :  { %1273 = vmax.xlane.f32.xlu2 %v1272_v36  ;;  %v4274_v36 = vld [vmem:[#allocation7 + $0x44] sm:$0xf0] }
 0x1fc   :  { %v1056_v37 = vpop.xlane.xlu1 %1055 }
 0x1fd   :  { %v1060_v38 = vsub.f32 %v1049_v13, %v1056_v37  ;;  %v3651_v37 = vld [vmem:[#allocation7 + $0xf0] sm:$0xf] }
 0x1ff   :  { %v1062_v40 = vmul.f32 1.442695, %v1060_v38 }
 0x201   :  { %4443 = vpow2.f32 %v1062_v40  ;;  %v4296_v40 = vld [vmem:[#allocation7 + $0xf4] sm:$0xf0] }
 0x202   :  { %v1126_v41 = vpop.xlane.xlu0 %1125 }
 0x203   :  { %v1130_v42 = vsub.f32 %v1120_v19, %v1126_v41  ;;  %v4273_v41 = vld [vmem:[#allocation7 + $0x44] sm:$0xf] }
 0x204   :  { %v1059_v43 = vpop.xlane.xlu1 %1058 }
 0x205   :  { %v1132_v45 = vmul.f32 1.442695, %v1130_v42  ;;  %v1061_v46 = vsub.f32 %v1051_v21, %v1059_v43  ;;  %v4280_v21 = vld [vmem:[#allocation7 + $0x74] sm:$0xf0]  ;;  %v3565_v42 = vld [vmem:[#allocation7 + $0x48] sm:$0xf0]  ;;  %v3652_v43 = vor.u32 %v4296_v40, %v3651_v37 }
 0x206   :  { %v3588_v23 = vor.u32 %v4280_v21, %v3587_v20  ;;  %v3629_v20 = vld [vmem:[#allocation7 + $0xc8] sm:$0xf0]  ;;  %v3603_v37 = vld [vmem:[#allocation7 + $0x90] sm:$0xf]  ;;  %v4283_v40 = vld [vmem:[#allocation7 + $0x94] sm:$0xf] }
 0x207   :  { %v4444_v47 = vpop.eup %4443  ;;  %4445 = vpow2.f32 %v1132_v45  ;;  %v1064_v34 = vmul.f32 1.442695, %v1061_v46  ;;  %v3568_v45 = vor.u32 %v4273_v41, %v3565_v42  ;;  %v4295_v46 = vld [vmem:[#allocation7 + $0xf4] sm:$0xf]  ;;  %v3605_v42 = vld [vmem:[#allocation7 + $0x98] sm:$0xf0] }
 0x208   :  { %v1066_v48 = vsel %vm1053_vm0, %v4444_v47, 0.0  ;;  %1525 = vmatpush.bf16.msrb.mxu0 %v3588_v23  ;;  %v4266_v23 = vld [vmem:[#allocation7 + $0x4] sm:$0xf0] }
 0x209   :  { %4447 = vpow2.f32 %v1064_v34  ;;  %1067 = vadd.xlane.f32.xlu2 %v1066_v48  ;;  %v3555_v48 = vld [vmem:[#allocation7 + $0x30] sm:$0xf] }
 0x20a   :  { %v1129_v50 = vpop.xlane.xlu0 %1128 }
 0x20b   :  { %v1131_v51 = vsub.f32 %v1122_v24, %v1129_v50  ;;  %v3592_v24 = vor.u32 %v4279_v22, %v3589_v3  ;;  %v4272_v50 = vld [vmem:[#allocation7 + $0x34] sm:$0xf0]  ;;  %v3531_v22 = vld [vmem:[#allocation7] sm:$0xf]  ;;  %v3619_v3 = vld [vmem:[#allocation7 + $0xb0] sm:$0xf] }
 0x20d   :  { %v4446_v52 = vpop.eup %4445  ;;  %v1134_v53 = vmul.f32 1.442695, %v1131_v51  ;;  %1563 = vmatpush.bf16.msrb.mxu2 %v3592_v24  ;;  %v3643_v51 = vld [vmem:[#allocation7 + $0xe0] sm:$0xf]  ;;  %v3532_v24 = vor.u32 %v4266_v23, %v3531_v22 }
 0x20e   :  { %v1136_v54 = vsel %vm1053_vm0, %v4446_v52, 0.0 }
 0x20f   :  { %v4448_v55 = vpop.eup %4447  ;;  %4449 = vpow2.f32 %v1134_v53  ;;  %1137 = vadd.xlane.f32.xlu1 %v1136_v54  ;;  %v4294_v53 = vld [vmem:[#allocation7 + $0xe4] sm:$0xf0]  ;;  %v4271_v54 = vld [vmem:[#allocation7 + $0x34] sm:$0xf] }
 0x210   :  { %v1072_v56 = vpack.c.bf16 %v4448_v55, %v4444_v47  ;;  %v1069_v57 = vsel %vm1053_vm0, %v4448_v55, 0.0  ;;  %v3653_v47 = vld [vmem:[#allocation7 + $0xf8] sm:$0xf0] }
 0x211   :  { %1070 = vadd.xlane.f32.xlu0 %v1069_v57  ;;  %v3656_v34 = vor.u32 %v4295_v46, %v3653_v47  ;;  %v3557_v55 = vld [vmem:[#allocation7 + $0x38] sm:$0xf0]  ;;  %v4282_v46 = vld [vmem:[#allocation7 + $0x84] sm:$0xf0]  ;;  %v4281_v47 = vld [vmem:[#allocation7 + $0x84] sm:$0xf] }
 0x212   :  { %v1271_v58 = vpop.xlane.xlu2 %1270  ;;  %v1201_v59 = vpop.xlane.xlu0 %1200  ;;  %3525 = vmatmul.msk.bf16.vlgmr.msrb.gmra.mxu1 %vm1053_vm0, %v1072_v56  ;;  %v3644_v56 = vor.u32 %v4294_v53, %v3643_v51  ;;  %v3560_v57 = vor.u32 %v4271_v54, %v3557_v55 }
 0x213   :  { %v1275_v60 = vsub.f32 %v1265_v27, %v1271_v58  ;;  %v1205_v61 = vsub.f32 %v1195_v1, %v1201_v59  ;;  %v3580_v1 = vor.u32 %v4278_v63, %v3579_v25  ;;  %v3584_v27 = vor.u32 %v4277_v49, %v3581_v26  ;;  %1544 = vmatpush.bf16.msrb.mxu1 %v3652_v43  ;;  %v4293_v58 = vld [vmem:[#allocation7 + $0xe4] sm:$0xf]  ;;  %v3645_v59 = vld [vmem:[#allocation7 + $0xe8] sm:$0xf0]  ;;  %v4288_v25 = vld [vmem:[#allocation7 + $0xb4] sm:$0xf0] }
 0x214   :  { %v1204_v4 = vpop.xlane.xlu1 %1203  ;;  %v4265_v63 = vld [vmem:[#allocation7 + $0x4] sm:$0xf]  ;;  %v3533_v49 = vld [vmem:[#allocation7 + $0x8] sm:$0xf0]  ;;  %v3608_v43 = vor.u32 %v4283_v40, %v3605_v42 }
 0x215   :  { %v4450_v5 = vpop.eup %4449  ;;  %v1277_v7 = vmul.f32 1.442695, %v1275_v60  ;;  %v1207_v8 = vmul.f32 1.442695, %v1205_v61  ;;  %v1206_v9 = vsub.f32 %v1197_v29, %v1204_v4  ;;  %1526 = vmatpush.bf16.msrb.mxu0 %v3580_v1  ;;  %1564 = vmatpush.bf16.msrb.mxu2 %v3584_v27  ;;  %v4276_v29 = vld [vmem:[#allocation7 + $0x54] sm:$0xf0]  ;;  %v3648_v60 = vor.u32 %v4293_v58, %v3645_v59 }
 0x216   :  { %v1142_v10 = vpack.c.bf16 %v4450_v5, %v4446_v52  ;;  %v1139_v11 = vsel %vm1053_vm0, %v4450_v5, 0.0  ;;  %v3572_v31 = vor.u32 %v4276_v29, %v3571_v28  ;;  %v3556_v52 = vor.u32 %v4272_v50, %v3555_v48  ;;  %v3547_v61 = vld [vmem:[#allocation7 + $0x20] sm:$0xf]  ;;  %v4270_v4 = vld [vmem:[#allocation7 + $0x24] sm:$0xf0] }
 0x217   :  { %4451 = vpow2.f32 %v1277_v7  ;;  %v1209_v14 = vmul.f32 1.442695, %v1206_v9  ;;  %1140 = vadd.xlane.f32.xlu2 %v1139_v11  ;;  %1545 = vmatpush.bf16.msrb.mxu1 %v3644_v56  ;;  %v3635_v5 = vld [vmem:[#allocation7 + $0xd0] sm:$0xf]  ;;  %v3548_v7 = vor.u32 %v4270_v4, %v3547_v61  ;;  %v4269_v9 = vld [vmem:[#allocation7 + $0x24] sm:$0xf]  ;;  %v3620_v1 = vor.u32 %v4288_v25, %v3619_v3 }
 0x218   :  { %4453 = vpow2.f32 %v1207_v8  ;;  %3526 = vmatmul.msk.bf16.vlgmr.msrb.gmra.mxu3 %vm1053_vm0, %v1142_v10  ;;  %v4292_v8 = vld [vmem:[#allocation7 + $0xd4] sm:$0xf0]  ;;  %v3549_v10 = vld [vmem:[#allocation7 + $0x28] sm:$0xf0]  ;;  %v3536_v26 = vor.u32 %v4265_v63, %v3533_v49  ;;  %v4287_v27 = vld [vmem:[#allocation7 + $0xb4] sm:$0xf] }
 0x219   :  { %4455 = vpow2.f32 %v1209_v14  ;;  %1527 = vmatpush.bf16.msrb.mxu0 %v3572_v31  ;;  %1565 = vmatpush.bf16.msrb.mxu2 %v3576_v33  ;;  %v3636_v11 = vor.u32 %v4292_v8, %v3635_v5  ;;  %v3552_v14 = vor.u32 %v4269_v9, %v3549_v10  ;;  %v3621_v28 = vld [vmem:[#allocation7 + $0xb8] sm:$0xf0]  ;;  %v4286_v31 = vld [vmem:[#allocation7 + $0xa4] sm:$0xf0]  ;;  %v3597_v48 = vld [vmem:[#allocation7 + $0x88] sm:$0xf0] }
 0x21a   :  { %v1274_v15 = vpop.xlane.xlu2 %1273  ;;  %1582 = vmatpush.bf16.msrb.mxu3 %v3656_v34  ;;  %v3624_v29 = vor.u32 %v4287_v27, %v3621_v28  ;;  %v3612_v33 = vor.u32 %v4286_v31, %v3611_v30  ;;  %v3600_v50 = vor.u32 %v4281_v47, %v3597_v48 }
 0x21b   :  { %v1276_v16 = vsub.f32 %v1267_v35, %v1274_v15  ;;  %v3563_v35 = vld [vmem:[#allocation7 + $0x40] sm:$0xf]  ;;  %v4291_v15 = vld [vmem:[#allocation7 + $0xd4] sm:$0xf]  ;;  %1546 = vmatpush.bf16.msrb.mxu1 %v3636_v11 }
 0x21c   :  { %v3564_v38 = vor.u32 %v4274_v36, %v3563_v35  ;;  %v3613_v35 = vld [vmem:[#allocation7 + $0xa8] sm:$0xf0] }
 0x21d   :  { %v4452_v39 = vpop.eup %4451  ;;  %v1279_v2 = vmul.f32 1.442695, %v1276_v16  ;;  %1566 = vmatpush.bf16.msrb.mxu2 %v3568_v45  ;;  %v3637_v16 = vld [vmem:[#allocation7 + $0xd8] sm:$0xf0]  ;;  %v3616_v36 = vor.u32 %v4285_v32, %v3613_v35  ;;  %v3595_v45 = vld [vmem:[#allocation7 + $0x80] sm:$0xf] }
 0x21e   :  { %v4454_v17 = vpop.eup %4453  ;;  %v1281_v6 = vsel %vm1053_vm0, %v4452_v39, 0.0  ;;  %1528 = vmatpush.bf16.msrb.mxu0 %v3564_v38  ;;  %1583 = vmatpush.bf16.msrb.mxu3 %v3648_v60  ;;  %v4284_v38 = vld [vmem:[#allocation7 + $0x94] sm:$0xf0]  ;;  %v3596_v34 = vor.u32 %v4282_v46, %v3595_v45  ;;  %v4509_v35 = vld [vmem:[#allocation3] sm:$0xff] }
 0x21f   :  { %v4456_v62 = vpop.eup %4455  ;;  %4457 = vpow2.f32 %v1279_v2  ;;  %1282 = vadd.xlane.f32.xlu2 %v1281_v6  ;;  %v1211_v18 = vsel %vm1053_vm0, %v4454_v17, 0.0  ;;  %v3539_v2 = vld [vmem:[#allocation7 + $0x10] sm:$0xf]  ;;  %v3627_v6 = vld [vmem:[#allocation7 + $0xc0] sm:$0xf]  ;;  %v3604_v41 = vor.u32 %v4284_v38, %v3603_v37  ;;  %v4510_v37 = vld [vmem:[#allocation3 + $0x8] sm:$0xff] }
 0x220   :  { %v1217_v44 = vpack.c.bf16 %v4456_v62, %v4454_v17  ;;  %1212 = vadd.xlane.f32.xlu0 %v1211_v18  ;;  %v1214_v13 = vsel %vm1053_vm0, %v4456_v62, 0.0  ;;  %v4268_v17 = vld [vmem:[#allocation7 + $0x14] sm:$0xf0]  ;;  %v4290_v18 = vld [vmem:[#allocation7 + $0xc4] sm:$0xf0] }
 0x221   :  { %1215 = vadd.xlane.f32.xlu1 %v1214_v13  ;;  %1567 = vmatpush.bf16.msrb.mxu2 %v3560_v57  ;;  %v3540_v62 = vor.u32 %v4268_v17, %v3539_v2  ;;  %v3541_v13 = vld [vmem:[#allocation7 + $0x18] sm:$0xf0] }
 0x222   :  { %3527 = vmatmul.msk.bf16.vlgmr.msra.gmra.mxu1 %vm1053_vm0, %v1217_v44  ;;  %1529 = vmatpush.bf16.msrb.mxu0 %v3556_v52  ;;  %v4267_v44 = vld [vmem:[#allocation7 + $0x14] sm:$0xf] }
 0x225   :  { %v4458_v0 = vpop.eup %4457  ;;  %1568 = vmatpush.bf16.msrb.mxu2 %v3552_v14 }
 0x226   :  { %v1287_v12 = vpack.c.bf16 %v4458_v0, %v4452_v39  ;;  %v1284_v19 = vsel %vm1053_vm0, %v4458_v0, 0.0  ;;  %1530 = vmatpush.bf16.msrb.mxu0 %v3548_v7  ;;  %v3640_v39 = vor.u32 %v4291_v15, %v3637_v16  ;;  %v3628_v0 = vor.u32 %v4290_v18, %v3627_v6 }
 0x228   :  { %1285 = vadd.xlane.f32.xlu0 %v1284_v19  ;;  %3528 = vmatmul.msk.bf16.vlgmr.msra.gmra.mxu3 %vm1053_vm0, %v1287_v12  ;;  %v3544_v12 = vor.u32 %v4267_v44, %v3541_v13  ;;  %v4289_v19 = vld [vmem:[#allocation7 + $0xc4] sm:$0xf] }
 0x229   :  { %1584 = vmatpush.bf16.msrb.mxu3 %v3640_v39  ;;  %v3632_v21 = vor.u32 %v4289_v19, %v3629_v20  ;;  %1547 = vmatpush.bf16.msrb.mxu1 %v3628_v0 }
 0x22a   :  { %1531 = vmatpush.bf16.msrb.mxu0 %v3540_v62  ;;  %1569 = vmatpush.bf16.msrb.mxu2 %v3544_v12 }
 0x22d   :  { %1585 = vmatpush.bf16.msrb.mxu3 %v3632_v21  ;;  %1548 = vmatpush.bf16.msrb.mxu1 %v3620_v1 }
 0x22e   :  { %1532 = vmatpush.bf16.msrb.mxu0 %v3532_v24  ;;  %1570 = vmatpush.bf16.msrb.mxu2 %v3536_v26  ;;  %v1359_v24 = vld [vmem:[%s5374_s5] sm:$0x3] }
 0x22f   :  { %v1361_v63 = vperm.slane %v1359_v24, 0  ;;  %v1362_v1 = vperm.slane %v1359_v24, 1 }
 0x231   :  { %1586 = vmatpush.bf16.msrb.mxu3 %v3624_v29  ;;  %1549 = vmatpush.bf16.msrb.mxu1 %v3612_v33 }
 0x235   :  { %1587 = vmatpush.bf16.msrb.mxu3 %v3616_v36  ;;  %1550 = vmatpush.bf16.msrb.mxu1 %v3604_v41 }
 0x239   :  { %1588 = vmatpush.bf16.msrb.mxu3 %v3608_v43  ;;  %1551 = vmatpush.bf16.msrb.mxu1 %v3596_v34 }
 0x23d   :  { %1589 = vmatpush.bf16.msrb.mxu3 %v3600_v50  ;;  %v4511_v50 = vld [vmem:[#allocation3 + $0x10] sm:$0xff] }
 0x27c   :  { %v1068_v51 = vpop.xlane.xlu2 %1067 }
 0x27d   :  { %4459 = vrcp.f32 %v1068_v51 }
 0x282   :  { %v1138_v55 = vpop.xlane.xlu1 %1137 }
 0x283   :  { %v4460_v54 = vpop.eup %4459 }
 0x284   :  { %v1071_v52 = vpop.xlane.xlu0 %1070 }
 0x285   :  { %4461 = vrcp.f32 %v1071_v52  ;;  %v4512_v52 = vld [vmem:[#allocation3 + $0x18] sm:$0xff] }
 0x286   :  { %4463 = vrcp.f32 %v1138_v55 }
 0x28a   :  { %v1141_v60 = vpop.xlane.xlu2 %1140 }
 0x28b   :  { %v4462_v56 = vpop.eup %4461  ;;  %4465 = vrcp.f32 %v1141_v60 }
 0x28c   :  { %v4464_v9 = vpop.eup %4463 }
 0x28f   :  { %v1091_v53 = vpop.f32.mrf.mxu1 }
 0x290   :  { %v1098_v58 = vmul.f32 %v4460_v54, %v1091_v53 }
 0x291   :  { %v4466_v10 = vpop.eup %4465 }
 0x292   :  { %v1283_v18 = vpop.xlane.xlu2 %1282 }
 0x293   :  { %v1213_v5 = vpop.xlane.xlu0 %1212 }
 0x294   :  { %v1216_v7 = vpop.xlane.xlu1 %1215  ;;  %4467 = vrcp.f32 %v1213_v5  ;;  %v4514_v5 = vld [vmem:[#allocation3 + $0x28] sm:$0xff] }
 0x295   :  { %4469 = vrcp.f32 %v1216_v7 }
 0x296   :  { %4471 = vrcp.f32 %v1283_v18 }
 0x297   :  { %v1093_v57 = vpop.f32.mrf.mxu1 }
 0x298   :  { %v1099_v59 = vmul.f32 %v4462_v56, %v1093_v57 }
 0x29a   :  { %v1323_v61 = vpack.c.bf16 %v1099_v59, %v1098_v58  ;;  %v4468_v16 = vpop.eup %4467 }
 0x29b   :  { %v1159_v4 = vpop.f32.mrf.mxu3  ;;  %v4470_v2 = vpop.eup %4469 }
 0x29c   :  { %1533 = vmatmul.bf16.vlgmr.msrb.gmra.mxu0 %v1323_v61  ;;  %1571 = vmatmul.bf16.vlgmr.msrb.gmra.mxu2 %v1323_v61  ;;  %v1166_v14 = vmul.f32 %v4464_v9, %v1159_v4  ;;  %v1286_v44 = vpop.xlane.xlu0 %1285  ;;  %v4472_v12 = vpop.eup %4471  ;;  %v4513_v61 = vld [vmem:[#allocation3 + $0x20] sm:$0xff] }
 0x29d   :  { %4473 = vrcp.f32 %v1286_v44  ;;  %v4758_v44 = vmov 256.0  }
 0x29e   :  { %4475 = vrcp.f32 %v4758_v44 }
 0x29f   :  { %v1236_v8 = vpop.f32.mrf.mxu1 }
 0x2a0   :  { %v1243_v6 = vmul.f32 %v4468_v16, %v1236_v8 }
 0x2a3   :  { %v1161_v11 = vpop.f32.mrf.mxu3  ;;  %v4474_v19 = vpop.eup %4473 }
 0x2a4   :  { %v1167_v15 = vmul.f32 %v4466_v10, %v1161_v11 }
 0x2a6   :  { %v1324_v39 = vpack.c.bf16 %v1167_v15, %v1166_v14 }
 0x2a7   :  { %v1238_v17 = vpop.f32.mrf.mxu1 }
 0x2a8   :  { %v1244_v62 = vmul.f32 %v4470_v2, %v1238_v17  ;;  %1552 = vmatmul.bf16.vlgmr.msrb.gmra.mxu1 %v1324_v39  ;;  %1590 = vmatmul.bf16.vlgmr.msrb.gmra.mxu3 %v1324_v39  ;;  %v4515_v2 = vld [vmem:[#allocation3 + $0x30] sm:$0xff] }
 0x2aa   :  { %v1325_v13 = vpack.c.bf16 %v1244_v62, %v1243_v6  ;;  %v4516_v6 = vld [vmem:[#allocation3 + $0x38] sm:$0xff] }
 0x2ab   :  { %v1304_v0 = vpop.f32.mrf.mxu3 }
 0x2ac   :  { %1538 = vmatmul.bf16.gmra.mxu0 %v1325_v13  ;;  %1576 = vmatmul.bf16.gmra.mxu2 %v1325_v13  ;;  %v1311_v21 = vmul.f32 %v4472_v12, %v1304_v0  ;;  %v4476_v13 = vpop.eup %4475 }
 0x2ad   :  { %v1624_v0 = vmul.f32 256.0, %v4476_v13  ;;  %vm1628_vm1 = vweird.f32 %v4476_v13 }
 0x2af   :  { %v1625_v12 = vsub.f32 1.0, %v1624_v0  ;;  %v4317_v0 = vld [vmem:[#allocation10 + $0xa4] sm:$0xf] }
 0x2b3   :  { %v1306_v20 = vpop.f32.mrf.mxu3 }
 0x2b4   :  { %v1312_v22 = vmul.f32 %v4474_v19, %v1306_v20  ;;  %v1626_v19 = vmul.f32 %v4476_v13, %v1625_v12 }
 0x2b6   :  { %v1326_v23 = vpack.c.bf16 %v1312_v22, %v1311_v21  ;;  %v1627_v20 = vadd.f32 %v4476_v13, %v1626_v19  ;;  %v3741_v19 = vld [vmem:[#allocation10 + $0xb0] sm:$0xf0] }
 0x2b8   :  { %1557 = vmatmul.bf16.gmra.mxu1 %v1326_v23  ;;  %1595 = vmatmul.bf16.gmra.mxu3 %v1326_v23  ;;  %v4954_v21 = vsel %vm1628_vm1, %v4476_v13, %v1627_v20  ;;  %v4351_v13 = vld [vmem:[#allocation10 + $0x1ac] sm:$0xf0]  ;;  %v4349_v20 = vld [vmem:[#allocation10 + $0x1a4] sm:$0xf] }
 0x319   :  { %v1534_v3 = vpop.f32.mrf.mxu0 }
 0x31a   :  { %v1535_v26 = vadd.f32 %v1534_v3, %v1361_v63 }
 0x31f   :  { %v1572_v25 = vpop.f32.mrf.mxu2 }
 0x320   :  { %v1573_v28 = vadd.f32 %v1572_v25, %v1362_v1 }
 0x321   :  { %v1536_v27 = vpop.f32.mrf.mxu0 }
 0x322   :  { %v1537_v40 = vadd.f32 %v1536_v27, %v1361_v63 }
 0x325   :  { %v1553_v49 = vpop.f32.mrf.mxu1 }
 0x326   :  { %v1554_v29 = vadd.f32 %v1553_v49, %v1535_v26 }
 0x327   :  { %v1574_v30 = vpop.f32.mrf.mxu2 }
 0x328   :  { %v1601_v36 = vadd.f32 %v4509_v35, %v1554_v29  ;;  %v1575_v42 = vadd.f32 %v1574_v30, %v1362_v1 }
 0x329   :  { %v1539_v45 = vpop.f32.mrf.mxu0 }
 0x32a   :  { %v1540_v54 = vadd.f32 %v1539_v45, %v1361_v63 }
 0x32b   :  { %v1591_v31 = vpop.f32.mrf.mxu3 }
 0x32c   :  { %v1592_v32 = vadd.f32 %v1591_v31, %v1573_v28 }
 0x32d   :  { %v1555_v33 = vpop.f32.mrf.mxu1 }
 0x32e   :  { %v1602_v38 = vadd.f32 %v4510_v37, %v1592_v32  ;;  %v1556_v43 = vadd.f32 %v1555_v33, %v1537_v40 }
 0x32f   :  { %v1577_v34 = vpop.f32.mrf.mxu2 }
 0x330   :  { %v1611_v41 = vadd.f32 %v1602_v38, %v1601_v36  ;;  %v1603_v51 = vadd.f32 %v4511_v50, %v1556_v43  ;;  %v1578_v56 = vadd.f32 %v1577_v34, %v1362_v1  ;;  %v4327_v50 = vld [vmem:[#allocation10 + $0xec] sm:$0xf0] }
 0x331   :  { %v1541_v60 = vpop.f32.mrf.mxu0 }
 0x332   :  { %1612 = vadd.xlane.f32.xlu1 %v1611_v41  ;;  %v1542_v10 = vadd.f32 %v1541_v60, %v1361_v63 }
 0x333   :  { %v1593_v46 = vpop.f32.mrf.mxu3 }
 0x334   :  { %v1594_v47 = vadd.f32 %v1593_v46, %v1575_v42 }
 0x335   :  { %v1558_v48 = vpop.f32.mrf.mxu1 }
 0x336   :  { %v1604_v53 = vadd.f32 %v4512_v52, %v1594_v47  ;;  %v1559_v57 = vadd.f32 %v1558_v48, %v1540_v54  ;;  %v3771_v48 = vld [vmem:[#allocation10 + $0xe0] sm:$0xf]  ;;  %v4325_v54 = vld [vmem:[#allocation10 + $0xe4] sm:$0xf] }
 0x337   :  { %v1579_v8 = vpop.f32.mrf.mxu2  ;;  %v3772_v52 = vor.u32 %v4327_v50, %v3771_v48 }
 0x338   :  { %v1614_v55 = vadd.f32 %v1604_v53, %v1603_v51  ;;  %v1605_v4 = vadd.f32 %v4513_v61, %v1559_v57  ;;  %v1580_v14 = vadd.f32 %v1579_v8, %v1362_v1  ;;  %v3755_v61 = vld [vmem:[#allocation10 + $0xc0] sm:$0xf]  ;;  %v4355_v8 = vld [vmem:[#allocation10 + $0x1cc] sm:$0xf0] }
 0x339   :  { %2206 = vmatpush.bf16.msra.mxu0 %v3772_v52  ;;  %v4309_v52 = vld [vmem:[#allocation10 + $0x64] sm:$0xf] }
 0x33a   :  { %1615 = vadd.xlane.f32.xlu2 %v1614_v55  ;;  %v3773_v55 = vld [vmem:[#allocation10 + $0xf0] sm:$0xf0] }
 0x33b   :  { %v1596_v58 = vpop.f32.mrf.mxu3  ;;  %v3776_v57 = vor.u32 %v4325_v54, %v3773_v55  ;;  %v3709_v55 = vld [vmem:[#allocation10 + $0x70] sm:$0xf0] }
 0x33c   :  { %v1597_v59 = vadd.f32 %v1596_v58, %v1578_v56  ;;  %v4357_v58 = vld [vmem:[#allocation10 + $0x1e4] sm:$0xf] }
 0x33d   :  { %v1560_v9 = vpop.f32.mrf.mxu1  ;;  %2244 = vmatpush.bf16.msra.mxu2 %v3776_v57  ;;  %v3837_v57 = vld [vmem:[#allocation10 + $0x170] sm:$0xf0] }
 0x33e   :  { %v1606_v7 = vadd.f32 %v4514_v5, %v1597_v59  ;;  %v1561_v15 = vadd.f32 %v1560_v9, %v1542_v10  ;;  %v3901_v59 = vld [vmem:[#allocation10 + $0x1f0] sm:$0xf0]  ;;  %v3883_v5 = vld [vmem:[#allocation10 + $0x1c0] sm:$0xf]  ;;  %v4321_v9 = vld [vmem:[#allocation10 + $0xc4] sm:$0xf] }
 0x33f   :  { %v3904_v60 = vor.u32 %v4357_v58, %v3901_v59  ;;  %v3757_v10 = vld [vmem:[#allocation10 + $0xd0] sm:$0xf0]  ;;  %v3712_v59 = vor.u32 %v4309_v52, %v3709_v55 }
 0x340   :  { %v1617_v11 = vadd.f32 %v1606_v7, %v1605_v4  ;;  %v1607_v17 = vadd.f32 %v4515_v2, %v1561_v15  ;;  %v4353_v15 = vld [vmem:[#allocation10 + $0x1c4] sm:$0xf]  ;;  %v3789_v55 = vld [vmem:[#allocation10 + $0x110] sm:$0xf0] }
 0x341   :  { %2263 = vmatpush.bf16.msra.mxu3 %v3904_v60 }
 0x342   :  { %1618 = vadd.xlane.f32.xlu0 %v1617_v11  ;;  %v3884_v11 = vor.u32 %v4355_v8, %v3883_v5  ;;  %v3819_v5 = vld [vmem:[#allocation10 + $0x140] sm:$0xf]  ;;  %v4339_v8 = vld [vmem:[#allocation10 + $0x14c] sm:$0xf0] }
 0x343   :  { %v1598_v16 = vpop.f32.mrf.mxu3 }
 0x344   :  { %v1599_v39 = vadd.f32 %v1598_v16, %v1580_v14  ;;  %v3760_v14 = vor.u32 %v4321_v9, %v3757_v10  ;;  %v3885_v16 = vld [vmem:[#allocation10 + $0x1d0] sm:$0xf0]  ;;  %v4305_v9 = vld [vmem:[#allocation10 + $0x44] sm:$0xf] }
 0x345   :  { %v3693_v10 = vld [vmem:[#allocation10 + $0x50] sm:$0xf0] }
 0x346   :  { %v1608_v62 = vadd.f32 %v4516_v6, %v1599_v39  ;;  %v3888_v39 = vor.u32 %v4353_v15, %v3885_v16  ;;  %2245 = vmatpush.bf16.msra.mxu2 %v3760_v14  ;;  %v4319_v6 = vld [vmem:[#allocation10 + $0xac] sm:$0xf0]  ;;  %v3820_v14 = vor.u32 %v4339_v8, %v3819_v5  ;;  %v3696_v15 = vor.u32 %v4305_v9, %v3693_v10  ;;  %v4337_v16 = vld [vmem:[#allocation10 + $0x144] sm:$0xf]  ;;  %v1610_v5 = vld [vmem:[#allocation8] sm:$0x3] }
 0x347   :  { %v3779_v9 = vld [vmem:[#allocation10 + $0xe8] sm:$0xf]  ;;  %v4328_v10 = vld [vmem:[#allocation10 + $0xf4] sm:$0xf0] }
 0x348   :  { %v1620_v18 = vadd.f32 %v1608_v62, %v1607_v17  ;;  %2264 = vmatpush.bf16.msra.mxu3 %v3888_v39  ;;  %v3821_v39 = vld [vmem:[#allocation10 + $0x150] sm:$0xf0] }
 0x34a   :  { %1621 = vadd.xlane.f32.xlu1 %v1620_v18 }
 0x3a5   :  { %v1613_v22 = vpop.xlane.xlu1 %1612 }
 0x3a6   :  { %v1630_v23 = vmul.f32 %v4954_v21, %v1613_v22  ;;  %v3869_v22 = vld [vmem:[#allocation10 + $0x1b0] sm:$0xf0] }
 0x3a8   :  { %v4957_v3 = vsub.f32 %v1601_v36, %v1630_v23  ;;  %v4959_v24 = vsub.f32 %v1602_v38, %v1630_v23  ;;  %v3744_v23 = vor.u32 %v4317_v0, %v3741_v19  ;;  %v3803_v19 = vld [vmem:[#allocation10 + $0x120] sm:$0xf] }
 0x3aa   :  { %v1642_v25 = vmul.f32 %v4957_v3, %v4957_v3  ;;  %v1643_v63 = vmul.f32 %v4959_v24, %v4959_v24  ;;  %2246 = vmatpush.bf16.msra.mxu2 %v3744_v23 }
 0x3ac   :  { %v1650_v49 = vadd.f32 %v1643_v63, %v1642_v25  ;;  %v3872_v25 = vor.u32 %v4349_v20, %v3869_v22  ;;  %v3723_v63 = vld [vmem:[#allocation10 + $0x80] sm:$0xf]  ;;  %v4335_v20 = vld [vmem:[#allocation10 + $0x12c] sm:$0xf0]  ;;  %v1609_v22 = vld [vmem:[%s5375_s6] sm:$0x3] }
 0x3ad   :  { %v1616_v1 = vpop.xlane.xlu2 %1615 }
 0x3ae   :  { %v1631_v26 = vmul.f32 %v4954_v21, %v1616_v1  ;;  %1651 = vadd.xlane.f32.xlu2 %v1650_v49  ;;  %v4315_v49 = vld [vmem:[#allocation10 + $0x8c] sm:$0xf0]  ;;  %v3851_v1 = vld [vmem:[#allocation10 + $0x180] sm:$0xf]  ;;  %2265 = vmatpush.bf16.msra.mxu3 %v3872_v25 }
 0x3b0   :  { %v4966_v27 = vsub.f32 %v1603_v51, %v1631_v26  ;;  %v4968_v28 = vsub.f32 %v1604_v53, %v1631_v26  ;;  %v3899_v51 = vld [vmem:[#allocation10 + $0x1e0] sm:$0xf]  ;;  %v4359_v53 = vld [vmem:[#allocation10 + $0x1ec] sm:$0xf0]  ;;  %v3724_v26 = vor.u32 %v4315_v49, %v3723_v63  ;;  %v3804_v63 = vor.u32 %v4335_v20, %v3803_v19  ;;  %v4301_v49 = vld [vmem:[#allocation10 + $0x24] sm:$0xf] }
 0x3b1   :  { %v3900_v56 = vor.u32 %v4359_v53, %v3899_v51  ;;  %v4343_v51 = vld [vmem:[#allocation10 + $0x16c] sm:$0xf0] }
 0x3b2   :  { %v1644_v29 = vmul.f32 %v4966_v27, %v4966_v27  ;;  %v1645_v30 = vmul.f32 %v4968_v28, %v4968_v28 }
 0x3b3   :  { %2225 = vmatpush.bf16.msra.mxu1 %v3900_v56  ;;  %v4341_v56 = vld [vmem:[#allocation10 + $0x164] sm:$0xf] }
 0x3b4   :  { %v1653_v31 = vadd.f32 %v1645_v30, %v1644_v29  ;;  %v4347_v29 = vld [vmem:[#allocation10 + $0x18c] sm:$0xf0]  ;;  %v4313_v30 = vld [vmem:[#allocation10 + $0x84] sm:$0xf]  ;;  %v3840_v60 = vor.u32 %v4341_v56, %v3837_v57  ;;  %v5013_v56 = vperm.slane %v1609_v22, 0 }
 0x3b5   :  { %v1619_v32 = vpop.xlane.xlu0 %1618 }
 0x3b6   :  { %v1632_v33 = vmul.f32 %v4954_v21, %v1619_v32  ;;  %1654 = vadd.xlane.f32.xlu0 %v1653_v31  ;;  %v3725_v31 = vld [vmem:[#allocation10 + $0x90] sm:$0xf0]  ;;  %v3852_v32 = vor.u32 %v4347_v29, %v3851_v1 }
 0x3b7   :  { %2226 = vmatpush.bf16.msra.mxu1 %v3884_v11  ;;  %v3677_v1 = vld [vmem:[#allocation10 + $0x30] sm:$0xf0] }
 0x3b8   :  { %v4975_v35 = vsub.f32 %v1605_v4, %v1632_v33  ;;  %v4977_v36 = vsub.f32 %v1606_v7, %v1632_v33  ;;  %v4323_v4 = vld [vmem:[#allocation10 + $0xcc] sm:$0xf0]  ;;  %v3728_v33 = vor.u32 %v4313_v30, %v3725_v31  ;;  %v3805_v30 = vld [vmem:[#allocation10 + $0x130] sm:$0xf0] }
 0x3b9   :  { %v3756_v7 = vor.u32 %v4323_v4, %v3755_v61  ;;  %v3691_v61 = vld [vmem:[#allocation10 + $0x40] sm:$0xf]  ;;  %v4307_v4 = vld [vmem:[#allocation10 + $0x4c] sm:$0xf0] }
 0x3ba   :  { %v1646_v37 = vmul.f32 %v4975_v35, %v4975_v35  ;;  %v1647_v38 = vmul.f32 %v4977_v36, %v4977_v36  ;;  %2247 = vmatpush.bf16.msra.mxu2 %v3728_v33  ;;  %v3680_v33 = vor.u32 %v4301_v49, %v3677_v1  ;;  %v3891_v1 = vld [vmem:[#allocation10 + $0x1c8] sm:$0xf] }
 0x3bb   :  { %2207 = vmatpush.bf16.msra.mxu0 %v3756_v7  ;;  %v3692_v7 = vor.u32 %v4307_v4, %v3691_v61 }
 0x3bc   :  { %v1656_v40 = vadd.f32 %v1647_v38, %v1646_v37  ;;  %v4345_v37 = vld [vmem:[#allocation10 + $0x184] sm:$0xf]  ;;  %v3853_v38 = vld [vmem:[#allocation10 + $0x190] sm:$0xf0] }
 0x3bd   :  { %v1622_v41 = vpop.xlane.xlu1 %1621 }
 0x3be   :  { %v1633_v42 = vmul.f32 %v4954_v21, %v1622_v41  ;;  %1657 = vadd.xlane.f32.xlu1 %v1656_v40  ;;  %v3856_v40 = vor.u32 %v4345_v37, %v3853_v38  ;;  %2248 = vmatpush.bf16.msra.mxu2 %v3712_v59  ;;  %v3659_v38 = vld [vmem:[#allocation10] sm:$0xf]  ;;  %v5017_v59 = vperm.slane %v1609_v22, 1  ;;  %v3909_v22 = vld [vmem:[#allocation10 + $0x1f8] sm:$0xf0] }
 0x3c0   :  { %v4984_v43 = vsub.f32 %v1607_v17, %v1633_v42  ;;  %v4986_v45 = vsub.f32 %v1608_v62, %v1633_v42  ;;  %v3739_v17 = vld [vmem:[#allocation10 + $0xa0] sm:$0xf]  ;;  %2266 = vmatpush.bf16.msra.mxu3 %v3856_v40  ;;  %v4299_v40 = vld [vmem:[#allocation10 + $0xc] sm:$0xf0] }
 0x3c1   :  { %v3867_v62 = vld [vmem:[#allocation10 + $0x1a0] sm:$0xf]  ;;  %v3740_v44 = vor.u32 %v4319_v6, %v3739_v17 }
 0x3c2   :  { %v1648_v46 = vmul.f32 %v4984_v43, %v4984_v43  ;;  %v1649_v47 = vmul.f32 %v4986_v45, %v4986_v45  ;;  %v3868_v12 = vor.u32 %v4351_v13, %v3867_v62  ;;  %v3707_v42 = vld [vmem:[#allocation10 + $0x60] sm:$0xf]  ;;  %2249 = vmatpush.bf16.msra.mxu2 %v3696_v15  ;;  %v4360_v15 = vld [vmem:[#allocation10 + $0x1f4] sm:$0xf0] }
 0x3c3   :  { %2208 = vmatpush.bf16.msra.mxu0 %v3740_v44  ;;  %v3675_v62 = vld [vmem:[#allocation10 + $0x20] sm:$0xf]  ;;  %v4303_v44 = vld [vmem:[#allocation10 + $0x2c] sm:$0xf0] }
 0x3c4   :  { %v1659_v34 = vadd.f32 %v1649_v47, %v1648_v46  ;;  %2227 = vmatpush.bf16.msra.mxu1 %v3868_v12  ;;  %v4311_v46 = vld [vmem:[#allocation10 + $0x6c] sm:$0xf0]  ;;  %v3835_v47 = vld [vmem:[#allocation10 + $0x160] sm:$0xf]  ;;  %2267 = vmatpush.bf16.msra.mxu3 %v3840_v60  ;;  %v3676_v12 = vor.u32 %v4303_v44, %v3675_v62  ;;  %v5030_v62 = vperm.slane %v1610_v5, 0  ;;  %v5032_v44 = vperm.slane %v1610_v5, 1 }
 0x3c5   :  { %v3708_v50 = vor.u32 %v4311_v46, %v3707_v42  ;;  %v3836_v54 = vor.u32 %v4343_v51, %v3835_v47  ;;  %v3660_v42 = vor.u32 %v4299_v40, %v3659_v38  ;;  %v4331_v46 = vld [vmem:[#allocation10 + $0x10c] sm:$0xf0]  ;;  %v4297_v47 = vld [vmem:[#allocation10 + $0x4] sm:$0xf] }
 0x3c6   :  { %1660 = vadd.xlane.f32.xlu2 %v1659_v34  ;;  %2250 = vmatpush.bf16.msra.mxu2 %v3680_v33  ;;  %v3765_v33 = vld [vmem:[#allocation10 + $0xd8] sm:$0xf0] }
 0x3c7   :  { %2209 = vmatpush.bf16.msra.mxu0 %v3724_v26  ;;  %v4333_v26 = vld [vmem:[#allocation10 + $0x124] sm:$0xf] }
 0x3c8   :  { %2228 = vmatpush.bf16.msra.mxu1 %v3852_v32  ;;  %v3808_v37 = vor.u32 %v4333_v26, %v3805_v30 }
 0x3cb   :  { %2210 = vmatpush.bf16.msra.mxu0 %v3708_v50 }
 0x3cc   :  { %2229 = vmatpush.bf16.msra.mxu1 %v3836_v54  ;;  %v4329_v54 = vld [vmem:[#allocation10 + $0x104] sm:$0xf] }
 0x3cf   :  { %2211 = vmatpush.bf16.msra.mxu0 %v3692_v7 }
 0x3d0   :  { %2230 = vmatpush.bf16.msra.mxu1 %v3820_v14  ;;  %v3907_v14 = vld [vmem:[#allocation10 + $0x1e8] sm:$0xf] }
 0x3d1   :  { %v3908_v19 = vor.u32 %v4360_v15, %v3907_v14  ;;  %v3749_v14 = vld [vmem:[#allocation10 + $0xb8] sm:$0xf0]  ;;  %v4350_v15 = vld [vmem:[#allocation10 + $0x1ac] sm:$0xf] }
 0x3d3   :  { %2212 = vmatpush.bf16.msra.mxu0 %v3676_v12  ;;  %v3780_v12 = vor.u32 %v4328_v10, %v3779_v9  ;;  %v4318_v9 = vld [vmem:[#allocation10 + $0xac] sm:$0xf] }
 0x3d4   :  { %2231 = vmatpush.bf16.msra.mxu1 %v3804_v63 }
 0x3d7   :  { %2213 = vmatpush.bf16.msra.mxu0 %v3660_v42 }
 0x3db   :  { %2282 = vmatpush.bf16.msrb.mxu0 %v3780_v12 }
 0x421   :  { %v1652_v2 = vpop.xlane.xlu2 %1651 }
 0x422   :  { %v4992_v18 = vmul.f32 0.003921569, %v1652_v2  ;;  %v3824_v2 = vor.u32 %v4337_v16, %v3821_v39  ;;  %v4326_v16 = vld [vmem:[#allocation10 + $0xec] sm:$0xf] }
 0x424   :  { %4477 = vrsqrt.f32 %v4992_v18  ;;  %2268 = vmatpush.bf16.msra.mxu3 %v3824_v2  ;;  %vm1673_vm2 = vcmp.eq.f32.partialorder %v4992_v18, inf  ;;  %vm1675_vm3 = vcmp.eq.f32.partialorder %v4992_v18, 0.0  ;;  %v1676_v29 = vand.u32 2147483648, %v4992_v18  ;;  %v3781_v2 = vld [vmem:[#allocation10 + $0xf8] sm:$0xf0] }
 0x425   :  { %v3784_v20 = vor.u32 %v4326_v16, %v3781_v2  ;;  %v3877_v16 = vld [vmem:[#allocation10 + $0x1b8] sm:$0xf0] }
 0x428   :  { %2269 = vmatpush.bf16.msra.mxu3 %v3808_v37 }
 0x429   :  { %v1655_v41 = vpop.xlane.xlu0 %1654 }
 0x42a   :  { %v4478_v34 = vpop.eup %4477  ;;  %v4995_v48 = vmul.f32 0.003921569, %v1655_v41  ;;  %v3787_v41 = vld [vmem:[#allocation10 + $0x100] sm:$0xf] }
 0x42b   :  { %v1667_v53 = vmul.f32 %v4478_v34, %v4992_v18  ;;  %v3788_v52 = vor.u32 %v4331_v46, %v3787_v41  ;;  %v4354_v46 = vld [vmem:[#allocation10 + $0x1cc] sm:$0xf] }
 0x42c   :  { %4479 = vrsqrt.f32 %v4995_v48  ;;  %vm1685_vm4 = vcmp.eq.f32.partialorder %v4995_v48, inf  ;;  %vm1687_vm5 = vcmp.eq.f32.partialorder %v4995_v48, 0.0  ;;  %v1688_v39 = vand.u32 2147483648, %v4995_v48 }
 0x42d   :  { %v1668_v58 = vmul.f32 %v4478_v34, %v1667_v53  ;;  %2232 = vmatpush.bf16.msra.mxu1 %v3788_v52 }
 0x42f   :  { %v1669_v11 = vmul.f32 0.5, %v1668_v58  ;;  %v3792_v58 = vor.u32 %v4329_v54, %v3789_v55  ;;  %v3875_v55 = vld [vmem:[#allocation10 + $0x1a8] sm:$0xf] }
 0x431   :  { %v1670_v17 = vsub.f32 1.5, %v1669_v11  ;;  %v1658_v6 = vpop.xlane.xlu1 %1657  ;;  %2270 = vmatpush.bf16.msra.mxu3 %v3792_v58  ;;  %2301 = vmatpush.bf16.msrb.mxu1 %v3908_v19 }
 0x432   :  { %v4480_v13 = vpop.eup %4479  ;;  %v4999_v0 = vmul.f32 0.003921569, %v1658_v6 }
 0x433   :  { %v1671_v23 = vmul.f32 %v4478_v34, %v1670_v17  ;;  %v1679_v25 = vmul.f32 %v4480_v13, %v4995_v48  ;;  %v3661_v34 = vld [vmem:[#allocation10 + $0x10] sm:$0xf0] }
 0x434   :  { %4481 = vrsqrt.f32 %v4999_v0  ;;  %v3664_v53 = vor.u32 %v4297_v47, %v3661_v34  ;;  %vm1697_vm6 = vcmp.eq.f32.partialorder %v4999_v0, inf  ;;  %vm1699_vm7 = vcmp.eq.f32.partialorder %v4999_v0, 0.0  ;;  %v3893_v34 = vld [vmem:[#allocation10 + $0x1d8] sm:$0xf0] }
 0x435   :  { %v1672_v31 = vmul.f32 %v1671_v23, %v4992_v18  ;;  %v1680_v32 = vmul.f32 %v4480_v13, %v1679_v25  ;;  %v3763_v23 = vld [vmem:[#allocation10 + $0xc8] sm:$0xf]  ;;  %v4324_v25 = vld [vmem:[#allocation10 + $0xd4] sm:$0xf0]  ;;  %v3896_v5 = vor.u32 %v4354_v46, %v3893_v34  ;;  %v1719_v46 = vmul.f32 %v5013_v56, %v4957_v3 }
 0x436   :  { %2251 = vmatpush.bf16.msra.mxu2 %v3664_v53  ;;  %v3764_v30 = vor.u32 %v4324_v25, %v3763_v23  ;;  %v1700_v53 = vand.u32 2147483648, %v4999_v0  ;;  %v3859_v23 = vld [vmem:[#allocation10 + $0x188] sm:$0xf]  ;;  %v4348_v25 = vld [vmem:[#allocation10 + $0x194] sm:$0xf0] }
 0x437   :  { %v1674_v50 = vsel %vm1673_vm2, %v4992_v18, %v1672_v31  ;;  %v1681_v51 = vmul.f32 0.5, %v1680_v32  ;;  %v4356_v31 = vld [vmem:[#allocation10 + $0x1d4] sm:$0xf0]  ;;  %v4322_v32 = vld [vmem:[#allocation10 + $0xcc] sm:$0xf] }
 0x438   :  { %v1677_v57 = vsel %vm1675_vm3, %v1676_v29, %v1674_v50  ;;  %v3892_v41 = vor.u32 %v4356_v31, %v3891_v1  ;;  %v3768_v42 = vor.u32 %v4322_v32, %v3765_v33  ;;  %v3747_v50 = vld [vmem:[#allocation10 + $0xa8] sm:$0xf]  ;;  %2283 = vmatpush.bf16.msrb.mxu0 %v3764_v30  ;;  %v3860_v1 = vor.u32 %v4348_v25, %v3859_v23  ;;  %v4346_v30 = vld [vmem:[#allocation10 + $0x18c] sm:$0xf] }
 0x439   :  { %v5019_v60 = vadd.f32 1e-06, %v1677_v57  ;;  %v1682_v61 = vsub.f32 1.5, %v1681_v51  ;;  %v1661_v4 = vpop.xlane.xlu2 %1660  ;;  %v4320_v51 = vld [vmem:[#allocation10 + $0xb4] sm:$0xf0] }
 0x43a   :  { %v4482_v7 = vpop.eup %4481  ;;  %v5021_v8 = vmul.f32 0.003921569, %v1661_v4  ;;  %2320 = vmatpush.bf16.msrb.mxu2 %v3784_v20  ;;  %v4352_v57 = vld [vmem:[#allocation10 + $0x1b4] sm:$0xf0]  ;;  %2302 = vmatpush.bf16.msrb.mxu1 %v3892_v41  ;;  %v3880_v20 = vor.u32 %v4350_v15, %v3877_v16  ;;  %v4338_v23 = vld [vmem:[#allocation10 + $0x14c] sm:$0xf] }
 0x43b   :  { %4483 = vrcp.f32 %v5019_v60  ;;  %v1683_v11 = vmul.f32 %v4480_v13, %v1682_v61  ;;  %v1691_v18 = vmul.f32 %v4482_v7, %v4999_v0  ;;  %v4358_v13 = vld [vmem:[#allocation10 + $0x1ec] sm:$0xf]  ;;  %v1740_v61 = vand.u32 2147483647, %v5019_v60  ;;  %v4308_v16 = vld [vmem:[#allocation10 + $0x54] sm:$0xf0] }
 0x43c   :  { %4485 = vrsqrt.f32 %v5021_v8  ;;  %v3912_v29 = vor.u32 %v4358_v13, %v3909_v22  ;;  %v1742_v4 = vand.u32 2147483648, %v5019_v60  ;;  %vm1709_vm8 = vcmp.eq.f32.partialorder %v5021_v8, inf  ;;  %v4316_v13 = vld [vmem:[#allocation10 + $0x94] sm:$0xf0] }
 0x43d   :  { %v1684_v17 = vmul.f32 %v1683_v11, %v4995_v48  ;;  %v1692_v6 = vmul.f32 %v4482_v7, %v1691_v18  ;;  %v3748_v11 = vor.u32 %v4320_v51, %v3747_v50  ;;  %v3876_v18 = vor.u32 %v4352_v57, %v3875_v55  ;;  %v3715_v51 = vld [vmem:[#allocation10 + $0x68] sm:$0xf]  ;;  %v4344_v57 = vld [vmem:[#allocation10 + $0x174] sm:$0xf0] }
 0x43e   :  { %2339 = vmatpush.bf16.msrb.mxu3 %v3912_v29  ;;  %2321 = vmatpush.bf16.msrb.mxu2 %v3768_v42  ;;  %vm1711_vm10 = vcmp.eq.f32.partialorder %v5021_v8, 0.0  ;;  %vm1736_vm11 = vweird.f32 %v5019_v60  ;;  %v3733_v29 = vld [vmem:[#allocation10 + $0x98] sm:$0xf0]  ;;  %vm1741_vm13 = vcmp.eq.f32.partialorder %v1740_v61, 8.507059e+37 }
 0x43f   :  { %v1686_v63 = vsel %vm1685_vm4, %v4995_v48, %v1684_v17  ;;  %v1693_v49 = vmul.f32 0.5, %v1692_v6  ;;  %v3752_v17 = vor.u32 %v4318_v9, %v3749_v14  ;;  %v3731_v6 = vld [vmem:[#allocation10 + $0x88] sm:$0xf]  ;;  %2284 = vmatpush.bf16.msrb.mxu0 %v3748_v11  ;;  %2303 = vmatpush.bf16.msrb.mxu1 %v3876_v18  ;;  %v3861_v42 = vld [vmem:[#allocation10 + $0x198] sm:$0xf0] }
 0x440   :  { %v1689_v26 = vsel %vm1687_vm5, %v1688_v39, %v1686_v63  ;;  %v3732_v22 = vor.u32 %v4316_v13, %v3731_v6  ;;  %v3864_v50 = vor.u32 %v4346_v30, %v3861_v42  ;;  %v4342_v18 = vld [vmem:[#allocation10 + $0x16c] sm:$0xf]  ;;  %v3845_v14 = vld [vmem:[#allocation10 + $0x178] sm:$0xf0]  ;;  %v3827_v6 = vld [vmem:[#allocation10 + $0x148] sm:$0xf] }
 0x441   :  { %v5041_v37 = vpop.eup %4483  ;;  %v5043_v38 = vadd.f32 1e-06, %v1689_v26  ;;  %v1694_v40 = vsub.f32 1.5, %v1693_v49  ;;  %v4314_v26 = vld [vmem:[#allocation10 + $0x8c] sm:$0xf] }
 0x442   :  { %v5045_v47 = vpop.eup %4485  ;;  %v1732_v48 = vmul.f32 %v5041_v37, %v5019_v60  ;;  %vm1737_vm9 = vweird.f32 %v5041_v37  ;;  %2340 = vmatpush.bf16.msrb.mxu3 %v3896_v5  ;;  %2322 = vmatpush.bf16.msrb.mxu2 %v3752_v17  ;;  %v3736_v41 = vor.u32 %v4314_v26, %v3733_v29  ;;  %v1743_v5 = vor.u32 1.1754944e-38, %v1742_v4  ;;  %v3699_v4 = vld [vmem:[#allocation10 + $0x48] sm:$0xf]  ;;  %v4340_v13 = vld [vmem:[#allocation10 + $0x154] sm:$0xf0] }
 0x443   :  { %4487 = vrcp.f32 %v5043_v38  ;;  %v1695_v52 = vmul.f32 %v4482_v7, %v1694_v40  ;;  %v1703_v54 = vmul.f32 %v5045_v47, %v5021_v8  ;;  %v1756_v2 = vand.u32 2147483647, %v5043_v38  ;;  %vm5076_vm12 = vmor %vm1736_vm11, %vm1737_vm9  ;;  %2285 = vmatpush.bf16.msrb.mxu0 %v3732_v22  ;;  %2304 = vmatpush.bf16.msrb.mxu1 %v3860_v1  ;;  %v3701_v22 = vld [vmem:[#allocation10 + $0x58] sm:$0xf0]  ;;  %v3683_v29 = vld [vmem:[#allocation10 + $0x28] sm:$0xf] }
 0x444   :  { %v1733_v58 = vsub.f32 1.0, %v1732_v48  ;;  %v1712_v40 = vand.u32 2147483648, %v5021_v8  ;;  %v1720_v48 = vmul.f32 %v5017_v59, %v4959_v24  ;;  %v1758_v3 = vand.u32 2147483648, %v5043_v38  ;;  %v3829_v26 = vld [vmem:[#allocation10 + $0x158] sm:$0xf0] }
 0x445   :  { %v1696_v10 = vmul.f32 %v1695_v52, %v4999_v0  ;;  %v1704_v7 = vmul.f32 %v5045_v47, %v1703_v54  ;;  %v4312_v52 = vld [vmem:[#allocation10 + $0x74] sm:$0xf0]  ;;  %v1721_v24 = vmul.f32 %v5013_v56, %v4966_v27  ;;  %vm5101_vm15 = vcmp.eq.f32.partialorder %v1756_v2, 8.507059e+37  ;;  %v3811_v42 = vld [vmem:[#allocation10 + $0x128] sm:$0xf] }
 0x446   :  { %v1734_v39 = vmul.f32 %v5041_v37, %v1733_v58  ;;  %2341 = vmatpush.bf16.msrb.mxu3 %v3880_v20  ;;  %v1722_v58 = vmul.f32 %v5017_v59, %v4968_v28  ;;  %2323 = vmatpush.bf16.msrb.mxu2 %v3736_v41  ;;  %v1759_v61 = vor.u32 1.1754944e-38, %v1758_v3  ;;  %v3848_v17 = vor.u32 %v4342_v18, %v3845_v14  ;;  %v4306_v20 = vld [vmem:[#allocation10 + $0x4c] sm:$0xf]  ;;  %v4304_v41 = vld [vmem:[#allocation10 + $0x34] sm:$0xf0] }
 0x447   :  { %v1698_v12 = vsel %vm1697_vm6, %v4999_v0, %v1696_v10  ;;  %v1705_v19 = vmul.f32 0.5, %v1704_v7  ;;  %v4310_v10 = vld [vmem:[#allocation10 + $0x6c] sm:$0xf]  ;;  %v3717_v7 = vld [vmem:[#allocation10 + $0x78] sm:$0xf0]  ;;  %vm1752_vm0 = vweird.f32 %v5043_v38  ;;  %v3828_v1 = vor.u32 %v4340_v13, %v3827_v6 }
 0x448   :  { %v1701_v63 = vsel %vm1699_vm7, %v1700_v53, %v1698_v12  ;;  %v1735_v49 = vadd.f32 %v5041_v37, %v1734_v39  ;;  %v3843_v53 = vld [vmem:[#allocation10 + $0x168] sm:$0xf]  ;;  %v3720_v39 = vor.u32 %v4310_v10, %v3717_v7  ;;  %v3832_v0 = vor.u32 %v4338_v23, %v3829_v26  ;;  %v4300_v10 = vld [vmem:[#allocation10 + $0x14] sm:$0xf0]  ;;  %v4330_v6 = vld [vmem:[#allocation10 + $0x10c] sm:$0xf] }
 0x449   :  { %v5069_v31 = vpop.eup %4487  ;;  %v5071_v32 = vadd.f32 1e-06, %v1701_v63  ;;  %v1706_v33 = vsub.f32 1.5, %v1705_v19  ;;  %v3844_v11 = vor.u32 %v4344_v57, %v3843_v53  ;;  %v3700_v19 = vor.u32 %v4308_v16, %v3699_v4  ;;  %v3797_v13 = vld [vmem:[#allocation10 + $0x118] sm:$0xf0] }
 0x44a   :  { %v1748_v34 = vmul.f32 %v5069_v31, %v5043_v38  ;;  %v1739_v55 = vsel %vm5076_vm12, %v5041_v37, %v1735_v49  ;;  %v3716_v37 = vor.u32 %v4312_v52, %v3715_v51  ;;  %vm1753_vm14 = vweird.f32 %v5069_v31  ;;  %2342 = vmatpush.bf16.msrb.mxu3 %v3864_v50  ;;  %2324 = vmatpush.bf16.msrb.mxu2 %v3720_v39  ;;  %v4302_v50 = vld [vmem:[#allocation10 + $0x2c] sm:$0xf]  ;;  %v3685_v51 = vld [vmem:[#allocation10 + $0x38] sm:$0xf0] }
 0x44b   :  { %4489 = vrcp.f32 %v5071_v32  ;;  %v1707_v54 = vmul.f32 %v5045_v47, %v1706_v33  ;;  %v1744_v27 = vsel %vm1741_vm13, %v1743_v5, %v1739_v55  ;;  %2305 = vmatpush.bf16.msrb.mxu1 %v3844_v11  ;;  %vm5118_vm1 = vmor %vm1752_vm0, %vm1753_vm14  ;;  %v3704_v38 = vor.u32 %v4306_v20, %v3701_v22  ;;  %v4332_v11 = vld [vmem:[#allocation10 + $0x114] sm:$0xf0] }
 0x44c   :  { %v1749_v9 = vsub.f32 1.0, %v1748_v34  ;;  %2286 = vmatpush.bf16.msrb.mxu0 %v3716_v37  ;;  %v1745_v49 = vmul.f32 %v1744_v27, %v1719_v46  ;;  %v1746_v33 = vmul.f32 %v1744_v27, %v1720_v48  ;;  %v4336_v46 = vld [vmem:[#allocation10 + $0x134] sm:$0xf0]  ;;  %v3813_v48 = vld [vmem:[#allocation10 + $0x138] sm:$0xf0]  ;;  %v3684_v3 = vor.u32 %v4304_v41, %v3683_v29 }
 0x44d   :  { %v1708_v47 = vmul.f32 %v1707_v54, %v5021_v8  ;;  %v3812_v57 = vor.u32 %v4336_v46, %v3811_v42  ;;  %v3688_v5 = vor.u32 %v4302_v50, %v3685_v51  ;;  %v3795_v37 = vld [vmem:[#allocation10 + $0x108] sm:$0xf]  ;;  %v4298_v27 = vld [vmem:[#allocation10 + $0xc] sm:$0xf]  ;;  %vm1768_vm3 = vweird.f32 %v5071_v32  ;;  %v4376_v50 = vld [vmem:[#allocation13 + $0x74] sm:$0xf0] }
 0x44e   :  { %v1750_v15 = vmul.f32 %v5069_v31, %v1749_v9  ;;  %2343 = vmatpush.bf16.msrb.mxu3 %v3848_v17  ;;  %v5131_v55 = vadd.f32 %v5030_v62, %v1745_v49  ;;  %2325 = vmatpush.bf16.msrb.mxu2 %v3704_v38  ;;  %v3667_v9 = vld [vmem:[#allocation10 + $0x8] sm:$0xf]  ;;  %v3796_v39 = vor.u32 %v4332_v11, %v3795_v37  ;;  %v4370_v37 = vld [vmem:[#allocation13 + $0x44] sm:$0xf0] }
 0x44f   :  { %v1710_v60 = vsel %vm1709_vm8, %v5021_v8, %v1708_v47  ;;  %2306 = vmatpush.bf16.msrb.mxu1 %v3828_v1  ;;  %v3668_v14 = vor.u32 %v4300_v10, %v3667_v9  ;;  %v3800_v22 = vor.u32 %v4330_v6, %v3797_v13  ;;  %v1723_v38 = vmul.f32 %v5013_v56, %v4975_v35  ;;  %v3931_v6 = vld [vmem:[#allocation13 + $0x20] sm:$0xf]  ;;  %v4003_v13 = vld [vmem:[#allocation13 + $0xb0] sm:$0xf] }
 0x450   :  { %v1713_v12 = vsel %vm1711_vm10, %v1712_v40, %v1710_v60  ;;  %v1751_v2 = vadd.f32 %v5069_v31, %v1750_v15  ;;  %2287 = vmatpush.bf16.msrb.mxu0 %v3700_v19  ;;  %v3669_v15 = vld [vmem:[#allocation10 + $0x18] sm:$0xf0]  ;;  %v1725_v29 = vmul.f32 %v5013_v56, %v4984_v43 }
 0x451   :  { %v5112_v25 = vpop.eup %4489  ;;  %v5114_v63 = vadd.f32 1e-06, %v1713_v12  ;;  %v3672_v17 = vor.u32 %v4298_v27, %v3669_v15  ;;  %v1772_v12 = vand.u32 2147483647, %v5071_v32  ;;  %v3939_v15 = vld [vmem:[#allocation13 + $0x30] sm:$0xf] }
 0x452   :  { %v1755_v30 = vsel %vm5118_vm1, %v5069_v31, %v1751_v2  ;;  %v1764_v40 = vmul.f32 %v5112_v25, %v5071_v32  ;;  %v4334_v31 = vld [vmem:[#allocation10 + $0x12c] sm:$0xf]  ;;  %2344 = vmatpush.bf16.msrb.mxu3 %v3832_v0  ;;  %vm1769_vm2 = vweird.f32 %v5112_v25  ;;  %2326 = vmatpush.bf16.msrb.mxu2 %v3688_v5  ;;  %v4372_v5 = vld [vmem:[#allocation13 + $0x54] sm:$0xf0] }
 0x453   :  { %4491 = vrcp.f32 %v5114_v63  ;;  %v1760_v34 = vsel %vm5101_vm15, %v1759_v61, %v1755_v30  ;;  %v3816_v18 = vor.u32 %v4334_v31, %v3813_v48  ;;  %2307 = vmatpush.bf16.msrb.mxu1 %v3812_v57  ;;  %v1774_v61 = vand.u32 2147483648, %v5071_v32  ;;  %vm1770_vm4 = vmor %vm1768_vm3, %vm1769_vm2  ;;  %v3955_v57 = vld [vmem:[#allocation13 + $0x50] sm:$0xf] }
 0x454   :  { %v1761_v52 = vmul.f32 %v1760_v34, %v1721_v24  ;;  %v1762_v53 = vmul.f32 %v1760_v34, %v1722_v58  ;;  %v1765_v54 = vsub.f32 1.0, %v1764_v40  ;;  %v5137_v24 = vadd.f32 %v5032_v44, %v1746_v33  ;;  %2288 = vmatpush.bf16.msrb.mxu0 %v3684_v3  ;;  %v3971_v34 = vld [vmem:[#allocation13 + $0x70] sm:$0xf]  ;;  %v4390_v3 = vld [vmem:[#allocation13 + $0xe4] sm:$0xf0] }
 0x455   :  { %v1775_v23 = vor.u32 1.1754944e-38, %v1774_v61  ;;  %v1790_v49 = vand.u32 2147483648, %v5114_v63  ;;  %vm1773_vm5 = vcmp.eq.f32.partialorder %v1772_v12, 8.507059e+37  ;;  %v1788_v8 = vand.u32 2147483647, %v5114_v63 }
 0x456   :  { %v5134_v7 = vadd.f32 %v5030_v62, %v1761_v52  ;;  %v5140_v58 = vadd.f32 %v5032_v44, %v1762_v53  ;;  %v1766_v47 = vmul.f32 %v5112_v25, %v1765_v54  ;;  %2345 = vmatpush.bf16.msrb.mxu3 %v3816_v18  ;;  %2327 = vmatpush.bf16.msrb.mxu2 %v3672_v17  ;;  %vm1784_vm7 = vweird.f32 %v5114_v63  ;;  %v4374_v52 = vld [vmem:[#allocation13 + $0x64] sm:$0xf0]  ;;  %v4035_v53 = vld [vmem:[#allocation13 + $0xf0] sm:$0xf]  ;;  %v4392_v54 = vld [vmem:[#allocation13 + $0xf4] sm:$0xf0] }
 0x457   :  { %2308 = vmatpush.bf16.msrb.mxu1 %v3796_v39  ;;  %v1726_v30 = vmul.f32 %v5017_v59, %v4986_v45  ;;  %v1791_v33 = vor.u32 1.1754944e-38, %v1790_v49  ;;  %vm1789_vm9 = vcmp.eq.f32.partialorder %v1788_v8, 8.507059e+37  ;;  %v3972_v51 = vor.u32 %v4376_v50, %v3971_v34  ;;  %v4019_v18 = vld [vmem:[#allocation13 + $0xd0] sm:$0xf]  ;;  %v4011_v61 = vld [vmem:[#allocation13 + $0xc0] sm:$0xf] }
 0x458   :  { %v5145_v28 = vpack.c.bf16 %v5134_v7, %v5131_v55  ;;  %v5149_v4 = vpack.c.bf16 %v5140_v58, %v5137_v24  ;;  %v1767_v16 = vadd.f32 %v5112_v25, %v1766_v47  ;;  %2289 = vmatpush.bf16.msrb.mxu0 %v3668_v14  ;;  %v4036_v31 = vor.u32 %v4392_v54, %v4035_v53  ;;  %v3947_v47 = vld [vmem:[#allocation13 + $0x40] sm:$0xf]  ;;  %v4388_v14 = vld [vmem:[#allocation13 + $0xd4] sm:$0xf0]  ;;  %v4386_v39 = vld [vmem:[#allocation13 + $0xc4] sm:$0xf0] }
 0x459   :  { %v4492_v60 = vpop.eup %4491  ;;  %v3956_v10 = vor.u32 %v4372_v5, %v3955_v57  ;;  %v3948_v11 = vor.u32 %v4370_v37, %v3947_v47  ;;  %v4020_v27 = vor.u32 %v4388_v14, %v4019_v18  ;;  %v4012_v17 = vor.u32 %v4386_v39, %v4011_v61  ;;  %v4384_v12 = vld [vmem:[#allocation13 + $0xb4] sm:$0xf0]  ;;  %v4382_v49 = vld [vmem:[#allocation13 + $0xa4] sm:$0xf0]  ;;  %v3915_v8 = vld [vmem:[#allocation13] sm:$0xf] }
 0x45a   :  { %2214 = vmatmul.bf16.vlgmr.msra.gmra.mxu0 %v5145_v28  ;;  %2233 = vmatmul.bf16.vlgmr.msra.gmra.mxu1 %v5149_v4  ;;  %v1780_v2 = vmul.f32 %v4492_v60, %v5114_v63  ;;  %v1771_v19 = vsel %vm1770_vm4, %v5112_v25, %v1767_v16  ;;  %vm1785_vm6 = vweird.f32 %v4492_v60  ;;  %v1724_v25 = vmul.f32 %v5017_v59, %v4977_v36  ;;  %v4368_v16 = vld [vmem:[#allocation13 + $0x34] sm:$0xf0]  ;;  %v4406_v34 = vld [vmem:[#allocation13 + $0x164] sm:$0xf0]  ;;  %v4373_v50 = vld [vmem:[#allocation13 + $0x64] sm:$0xf] }
 0x45b   :  { %2252 = vmatmul.bf16.vlgmr.msra.gmra.mxu2 %v5145_v28  ;;  %2271 = vmatmul.bf16.vlgmr.msra.gmra.mxu3 %v5149_v4  ;;  %v1776_v1 = vsel %vm1773_vm5, %v1775_v23, %v1771_v19  ;;  %vm1786_vm8 = vmor %vm1784_vm7, %vm1785_vm6  ;;  %v3923_v19 = vld [vmem:[#allocation13 + $0x10] sm:$0xf]  ;;  %v3995_v23 = vld [vmem:[#allocation13 + $0xa0] sm:$0xf] }
 0x45c   :  { %v1781_v20 = vsub.f32 1.0, %v1780_v2  ;;  %2346 = vmatpush.bf16.msrb.mxu3 %v3800_v22  ;;  %v1777_v40 = vmul.f32 %v1776_v1, %v1723_v38  ;;  %v1778_v41 = vmul.f32 %v1776_v1, %v1724_v25  ;;  %2772 = vmatpush.bf16.msra.mxu0 %v3972_v51  ;;  %v4004_v2 = vor.u32 %v4384_v12, %v4003_v13  ;;  %v4362_v1 = vld [vmem:[#allocation13 + $0x4] sm:$0xf0]  ;;  %v3987_v25 = vld [vmem:[#allocation13 + $0x90] sm:$0xf] }
 0x45d   :  { %2791 = vmatpush.bf16.msra.mxu1 %v4036_v31  ;;  %v3916_v38 = vor.u32 %v4362_v1, %v3915_v8  ;;  %v3965_v51 = vld [vmem:[#allocation13 + $0x68] sm:$0xf0]  ;;  %v4163_v53 = vld [vmem:[#allocation13 + $0x1f0] sm:$0xf]  ;;  %v4424_v54 = vld [vmem:[#allocation13 + $0x1f4] sm:$0xf0] }
 0x45e   :  { %v1782_v32 = vmul.f32 %v4492_v60, %v1781_v20  ;;  %v5176_v36 = vadd.f32 %v5030_v62, %v1777_v40  ;;  %v5182_v43 = vadd.f32 %v5032_v44, %v1778_v41  ;;  %v4364_v20 = vld [vmem:[#allocation13 + $0x14] sm:$0xf0]  ;;  %v4375_v40 = vld [vmem:[#allocation13 + $0x74] sm:$0xf]  ;;  %v3973_v41 = vld [vmem:[#allocation13 + $0x78] sm:$0xf0] }
 0x45f   :  { %v3924_v22 = vor.u32 %v4364_v20, %v3923_v19  ;;  %v4391_v31 = vld [vmem:[#allocation13 + $0xf4] sm:$0xf]  ;;  %v4083_v57 = vld [vmem:[#allocation13 + $0x150] sm:$0xf]  ;;  %v4404_v5 = vld [vmem:[#allocation13 + $0x154] sm:$0xf0] }
 0x460   :  { %v1783_v26 = vadd.f32 %v4492_v60, %v1782_v32  ;;  %v3996_v32 = vor.u32 %v4382_v49, %v3995_v23  ;;  %v3957_v47 = vld [vmem:[#allocation13 + $0x58] sm:$0xf0]  ;;  %v4422_v18 = vld [vmem:[#allocation13 + $0x1e4] sm:$0xf0]  ;;  %v4389_v14 = vld [vmem:[#allocation13 + $0xe4] sm:$0xf] }
 0x461   :  { %v4402_v61 = vld [vmem:[#allocation13 + $0x144] sm:$0xf0]  ;;  %v4369_v39 = vld [vmem:[#allocation13 + $0x44] sm:$0xf]  ;;  %v4147_v13 = vld [vmem:[#allocation13 + $0x1d0] sm:$0xf] }
 0x462   :  { %v1787_v0 = vsel %vm1786_vm8, %v4492_v60, %v1783_v26  ;;  %v3940_v60 = vor.u32 %v4368_v16, %v3939_v15  ;;  %v4380_v26 = vld [vmem:[#allocation13 + $0x94] sm:$0xf0]  ;;  %v4029_v15 = vld [vmem:[#allocation13 + $0xe8] sm:$0xf0]  ;;  %v4021_v23 = vld [vmem:[#allocation13 + $0xd8] sm:$0xf0] }
 0x463   :  { %v1792_v35 = vsel %vm1789_vm9, %v1791_v33, %v1787_v0  ;;  %v4408_v33 = vld [vmem:[#allocation13 + $0x174] sm:$0xf0]  ;;  %v4032_v16 = vor.u32 %v4389_v14, %v4029_v15  ;;  %v4067_v8 = vld [vmem:[#allocation13 + $0x130] sm:$0xf] }
 0x464   :  { %v1793_v42 = vmul.f32 %v1792_v35, %v1725_v29  ;;  %v1794_v46 = vmul.f32 %v1792_v35, %v1726_v30  ;;  %v3988_v29 = vor.u32 %v4380_v26, %v3987_v25  ;;  %v4099_v30 = vld [vmem:[#allocation13 + $0x170] sm:$0xf]  ;;  %v3976_v35 = vor.u32 %v4375_v40, %v3973_v41  ;;  %v4420_v12 = vld [vmem:[#allocation13 + $0x1d4] sm:$0xf0]  ;;  %v4367_v25 = vld [vmem:[#allocation13 + $0x34] sm:$0xf] }
 0x465   :  { %v4100_v0 = vor.u32 %v4408_v33, %v4099_v30  ;;  %v4400_v1 = vld [vmem:[#allocation13 + $0x134] sm:$0xf0]  ;;  %v3941_v26 = vld [vmem:[#allocation13 + $0x38] sm:$0xf0]  ;;  %v4139_v30 = vld [vmem:[#allocation13 + $0x1c0] sm:$0xf] }
 0x466   :  { %v5179_v63 = vadd.f32 %v5030_v62, %v1793_v42  ;;  %v5185_v45 = vadd.f32 %v5032_v44, %v1794_v46  ;;  %v3963_v62 = vld [vmem:[#allocation13 + $0x60] sm:$0xf]  ;;  %v4378_v46 = vld [vmem:[#allocation13 + $0x84] sm:$0xf0]  ;;  %v4385_v40 = vld [vmem:[#allocation13 + $0xc4] sm:$0xf] }
 0x467   :  { %v4027_v44 = vld [vmem:[#allocation13 + $0xe0] sm:$0xf]  ;;  %v3964_v48 = vor.u32 %v4374_v52, %v3963_v62  ;;  %2810 = vmatpush.bf16.msra.mxu2 %v4100_v0  ;;  %v3968_v52 = vor.u32 %v4373_v50, %v3965_v51  ;;  %v4418_v33 = vld [vmem:[#allocation13 + $0x1c4] sm:$0xf0]  ;;  %v4013_v41 = vld [vmem:[#allocation13 + $0xc8] sm:$0xf0] }
 0x468   :  { %v1810_v56 = vpack.c.bf16 %v5179_v63, %v5176_v36  ;;  %v1811_v59 = vpack.c.bf16 %v5185_v45, %v5182_v43  ;;  %v4028_v9 = vor.u32 %v4390_v3, %v4027_v44  ;;  %v3979_v42 = vld [vmem:[#allocation13 + $0x80] sm:$0xf]  ;;  %v4164_v44 = vor.u32 %v4424_v54, %v4163_v53  ;;  %v3933_v50 = vld [vmem:[#allocation13 + $0x28] sm:$0xf0]  ;;  %v4131_v53 = vld [vmem:[#allocation13 + $0x1b0] sm:$0xf] }
 0x469   :  { %2773 = vmatpush.bf16.msra.mxu0 %v3964_v48  ;;  %v4037_v48 = vld [vmem:[#allocation13 + $0xf8] sm:$0xf0]  ;;  %v4140_v0 = vor.u32 %v4418_v33, %v4139_v30  ;;  %v4416_v54 = vld [vmem:[#allocation13 + $0x1b4] sm:$0xf0]  ;;  %v4379_v30 = vld [vmem:[#allocation13 + $0x94] sm:$0xf] }
 0x46a   :  { %2219 = vmatmul.bf16.gmra.mxu0 %v1810_v56  ;;  %2238 = vmatmul.bf16.gmra.mxu1 %v1811_v59  ;;  %v4040_v3 = vor.u32 %v4391_v31, %v4037_v48  ;;  %v4383_v31 = vld [vmem:[#allocation13 + $0xb4] sm:$0xf] }
 0x46b   :  { %2257 = vmatmul.bf16.gmra.mxu2 %v1810_v56  ;;  %2276 = vmatmul.bf16.gmra.mxu3 %v1811_v59 }
 0x46c   :  { %2792 = vmatpush.bf16.msra.mxu1 %v4028_v9  ;;  %v4371_v9 = vld [vmem:[#allocation13 + $0x54] sm:$0xf]  ;;  %2829 = vmatpush.bf16.msra.mxu3 %v4164_v44 }
 0x46d   :  { %2774 = vmatpush.bf16.msra.mxu0 %v3956_v10  ;;  %v4084_v10 = vor.u32 %v4404_v5, %v4083_v57  ;;  %v3960_v37 = vor.u32 %v4371_v9, %v3957_v47  ;;  %v4132_v57 = vor.u32 %v4416_v54, %v4131_v53  ;;  %v4005_v5 = vld [vmem:[#allocation13 + $0xb8] sm:$0xf0] }
 0x46e   :  { %v4008_v47 = vor.u32 %v4383_v31, %v4005_v5  ;;  %v4405_v5 = vld [vmem:[#allocation13 + $0x164] sm:$0xf] }
 0x470   :  { %2793 = vmatpush.bf16.msra.mxu1 %v4020_v27 }
 0x471   :  { %2775 = vmatpush.bf16.msra.mxu0 %v3948_v11  ;;  %v4155_v11 = vld [vmem:[#allocation13 + $0x1e0] sm:$0xf] }
 0x472   :  { %v4156_v27 = vor.u32 %v4422_v18, %v4155_v11  ;;  %v4396_v11 = vld [vmem:[#allocation13 + $0x114] sm:$0xf0]  ;;  %v4363_v18 = vld [vmem:[#allocation13 + $0x14] sm:$0xf] }
 0x474   :  { %2794 = vmatpush.bf16.msra.mxu1 %v4012_v17  ;;  %v5195_v17 = vld [vmem:[#allocation11] sm:$0xf]  ;;  %2830 = vmatpush.bf16.msra.mxu3 %v4156_v27 }
 0x475   :  { %2776 = vmatpush.bf16.msra.mxu0 %v3940_v60  ;;  %v4075_v60 = vld [vmem:[#allocation13 + $0x140] sm:$0xf]  ;;  %v5198_v49 = vperm.slane %v5195_v17, 0  ;;  %v5202_v44 = vperm.slane %v5195_v17, 1  ;;  %v3925_v27 = vld [vmem:[#allocation13 + $0x18] sm:$0xf0] }
 0x478   :  { %2795 = vmatpush.bf16.msra.mxu1 %v4004_v2  ;;  %v4387_v2 = vld [vmem:[#allocation13 + $0xd4] sm:$0xf] }
 0x47a   :  { %2290 = vmatmul.bf16.vlgmr.msrb.gmra.mxu0 %v5145_v28  ;;  %2309 = vmatmul.bf16.vlgmr.msrb.gmra.mxu1 %v5149_v4 }
 0x47b   :  { %2328 = vmatmul.bf16.vlgmr.msrb.gmra.mxu2 %v5145_v28  ;;  %2347 = vmatmul.bf16.vlgmr.msrb.gmra.mxu3 %v5149_v4  ;;  %v4366_v28 = vld [vmem:[#allocation13 + $0x24] sm:$0xf0] }
 0x47c   :  { %v3932_v4 = vor.u32 %v4366_v28, %v3931_v6  ;;  %2796 = vmatpush.bf16.msra.mxu1 %v3996_v32  ;;  %v4076_v6 = vor.u32 %v4402_v61, %v4075_v60  ;;  %v3949_v28 = vld [vmem:[#allocation13 + $0x48] sm:$0xf0]  ;;  %v4024_v32 = vor.u32 %v4387_v2, %v4021_v23  ;;  %v4123_v60 = vld [vmem:[#allocation13 + $0x1a0] sm:$0xf]  ;;  %v4414_v61 = vld [vmem:[#allocation13 + $0x1a4] sm:$0xf0] }
 0x47d   :  { %v4361_v23 = vld [vmem:[#allocation13 + $0x4] sm:$0xf] }
 0x47e   :  { %2777 = vmatpush.bf16.msra.mxu0 %v3932_v4  ;;  %v3952_v4 = vor.u32 %v4369_v39, %v3949_v28  ;;  %v4381_v39 = vld [vmem:[#allocation13 + $0xa4] sm:$0xf]  ;;  %v4124_v28 = vor.u32 %v4414_v61, %v4123_v60 }
 0x480   :  { %2797 = vmatpush.bf16.msra.mxu1 %v3988_v29  ;;  %v3944_v29 = vor.u32 %v4367_v25, %v3941_v26  ;;  %v4115_v26 = vld [vmem:[#allocation13 + $0x190] sm:$0xf] }
 0x482   :  { %2778 = vmatpush.bf16.msra.mxu0 %v3924_v22  ;;  %v4148_v22 = vor.u32 %v4420_v12, %v4147_v13 }
 0x484   :  { %2831 = vmatpush.bf16.msra.mxu3 %v4148_v22 }
 0x486   :  { %2779 = vmatpush.bf16.msra.mxu0 %v3916_v38  ;;  %v4068_v38 = vor.u32 %v4400_v1, %v4067_v8 }
 0x488   :  { %2832 = vmatpush.bf16.msra.mxu3 %v4140_v0 }
 0x48a   :  { %2295 = vmatmul.bf16.gmra.mxu0 %v1810_v56  ;;  %2314 = vmatmul.bf16.gmra.mxu1 %v1811_v59 }
 0x48b   :  { %2333 = vmatmul.bf16.gmra.mxu2 %v1810_v56  ;;  %2352 = vmatmul.bf16.gmra.mxu3 %v1811_v59  ;;  %v3980_v56 = vor.u32 %v4378_v46, %v3979_v42  ;;  %v4091_v59 = vld [vmem:[#allocation13 + $0x160] sm:$0xf]  ;;  %v4016_v42 = vor.u32 %v4385_v40, %v4013_v41 }
 0x48c   :  { %2848 = vmatpush.bf16.msrb.mxu0 %v3976_v35  ;;  %v4092_v62 = vor.u32 %v4406_v34, %v4091_v59  ;;  %v4059_v46 = vld [vmem:[#allocation13 + $0x120] sm:$0xf]  ;;  %v4365_v34 = vld [vmem:[#allocation13 + $0x24] sm:$0xf]  ;;  %2833 = vmatpush.bf16.msra.mxu3 %v4132_v57 }
 0x48d   :  { %2798 = vmatpush.bf16.msra.mxu1 %v3980_v56  ;;  %v4398_v56 = vld [vmem:[#allocation13 + $0x124] sm:$0xf0] }
 0x48e   :  { %2811 = vmatpush.bf16.msra.mxu2 %v4092_v62  ;;  %v4060_v59 = vor.u32 %v4398_v56, %v4059_v46  ;;  %v4407_v56 = vld [vmem:[#allocation13 + $0x174] sm:$0xf] }
 0x490   :  { %2849 = vmatpush.bf16.msrb.mxu0 %v3968_v52  ;;  %v3936_v52 = vor.u32 %v4365_v34, %v3933_v50  ;;  %2834 = vmatpush.bf16.msra.mxu3 %v4124_v28 }
 0x491   :  { %2867 = vmatpush.bf16.msrb.mxu1 %v4040_v3 }
 0x492   :  { %2812 = vmatpush.bf16.msra.mxu2 %v4084_v10 }
 0x494   :  { %2850 = vmatpush.bf16.msrb.mxu0 %v3960_v37  ;;  %v4051_v37 = vld [vmem:[#allocation13 + $0x110] sm:$0xf] }
 0x495   :  { %2868 = vmatpush.bf16.msrb.mxu1 %v4032_v16  ;;  %v4052_v14 = vor.u32 %v4396_v11, %v4051_v37  ;;  %v3928_v16 = vor.u32 %v4363_v18, %v3925_v27  ;;  %v4423_v18 = vld [vmem:[#allocation13 + $0x1f4] sm:$0xf] }
 0x496   :  { %2813 = vmatpush.bf16.msra.mxu2 %v4076_v6 }
 0x498   :  { %2851 = vmatpush.bf16.msrb.mxu0 %v3952_v4  ;;  %v3997_v4 = vld [vmem:[#allocation13 + $0xa8] sm:$0xf0] }
 0x499   :  { %2869 = vmatpush.bf16.msrb.mxu1 %v4024_v32  ;;  %v4000_v2 = vor.u32 %v4381_v39, %v3997_v4  ;;  %v3917_v32 = vld [vmem:[#allocation13 + $0x8] sm:$0xf0]  ;;  %v4403_v39 = vld [vmem:[#allocation13 + $0x154] sm:$0xf] }
 0x49a   :  { %2814 = vmatpush.bf16.msra.mxu2 %v4068_v38  ;;  %v3920_v25 = vor.u32 %v4361_v23, %v3917_v32  ;;  %v4401_v23 = vld [vmem:[#allocation13 + $0x144] sm:$0xf]  ;;  %v4077_v32 = vld [vmem:[#allocation13 + $0x148] sm:$0xf0] }
 0x49c   :  { %2852 = vmatpush.bf16.msrb.mxu0 %v3944_v29  ;;  %v4412_v29 = vld [vmem:[#allocation13 + $0x194] sm:$0xf0] }
 0x49d   :  { %2870 = vmatpush.bf16.msrb.mxu1 %v4016_v42  ;;  %v3989_v42 = vld [vmem:[#allocation13 + $0x98] sm:$0xf0] }
 0x49e   :  { %2815 = vmatpush.bf16.msra.mxu2 %v4060_v59  ;;  %v3992_v46 = vor.u32 %v4379_v30, %v3989_v42  ;;  %v4101_v59 = vld [vmem:[#allocation13 + $0x178] sm:$0xf0]  ;;  %v4399_v42 = vld [vmem:[#allocation13 + $0x134] sm:$0xf] }
 0x49f   :  { %v4104_v50 = vor.u32 %v4407_v56, %v4101_v59 }
 0x4a0   :  { %2853 = vmatpush.bf16.msrb.mxu0 %v3936_v52  ;;  %v4410_v52 = vld [vmem:[#allocation13 + $0x184] sm:$0xf0] }
 0x4a1   :  { %2871 = vmatpush.bf16.msrb.mxu1 %v4008_v47 }
 0x4a2   :  { %2816 = vmatpush.bf16.msra.mxu2 %v4052_v14  ;;  %v4165_v14 = vld [vmem:[#allocation13 + $0x1f8] sm:$0xf0] }
 0x4a4   :  { %2854 = vmatpush.bf16.msrb.mxu0 %v3928_v16  ;;  %v4168_v16 = vor.u32 %v4423_v18, %v4165_v14  ;;  %v4395_v14 = vld [vmem:[#allocation13 + $0x114] sm:$0xf] }
 0x4a5   :  { %2872 = vmatpush.bf16.msrb.mxu1 %v4000_v2 }
 0x4a8   :  { %2855 = vmatpush.bf16.msrb.mxu0 %v3920_v25 }
 0x4a9   :  { %2873 = vmatpush.bf16.msrb.mxu1 %v3992_v46  ;;  %v4069_v46 = vld [vmem:[#allocation13 + $0x138] sm:$0xf0] }
 0x4aa   :  { %v4072_v59 = vor.u32 %v4399_v42, %v4069_v46 }
 0x4d7   :  { %v2215_v19 = vpop.f32.mrf.mxu0  ;;  %v2234_v20 = vpop.f32.mrf.mxu1 }
 0x4d8   :  { %v2216_v35 = vadd.f32 %v2215_v19, %v5198_v49  ;;  %v4043_v19 = vld [vmem:[#allocation13 + $0x100] sm:$0xf] }
 0x4da   :  { %v2235_v9 = vadd.f32 %v2234_v20, %v2216_v35  ;;  %v4394_v20 = vld [vmem:[#allocation13 + $0x104] sm:$0xf0]  ;;  %v4116_v35 = vor.u32 %v4412_v29, %v4115_v26  ;;  %v4419_v26 = vld [vmem:[#allocation13 + $0x1d4] sm:$0xf]  ;;  %v4149_v29 = vld [vmem:[#allocation13 + $0x1d8] sm:$0xf0] }
 0x4db   :  { %v4044_v22 = vor.u32 %v4394_v20, %v4043_v19 }
 0x4dc   :  { %v2358_v13 = vmax.f32 %v2235_v9, 0.0  ;;  %2835 = vmatpush.bf16.msra.mxu3 %v4116_v35  ;;  %v4093_v9 = vld [vmem:[#allocation13 + $0x168] sm:$0xf0]  ;;  %v5220_v35 = vperm.slane %v5195_v17, 2 }
 0x4dd   :  { %2817 = vmatpush.bf16.msra.mxu2 %v4044_v22  ;;  %v4096_v47 = vor.u32 %v4405_v5, %v4093_v9  ;;  %v4415_v9 = vld [vmem:[#allocation13 + $0x1b4] sm:$0xf] }
 0x4de   :  { %v2253_v62 = vpop.f32.mrf.mxu2  ;;  %v2272_v51 = vpop.f32.mrf.mxu3 }
 0x4df   :  { %v2217_v48 = vpop.f32.mrf.mxu0  ;;  %v2236_v3 = vpop.f32.mrf.mxu1  ;;  %v2254_v6 = vadd.f32 %v2253_v62, %v5202_v44  ;;  %v4107_v62 = vld [vmem:[#allocation13 + $0x180] sm:$0xf] }
 0x4e0   :  { %v2218_v10 = vadd.f32 %v2217_v48, %v5198_v49  ;;  %v4108_v31 = vor.u32 %v4410_v52, %v4107_v62  ;;  %v3981_v48 = vld [vmem:[#allocation13 + $0x88] sm:$0xf0] }
 0x4e1   :  { %v2273_v33 = vadd.f32 %v2272_v51, %v2254_v6  ;;  %v4377_v51 = vld [vmem:[#allocation13 + $0x84] sm:$0xf]  ;;  %2886 = vmatpush.bf16.msrb.mxu2 %v4104_v50  ;;  %v4085_v6 = vld [vmem:[#allocation13 + $0x158] sm:$0xf0]  ;;  %v4141_v50 = vld [vmem:[#allocation13 + $0x1c8] sm:$0xf0] }
 0x4e2   :  { %v2237_v15 = vadd.f32 %v2236_v3, %v2218_v10  ;;  %v3984_v57 = vor.u32 %v4377_v51, %v3981_v48  ;;  %2836 = vmatpush.bf16.msra.mxu3 %v4108_v31  ;;  %v4088_v28 = vor.u32 %v4403_v39, %v4085_v6  ;;  %v4125_v39 = vld [vmem:[#allocation13 + $0x1a8] sm:$0xf0] }
 0x4e3   :  { %v2359_v53 = vmax.f32 %v2273_v33, 0.0  ;;  %v4045_v6 = vld [vmem:[#allocation13 + $0x108] sm:$0xf0] }
 0x4e4   :  { %v2362_v12 = vmax.f32 %v2237_v15, 0.0  ;;  %2874 = vmatpush.bf16.msrb.mxu1 %v3984_v57 }
 0x4e5   :  { %2887 = vmatpush.bf16.msrb.mxu2 %v4096_v47  ;;  %v4133_v47 = vld [vmem:[#allocation13 + $0x1b8] sm:$0xf0] }
 0x4e6   :  { %v5206_v8 = vpack.c.bf16 %v2362_v12, %v2358_v13  ;;  %v2255_v1 = vpop.f32.mrf.mxu2  ;;  %v2274_v38 = vpop.f32.mrf.mxu3  ;;  %2905 = vmatpush.bf16.msrb.mxu3 %v4168_v16  ;;  %v4421_v13 = vld [vmem:[#allocation13 + $0x1e4] sm:$0xf]  ;;  %v4157_v12 = vld [vmem:[#allocation13 + $0x1e8] sm:$0xf0]  ;;  %v4136_v18 = vor.u32 %v4415_v9, %v4133_v47 }
 0x4e7   :  { %v2256_v40 = vadd.f32 %v2255_v1, %v5202_v44  ;;  %v2220_v0 = vpop.f32.mrf.mxu0  ;;  %v2239_v41 = vpop.f32.mrf.mxu1  ;;  %v4160_v19 = vor.u32 %v4421_v13, %v4157_v12  ;;  %v4080_v1 = vor.u32 %v4401_v23, %v4077_v32  ;;  %v4411_v13 = vld [vmem:[#allocation13 + $0x194] sm:$0xf]  ;;  %v4117_v12 = vld [vmem:[#allocation13 + $0x198] sm:$0xf0] }
 0x4e8   :  { %2780 = vmatmul.bf16.vlgmr.msra.gmra.mxu0 %v5206_v8  ;;  %v2221_v3 = vadd.f32 %v2220_v0, %v5198_v49  ;;  %v4120_v23 = vor.u32 %v4411_v13, %v4117_v12 }
 0x4e9   :  { %v2275_v34 = vadd.f32 %v2274_v38, %v2256_v40  ;;  %2888 = vmatpush.bf16.msrb.mxu2 %v4088_v28 }
 0x4ea   :  { %v2240_v60 = vadd.f32 %v2239_v41, %v2221_v3  ;;  %2906 = vmatpush.bf16.msrb.mxu3 %v4160_v19  ;;  %v4152_v41 = vor.u32 %v4419_v26, %v4149_v29  ;;  %v5227_v3 = vperm.slane %v5195_v17, 3  ;;  %v4393_v17 = vld [vmem:[#allocation13 + $0x104] sm:$0xf] }
 0x4eb   :  { %v2363_v54 = vmax.f32 %v2275_v34, 0.0  ;;  %v4417_v34 = vld [vmem:[#allocation13 + $0x1c4] sm:$0xf]  ;;  %v4048_v19 = vor.u32 %v4393_v17, %v4045_v6 }
 0x4ec   :  { %v2366_v20 = vmax.f32 %v2240_v60, 0.0 }
 0x4ed   :  { %v5211_v10 = vpack.c.bf16 %v2363_v54, %v2359_v53  ;;  %2889 = vmatpush.bf16.msrb.mxu2 %v4080_v1  ;;  %v4397_v53 = vld [vmem:[#allocation13 + $0x124] sm:$0xf]  ;;  %v4061_v54 = vld [vmem:[#allocation13 + $0x128] sm:$0xf0] }
 0x4ee   :  { %v2258_v37 = vpop.f32.mrf.mxu2  ;;  %v2277_v11 = vpop.f32.mrf.mxu3  ;;  %2907 = vmatpush.bf16.msrb.mxu3 %v4152_v41  ;;  %v4064_v48 = vor.u32 %v4397_v53, %v4061_v54 }
 0x4ef   :  { %2799 = vmatmul.bf16.vlgmr.msra.gmra.mxu1 %v5211_v10  ;;  %v2222_v27 = vpop.f32.mrf.mxu0  ;;  %v2241_v15 = vpop.f32.mrf.mxu1  ;;  %v2259_v2 = vadd.f32 %v2258_v37, %v5202_v44 }
 0x4f0   :  { %v2223_v61 = vadd.f32 %v2222_v27, %v5198_v49  ;;  %v4053_v27 = vld [vmem:[#allocation13 + $0x118] sm:$0xf0] }
 0x4f1   :  { %v2278_v30 = vadd.f32 %v2277_v11, %v2259_v2  ;;  %2890 = vmatpush.bf16.msrb.mxu2 %v4072_v59 }
 0x4f2   :  { %v2242_v4 = vadd.f32 %v2241_v15, %v2223_v61  ;;  %v4413_v15 = vld [vmem:[#allocation13 + $0x1a4] sm:$0xf]  ;;  %v4056_v61 = vor.u32 %v4395_v14, %v4053_v27 }
 0x4f3   :  { %v2367_v62 = vmax.f32 %v2278_v30, 0.0  ;;  %v4128_v28 = vor.u32 %v4413_v15, %v4125_v39 }
 0x4f4   :  { %v2370_v22 = vmax.f32 %v2242_v4, 0.0 }
 0x4f5   :  { %2891 = vmatpush.bf16.msrb.mxu2 %v4064_v48 }
 0x4f6   :  { %v5216_v38 = vpack.c.bf16 %v2370_v22, %v2366_v20  ;;  %v2260_v49 = vpop.f32.mrf.mxu2  ;;  %v2279_v25 = vpop.f32.mrf.mxu3 }
 0x4f7   :  { %v2261_v33 = vadd.f32 %v2260_v49, %v5202_v44  ;;  %v2291_v40 = vpop.f32.mrf.mxu0  ;;  %v2310_v0 = vpop.f32.mrf.mxu1  ;;  %v4144_v44 = vor.u32 %v4417_v34, %v4141_v50 }
 0x4f8   :  { %2785 = vmatmul.bf16.gmra.mxu0 %v5216_v38  ;;  %v2292_v51 = vadd.f32 %v2291_v40, %v5220_v35  ;;  %v4109_v40 = vld [vmem:[#allocation13 + $0x188] sm:$0xf0] }
 0x4f9   :  { %v2280_v56 = vadd.f32 %v2279_v25, %v2261_v33  ;;  %2908 = vmatpush.bf16.msrb.mxu3 %v4144_v44  ;;  %2892 = vmatpush.bf16.msrb.mxu2 %v4056_v61  ;;  %v4409_v33 = vld [vmem:[#allocation13 + $0x184] sm:$0xf] }
 0x4fa   :  { %v2311_v16 = vadd.f32 %v2310_v0, %v2292_v51  ;;  %v4112_v41 = vor.u32 %v4409_v33, %v4109_v40 }
 0x4fb   :  { %v2371_v52 = vmax.f32 %v2280_v56, 0.0 }
 0x4fc   :  { %v2360_v20 = vmax.f32 %v2311_v16, 0.0 }
 0x4fd   :  { %v5224_v31 = vpack.c.bf16 %v2371_v52, %v2367_v62  ;;  %2909 = vmatpush.bf16.msrb.mxu3 %v4136_v18  ;;  %2893 = vmatpush.bf16.msrb.mxu2 %v4048_v19 }
 0x4fe   :  { %v2329_v57 = vpop.f32.mrf.mxu2  ;;  %v2348_v5 = vpop.f32.mrf.mxu3 }
 0x4ff   :  { %2804 = vmatmul.bf16.gmra.mxu1 %v5224_v31  ;;  %v2293_v37 = vpop.f32.mrf.mxu0  ;;  %v2312_v11 = vpop.f32.mrf.mxu1  ;;  %v2330_v2 = vadd.f32 %v2329_v57, %v5227_v3 }
 0x500   :  { %v2294_v60 = vadd.f32 %v2293_v37, %v5220_v35 }
 0x501   :  { %2910 = vmatpush.bf16.msrb.mxu3 %v4128_v28  ;;  %v2349_v25 = vadd.f32 %v2348_v5, %v2330_v2 }
 0x502   :  { %v2313_v4 = vadd.f32 %v2312_v11, %v2294_v60 }
 0x503   :  { %v2361_v42 = vmax.f32 %v2349_v25, 0.0 }
 0x504   :  { %v2364_v22 = vmax.f32 %v2313_v4, 0.0 }
 0x505   :  { %2911 = vmatpush.bf16.msrb.mxu3 %v4120_v23 }
 0x506   :  { %v2376_v32 = vpack.c.bf16 %v2364_v22, %v2360_v20  ;;  %v2331_v1 = vpop.f32.mrf.mxu2  ;;  %v2350_v49 = vpop.f32.mrf.mxu3 }
 0x507   :  { %v2332_v26 = vadd.f32 %v2331_v1, %v5227_v3  ;;  %v2296_v29 = vpop.f32.mrf.mxu0  ;;  %v2315_v30 = vpop.f32.mrf.mxu1 }
 0x508   :  { %2818 = vmatmul.bf16.vlgmr.msra.gmra.mxu2 %v2376_v32  ;;  %2856 = vmatmul.bf16.vlgmr.msrb.gmra.mxu0 %v5206_v8  ;;  %v2297_v56 = vadd.f32 %v2296_v29, %v5220_v35 }
 0x509   :  { %v2351_v0 = vadd.f32 %v2350_v49, %v2332_v26  ;;  %2912 = vmatpush.bf16.msrb.mxu3 %v4112_v41 }
 0x50a   :  { %v2316_v52 = vadd.f32 %v2315_v30, %v2297_v56 }
 0x50b   :  { %v2365_v46 = vmax.f32 %v2351_v0, 0.0 }
 0x50c   :  { %v2368_v54 = vmax.f32 %v2316_v52, 0.0 }
 0x50d   :  { %v2377_v59 = vpack.c.bf16 %v2365_v46, %v2361_v42 }
 0x50e   :  { %v2334_v34 = vpop.f32.mrf.mxu2  ;;  %v2353_v50 = vpop.f32.mrf.mxu3 }
 0x50f   :  { %2837 = vmatmul.bf16.vlgmr.msra.gmra.mxu3 %v2377_v59  ;;  %2875 = vmatmul.bf16.vlgmr.msrb.gmra.mxu1 %v5211_v10  ;;  %v2298_v62 = vpop.f32.mrf.mxu0  ;;  %v2317_v44 = vpop.f32.mrf.mxu1  ;;  %v2335_v53 = vadd.f32 %v2334_v34, %v5227_v3 }
 0x510   :  { %v2299_v8 = vadd.f32 %v2298_v62, %v5220_v35 }
 0x511   :  { %v2354_v9 = vadd.f32 %v2353_v50, %v2335_v53 }
 0x512   :  { %v2318_v51 = vadd.f32 %v2317_v44, %v2299_v8 }
 0x513   :  { %v2369_v11 = vmax.f32 %v2354_v9, 0.0 }
 0x514   :  { %v2372_v48 = vmax.f32 %v2318_v51, 0.0 }
 0x516   :  { %v2380_v57 = vpack.c.bf16 %v2372_v48, %v2368_v54  ;;  %v2336_v5 = vpop.f32.mrf.mxu2  ;;  %v2355_v37 = vpop.f32.mrf.mxu3 }
 0x517   :  { %v2337_v47 = vadd.f32 %v2336_v5, %v5227_v3 }
 0x518   :  { %2823 = vmatmul.bf16.gmra.mxu2 %v2380_v57  ;;  %2861 = vmatmul.bf16.gmra.mxu0 %v5216_v38 }
 0x519   :  { %v2356_v10 = vadd.f32 %v2355_v37, %v2337_v47 }
 0x51b   :  { %v2373_v18 = vmax.f32 %v2356_v10, 0.0 }
 0x51d   :  { %v2381_v14 = vpack.c.bf16 %v2373_v18, %v2369_v11 }
 0x51f   :  { %2842 = vmatmul.bf16.gmra.mxu3 %v2381_v14  ;;  %2880 = vmatmul.bf16.gmra.mxu1 %v5224_v31  ;;  %v2446_v31 = vld [vmem:[#allocation14] sm:$0x3] }
 0x520   :  { %v2448_v20 = vperm.slane %v2446_v31, 0  ;;  %v2449_v22 = vperm.slane %v2446_v31, 1 }
 0x528   :  { %2894 = vmatmul.bf16.vlgmr.msrb.gmra.mxu2 %v2376_v32 }
 0x52f   :  { %2913 = vmatmul.bf16.vlgmr.msrb.gmra.mxu3 %v2377_v59 }
 0x538   :  { %2899 = vmatmul.bf16.gmra.mxu2 %v2380_v57 }
 0x53f   :  { %2918 = vmatmul.bf16.gmra.mxu3 %v2381_v14 }
 0x565   :  { %v2781_v35 = vpop.f32.mrf.mxu0 }
 0x566   :  { %v2782_v32 = vadd.f32 %v2781_v35, %v2448_v20 }
 0x56c   :  { %v2800_v27 = vpop.f32.mrf.mxu1 }
 0x56d   :  { %v2783_v15 = vpop.f32.mrf.mxu0  ;;  %v2801_v49 = vadd.f32 %v2800_v27, %v2782_v32 }
 0x56e   :  { %v2784_v42 = vadd.f32 %v2783_v15, %v2448_v20 }
 0x574   :  { %v2802_v16 = vpop.f32.mrf.mxu1 }
 0x575   :  { %v2786_v60 = vpop.f32.mrf.mxu0  ;;  %v2803_v59 = vadd.f32 %v2802_v16, %v2784_v42 }
 0x576   :  { %v2787_v5 = vadd.f32 %v2786_v60, %v2448_v20 }
 0x57c   :  { %v2805_v61 = vpop.f32.mrf.mxu1 }
 0x57d   :  { %v2788_v17 = vpop.f32.mrf.mxu0  ;;  %v2806_v37 = vadd.f32 %v2805_v61, %v2787_v5 }
 0x584   :  { %v2807_v4 = vpop.f32.mrf.mxu1 }
 0x585   :  { %v2857_v2 = vpop.f32.mrf.mxu0 }
 0x586   :  { %v2858_v25 = vadd.f32 %v2857_v2, %v2449_v22 }
 0x58b   :  { %v2819_v3 = vpop.f32.mrf.mxu2 }
 0x58c   :  { %v2876_v19 = vpop.f32.mrf.mxu1  ;;  %v2820_v29 = vadd.f32 %v2819_v3, %v2801_v49  ;;  %v2789_v3 = vadd.f32 %v2788_v17, %v2448_v20 }
 0x58d   :  { %v2859_v26 = vpop.f32.mrf.mxu0  ;;  %v2877_v30 = vadd.f32 %v2876_v19, %v2858_v25 }
 0x58e   :  { %v2860_v34 = vadd.f32 %v2859_v26, %v2449_v22  ;;  %v2808_v60 = vadd.f32 %v2807_v4, %v2789_v3 }
 0x592   :  { %v2838_v39 = vpop.f32.mrf.mxu3 }
 0x593   :  { %v2821_v38 = vpop.f32.mrf.mxu2  ;;  %v2839_v40 = vadd.f32 %v2838_v39, %v2820_v29 }
 0x594   :  { %v2878_v33 = vpop.f32.mrf.mxu1  ;;  %v2822_v52 = vadd.f32 %v2821_v38, %v2803_v59 }
 0x595   :  { %v2924_v50 = vadd.f32 %v2839_v40, %v5131_v55  ;;  %v2879_v8 = vadd.f32 %v2878_v33, %v2860_v34  ;;  %v2862_v51 = vpop.f32.mrf.mxu0 }
 0x596   :  { %v2863_v10 = vadd.f32 %v2862_v51, %v2449_v22 }
 0x59a   :  { %v2840_v6 = vpop.f32.mrf.mxu3 }
 0x59b   :  { %v2824_v28 = vpop.f32.mrf.mxu2  ;;  %v2841_v53 = vadd.f32 %v2840_v6, %v2822_v52 }
 0x59c   :  { %v2881_v48 = vpop.f32.mrf.mxu1  ;;  %v2825_v18 = vadd.f32 %v2824_v28, %v2806_v37 }
 0x59d   :  { %v2926_v11 = vadd.f32 %v2841_v53, %v5134_v7  ;;  %v2864_v15 = vpop.f32.mrf.mxu0 }
 0x59e   :  { %v2865_v6 = vadd.f32 %v2864_v15, %v2449_v22 }
 0x5a2   :  { %v2843_v13 = vpop.f32.mrf.mxu3 }
 0x5a3   :  { %v2826_v12 = vpop.f32.mrf.mxu2  ;;  %v2844_v35 = vadd.f32 %v2843_v13, %v2825_v18 }
 0x5a4   :  { %v2883_v38 = vpop.f32.mrf.mxu1  ;;  %v2827_v2 = vadd.f32 %v2826_v12, %v2808_v60 }
 0x5a5   :  { %v2928_v61 = vadd.f32 %v2844_v35, %v5176_v36 }
 0x5aa   :  { %v2845_v23 = vpop.f32.mrf.mxu3 }
 0x5ab   :  { %v2895_v1 = vpop.f32.mrf.mxu2  ;;  %v2846_v19 = vadd.f32 %v2845_v23, %v2827_v2 }
 0x5ac   :  { %v2896_v0 = vadd.f32 %v2895_v1, %v2877_v30 }
 0x5ad   :  { %v2930_v49 = vadd.f32 %v2846_v19, %v5179_v63 }
 0x5b2   :  { %v2914_v41 = vpop.f32.mrf.mxu3 }
 0x5b3   :  { %v2915_v46 = vadd.f32 %v2914_v41, %v2896_v0  ;;  %v2897_v56 = vpop.f32.mrf.mxu2 }
 0x5b4   :  { %v2898_v54 = vadd.f32 %v2897_v56, %v2879_v8 }
 0x5b5   :  { %v2925_v62 = vadd.f32 %v2915_v46, %v5137_v24  ;;  %v2882_v24 = vadd.f32 %v2881_v48, %v2863_v10 }
 0x5b7   :  { %v2934_v44 = vadd.f32 %v2925_v62, %v2924_v50 }
 0x5b9   :  { %2935 = vadd.xlane.f32.xlu0 %v2934_v44 }
 0x5ba   :  { %v2916_v57 = vpop.f32.mrf.mxu3 }
 0x5bb   :  { %v2917_v9 = vadd.f32 %v2916_v57, %v2898_v54  ;;  %v2900_v47 = vpop.f32.mrf.mxu2 }
 0x5bc   :  { %v2901_v27 = vadd.f32 %v2900_v47, %v2882_v24 }
 0x5bd   :  { %v2927_v55 = vadd.f32 %v2917_v9, %v5140_v58  ;;  %v2884_v58 = vadd.f32 %v2883_v38, %v2865_v6 }
 0x5bf   :  { %v2937_v14 = vadd.f32 %v2927_v55, %v2926_v11 }
 0x5c1   :  { %2938 = vadd.xlane.f32.xlu1 %v2937_v14 }
 0x5c2   :  { %v2919_v16 = vpop.f32.mrf.mxu3 }
 0x5c3   :  { %v2920_v39 = vadd.f32 %v2919_v16, %v2901_v27  ;;  %v2902_v7 = vpop.f32.mrf.mxu2 }
 0x5c4   :  { %v2903_v32 = vadd.f32 %v2902_v7, %v2884_v58 }
 0x5c5   :  { %v2929_v31 = vadd.f32 %v2920_v39, %v5182_v43 }
 0x5c7   :  { %v2940_v28 = vadd.f32 %v2929_v31, %v2928_v61 }
 0x5c9   :  { %2941 = vadd.xlane.f32.xlu2 %v2940_v28 }
 0x5ca   :  { %v2921_v13 = vpop.f32.mrf.mxu3 }
 0x5cb   :  { %v2922_v1 = vadd.f32 %v2921_v13, %v2903_v32  ;;  %v2932_v32 = vld [vmem:[%s5381_s12] sm:$0x3] }
 0x5cd   :  { %v2931_v17 = vadd.f32 %v2922_v1, %v5185_v45 }
 0x5cf   :  { %v2943_v20 = vadd.f32 %v2931_v17, %v2930_v49 }
 0x5d1   :  { %2944 = vadd.xlane.f32.xlu0 %v2943_v20 }
 0x62c   :  { %v2936_v4 = vpop.xlane.xlu0 %2935 }
 0x62d   :  { %v2946_v36 = vmul.f32 %v2936_v4, %v4954_v21 }
 0x62f   :  { %v5250_v22 = vsub.f32 %v2924_v50, %v2946_v36  ;;  %v5252_v43 = vsub.f32 %v2925_v62, %v2946_v36 }
 0x631   :  { %v2958_v12 = vmul.f32 %v5250_v22, %v5250_v22  ;;  %v2959_v23 = vmul.f32 %v5252_v43, %v5252_v43 }
 0x633   :  { %v2966_v25 = vadd.f32 %v2959_v23, %v2958_v12  ;;  %v5297_v23 = vperm.slane %v2932_v32, 0 }
 0x634   :  { %v2939_v26 = vpop.xlane.xlu1 %2938 }
 0x635   :  { %v2947_v63 = vmul.f32 %v2939_v26, %v4954_v21  ;;  %2967 = vadd.xlane.f32.xlu1 %v2966_v25  ;;  %v2933_v25 = vld [vmem:[#allocation16] sm:$0x3] }
 0x637   :  { %v5259_v45 = vsub.f32 %v2926_v11, %v2947_v63  ;;  %v5261_v29 = vsub.f32 %v2927_v55, %v2947_v63 }
 0x639   :  { %v2960_v30 = vmul.f32 %v5259_v45, %v5259_v45  ;;  %v2961_v33 = vmul.f32 %v5261_v29, %v5261_v29 }
 0x63b   :  { %v2969_v40 = vadd.f32 %v2961_v33, %v2960_v30  ;;  %v5301_v30 = vperm.slane %v2932_v32, 1 }
 0x63c   :  { %v2942_v0 = vpop.xlane.xlu2 %2941 }
 0x63d   :  { %v2948_v41 = vmul.f32 %v2942_v0, %v4954_v21  ;;  %2970 = vadd.xlane.f32.xlu2 %v2969_v40 }
 0x63f   :  { %v5268_v42 = vsub.f32 %v2928_v61, %v2948_v41  ;;  %v5270_v46 = vsub.f32 %v2929_v31, %v2948_v41  ;;  %v5303_v41 = vperm.slane %v2933_v25, 0 }
 0x641   :  { %v2962_v56 = vmul.f32 %v5268_v42, %v5268_v42  ;;  %v2963_v59 = vmul.f32 %v5270_v46, %v5270_v46 }
 0x643   :  { %v2972_v34 = vadd.f32 %v2963_v59, %v2962_v56 }
 0x644   :  { %v2945_v50 = vpop.xlane.xlu0 %2944 }
 0x645   :  { %v2949_v62 = vmul.f32 %v2945_v50, %v4954_v21  ;;  %2973 = vadd.xlane.f32.xlu0 %v2972_v34  ;;  %v3035_v34 = vmul.f32 %v5297_v23, %v5250_v22  ;;  %v5307_v50 = vperm.slane %v2933_v25, 1  ;;  %v3036_v22 = vmul.f32 %v5301_v30, %v5252_v43 }
 0x647   :  { %v5277_v52 = vsub.f32 %v2930_v49, %v2949_v62  ;;  %v5279_v8 = vsub.f32 %v2931_v17, %v2949_v62 }
 0x649   :  { %v2964_v44 = vmul.f32 %v5277_v52, %v5277_v52  ;;  %v2965_v51 = vmul.f32 %v5279_v8, %v5279_v8 }
 0x64b   :  { %v2975_v53 = vadd.f32 %v2965_v51, %v2964_v44 }
 0x64d   :  { %2976 = vadd.xlane.f32.xlu1 %v2975_v53 }
 0x6a8   :  { %v2968_v54 = vpop.xlane.xlu1 %2967 }
 0x6a9   :  { %v2978_v48 = vmul.f32 0.003921569, %v2968_v54 }
 0x6ab   :  { %4493 = vrsqrt.f32 %v2978_v48  ;;  %vm2989_vm10 = vcmp.eq.f32.partialorder %v2978_v48, inf  ;;  %v2992_v15 = vand.u32 2147483648, %v2978_v48  ;;  %vm2991_vm11 = vcmp.eq.f32.partialorder %v2978_v48, 0.0 }
 0x6b0   :  { %v2971_v57 = vpop.xlane.xlu2 %2970 }
 0x6b1   :  { %v4494_v5 = vpop.eup %4493  ;;  %v2979_v9 = vmul.f32 0.003921569, %v2971_v57 }
 0x6b2   :  { %v2983_v21 = vmul.f32 %v4494_v5, %v2978_v48 }
 0x6b3   :  { %4495 = vrsqrt.f32 %v2979_v9  ;;  %vm3001_vm12 = vcmp.eq.f32.partialorder %v2979_v9, inf  ;;  %v3004_v19 = vand.u32 2147483648, %v2979_v9  ;;  %vm3003_vm13 = vcmp.eq.f32.partialorder %v2979_v9, 0.0 }
 0x6b4   :  { %v2984_v47 = vmul.f32 %v4494_v5, %v2983_v21 }
 0x6b6   :  { %v2985_v37 = vmul.f32 0.5, %v2984_v47 }
 0x6b8   :  { %v2986_v10 = vsub.f32 1.5, %v2985_v37  ;;  %v2974_v11 = vpop.xlane.xlu0 %2973 }
 0x6b9   :  { %v4496_v55 = vpop.eup %4495  ;;  %v5285_v18 = vmul.f32 0.003921569, %v2974_v11 }
 0x6ba   :  { %v2987_v24 = vmul.f32 %v4494_v5, %v2986_v10  ;;  %v2995_v14 = vmul.f32 %v4496_v55, %v2979_v9 }
 0x6bb   :  { %4497 = vrsqrt.f32 %v5285_v18  ;;  %vm3013_vm0 = vcmp.eq.f32.partialorder %v5285_v18, inf  ;;  %v3016_v53 = vand.u32 2147483648, %v5285_v18  ;;  %vm3015_vm2 = vcmp.eq.f32.partialorder %v5285_v18, 0.0 }
 0x6bc   :  { %v2988_v35 = vmul.f32 %v2987_v24, %v2978_v48  ;;  %v2996_v27 = vmul.f32 %v4496_v55, %v2995_v14 }
 0x6be   :  { %v2990_v16 = vsel %vm2989_vm10, %v2978_v48, %v2988_v35  ;;  %v2997_v3 = vmul.f32 0.5, %v2996_v27 }
 0x6bf   :  { %v2993_v39 = vsel %vm2991_vm11, %v2992_v15, %v2990_v16 }
 0x6c0   :  { %v3043_v38 = vadd.f32 1e-06, %v2993_v39  ;;  %v2998_v60 = vsub.f32 1.5, %v2997_v3  ;;  %v2977_v6 = vpop.xlane.xlu1 %2976 }
 0x6c1   :  { %v4498_v61 = vpop.eup %4497  ;;  %v5288_v31 = vmul.f32 0.003921569, %v2977_v6 }
 0x6c2   :  { %4499 = vrcp.f32 %v3043_v38  ;;  %v2999_v7 = vmul.f32 %v4496_v55, %v2998_v60  ;;  %v3007_v2 = vmul.f32 %v4498_v61, %v5285_v18  ;;  %v3058_v33 = vand.u32 2147483648, %v3043_v38 }
 0x6c3   :  { %4501 = vrsqrt.f32 %v5288_v31  ;;  %v3056_v59 = vand.u32 2147483647, %v3043_v38  ;;  %vm3052_vm15 = vweird.f32 %v3043_v38  ;;  %vm3025_vm4 = vcmp.eq.f32.partialorder %v5288_v31, inf }
 0x6c4   :  { %v3000_v58 = vmul.f32 %v2999_v7, %v2979_v9  ;;  %v3008_v28 = vmul.f32 %v4498_v61, %v3007_v2  ;;  %v3059_v54 = vor.u32 1.1754944e-38, %v3058_v33  ;;  %v3028_v3 = vand.u32 2147483648, %v5288_v31 }
 0x6c5   :  { %vm3057_vm3 = vcmp.eq.f32.partialorder %v3056_v59, 8.507059e+37  ;;  %vm3027_vm6 = vcmp.eq.f32.partialorder %v5288_v31, 0.0  ;;  %v3037_v2 = vmul.f32 %v5297_v23, %v5259_v45 }
 0x6c6   :  { %v3002_v13 = vsel %vm3001_vm12, %v2979_v9, %v3000_v58  ;;  %v3009_v1 = vmul.f32 0.5, %v3008_v28  ;;  %v3038_v58 = vmul.f32 %v5301_v30, %v5261_v29 }
 0x6c7   :  { %v3005_v17 = vsel %vm3003_vm13, %v3004_v19, %v3002_v13 }
 0x6c8   :  { %v4500_v49 = vpop.eup %4499  ;;  %v5295_v36 = vadd.f32 1e-06, %v3005_v17  ;;  %v3010_v12 = vsub.f32 1.5, %v3009_v1 }
 0x6c9   :  { %v4502_v20 = vpop.eup %4501  ;;  %v3048_v4 = vmul.f32 %v4500_v49, %v3043_v38  ;;  %vm3053_vm14 = vweird.f32 %v4500_v49 }
 0x6ca   :  { %v3019_v26 = vmul.f32 %v4502_v20, %v5288_v31  ;;  %4503 = vrcp.f32 %v5295_v36  ;;  %v3011_v40 = vmul.f32 %v4498_v61, %v3010_v12  ;;  %vm3054_vm1 = vmor %vm3052_vm15, %vm3053_vm14  ;;  %v3074_v43 = vand.u32 2147483648, %v5295_v36 }
 0x6cb   :  { %v3049_v63 = vsub.f32 1.0, %v3048_v4  ;;  %v3072_v16 = vand.u32 2147483647, %v5295_v36  ;;  %vm3068_vm7 = vweird.f32 %v5295_v36 }
 0x6cc   :  { %v3020_v0 = vmul.f32 %v4502_v20, %v3019_v26  ;;  %v3012_v62 = vmul.f32 %v3011_v40, %v5285_v18  ;;  %v3075_v6 = vor.u32 1.1754944e-38, %v3074_v43  ;;  %v3039_v26 = vmul.f32 %v5297_v23, %v5268_v42 }
 0x6cd   :  { %v3050_v56 = vmul.f32 %v4500_v49, %v3049_v63  ;;  %vm3073_vm9 = vcmp.eq.f32.partialorder %v3072_v16, 8.507059e+37  ;;  %v3040_v63 = vmul.f32 %v5301_v30, %v5270_v46  ;;  %v3041_v46 = vmul.f32 %v5297_v23, %v5277_v52 }
 0x6ce   :  { %v3021_v44 = vmul.f32 0.5, %v3020_v0  ;;  %v3014_v48 = vsel %vm3013_vm0, %v5285_v18, %v3012_v62 }
 0x6cf   :  { %v3051_v51 = vadd.f32 %v4500_v49, %v3050_v56  ;;  %v3017_v21 = vsel %vm3015_vm2, %v3016_v53, %v3014_v48  ;;  %v3042_v48 = vmul.f32 %v5301_v30, %v5279_v8 }
 0x6d0   :  { %v3022_v57 = vsub.f32 1.5, %v3021_v44  ;;  %v4504_v5 = vpop.eup %4503  ;;  %v3045_v10 = vadd.f32 1e-06, %v3017_v21 }
 0x6d1   :  { %v3055_v9 = vsel %vm3054_vm1, %v4500_v49, %v3051_v51  ;;  %v3064_v37 = vmul.f32 %v4504_v5, %v5295_v36  ;;  %vm3069_vm5 = vweird.f32 %v4504_v5 }
 0x6d2   :  { %v3060_v47 = vsel %vm3057_vm3, %v3059_v54, %v3055_v9  ;;  %v3023_v24 = vmul.f32 %v4502_v20, %v3022_v57  ;;  %4505 = vrcp.f32 %v3045_v10  ;;  %vm3070_vm8 = vmor %vm3068_vm7, %vm3069_vm5  ;;  %v3090_v20 = vand.u32 2147483648, %v3045_v10 }
 0x6d3   :  { %v3061_v11 = vmul.f32 %v3060_v47, %v3035_v34  ;;  %v3062_v55 = vmul.f32 %v3060_v47, %v3036_v22  ;;  %v3065_v14 = vsub.f32 1.0, %v3064_v37  ;;  %v3088_v36 = vand.u32 2147483647, %v3045_v10 }
 0x6d4   :  { %v3024_v27 = vmul.f32 %v3023_v24, %v5288_v31  ;;  %vm3084_vm11 = vweird.f32 %v3045_v10  ;;  %v3091_v12 = vor.u32 1.1754944e-38, %v3090_v20 }
 0x6d5   :  { %v3116_v18 = vadd.f32 %v5303_v41, %v3061_v11  ;;  %v3117_v35 = vadd.f32 %v5307_v50, %v3062_v55  ;;  %v3066_v15 = vmul.f32 %v4504_v5, %v3065_v14  ;;  %vm3089_vm13 = vcmp.eq.f32.partialorder %v3088_v36, 8.507059e+37 }
 0x6d6   :  { %v3026_v39 = vsel %vm3025_vm4, %v5288_v31, %v3024_v27 }
 0x6d7   :  { %3124 = vst [vmem:[%s5383_s14] sm:$0xff] %v3116_v18  ;;  %v3067_v38 = vadd.f32 %v4504_v5, %v3066_v15  ;;  %v3029_v60 = vsel %vm3027_vm6, %v3028_v3, %v3026_v39 }
 0x6d8   :  { %3125 = vst [vmem:[%s5383_s14 + $0x8] sm:$0xff] %v3117_v35  ;;  %v3046_v61 = vadd.f32 1e-06, %v3029_v60  ;;  %v4506_v7 = vpop.eup %4505 }
 0x6d9   :  { %v3071_v28 = vsel %vm3070_vm8, %v4504_v5, %v3067_v38  ;;  %v3080_v19 = vmul.f32 %v4506_v7, %v3045_v10  ;;  %vm3085_vm10 = vweird.f32 %v4506_v7 }
 0x6da   :  { %v3076_v31 = vsel %vm3073_vm9, %v3075_v6, %v3071_v28  ;;  %4507 = vrcp.f32 %v3046_v61  ;;  %vm3086_vm12 = vmor %vm3084_vm11, %vm3085_vm10  ;;  %v3106_v34 = vand.u32 2147483648, %v3046_v61  ;;  %v3104_v44 = vand.u32 2147483647, %v3046_v61 }
 0x6db   :  { %v3077_v32 = vmul.f32 %v3076_v31, %v3037_v2  ;;  %v3078_v13 = vmul.f32 %v3076_v31, %v3038_v58  ;;  %v3081_v1 = vsub.f32 1.0, %v3080_v19  ;;  %vm3100_vm15 = vweird.f32 %v3046_v61 }
 0x6dc   :  { %v3107_v42 = vor.u32 1.1754944e-38, %v3106_v34  ;;  %vm3105_vm1 = vcmp.eq.f32.partialorder %v3104_v44, 8.507059e+37 }
 0x6dd   :  { %v3118_v49 = vadd.f32 %v5303_v41, %v3077_v32  ;;  %v3119_v17 = vadd.f32 %v5307_v50, %v3078_v13  ;;  %v3082_v4 = vmul.f32 %v4506_v7, %v3081_v1 }
 0x6df   :  { %3126 = vst [vmem:[%s5383_s14 + $0x10] sm:$0xff] %v3118_v49  ;;  %v3083_v29 = vadd.f32 %v4506_v7, %v3082_v4 }
 0x6e0   :  { %v4508_v45 = vpop.eup %4507  ;;  %3127 = vst [vmem:[%s5383_s14 + $0x18] sm:$0xff] %v3119_v17 }
 0x6e1   :  { %v3096_v25 = vmul.f32 %v4508_v45, %v3046_v61  ;;  %v3087_v33 = vsel %vm3086_vm12, %v4506_v7, %v3083_v29  ;;  %vm3101_vm14 = vweird.f32 %v4508_v45 }
 0x6e2   :  { %v3092_v40 = vsel %vm3089_vm13, %v3091_v12, %v3087_v33  ;;  %vm3102_vm0 = vmor %vm3100_vm15, %vm3101_vm14 }
 0x6e3   :  { %v3097_v0 = vsub.f32 1.0, %v3096_v25  ;;  %v3093_v56 = vmul.f32 %v3092_v40, %v3039_v26  ;;  %v3094_v59 = vmul.f32 %v3092_v40, %v3040_v63 }
 0x6e5   :  { %v3098_v62 = vmul.f32 %v4508_v45, %v3097_v0  ;;  %v3120_v51 = vadd.f32 %v5303_v41, %v3093_v56  ;;  %v3121_v53 = vadd.f32 %v5307_v50, %v3094_v59 }
 0x6e7   :  { %v3099_v54 = vadd.f32 %v4508_v45, %v3098_v62  ;;  %3128 = vst [vmem:[%s5383_s14 + $0x20] sm:$0xff] %v3120_v51 }
 0x6e8   :  { %3129 = vst [vmem:[%s5383_s14 + $0x28] sm:$0xff] %v3121_v53 }
 0x6e9   :  { %v3103_v57 = vsel %vm3102_vm0, %v4508_v45, %v3099_v54 }
 0x6ea   :  { %v3108_v5 = vsel %vm3105_vm1, %v3107_v42, %v3103_v57 }
 0x6eb   :  { %v3109_v22 = vmul.f32 %v3108_v5, %v3041_v46  ;;  %v3110_v9 = vmul.f32 %v3108_v5, %v3042_v48 }
 0x6ed   :  { %v3122_v21 = vadd.f32 %v5303_v41, %v3109_v22  ;;  %v3123_v47 = vadd.f32 %v5307_v50, %v3110_v9 }
 0x6ef   :  { %3130 = vst [vmem:[%s5383_s14 + $0x30] sm:$0xff] %v3122_v21 }
 0x6f0   :  { %3131 = vst [vmem:[%s5383_s14 + $0x38] sm:$0xff] %v3123_v47 }
 0x6f1   :  { %3136 = vsyncpa [#allocation4], 1 }
 0x6f2   :  { %3137 = vsyncpa [#allocation6], 1 }
 0x6f3   :  { %3138 = vsyncpa [#allocation9], 1 }
 0x6f4   :  { %3139 = vsyncpa [#allocation12], 1 }
 0x6f5   :  { %3140 = vsyncpa [#allocation15], 1 }

</bundles_post_ra>
